<compile_context>
chip_gen: v7x
topology: tpu7x:2x2x1
jax: 0.10.0
libtpu: 0.0.40
codegen_flags: <defaults>
</compile_context>

<pallas_src>
import functools
import math

import jax
import jax.numpy as jnp
from jax import lax
from jax.experimental import pallas as pl
from jax.experimental.pallas import tpu as pltpu

_HI = lax.Precision.HIGHEST  # used only by the pure-JAX reference


def _round_up(v, m):
    return (v + m - 1) // m * m


# ----------------------------------------------------------------------------------------
# Shared math helper (used both inside kernels and by the pure-JAX reference):
# PyTorch LayerNorm from the spec: a * (x - mean) / (std_unbiased + eps) + b
# ----------------------------------------------------------------------------------------
def _ln_math(x, a, b, eps):
    d = x.shape[-1]
    mean = jnp.mean(x, axis=-1, keepdims=True)
    c = x - mean
    var = jnp.sum(c * c, axis=-1, keepdims=True) * (1.0 / (d - 1))
    return a * c / (jnp.sqrt(var) + eps) + b


# ==========================================================================================
# 1) FeatureExtractor (conv1 -> bn1(eval) -> relu -> Linear) as one fused, M-tiled kernel
# ==========================================================================================
def _fe_kernel(patch_ref, wconv_ref, shift_ref, wlin_ref, blin_ref, out_ref):
    # conv1 as im2col matmul: bf16 operands, f32 accumulation on the MXU.
    # (BN scale is pre-folded into wconv; only the shift remains.)
    h = jnp.dot(patch_ref[...], wconv_ref[...], preferred_element_type=jnp.float32)
    h = jnp.maximum(h + shift_ref[...], 0.0)                      # BN shift + ReLU (VPU, f32)
    # self.linear (c_feature -> c_model), bf16 operands / f32 accumulate, lane-dense output
    out_ref[...] = jnp.dot(h.astype(jnp.bfloat16), wlin_ref[...],
                           preferred_element_type=jnp.float32) + blin_ref[...]


def _fe_prepare(p_fe):
    """Fold BN running stats into conv weights, build bf16 weight matrices (trace-time, free)."""
    w = p_fe["conv1_w"].astype(jnp.float32)                        # (Cout, Cin, 7, 7) OIHW
    eps = 1e-5
    scale = p_fe["bn_gamma"] / jnp.sqrt(p_fe["bn_var"] + eps)
    shift = p_fe["bn_beta"] - p_fe["bn_mean"] * scale
    # rows ordered (kh, kw, cin) to match the channel-last patch construction below
    wmat = w.transpose(2, 3, 1, 0).reshape(-1, w.shape[0])         # (k*k*Cin, Cout)
    wmat = (wmat * scale[None, :]).astype(jnp.bfloat16)            # fold BN scale, cast bf16
    wlin = p_fe["lin_w"].T.astype(jnp.bfloat16)                    # (Cout, c_model)
    blin = p_fe["lin_b"].reshape(1, -1).astype(jnp.float32)
    return wmat, shift.reshape(1, -1).astype(jnp.float32), wlin, blin


def _im2col_bf16(x, *, ksize=7, stride=2, pad=3):
    """Channel-last im2col in bf16 (halves patch HBM bytes, rows already in (b, oh, ow) order,
    so no post-hoc transpose copy is needed).  Columns ordered (kh, kw, cin)."""
    B, Cin, H, W = x.shape
    OH = (H + 2 * pad - ksize) // stride + 1
    OW = (W + 2 * pad - ksize) // stride + 1
    xt = jnp.transpose(x, (0, 2, 3, 1)).astype(jnp.bfloat16)       # NHWC
    xp = jnp.pad(xt, ((0, 0), (pad, pad), (pad, pad), (0, 0)))
    taps = [xp[:, kh:kh + stride * OH:stride, kw:kw + stride * OW:stride, :]
            for kh in range(ksize) for kw in range(ksize)]
    patches = jnp.stack(taps, axis=3)                              # (B, OH, OW, k*k, Cin)
    patches = patches.reshape(B * OH * OW, ksize * ksize * Cin)    # (M, K) -- free reshapes
    return patches, OH, OW


def feature_extractor_forward(x, p_fe, *, block_m=512):
    """x: (B, Cin, H, W) f32 -> (B, OH*OW, c_model) f32."""
    B = x.shape[0]
    wconv, shift, wlin, blin = _fe_prepare(p_fe)
    K, Cout = wconv.shape
    c_model = wlin.shape[1]
    patches, OH, OW = _im2col_bf16(x)
    M = B * OH * OW

    # Padding: K to a multiple of 16 (bf16 sublane pack; 160 keeps patch HBM bytes lower than 256),
    # channel dims to 128 lanes (lane-dense MXU tiles + unmasked vst on the output).
    K_pad = _round_up(K, 16)              # 147 -> 160
    N_pad = _round_up(Cout, 128)          # 64  -> 128
    P_pad = _round_up(c_model, 128)       # 32  -> 128
    TM = min(block_m, _round_up(M, 8))    # big M tiles at real shapes (default 512)
    M_pad = _round_up(M, TM)

    patches = jnp.pad(patches, ((0, M_pad - M), (0, K_pad - K)))
    wconv_p = jnp.pad(wconv, ((0, K_pad - K), (0, N_pad - Cout)))
    shift_p = jnp.pad(shift, ((0, 0), (0, N_pad - Cout)))
    wlin_p = jnp.pad(wlin, ((0, N_pad - Cout), (0, P_pad - c_model)))
    blin_p = jnp.pad(blin, ((0, 0), (0, P_pad - c_model)))

    grid_m = M_pad // TM
    patch_kwargs = {}
    if grid_m >= 3:
        # deeper prefetch of the streamed patch tiles when the pipeline is DMA-bound (v6e/v7x)
        patch_kwargs["pipeline_mode"] = pl.Buffered(3)

    flops = 2 * M_pad * K_pad * N_pad + 2 * M_pad * N_pad * P_pad
    bytes_accessed = (M_pad * K_pad * 2 + K_pad * N_pad * 2 + N_pad * P_pad * 2
                      + (N_pad + P_pad) * 4 + M_pad * P_pad * 4)

    out = pl.pallas_call(
        _fe_kernel,
        out_shape=jax.ShapeDtypeStruct((M_pad, P_pad), jnp.float32),
        grid=(grid_m,),
        in_specs=[
            pl.BlockSpec((TM, K_pad), lambda i: (i, 0), **patch_kwargs),   # patches: streamed
            pl.BlockSpec((K_pad, N_pad), lambda i: (0, 0)),                # conv weight: resident
            pl.BlockSpec((1, N_pad), lambda i: (0, 0)),                    # BN shift: resident
            pl.BlockSpec((N_pad, P_pad), lambda i: (0, 0)),                # linear weight: resident
            pl.BlockSpec((1, P_pad), lambda i: (0, 0)),                    # linear bias: resident
        ],
        out_specs=pl.BlockSpec((TM, P_pad), lambda i: (i, 0)),
        compiler_params=pltpu.CompilerParams(
            dimension_semantics=("parallel",),            # megacore-shard the M tiles (v7x)
            vmem_limit_bytes=48 * 1024 * 1024),           # stays under v7x's 64 MiB physical VMEM
        cost_estimate=pl.CostEstimate(flops=flops, transcendentals=0,
                                      bytes_accessed=bytes_accessed),
    )(patches, wconv_p, shift_p, wlin_p, blin_p)

    return out[:M, :c_model].reshape(B, OH * OW, c_model)


# ==========================================================================================
# 2) Fused transformer sub-layer kernels
# ==========================================================================================
def _attn_sublayer_kernel(x_ref, kv_ref, mask_ref, ln_a_ref, ln_b_ref,
                          wq_ref, bq_ref, wk_ref, bk_ref, wv_ref, bv_ref, wo_ref, bo_ref,
                          out_ref, *, n_heads, d_k, eps, ln_kv):
    x = x_ref[0]                                         # (Sq, D)
    kv = kv_ref[0]                                       # (Skv, D)
    mask = mask_ref[0]                                   # (Sq, Skv) float (1 keep / 0 mask)
    xn = _ln_math(x, ln_a_ref[...], ln_b_ref[...], eps)  # SubLayer pre-norm
    kvn = _ln_math(kv, ln_a_ref[...], ln_b_ref[...], eps) if ln_kv else kv

    q = jnp.dot(xn, wq_ref[...], preferred_element_type=jnp.float32) + bq_ref[...]
    k = jnp.dot(kvn, wk_ref[...], preferred_element_type=jnp.float32) + bk_ref[...]
    v = jnp.dot(kvn, wv_ref[...], preferred_element_type=jnp.float32) + bv_ref[...]
    wo = wo_ref[...]

    Sq, D = x.shape
    inv_sqrt_dk = 1.0 / math.sqrt(d_k)
    attn = jnp.zeros((Sq, D), jnp.float32)
    for h in range(n_heads):                             # unrolled; each head is a tiny 2-D matmul
        sl = slice(h * d_k, (h + 1) * d_k)
        s = lax.dot_general(q[:, sl], k[:, sl], (((1,), (1,)), ((), ())),
                            preferred_element_type=jnp.float32) * inv_sqrt_dk
        s = jnp.where(mask == 0.0, -1e9, s)
        s = s - jnp.max(s, axis=-1, keepdims=True)
        e = jnp.exp(s)
        p = e / jnp.sum(e, axis=-1, keepdims=True)
        ctx_h = jnp.dot(p, v[:, sl], preferred_element_type=jnp.float32)     # (Sq, d_k)
        attn = attn + jnp.dot(ctx_h, wo[sl, :], preferred_element_type=jnp.float32)
    out_ref[0] = x + attn + bo_ref[...]                  # residual (dropout == identity in eval)


def _ffn_sublayer_kernel(x_ref, ln_a_ref, ln_b_ref, w1_ref, b1_ref, w2_ref, b2_ref,
                         out_ref, *, eps):
    x = x_ref[...]
    xn = _ln_math(x, ln_a_ref[...], ln_b_ref[...], eps)
    h = jnp.maximum(jnp.dot(xn, w1_ref[...], preferred_element_type=jnp.float32) + b1_ref[...], 0.0)
    out_ref[...] = x + jnp.dot(h, w2_ref[...], preferred_element_type=jnp.float32) + b2_ref[...]


def _ln_kernel(x_ref, a_ref, b_ref, out_ref, *, eps):
    out_ref[...] = _ln_math(x_ref[...], a_ref[...], b_ref[...], eps)


def _logits_logsoftmax_kernel(x_ref, w_ref, b_ref, out_ref):
    logits = jnp.dot(x_ref[...], w_ref[...], preferred_element_type=jnp.float32) + b_ref[...]
    z = logits - jnp.max(logits, axis=-1, keepdims=True)
    out_ref[...] = z - jnp.log(jnp.sum(jnp.exp(z), axis=-1, keepdims=True))


# ---- small wrappers -----------------------------------------------------------------------
def _rowwise_pallas(kernel_fn, x2d, consts, out_cols, *, row_tile=256, out_dtype=jnp.float32):
    """Run a row-wise kernel over a (R, D) matrix, tiled over rows with resident 2-D consts."""
    R, D = x2d.shape
    TR = min(row_tile, _round_up(R, 8))
    R_pad = _round_up(R, TR)
    if R_pad != R:
        x2d = jnp.pad(x2d, ((0, R_pad - R), (0, 0)))
    in_specs = [pl.BlockSpec((TR, D), lambda i: (i, 0))]
    in_specs += [pl.BlockSpec(tuple(c.shape), lambda i: (0, 0)) for c in consts]
    out = pl.pallas_call(
        kernel_fn,
        out_shape=jax.ShapeDtypeStruct((R_pad, out_cols), out_dtype),
        grid=(R_pad // TR,),
        in_specs=in_specs,
        out_specs=pl.BlockSpec((TR, out_cols), lambda i: (i, 0)),
        compiler_params=pltpu.CompilerParams(dimension_semantics=("parallel",)),
    )(x2d, *consts)
    return out[:R]


def attention_sublayer(x, kv, mask, p, *, n_heads, ln_kv):
    B, Sq, D = x.shape
    Skv = kv.shape[1]
    d_k = D // n_heads
    kern = functools.partial(_attn_sublayer_kernel, n_heads=n_heads, d_k=d_k, eps=1e-6, ln_kv=ln_kv)
    consts = [p["ln_a"], p["ln_b"], p["wq"], p["bq"], p["wk"], p["bk"],
              p["wv"], p["bv"], p["wo"], p["bo"]]
    in_specs = [
        pl.BlockSpec((1, Sq, D), lambda b: (b, 0, 0)),
        pl.BlockSpec((1, Skv, D), lambda b: (b, 0, 0)),
        pl.BlockSpec((1, Sq, Skv), lambda b: (b, 0, 0)),
    ] + [pl.BlockSpec(tuple(c.shape), lambda b: (0, 0)) for c in consts]
    return pl.pallas_call(
        kern,
        out_shape=jax.ShapeDtypeStruct((B, Sq, D), jnp.float32),
        grid=(B,),
        in_specs=in_specs,
        out_specs=pl.BlockSpec((1, Sq, D), lambda b: (b, 0, 0)),
        compiler_params=pltpu.CompilerParams(dimension_semantics=("parallel",)),
    )(x, kv, mask, *consts)


def ffn_sublayer(x, p):
    B, S, D = x.shape
    kern = functools.partial(_ffn_sublayer_kernel, eps=1e-6)
    consts = [p["ln_a"], p["ln_b"], p["w1"], p["b1"], p["w2"], p["b2"]]
    return _rowwise_pallas(kern, x.reshape(B * S, D), consts, out_cols=D).reshape(B, S, D)


def layer_norm(x, a, b):
    B, S, D = x.shape
    kern = functools.partial(_ln_kernel, eps=1e-6)
    return _rowwise_pallas(kern, x.reshape(B * S, D), [a, b], out_cols=D).reshape(B, S, D)


def out_process(x, w, b):
    B, S, D = x.shape
    V = w.shape[1]
    return _rowwise_pallas(_logits_logsoftmax_kernel, x.reshape(B * S, D), [w, b],
                           out_cols=V).reshape(B, S, V)


# ==========================================================================================
# 3) Full Transformer forward (glue: positional-encoding adds and embedding gather in JAX)
# ==========================================================================================
def transformer_forward(params, x_img, src_mask, tgt, tgt_mask, *, n_heads=8, fe_block_m=512):
    c_model = params["pe_img"].shape[-1]
    feat = feature_extractor_forward(x_img, params["fe"], block_m=fe_block_m)   # (B, S, c_model)
    B, S, _ = feat.shape
    x = feat + params["pe_img"][:, :S, :]                 # img_pos_enc (dropout == identity)

    enc_mask = jnp.broadcast_to(src_mask, (B, S, S)).astype(jnp.float32)
    for lyr in params["encoder"]["layers"]:
        x = attention_sublayer(x, x, enc_mask, lyr["attn"], n_heads=n_heads, ln_kv=True)
        x = ffn_sublayer(x, lyr["ffn"])
    memory = layer_norm(x, params["encoder"]["norm_a"], params["encoder"]["norm_b"])

    T = tgt.shape[1]
    # TODO(synk): embedding gather + pos-enc add are left as cheap XLA glue (a Pallas scalar-prefetch
    # row-gather is possible but pointless at these sizes).
    y = jnp.take(params["tgt_emb"], tgt, axis=0) / math.sqrt(c_model) + params["pe_tgt"][:, :T, :]
    self_mask = tgt_mask.astype(jnp.float32)
    cross_mask = jnp.broadcast_to(src_mask, (B, T, S)).astype(jnp.float32)
    for lyr in params["decoder"]["layers"]:
        y = attention_sublayer(y, y, self_mask, lyr["self_attn"], n_heads=n_heads, ln_kv=True)
        y = attention_sublayer(y, memory, cross_mask, lyr["src_attn"], n_heads=n_heads, ln_kv=False)
        y = ffn_sublayer(y, lyr["ffn"])
    y = layer_norm(y, params["decoder"]["norm_a"], params["decoder"]["norm_b"])
    return out_process(y, params["out_w"], params["out_b"])


# ==========================================================================================
# 4) Parameter construction + pure-JAX reference
# ==========================================================================================
def init_params(key, *, c_model, c_feature, c_ff, n_heads, voc_len, cin, n_enc, n_dec, max_len):
    keys = iter(jax.random.split(key, 256))
    nk = lambda: next(keys)

    def linear(din, dout):
        w = jax.random.normal(nk(), (din, dout), jnp.float32) / math.sqrt(din)
        b = jax.random.normal(nk(), (1, dout), jnp.float32) * 0.01
        return w, b

    def ln_params():
        a = 1.0 + 0.05 * jax.random.normal(nk(), (1, c_model), jnp.float32)
        b = 0.05 * jax.random.normal(nk(), (1, c_model), jnp.float32)
        return a, b

    def attn_params():
        a, b = ln_params()
        wq, bq = linear(c_model, c_model); wk, bk = linear(c_model, c_model)
        wv, bv = linear(c_model, c_model); wo, bo = linear(c_model, c_model)
        return {"ln_a": a, "ln_b": b, "wq": wq, "bq": bq, "wk": wk, "bk": bk,
                "wv": wv, "bv": bv, "wo": wo, "bo": bo}

    def ffn_params():
        a, b = ln_params()
        w1, b1 = linear(c_model, c_ff)
        w2, b2 = linear(c_ff, c_model)
        return {"ln_a": a, "ln_b": b, "w1": w1, "b1": b1, "w2": w2, "b2": b2}

    fe = {
        "conv1_w": jax.random.normal(nk(), (c_feature, cin, 7, 7), jnp.float32) * 0.05,
        "bn_gamma": jax.random.uniform(nk(), (c_feature,), jnp.float32, 0.5, 1.5),
        "bn_beta": jax.random.normal(nk(), (c_feature,), jnp.float32) * 0.1,
        "bn_mean": jax.random.normal(nk(), (c_feature,), jnp.float32) * 0.1,
        "bn_var": jax.random.uniform(nk(), (c_feature,), jnp.float32, 0.5, 1.5),
        "lin_w": jax.random.normal(nk(), (c_model, c_feature), jnp.float32) / math.sqrt(c_feature),
        "lin_b": jax.random.normal(nk(), (c_model,), jnp.float32) * 0.01,
    }
    enc_na, enc_nb = ln_params()
    dec_na, dec_nb = ln_params()
    return {
        "fe": fe,
        "pe_img": jax.random.normal(nk(), (1, max_len, c_model), jnp.float32),
        "pe_tgt": jax.random.normal(nk(), (1, max_len, c_model), jnp.float32),
        "encoder": {"layers": [{"attn": attn_params(), "ffn": ffn_params()} for _ in range(n_enc)],
                    "norm_a": enc_na, "norm_b": enc_nb},
        "decoder": {"layers": [{"self_attn": attn_params(), "src_attn": attn_params(),
                                "ffn": ffn_params()} for _ in range(n_dec)],
                    "norm_a": dec_na, "norm_b": dec_nb},
        "tgt_emb": jax.random.normal(nk(), (voc_len, c_model), jnp.float32),
        "out_w": jax.random.normal(nk(), (c_model, voc_len), jnp.float32) / math.sqrt(c_model),
        "out_b": jax.random.normal(nk(), (1, voc_len), jnp.float32) * 0.01,
    }


def _mm(a, b):
    return jnp.matmul(a, b, precision=_HI)


def _ref_fe_f32(x, p_fe):
    """Full-f32 conv reference for the stem (fidelity check only)."""
    conv = lax.conv_general_dilated(x, p_fe["conv1_w"], (2, 2), ((3, 3), (3, 3)),
                                    dimension_numbers=("NCHW", "OIHW", "NCHW"), precision=_HI)
    eps = 1e-5
    scale = p_fe["bn_gamma"] / jnp.sqrt(p_fe["bn_var"] + eps)
    shift = p_fe["bn_beta"] - p_fe["bn_mean"] * scale
    act = jnp.maximum(conv * scale[None, :, None, None] + shift[None, :, None, None], 0.0)
    B, Cout = act.shape[0], act.shape[1]
    feat = act.reshape(B, Cout, -1).transpose(0, 2, 1)
    return _mm(feat, p_fe["lin_w"].T) + p_fe["lin_b"]


def _ref_fe_matched(x, p_fe):
    """Reference stem using the same bf16 operands as the kernel (isolates Pallas correctness)."""
    wconv, shift, wlin, blin = _fe_prepare(p_fe)
    patches, OH, OW = _im2col_bf16(x)
    h = jnp.maximum(jnp.dot(patches, wconv, preferred_element_type=jnp.float32) + shift, 0.0)
    out = jnp.dot(h.astype(jnp.bfloat16), wlin, preferred_element_type=jnp.float32) + blin
    return out.reshape(x.shape[0], OH * OW, -1)


def _ref_attention(xq, xkv, mask3, p, n_heads):
    d_k = xq.shape[-1] // n_heads
    q = _mm(xq, p["wq"]) + p["bq"]
    k = _mm(xkv, p["wk"]) + p["bk"]
    v = _mm(xkv, p["wv"]) + p["bv"]
    B, Sq, D = q.shape
    Sk = k.shape[1]
    qh = q.reshape(B, Sq, n_heads, d_k).transpose(0, 2, 1, 3)
    kh = k.reshape(B, Sk, n_heads, d_k).transpose(0, 2, 1, 3)
    vh = v.reshape(B, Sk, n_heads, d_k).transpose(0, 2, 1, 3)
    s = jnp.einsum("bhqd,bhkd->bhqk", qh, kh, precision=_HI) / math.sqrt(d_k)
    s = jnp.where(mask3[:, None, :, :] == 0, -1e9, s)
    pa = jax.nn.softmax(s, axis=-1)
    ctx = jnp.einsum("bhqk,bhkd->bhqd", pa, vh, precision=_HI)
    ctx = ctx.transpose(0, 2, 1, 3).reshape(B, Sq, D)
    return _mm(ctx, p["wo"]) + p["bo"]


def ref_transformer(params, x_img, src_mask, tgt, tgt_mask, *, n_heads):
    c_model = params["pe_img"].shape[-1]
    feat = _ref_fe_matched(x_img, params["fe"])
    B, S, _ = feat.shape
    x = feat + params["pe_img"][:, :S, :]
    enc_mask = jnp.broadcast_to(src_mask, (B, S, S))
    for lyr in params["encoder"]["layers"]:
        pa = lyr["attn"]
        x = x + _ref_attention(_ln_math(x, pa["ln_a"], pa["ln_b"], 1e-6),
                               _ln_math(x, pa["ln_a"], pa["ln_b"], 1e-6), enc_mask, pa, n_heads)
        pf = lyr["ffn"]
        xn = _ln_math(x, pf["ln_a"], pf["ln_b"], 1e-6)
        x = x + _mm(jnp.maximum(_mm(xn, pf["w1"]) + pf["b1"], 0.0), pf["w2"]) + pf["b2"]
    memory = _ln_math(x, params["encoder"]["norm_a"], params["encoder"]["norm_b"], 1e-6)

    T = tgt.shape[1]
    y = jnp.take(params["tgt_emb"], tgt, axis=0) / math.sqrt(c_model) + params["pe_tgt"][:, :T, :]
    cross_mask = jnp.broadcast_to(src_mask, (B, T, S))
    for lyr in params["decoder"]["layers"]:
        pa = lyr["self_attn"]
        y = y + _ref_attention(_ln_math(y, pa["ln_a"], pa["ln_b"], 1e-6),
                               _ln_math(y, pa["ln_a"], pa["ln_b"], 1e-6), tgt_mask, pa, n_heads)
        pc = lyr["src_attn"]
        y = y + _ref_attention(_ln_math(y, pc["ln_a"], pc["ln_b"], 1e-6), memory,
                               cross_mask, pc, n_heads)
        pf = lyr["ffn"]
        yn = _ln_math(y, pf["ln_a"], pf["ln_b"], 1e-6)
        y = y + _mm(jnp.maximum(_mm(yn, pf["w1"]) + pf["b1"], 0.0), pf["w2"]) + pf["b2"]
    y = _ln_math(y, params["decoder"]["norm_a"], params["decoder"]["norm_b"], 1e-6)
    return jax.nn.log_softmax(_mm(y, params["out_w"]) + params["out_b"], axis=-1)


# ==========================================================================================
# 5) Demo / self-test at small shapes
# ==========================================================================================
if __name__ == "__main__":
    B, Cin, H, W = 2, 3, 16, 16
    c_model, c_feature, c_ff, n_heads, voc_len, T = 32, 64, 64, 8, 16, 8

    key = jax.random.PRNGKey(0)
    kp, kx, kt = jax.random.split(key, 3)
    params = init_params(kp, c_model=c_model, c_feature=c_feature, c_ff=c_ff, n_heads=n_heads,
                         voc_len=voc_len, cin=Cin, n_enc=4, n_dec=4, max_len=64)

    x_img = jax.random.normal(kx, (B, Cin, H, W), jnp.float32)
    OH = (H + 2 * 3 - 7) // 2 + 1
    S = OH * OH                                                     # 64 image tokens
    src_mask = jnp.ones((B, 1, S), jnp.float32)
    tgt = jax.random.randint(kt, (B, T), 0, voc_len, dtype=jnp.int32)
    tgt_mask = jnp.broadcast_to(jnp.tril(jnp.ones((T, T), jnp.float32)), (B, T, T))

    # small FE tile to exercise the M-grid at toy shapes; default block_m=512 for real shapes
    fwd = jax.jit(functools.partial(transformer_forward, n_heads=n_heads, fe_block_m=64))
    out = jax.block_until_ready(fwd(params, x_img, src_mask, tgt, tgt_mask))
    assert out.shape == (B, T, voc_len), out.shape

    # Check 1: FeatureExtractor kernel vs full-f32 conv reference (loose: kernel uses bf16 operands)
    fe_out = feature_extractor_forward(x_img, params["fe"], block_m=64)
    fe_ref = _ref_fe_f32(x_img, params["fe"])
    assert fe_out.shape == fe_ref.shape == (B, S, c_model)
    fe_err = float(jnp.max(jnp.abs(fe_out - fe_ref)))
    assert jnp.allclose(fe_out, fe_ref, atol=6e-2, rtol=6e-2), fe_err

    # Check 2: full forward vs pure-JAX reference (reference stem uses the same bf16 operands)
    ref = ref_transformer(params, x_img, src_mask, tgt, tgt_mask, n_heads=n_heads)
    err = float(jnp.max(jnp.abs(out - ref)))
    assert jnp.allclose(out, ref, atol=5e-2, rtol=5e-2), err

    print("KERNEL_OK")
</pallas_src>

<mosaic_0001>
module attributes {stable_mosaic.version = 11 : i64} {
  func.func @_fe_kernel(%arg0: i32, %arg1: memref<64x160xbf16, #tpu.memory_space<vmem>>, %arg2: memref<160x128xbf16, #tpu.memory_space<vmem>>, %arg3: memref<1x128xf32, #tpu.memory_space<vmem>>, %arg4: memref<128x128xbf16, #tpu.memory_space<vmem>>, %arg5: memref<1x128xf32, #tpu.memory_space<vmem>>, %arg6: memref<64x128xf32, #tpu.memory_space<vmem>>) attributes {dimension_semantics = [#tpu.dimension_semantics<parallel>], iteration_bounds = array<i64: 2>, scalar_prefetch = 0 : i64, scratch_operands = 0 : i64, tpu.core_type = #tpu.core_type<tc>, window_params = [{transform_indices = @transform_0, window_bounds = array<i64: 64, 160>}, {pipeline_mode = #tpu.pipeline_mode<synchronous>, transform_indices = @transform_1, window_bounds = array<i64: 160, 128>}, {pipeline_mode = #tpu.pipeline_mode<synchronous>, transform_indices = @transform_2, window_bounds = array<i64: 1, 128>}, {pipeline_mode = #tpu.pipeline_mode<synchronous>, transform_indices = @transform_3, window_bounds = array<i64: 128, 128>}, {pipeline_mode = #tpu.pipeline_mode<synchronous>, transform_indices = @transform_4, window_bounds = array<i64: 1, 128>}, {transform_indices = @transform_5, window_bounds = array<i64: 64, 128>}]} {
    %c0 = arith.constant 0 : index
    %c0_0 = arith.constant 0 : index
    %0 = vector.load %arg1[%c0, %c0_0] : memref<64x160xbf16, #tpu.memory_space<vmem>>, vector<64x160xbf16>
    %c0_1 = arith.constant 0 : index
    %c0_2 = arith.constant 0 : index
    %1 = vector.load %arg2[%c0_1, %c0_2] : memref<160x128xbf16, #tpu.memory_space<vmem>>, vector<160x128xbf16>
    %cst = arith.constant dense<0.000000e+00> : vector<64x128xf32>
    %2 = tpu.matmul %0, %1, %cst {dimension_numbers = #tpu.dot_dimension_numbers<[1], [0], [0], [1], [0, 0, 1, 1], [], []>} : vector<64x160xbf16>, vector<160x128xbf16>, vector<64x128xf32> -> vector<64x128xf32>
    %c0_3 = arith.constant 0 : index
    %c0_4 = arith.constant 0 : index
    %3 = vector.load %arg3[%c0_3, %c0_4] : memref<1x128xf32, #tpu.memory_space<vmem>>, vector<1x128xf32>
    %4 = vector.broadcast %3 : vector<1x128xf32> to vector<64x128xf32>
    %5 = arith.addf %2, %4 : vector<64x128xf32>
    %cst_5 = arith.constant 0.000000e+00 : f32
    %6 = vector.broadcast %cst_5 : f32 to vector<64x128xf32>
    %7 = arith.maximumf %5, %6 : vector<64x128xf32>
    %8 = arith.truncf %7 : vector<64x128xf32> to vector<64x128xbf16>
    %c0_6 = arith.constant 0 : index
    %c0_7 = arith.constant 0 : index
    %9 = vector.load %arg4[%c0_6, %c0_7] : memref<128x128xbf16, #tpu.memory_space<vmem>>, vector<128x128xbf16>
    %cst_8 = arith.constant dense<0.000000e+00> : vector<64x128xf32>
    %10 = tpu.matmul %8, %9, %cst_8 {dimension_numbers = #tpu.dot_dimension_numbers<[1], [0], [0], [1], [0, 0, 1, 1], [], []>} : vector<64x128xbf16>, vector<128x128xbf16>, vector<64x128xf32> -> vector<64x128xf32>
    %c0_9 = arith.constant 0 : index
    %c0_10 = arith.constant 0 : index
    %11 = vector.load %arg5[%c0_9, %c0_10] : memref<1x128xf32, #tpu.memory_space<vmem>>, vector<1x128xf32>
    %12 = vector.broadcast %11 : vector<1x128xf32> to vector<64x128xf32>
    %13 = arith.addf %10, %12 : vector<64x128xf32>
    %c0_11 = arith.constant 0 : index
    %c0_12 = arith.constant 0 : index
    %14 = vector.load %arg6[%c0_11, %c0_12] : memref<64x128xf32, #tpu.memory_space<vmem>>, vector<64x128xf32>
    tpu.vector_store %arg6[%c0_11, %c0_12], %13 {strides = array<i32>} : memref<64x128xf32, #tpu.memory_space<vmem>>, vector<64x128xf32>,
    return
  }
  func.func @transform_0(%arg0: i32) -> (i32, i32) {
    %c0_i32 = arith.constant 0 : i32
    %c0_i32_0 = arith.constant 0 : i32
    return %arg0, %c0_i32 : i32, i32
  }
  func.func @transform_1(%arg0: i32) -> (i32, i32) {
    %c0_i32 = arith.constant 0 : i32
    %c0_i32_0 = arith.constant 0 : i32
    %c0_i32_1 = arith.constant 0 : i32
    return %c0_i32, %c0_i32_0 : i32, i32
  }
  func.func @transform_2(%arg0: i32) -> (i32, i32) {
    %c0_i32 = arith.constant 0 : i32
    %c0_i32_0 = arith.constant 0 : i32
    %c0_i32_1 = arith.constant 0 : i32
    return %c0_i32, %c0_i32_0 : i32, i32
  }
  func.func @transform_3(%arg0: i32) -> (i32, i32) {
    %c0_i32 = arith.constant 0 : i32
    %c0_i32_0 = arith.constant 0 : i32
    %c0_i32_1 = arith.constant 0 : i32
    return %c0_i32, %c0_i32_0 : i32, i32
  }
  func.func @transform_4(%arg0: i32) -> (i32, i32) {
    %c0_i32 = arith.constant 0 : i32
    %c0_i32_0 = arith.constant 0 : i32
    %c0_i32_1 = arith.constant 0 : i32
    return %c0_i32, %c0_i32_0 : i32, i32
  }
  func.func @transform_5(%arg0: i32) -> (i32, i32) {
    %c0_i32 = arith.constant 0 : i32
    %c0_i32_0 = arith.constant 0 : i32
    return %arg0, %c0_i32 : i32, i32
  }
}

module attributes {stable_mosaic.version = 11 : i64} {
  func.func @_attn_sublayer_kernel(%arg0: i32, %arg1: memref<1x64x32xf32, #tpu.memory_space<vmem>>, %arg2: memref<1x64x32xf32, #tpu.memory_space<vmem>>, %arg3: memref<1x64x64xf32, #tpu.memory_space<vmem>>, %arg4: memref<1x32xf32, #tpu.memory_space<vmem>>, %arg5: memref<1x32xf32, #tpu.memory_space<vmem>>, %arg6: memref<32x32xf32, #tpu.memory_space<vmem>>, %arg7: memref<1x32xf32, #tpu.memory_space<vmem>>, %arg8: memref<32x32xf32, #tpu.memory_space<vmem>>, %arg9: memref<1x32xf32, #tpu.memory_space<vmem>>, %arg10: memref<32x32xf32, #tpu.memory_space<vmem>>, %arg11: memref<1x32xf32, #tpu.memory_space<vmem>>, %arg12: memref<32x32xf32, #tpu.memory_space<vmem>>, %arg13: memref<1x32xf32, #tpu.memory_space<vmem>>, %arg14: memref<1x64x32xf32, #tpu.memory_space<vmem>>) attributes {dimension_semantics = [#tpu.dimension_semantics<parallel>], iteration_bounds = array<i64: 2>, scalar_prefetch = 0 : i64, scratch_operands = 0 : i64, tpu.core_type = #tpu.core_type<tc>, window_params = [{transform_indices = @transform_0, window_bounds = array<i64: 1, 64, 32>}, {transform_indices = @transform_1, window_bounds = array<i64: 1, 64, 32>}, {transform_indices = @transform_2, window_bounds = array<i64: 1, 64, 64>}, {pipeline_mode = #tpu.pipeline_mode<synchronous>, transform_indices = @transform_3, window_bounds = array<i64: 1, 32>}, {pipeline_mode = #tpu.pipeline_mode<synchronous>, transform_indices = @transform_4, window_bounds = array<i64: 1, 32>}, {pipeline_mode = #tpu.pipeline_mode<synchronous>, transform_indices = @transform_5, window_bounds = array<i64: 32, 32>}, {pipeline_mode = #tpu.pipeline_mode<synchronous>, transform_indices = @transform_6, window_bounds = array<i64: 1, 32>}, {pipeline_mode = #tpu.pipeline_mode<synchronous>, transform_indices = @transform_7, window_bounds = array<i64: 32, 32>}, {pipeline_mode = #tpu.pipeline_mode<synchronous>, transform_indices = @transform_8, window_bounds = array<i64: 1, 32>}, {pipeline_mode = #tpu.pipeline_mode<synchronous>, transform_indices = @transform_9, window_bounds = array<i64: 32, 32>}, {pipeline_mode = #tpu.pipeline_mode<synchronous>, transform_indices = @transform_10, window_bounds = array<i64: 1, 32>}, {pipeline_mode = #tpu.pipeline_mode<synchronous>, transform_indices = @transform_11, window_bounds = array<i64: 32, 32>}, {pipeline_mode = #tpu.pipeline_mode<synchronous>, transform_indices = @transform_12, window_bounds = array<i64: 1, 32>}, {transform_indices = @transform_13, window_bounds = array<i64: 1, 64, 32>}]} {
    %c0 = arith.constant 0 : index
    %c0_0 = arith.constant 0 : index
    %c0_1 = arith.constant 0 : index
    %0 = vector.load %arg1[%c0, %c0_0, %c0_1] : memref<1x64x32xf32, #tpu.memory_space<vmem>>, vector<1x64x32xf32>
    %1 = vector.shape_cast %0 : vector<1x64x32xf32> to vector<64x32xf32>
    %c0_2 = arith.constant 0 : index
    %c0_3 = arith.constant 0 : index
    %c0_4 = arith.constant 0 : index
    %2 = vector.load %arg2[%c0_2, %c0_3, %c0_4] : memref<1x64x32xf32, #tpu.memory_space<vmem>>, vector<1x64x32xf32>
    %3 = vector.shape_cast %2 : vector<1x64x32xf32> to vector<64x32xf32>
    %c0_5 = arith.constant 0 : index
    %c0_6 = arith.constant 0 : index
    %c0_7 = arith.constant 0 : index
    %4 = vector.load %arg3[%c0_5, %c0_6, %c0_7] : memref<1x64x64xf32, #tpu.memory_space<vmem>>, vector<1x64x64xf32>
    %5 = vector.shape_cast %4 : vector<1x64x64xf32> to vector<64x64xf32>
    %c0_8 = arith.constant 0 : index
    %c0_9 = arith.constant 0 : index
    %6 = vector.load %arg4[%c0_8, %c0_9] : memref<1x32xf32, #tpu.memory_space<vmem>>, vector<1x32xf32>
    %c0_10 = arith.constant 0 : index
    %c0_11 = arith.constant 0 : index
    %7 = vector.load %arg5[%c0_10, %c0_11] : memref<1x32xf32, #tpu.memory_space<vmem>>, vector<1x32xf32>
    %cst = arith.constant dense<0.000000e+00> : vector<64xf32>
    %8 = vector.multi_reduction <add>, %1, %cst [1] : vector<64x32xf32> to vector<64xf32>
    %9 = vector.shape_cast %8 : vector<64xf32> to vector<64x1xf32>
    %cst_12 = arith.constant 3.200000e+01 : f32
    %10 = vector.broadcast %cst_12 : f32 to vector<64x1xf32>
    %11 = arith.divf %9, %10 : vector<64x1xf32>
    %12 = vector.broadcast %11 : vector<64x1xf32> to vector<64x32xf32>
    %13 = arith.subf %1, %12 : vector<64x32xf32>
    %14 = arith.mulf %13, %13 : vector<64x32xf32>
    %cst_13 = arith.constant dense<0.000000e+00> : vector<64xf32>
    %15 = vector.multi_reduction <add>, %14, %cst_13 [1] : vector<64x32xf32> to vector<64xf32>
    %16 = vector.shape_cast %15 : vector<64xf32> to vector<64x1xf32>
    %cst_14 = arith.constant 0.0322580636 : f32
    %17 = vector.broadcast %cst_14 : f32 to vector<64x1xf32>
    %18 = arith.mulf %16, %17 : vector<64x1xf32>
    %19 = vector.broadcast %6 : vector<1x32xf32> to vector<64x32xf32>
    %20 = arith.mulf %19, %13 : vector<64x32xf32>
    %21 = math.sqrt %18 : vector<64x1xf32>
    %cst_15 = arith.constant 9.99999997E-7 : f32
    %22 = vector.broadcast %cst_15 : f32 to vector<64x1xf32>
    %23 = arith.addf %21, %22 : vector<64x1xf32>
    %24 = vector.broadcast %23 : vector<64x1xf32> to vector<64x32xf32>
    %25 = arith.divf %20, %24 : vector<64x32xf32>
    %26 = vector.broadcast %7 : vector<1x32xf32> to vector<64x32xf32>
    %27 = arith.addf %25, %26 : vector<64x32xf32>
    %c0_16 = arith.constant 0 : index
    %c0_17 = arith.constant 0 : index
    %28 = vector.load %arg4[%c0_16, %c0_17] : memref<1x32xf32, #tpu.memory_space<vmem>>, vector<1x32xf32>
    %c0_18 = arith.constant 0 : index
    %c0_19 = arith.constant 0 : index
    %29 = vector.load %arg5[%c0_18, %c0_19] : memref<1x32xf32, #tpu.memory_space<vmem>>, vector<1x32xf32>
    %cst_20 = arith.constant dense<0.000000e+00> : vector<64xf32>
    %30 = vector.multi_reduction <add>, %3, %cst_20 [1] : vector<64x32xf32> to vector<64xf32>
    %31 = vector.shape_cast %30 : vector<64xf32> to vector<64x1xf32>
    %cst_21 = arith.constant 3.200000e+01 : f32
    %32 = vector.broadcast %cst_21 : f32 to vector<64x1xf32>
    %33 = arith.divf %31, %32 : vector<64x1xf32>
    %34 = vector.broadcast %33 : vector<64x1xf32> to vector<64x32xf32>
    %35 = arith.subf %3, %34 : vector<64x32xf32>
    %36 = arith.mulf %35, %35 : vector<64x32xf32>
    %cst_22 = arith.constant dense<0.000000e+00> : vector<64xf32>
    %37 = vector.multi_reduction <add>, %36, %cst_22 [1] : vector<64x32xf32> to vector<64xf32>
    %38 = vector.shape_cast %37 : vector<64xf32> to vector<64x1xf32>
    %cst_23 = arith.constant 0.0322580636 : f32
    %39 = vector.broadcast %cst_23 : f32 to vector<64x1xf32>
    %40 = arith.mulf %38, %39 : vector<64x1xf32>
    %41 = vector.broadcast %28 : vector<1x32xf32> to vector<64x32xf32>
    %42 = arith.mulf %41, %35 : vector<64x32xf32>
    %43 = math.sqrt %40 : vector<64x1xf32>
    %cst_24 = arith.constant 9.99999997E-7 : f32
    %44 = vector.broadcast %cst_24 : f32 to vector<64x1xf32>
    %45 = arith.addf %43, %44 : vector<64x1xf32>
    %46 = vector.broadcast %45 : vector<64x1xf32> to vector<64x32xf32>
    %47 = arith.divf %42, %46 : vector<64x32xf32>
    %48 = vector.broadcast %29 : vector<1x32xf32> to vector<64x32xf32>
    %49 = arith.addf %47, %48 : vector<64x32xf32>
    %c0_25 = arith.constant 0 : index
    %c0_26 = arith.constant 0 : index
    %50 = vector.load %arg6[%c0_25, %c0_26] : memref<32x32xf32, #tpu.memory_space<vmem>>, vector<32x32xf32>
    %cst_27 = arith.constant dense<0.000000e+00> : vector<64x32xf32>
    %51 = tpu.matmul %27, %50, %cst_27 {dimension_numbers = #tpu.dot_dimension_numbers<[1], [0], [0], [1], [0, 0, 1, 1], [], []>} : vector<64x32xf32>, vector<32x32xf32>, vector<64x32xf32> -> vector<64x32xf32>
    %c0_28 = arith.constant 0 : index
    %c0_29 = arith.constant 0 : index
    %52 = vector.load %arg7[%c0_28, %c0_29] : memref<1x32xf32, #tpu.memory_space<vmem>>, vector<1x32xf32>
    %53 = vector.broadcast %52 : vector<1x32xf32> to vector<64x32xf32>
    %54 = arith.addf %51, %53 : vector<64x32xf32>
    %c0_30 = arith.constant 0 : index
    %c0_31 = arith.constant 0 : index
    %55 = vector.load %arg8[%c0_30, %c0_31] : memref<32x32xf32, #tpu.memory_space<vmem>>, vector<32x32xf32>
    %cst_32 = arith.constant dense<0.000000e+00> : vector<64x32xf32>
    %56 = tpu.matmul %49, %55, %cst_32 {dimension_numbers = #tpu.dot_dimension_numbers<[1], [0], [0], [1], [0, 0, 1, 1], [], []>} : vector<64x32xf32>, vector<32x32xf32>, vector<64x32xf32> -> vector<64x32xf32>
    %c0_33 = arith.constant 0 : index
    %c0_34 = arith.constant 0 : index
    %57 = vector.load %arg9[%c0_33, %c0_34] : memref<1x32xf32, #tpu.memory_space<vmem>>, vector<1x32xf32>
    %58 = vector.broadcast %57 : vector<1x32xf32> to vector<64x32xf32>
    %59 = arith.addf %56, %58 : vector<64x32xf32>
    %c0_35 = arith.constant 0 : index
    %c0_36 = arith.constant 0 : index
    %60 = vector.load %arg10[%c0_35, %c0_36] : memref<32x32xf32, #tpu.memory_space<vmem>>, vector<32x32xf32>
    %cst_37 = arith.constant dense<0.000000e+00> : vector<64x32xf32>
    %61 = tpu.matmul %49, %60, %cst_37 {dimension_numbers = #tpu.dot_dimension_numbers<[1], [0], [0], [1], [0, 0, 1, 1], [], []>} : vector<64x32xf32>, vector<32x32xf32>, vector<64x32xf32> -> vector<64x32xf32>
    %c0_38 = arith.constant 0 : index
    %c0_39 = arith.constant 0 : index
    %62 = vector.load %arg11[%c0_38, %c0_39] : memref<1x32xf32, #tpu.memory_space<vmem>>, vector<1x32xf32>
    %63 = vector.broadcast %62 : vector<1x32xf32> to vector<64x32xf32>
    %64 = arith.addf %61, %63 : vector<64x32xf32>
    %c0_40 = arith.constant 0 : index
    %c0_41 = arith.constant 0 : index
    %65 = vector.load %arg12[%c0_40, %c0_41] : memref<32x32xf32, #tpu.memory_space<vmem>>, vector<32x32xf32>
    %cst_42 = arith.constant 0.000000e+00 : f32
    %66 = vector.broadcast %cst_42 : f32 to vector<64x32xf32>
    %67 = vector.extract_strided_slice %54 {offsets = [0, 0], sizes = [64, 4], strides = [1, 1]} : vector<64x32xf32> to vector<64x4xf32>
    %68 = vector.extract_strided_slice %59 {offsets = [0, 0], sizes = [64, 4], strides = [1, 1]} : vector<64x32xf32> to vector<64x4xf32>
    %cst_43 = arith.constant dense<0.000000e+00> : vector<64x64xf32>
    %69 = tpu.matmul %67, %68, %cst_43 {dimension_numbers = #tpu.dot_dimension_numbers<[1], [1], [0], [0], [0, 0, 1, 0], [], []>} : vector<64x4xf32>, vector<64x4xf32>, vector<64x64xf32> -> vector<64x64xf32>
    %cst_44 = arith.constant 5.000000e-01 : f32
    %70 = vector.broadcast %cst_44 : f32 to vector<64x64xf32>
    %71 = arith.mulf %69, %70 : vector<64x64xf32>
    %cst_45 = arith.constant 0.000000e+00 : f32
    %72 = vector.broadcast %cst_45 : f32 to vector<64x64xf32>
    %73 = arith.cmpf oeq, %5, %72 : vector<64x64xf32>
    %cst_46 = arith.constant -1.000000e+09 : f32
    %74 = vector.broadcast %cst_46 : f32 to vector<64x64xf32>
    %75 = arith.select %73, %74, %71 : vector<64x64xi1>, vector<64x64xf32>
    %cst_47 = arith.constant dense<0xFF800000> : vector<64xf32>
    %76 = vector.multi_reduction <maximumf>, %75, %cst_47 [1] : vector<64x64xf32> to vector<64xf32>
    %77 = vector.shape_cast %76 : vector<64xf32> to vector<64x1xf32>
    %78 = vector.broadcast %77 : vector<64x1xf32> to vector<64x64xf32>
    %79 = arith.subf %75, %78 : vector<64x64xf32>
    %80 = math.exp %79 : vector<64x64xf32>
    %cst_48 = arith.constant dense<0.000000e+00> : vector<64xf32>
    %81 = vector.multi_reduction <add>, %80, %cst_48 [1] : vector<64x64xf32> to vector<64xf32>
    %82 = vector.shape_cast %81 : vector<64xf32> to vector<64x1xf32>
    %83 = vector.broadcast %82 : vector<64x1xf32> to vector<64x64xf32>
    %84 = arith.divf %80, %83 : vector<64x64xf32>
    %85 = vector.extract_strided_slice %64 {offsets = [0, 0], sizes = [64, 4], strides = [1, 1]} : vector<64x32xf32> to vector<64x4xf32>
    %cst_49 = arith.constant dense<0.000000e+00> : vector<64x4xf32>
    %86 = tpu.matmul %84, %85, %cst_49 {dimension_numbers = #tpu.dot_dimension_numbers<[1], [0], [0], [1], [0, 0, 1, 1], [], []>} : vector<64x64xf32>, vector<64x4xf32>, vector<64x4xf32> -> vector<64x4xf32>
    %87 = vector.extract_strided_slice %65 {offsets = [0, 0], sizes = [4, 32], strides = [1, 1]} : vector<32x32xf32> to vector<4x32xf32>
    %cst_50 = arith.constant dense<0.000000e+00> : vector<64x32xf32>
    %88 = tpu.matmul %86, %87, %cst_50 {dimension_numbers = #tpu.dot_dimension_numbers<[1], [0], [0], [1], [0, 0, 1, 1], [], []>} : vector<64x4xf32>, vector<4x32xf32>, vector<64x32xf32> -> vector<64x32xf32>
    %89 = arith.addf %66, %88 : vector<64x32xf32>
    %90 = vector.extract_strided_slice %54 {offsets = [0, 4], sizes = [64, 4], strides = [1, 1]} : vector<64x32xf32> to vector<64x4xf32>
    %91 = vector.extract_strided_slice %59 {offsets = [0, 4], sizes = [64, 4], strides = [1, 1]} : vector<64x32xf32> to vector<64x4xf32>
    %cst_51 = arith.constant dense<0.000000e+00> : vector<64x64xf32>
    %92 = tpu.matmul %90, %91, %cst_51 {dimension_numbers = #tpu.dot_dimension_numbers<[1], [1], [0], [0], [0, 0, 1, 0], [], []>} : vector<64x4xf32>, vector<64x4xf32>, vector<64x64xf32> -> vector<64x64xf32>
    %cst_52 = arith.constant 5.000000e-01 : f32
    %93 = vector.broadcast %cst_52 : f32 to vector<64x64xf32>
    %94 = arith.mulf %92, %93 : vector<64x64xf32>
    %cst_53 = arith.constant 0.000000e+00 : f32
    %95 = vector.broadcast %cst_53 : f32 to vector<64x64xf32>
    %96 = arith.cmpf oeq, %5, %95 : vector<64x64xf32>
    %cst_54 = arith.constant -1.000000e+09 : f32
    %97 = vector.broadcast %cst_54 : f32 to vector<64x64xf32>
    %98 = arith.select %96, %97, %94 : vector<64x64xi1>, vector<64x64xf32>
    %cst_55 = arith.constant dense<0xFF800000> : vector<64xf32>
    %99 = vector.multi_reduction <maximumf>, %98, %cst_55 [1] : vector<64x64xf32> to vector<64xf32>
    %100 = vector.shape_cast %99 : vector<64xf32> to vector<64x1xf32>
    %101 = vector.broadcast %100 : vector<64x1xf32> to vector<64x64xf32>
    %102 = arith.subf %98, %101 : vector<64x64xf32>
    %103 = math.exp %102 : vector<64x64xf32>
    %cst_56 = arith.constant dense<0.000000e+00> : vector<64xf32>
    %104 = vector.multi_reduction <add>, %103, %cst_56 [1] : vector<64x64xf32> to vector<64xf32>
    %105 = vector.shape_cast %104 : vector<64xf32> to vector<64x1xf32>
    %106 = vector.broadcast %105 : vector<64x1xf32> to vector<64x64xf32>
    %107 = arith.divf %103, %106 : vector<64x64xf32>
    %108 = vector.extract_strided_slice %64 {offsets = [0, 4], sizes = [64, 4], strides = [1, 1]} : vector<64x32xf32> to vector<64x4xf32>
    %cst_57 = arith.constant dense<0.000000e+00> : vector<64x4xf32>
    %109 = tpu.matmul %107, %108, %cst_57 {dimension_numbers = #tpu.dot_dimension_numbers<[1], [0], [0], [1], [0, 0, 1, 1], [], []>} : vector<64x64xf32>, vector<64x4xf32>, vector<64x4xf32> -> vector<64x4xf32>
    %110 = vector.extract_strided_slice %65 {offsets = [4, 0], sizes = [4, 32], strides = [1, 1]} : vector<32x32xf32> to vector<4x32xf32>
    %cst_58 = arith.constant dense<0.000000e+00> : vector<64x32xf32>
    %111 = tpu.matmul %109, %110, %cst_58 {dimension_numbers = #tpu.dot_dimension_numbers<[1], [0], [0], [1], [0, 0, 1, 1], [], []>} : vector<64x4xf32>, vector<4x32xf32>, vector<64x32xf32> -> vector<64x32xf32>
    %112 = arith.addf %89, %111 : vector<64x32xf32>
    %113 = vector.extract_strided_slice %54 {offsets = [0, 8], sizes = [64, 4], strides = [1, 1]} : vector<64x32xf32> to vector<64x4xf32>
    %114 = vector.extract_strided_slice %59 {offsets = [0, 8], sizes = [64, 4], strides = [1, 1]} : vector<64x32xf32> to vector<64x4xf32>
    %cst_59 = arith.constant dense<0.000000e+00> : vector<64x64xf32>
    %115 = tpu.matmul %113, %114, %cst_59 {dimension_numbers = #tpu.dot_dimension_numbers<[1], [1], [0], [0], [0, 0, 1, 0], [], []>} : vector<64x4xf32>, vector<64x4xf32>, vector<64x64xf32> -> vector<64x64xf32>
    %cst_60 = arith.constant 5.000000e-01 : f32
    %116 = vector.broadcast %cst_60 : f32 to vector<64x64xf32>
    %117 = arith.mulf %115, %116 : vector<64x64xf32>
    %cst_61 = arith.constant 0.000000e+00 : f32
    %118 = vector.broadcast %cst_61 : f32 to vector<64x64xf32>
    %119 = arith.cmpf oeq, %5, %118 : vector<64x64xf32>
    %cst_62 = arith.constant -1.000000e+09 : f32
    %120 = vector.broadcast %cst_62 : f32 to vector<64x64xf32>
    %121 = arith.select %119, %120, %117 : vector<64x64xi1>, vector<64x64xf32>
    %cst_63 = arith.constant dense<0xFF800000> : vector<64xf32>
    %122 = vector.multi_reduction <maximumf>, %121, %cst_63 [1] : vector<64x64xf32> to vector<64xf32>
    %123 = vector.shape_cast %122 : vector<64xf32> to vector<64x1xf32>
    %124 = vector.broadcast %123 : vector<64x1xf32> to vector<64x64xf32>
    %125 = arith.subf %121, %124 : vector<64x64xf32>
    %126 = math.exp %125 : vector<64x64xf32>
    %cst_64 = arith.constant dense<0.000000e+00> : vector<64xf32>
    %127 = vector.multi_reduction <add>, %126, %cst_64 [1] : vector<64x64xf32> to vector<64xf32>
    %128 = vector.shape_cast %127 : vector<64xf32> to vector<64x1xf32>
    %129 = vector.broadcast %128 : vector<64x1xf32> to vector<64x64xf32>
    %130 = arith.divf %126, %129 : vector<64x64xf32>
    %131 = vector.extract_strided_slice %64 {offsets = [0, 8], sizes = [64, 4], strides = [1, 1]} : vector<64x32xf32> to vector<64x4xf32>
    %cst_65 = arith.constant dense<0.000000e+00> : vector<64x4xf32>
    %132 = tpu.matmul %130, %131, %cst_65 {dimension_numbers = #tpu.dot_dimension_numbers<[1], [0], [0], [1], [0, 0, 1, 1], [], []>} : vector<64x64xf32>, vector<64x4xf32>, vector<64x4xf32> -> vector<64x4xf32>
    %133 = vector.extract_strided_slice %65 {offsets = [8, 0], sizes = [4, 32], strides = [1, 1]} : vector<32x32xf32> to vector<4x32xf32>
    %cst_66 = arith.constant dense<0.000000e+00> : vector<64x32xf32>
    %134 = tpu.matmul %132, %133, %cst_66 {dimension_numbers = #tpu.dot_dimension_numbers<[1], [0], [0], [1], [0, 0, 1, 1], [], []>} : vector<64x4xf32>, vector<4x32xf32>, vector<64x32xf32> -> vector<64x32xf32>
    %135 = arith.addf %112, %134 : vector<64x32xf32>
    %136 = vector.extract_strided_slice %54 {offsets = [0, 12], sizes = [64, 4], strides = [1, 1]} : vector<64x32xf32> to vector<64x4xf32>
    %137 = vector.extract_strided_slice %59 {offsets = [0, 12], sizes = [64, 4], strides = [1, 1]} : vector<64x32xf32> to vector<64x4xf32>
    %cst_67 = arith.constant dense<0.000000e+00> : vector<64x64xf32>
    %138 = tpu.matmul %136, %137, %cst_67 {dimension_numbers = #tpu.dot_dimension_numbers<[1], [1], [0], [0], [0, 0, 1, 0], [], []>} : vector<64x4xf32>, vector<64x4xf32>, vector<64x64xf32> -> vector<64x64xf32>
    %cst_68 = arith.constant 5.000000e-01 : f32
    %139 = vector.broadcast %cst_68 : f32 to vector<64x64xf32>
    %140 = arith.mulf %138, %139 : vector<64x64xf32>
    %cst_69 = arith.constant 0.000000e+00 : f32
    %141 = vector.broadcast %cst_69 : f32 to vector<64x64xf32>
    %142 = arith.cmpf oeq, %5, %141 : vector<64x64xf32>
    %cst_70 = arith.constant -1.000000e+09 : f32
    %143 = vector.broadcast %cst_70 : f32 to vector<64x64xf32>
    %144 = arith.select %142, %143, %140 : vector<64x64xi1>, vector<64x64xf32>
    %cst_71 = arith.constant dense<0xFF800000> : vector<64xf32>
    %145 = vector.multi_reduction <maximumf>, %144, %cst_71 [1] : vector<64x64xf32> to vector<64xf32>
    %146 = vector.shape_cast %145 : vector<64xf32> to vector<64x1xf32>
    %147 = vector.broadcast %146 : vector<64x1xf32> to vector<64x64xf32>
    %148 = arith.subf %144, %147 : vector<64x64xf32>
    %149 = math.exp %148 : vector<64x64xf32>
    %cst_72 = arith.constant dense<0.000000e+00> : vector<64xf32>
    %150 = vector.multi_reduction <add>, %149, %cst_72 [1] : vector<64x64xf32> to vector<64xf32>
    %151 = vector.shape_cast %150 : vector<64xf32> to vector<64x1xf32>
    %152 = vector.broadcast %151 : vector<64x1xf32> to vector<64x64xf32>
    %153 = arith.divf %149, %152 : vector<64x64xf32>
    %154 = vector.extract_strided_slice %64 {offsets = [0, 12], sizes = [64, 4], strides = [1, 1]} : vector<64x32xf32> to vector<64x4xf32>
    %cst_73 = arith.constant dense<0.000000e+00> : vector<64x4xf32>
    %155 = tpu.matmul %153, %154, %cst_73 {dimension_numbers = #tpu.dot_dimension_numbers<[1], [0], [0], [1], [0, 0, 1, 1], [], []>} : vector<64x64xf32>, vector<64x4xf32>, vector<64x4xf32> -> vector<64x4xf32>
    %156 = vector.extract_strided_slice %65 {offsets = [12, 0], sizes = [4, 32], strides = [1, 1]} : vector<32x32xf32> to vector<4x32xf32>
    %cst_74 = arith.constant dense<0.000000e+00> : vector<64x32xf32>
    %157 = tpu.matmul %155, %156, %cst_74 {dimension_numbers = #tpu.dot_dimension_numbers<[1], [0], [0], [1], [0, 0, 1, 1], [], []>} : vector<64x4xf32>, vector<4x32xf32>, vector<64x32xf32> -> vector<64x32xf32>
    %158 = arith.addf %135, %157 : vector<64x32xf32>
    %159 = vector.extract_strided_slice %54 {offsets = [0, 16], sizes = [64, 4], strides = [1, 1]} : vector<64x32xf32> to vector<64x4xf32>
    %160 = vector.extract_strided_slice %59 {offsets = [0, 16], sizes = [64, 4], strides = [1, 1]} : vector<64x32xf32> to vector<64x4xf32>
    %cst_75 = arith.constant dense<0.000000e+00> : vector<64x64xf32>
    %161 = tpu.matmul %159, %160, %cst_75 {dimension_numbers = #tpu.dot_dimension_numbers<[1], [1], [0], [0], [0, 0, 1, 0], [], []>} : vector<64x4xf32>, vector<64x4xf32>, vector<64x64xf32> -> vector<64x64xf32>
    %cst_76 = arith.constant 5.000000e-01 : f32
    %162 = vector.broadcast %cst_76 : f32 to vector<64x64xf32>
    %163 = arith.mulf %161, %162 : vector<64x64xf32>
    %cst_77 = arith.constant 0.000000e+00 : f32
    %164 = vector.broadcast %cst_77 : f32 to vector<64x64xf32>
    %165 = arith.cmpf oeq, %5, %164 : vector<64x64xf32>
    %cst_78 = arith.constant -1.000000e+09 : f32
    %166 = vector.broadcast %cst_78 : f32 to vector<64x64xf32>
    %167 = arith.select %165, %166, %163 : vector<64x64xi1>, vector<64x64xf32>
    %cst_79 = arith.constant dense<0xFF800000> : vector<64xf32>
    %168 = vector.multi_reduction <maximumf>, %167, %cst_79 [1] : vector<64x64xf32> to vector<64xf32>
    %169 = vector.shape_cast %168 : vector<64xf32> to vector<64x1xf32>
    %170 = vector.broadcast %169 : vector<64x1xf32> to vector<64x64xf32>
    %171 = arith.subf %167, %170 : vector<64x64xf32>
    %172 = math.exp %171 : vector<64x64xf32>
    %cst_80 = arith.constant dense<0.000000e+00> : vector<64xf32>
    %173 = vector.multi_reduction <add>, %172, %cst_80 [1] : vector<64x64xf32> to vector<64xf32>
    %174 = vector.shape_cast %173 : vector<64xf32> to vector<64x1xf32>
    %175 = vector.broadcast %174 : vector<64x1xf32> to vector<64x64xf32>
    %176 = arith.divf %172, %175 : vector<64x64xf32>
    %177 = vector.extract_strided_slice %64 {offsets = [0, 16], sizes = [64, 4], strides = [1, 1]} : vector<64x32xf32> to vector<64x4xf32>
    %cst_81 = arith.constant dense<0.000000e+00> : vector<64x4xf32>
    %178 = tpu.matmul %176, %177, %cst_81 {dimension_numbers = #tpu.dot_dimension_numbers<[1], [0], [0], [1], [0, 0, 1, 1], [], []>} : vector<64x64xf32>, vector<64x4xf32>, vector<64x4xf32> -> vector<64x4xf32>
    %179 = vector.extract_strided_slice %65 {offsets = [16, 0], sizes = [4, 32], strides = [1, 1]} : vector<32x32xf32> to vector<4x32xf32>
    %cst_82 = arith.constant dense<0.000000e+00> : vector<64x32xf32>
    %180 = tpu.matmul %178, %179, %cst_82 {dimension_numbers = #tpu.dot_dimension_numbers<[1], [0], [0], [1], [0, 0, 1, 1], [], []>} : vector<64x4xf32>, vector<4x32xf32>, vector<64x32xf32> -> vector<64x32xf32>
    %181 = arith.addf %158, %180 : vector<64x32xf32>
    %182 = vector.extract_strided_slice %54 {offsets = [0, 20], sizes = [64, 4], strides = [1, 1]} : vector<64x32xf32> to vector<64x4xf32>
    %183 = vector.extract_strided_slice %59 {offsets = [0, 20], sizes = [64, 4], strides = [1, 1]} : vector<64x32xf32> to vector<64x4xf32>
    %cst_83 = arith.constant dense<0.000000e+00> : vector<64x64xf32>
    %184 = tpu.matmul %182, %183, %cst_83 {dimension_numbers = #tpu.dot_dimension_numbers<[1], [1], [0], [0], [0, 0, 1, 0], [], []>} : vector<64x4xf32>, vector<64x4xf32>, vector<64x64xf32> -> vector<64x64xf32>
    %cst_84 = arith.constant 5.000000e-01 : f32
    %185 = vector.broadcast %cst_84 : f32 to vector<64x64xf32>
    %186 = arith.mulf %184, %185 : vector<64x64xf32>
    %cst_85 = arith.constant 0.000000e+00 : f32
    %187 = vector.broadcast %cst_85 : f32 to vector<64x64xf32>
    %188 = arith.cmpf oeq, %5, %187 : vector<64x64xf32>
    %cst_86 = arith.constant -1.000000e+09 : f32
    %189 = vector.broadcast %cst_86 : f32 to vector<64x64xf32>
    %190 = arith.select %188, %189, %186 : vector<64x64xi1>, vector<64x64xf32>
    %cst_87 = arith.constant dense<0xFF800000> : vector<64xf32>
    %191 = vector.multi_reduction <maximumf>, %190, %cst_87 [1] : vector<64x64xf32> to vector<64xf32>
    %192 = vector.shape_cast %191 : vector<64xf32> to vector<64x1xf32>
    %193 = vector.broadcast %192 : vector<64x1xf32> to vector<64x64xf32>
    %194 = arith.subf %190, %193 : vector<64x64xf32>
    %195 = math.exp %194 : vector<64x64xf32>
    %cst_88 = arith.constant dense<0.000000e+00> : vector<64xf32>
    %196 = vector.multi_reduction <add>, %195, %cst_88 [1] : vector<64x64xf32> to vector<64xf32>
    %197 = vector.shape_cast %196 : vector<64xf32> to vector<64x1xf32>
    %198 = vector.broadcast %197 : vector<64x1xf32> to vector<64x64xf32>
    %199 = arith.divf %195, %198 : vector<64x64xf32>
    %200 = vector.extract_strided_slice %64 {offsets = [0, 20], sizes = [64, 4], strides = [1, 1]} : vector<64x32xf32> to vector<64x4xf32>
    %cst_89 = arith.constant dense<0.000000e+00> : vector<64x4xf32>
    %201 = tpu.matmul %199, %200, %cst_89 {dimension_numbers = #tpu.dot_dimension_numbers<[1], [0], [0], [1], [0, 0, 1, 1], [], []>} : vector<64x64xf32>, vector<64x4xf32>, vector<64x4xf32> -> vector<64x4xf32>
    %202 = vector.extract_strided_slice %65 {offsets = [20, 0], sizes = [4, 32], strides = [1, 1]} : vector<32x32xf32> to vector<4x32xf32>
    %cst_90 = arith.constant dense<0.000000e+00> : vector<64x32xf32>
    %203 = tpu.matmul %201, %202, %cst_90 {dimension_numbers = #tpu.dot_dimension_numbers<[1], [0], [0], [1], [0, 0, 1, 1], [], []>} : vector<64x4xf32>, vector<4x32xf32>, vector<64x32xf32> -> vector<64x32xf32>
    %204 = arith.addf %181, %203 : vector<64x32xf32>
    %205 = vector.extract_strided_slice %54 {offsets = [0, 24], sizes = [64, 4], strides = [1, 1]} : vector<64x32xf32> to vector<64x4xf32>
    %206 = vector.extract_strided_slice %59 {offsets = [0, 24], sizes = [64, 4], strides = [1, 1]} : vector<64x32xf32> to vector<64x4xf32>
    %cst_91 = arith.constant dense<0.000000e+00> : vector<64x64xf32>
    %207 = tpu.matmul %205, %206, %cst_91 {dimension_numbers = #tpu.dot_dimension_numbers<[1], [1], [0], [0], [0, 0, 1, 0], [], []>} : vector<64x4xf32>, vector<64x4xf32>, vector<64x64xf32> -> vector<64x64xf32>
    %cst_92 = arith.constant 5.000000e-01 : f32
    %208 = vector.broadcast %cst_92 : f32 to vector<64x64xf32>
    %209 = arith.mulf %207, %208 : vector<64x64xf32>
    %cst_93 = arith.constant 0.000000e+00 : f32
    %210 = vector.broadcast %cst_93 : f32 to vector<64x64xf32>
    %211 = arith.cmpf oeq, %5, %210 : vector<64x64xf32>
    %cst_94 = arith.constant -1.000000e+09 : f32
    %212 = vector.broadcast %cst_94 : f32 to vector<64x64xf32>
    %213 = arith.select %211, %212, %209 : vector<64x64xi1>, vector<64x64xf32>
    %cst_95 = arith.constant dense<0xFF800000> : vector<64xf32>
    %214 = vector.multi_reduction <maximumf>, %213, %cst_95 [1] : vector<64x64xf32> to vector<64xf32>
    %215 = vector.shape_cast %214 : vector<64xf32> to vector<64x1xf32>
    %216 = vector.broadcast %215 : vector<64x1xf32> to vector<64x64xf32>
    %217 = arith.subf %213, %216 : vector<64x64xf32>
    %218 = math.exp %217 : vector<64x64xf32>
    %cst_96 = arith.constant dense<0.000000e+00> : vector<64xf32>
    %219 = vector.multi_reduction <add>, %218, %cst_96 [1] : vector<64x64xf32> to vector<64xf32>
    %220 = vector.shape_cast %219 : vector<64xf32> to vector<64x1xf32>
    %221 = vector.broadcast %220 : vector<64x1xf32> to vector<64x64xf32>
    %222 = arith.divf %218, %221 : vector<64x64xf32>
    %223 = vector.extract_strided_slice %64 {offsets = [0, 24], sizes = [64, 4], strides = [1, 1]} : vector<64x32xf32> to vector<64x4xf32>
    %cst_97 = arith.constant dense<0.000000e+00> : vector<64x4xf32>
    %224 = tpu.matmul %222, %223, %cst_97 {dimension_numbers = #tpu.dot_dimension_numbers<[1], [0], [0], [1], [0, 0, 1, 1], [], []>} : vector<64x64xf32>, vector<64x4xf32>, vector<64x4xf32> -> vector<64x4xf32>
    %225 = vector.extract_strided_slice %65 {offsets = [24, 0], sizes = [4, 32], strides = [1, 1]} : vector<32x32xf32> to vector<4x32xf32>
    %cst_98 = arith.constant dense<0.000000e+00> : vector<64x32xf32>
    %226 = tpu.matmul %224, %225, %cst_98 {dimension_numbers = #tpu.dot_dimension_numbers<[1], [0], [0], [1], [0, 0, 1, 1], [], []>} : vector<64x4xf32>, vector<4x32xf32>, vector<64x32xf32> -> vector<64x32xf32>
    %227 = arith.addf %204, %226 : vector<64x32xf32>
    %228 = vector.extract_strided_slice %54 {offsets = [0, 28], sizes = [64, 4], strides = [1, 1]} : vector<64x32xf32> to vector<64x4xf32>
    %229 = vector.extract_strided_slice %59 {offsets = [0, 28], sizes = [64, 4], strides = [1, 1]} : vector<64x32xf32> to vector<64x4xf32>
    %cst_99 = arith.constant dense<0.000000e+00> : vector<64x64xf32>
    %230 = tpu.matmul %228, %229, %cst_99 {dimension_numbers = #tpu.dot_dimension_numbers<[1], [1], [0], [0], [0, 0, 1, 0], [], []>} : vector<64x4xf32>, vector<64x4xf32>, vector<64x64xf32> -> vector<64x64xf32>
    %cst_100 = arith.constant 5.000000e-01 : f32
    %231 = vector.broadcast %cst_100 : f32 to vector<64x64xf32>
    %232 = arith.mulf %230, %231 : vector<64x64xf32>
    %cst_101 = arith.constant 0.000000e+00 : f32
    %233 = vector.broadcast %cst_101 : f32 to vector<64x64xf32>
    %234 = arith.cmpf oeq, %5, %233 : vector<64x64xf32>
    %cst_102 = arith.constant -1.000000e+09 : f32
    %235 = vector.broadcast %cst_102 : f32 to vector<64x64xf32>
    %236 = arith.select %234, %235, %232 : vector<64x64xi1>, vector<64x64xf32>
    %cst_103 = arith.constant dense<0xFF800000> : vector<64xf32>
    %237 = vector.multi_reduction <maximumf>, %236, %cst_103 [1] : vector<64x64xf32> to vector<64xf32>
    %238 = vector.shape_cast %237 : vector<64xf32> to vector<64x1xf32>
    %239 = vector.broadcast %238 : vector<64x1xf32> to vector<64x64xf32>
    %240 = arith.subf %236, %239 : vector<64x64xf32>
    %241 = math.exp %240 : vector<64x64xf32>
    %cst_104 = arith.constant dense<0.000000e+00> : vector<64xf32>
    %242 = vector.multi_reduction <add>, %241, %cst_104 [1] : vector<64x64xf32> to vector<64xf32>
    %243 = vector.shape_cast %242 : vector<64xf32> to vector<64x1xf32>
    %244 = vector.broadcast %243 : vector<64x1xf32> to vector<64x64xf32>
    %245 = arith.divf %241, %244 : vector<64x64xf32>
    %246 = vector.extract_strided_slice %64 {offsets = [0, 28], sizes = [64, 4], strides = [1, 1]} : vector<64x32xf32> to vector<64x4xf32>
    %cst_105 = arith.constant dense<0.000000e+00> : vector<64x4xf32>
    %247 = tpu.matmul %245, %246, %cst_105 {dimension_numbers = #tpu.dot_dimension_numbers<[1], [0], [0], [1], [0, 0, 1, 1], [], []>} : vector<64x64xf32>, vector<64x4xf32>, vector<64x4xf32> -> vector<64x4xf32>
    %248 = vector.extract_strided_slice %65 {offsets = [28, 0], sizes = [4, 32], strides = [1, 1]} : vector<32x32xf32> to vector<4x32xf32>
    %cst_106 = arith.constant dense<0.000000e+00> : vector<64x32xf32>
    %249 = tpu.matmul %247, %248, %cst_106 {dimension_numbers = #tpu.dot_dimension_numbers<[1], [0], [0], [1], [0, 0, 1, 1], [], []>} : vector<64x4xf32>, vector<4x32xf32>, vector<64x32xf32> -> vector<64x32xf32>
    %250 = arith.addf %227, %249 : vector<64x32xf32>
    %251 = arith.addf %1, %250 : vector<64x32xf32>
    %c0_107 = arith.constant 0 : index
    %c0_108 = arith.constant 0 : index
    %252 = vector.load %arg13[%c0_107, %c0_108] : memref<1x32xf32, #tpu.memory_space<vmem>>, vector<1x32xf32>
    %253 = vector.broadcast %252 : vector<1x32xf32> to vector<64x32xf32>
    %254 = arith.addf %251, %253 : vector<64x32xf32>
    %c0_109 = arith.constant 0 : index
    %c0_110 = arith.constant 0 : index
    %c0_111 = arith.constant 0 : index
    %255 = vector.load %arg14[%c0_109, %c0_110, %c0_111] : memref<1x64x32xf32, #tpu.memory_space<vmem>>, vector<1x64x32xf32>
    %256 = vector.shape_cast %255 : vector<1x64x32xf32> to vector<64x32xf32>
    %257 = vector.shape_cast %254 : vector<64x32xf32> to vector<1x64x32xf32>
    tpu.vector_store %arg14[%c0_109, %c0_110, %c0_111], %257 {strides = array<i32>} : memref<1x64x32xf32, #tpu.memory_space<vmem>>, vector<1x64x32xf32>,
    return
  }
  func.func @transform_0(%arg0: i32) -> (i32, i32, i32) {
    %c0_i32 = arith.constant 0 : i32
    %c0_i32_0 = arith.constant 0 : i32
    %c0_i32_1 = arith.constant 0 : i32
    return %arg0, %c0_i32, %c0_i32_0 : i32, i32, i32
  }
  func.func @transform_1(%arg0: i32) -> (i32, i32, i32) {
    %c0_i32 = arith.constant 0 : i32
    %c0_i32_0 = arith.constant 0 : i32
    %c0_i32_1 = arith.constant 0 : i32
    return %arg0, %c0_i32, %c0_i32_0 : i32, i32, i32
  }
  func.func @transform_2(%arg0: i32) -> (i32, i32, i32) {
    %c0_i32 = arith.constant 0 : i32
    %c0_i32_0 = arith.constant 0 : i32
    %c0_i32_1 = arith.constant 0 : i32
    return %arg0, %c0_i32, %c0_i32_0 : i32, i32, i32
  }
  func.func @transform_3(%arg0: i32) -> (i32, i32) {
    %c0_i32 = arith.constant 0 : i32
    %c0_i32_0 = arith.constant 0 : i32
    %c0_i32_1 = arith.constant 0 : i32
    return %c0_i32, %c0_i32_0 : i32, i32
  }
  func.func @transform_4(%arg0: i32) -> (i32, i32) {
    %c0_i32 = arith.constant 0 : i32
    %c0_i32_0 = arith.constant 0 : i32
    %c0_i32_1 = arith.constant 0 : i32
    return %c0_i32, %c0_i32_0 : i32, i32
  }
  func.func @transform_5(%arg0: i32) -> (i32, i32) {
    %c0_i32 = arith.constant 0 : i32
    %c0_i32_0 = arith.constant 0 : i32
    %c0_i32_1 = arith.constant 0 : i32
    return %c0_i32, %c0_i32_0 : i32, i32
  }
  func.func @transform_6(%arg0: i32) -> (i32, i32) {
    %c0_i32 = arith.constant 0 : i32
    %c0_i32_0 = arith.constant 0 : i32
    %c0_i32_1 = arith.constant 0 : i32
    return %c0_i32, %c0_i32_0 : i32, i32
  }
  func.func @transform_7(%arg0: i32) -> (i32, i32) {
    %c0_i32 = arith.constant 0 : i32
    %c0_i32_0 = arith.constant 0 : i32
    %c0_i32_1 = arith.constant 0 : i32
    return %c0_i32, %c0_i32_0 : i32, i32
  }
  func.func @transform_8(%arg0: i32) -> (i32, i32) {
    %c0_i32 = arith.constant 0 : i32
    %c0_i32_0 = arith.constant 0 : i32
    %c0_i32_1 = arith.constant 0 : i32
    return %c0_i32, %c0_i32_0 : i32, i32
  }
  func.func @transform_9(%arg0: i32) -> (i32, i32) {
    %c0_i32 = arith.constant 0 : i32
    %c0_i32_0 = arith.constant 0 : i32
    %c0_i32_1 = arith.constant 0 : i32
    return %c0_i32, %c0_i32_0 : i32, i32
  }
  func.func @transform_10(%arg0: i32) -> (i32, i32) {
    %c0_i32 = arith.constant 0 : i32
    %c0_i32_0 = arith.constant 0 : i32
    %c0_i32_1 = arith.constant 0 : i32
    return %c0_i32, %c0_i32_0 : i32, i32
  }
  func.func @transform_11(%arg0: i32) -> (i32, i32) {
    %c0_i32 = arith.constant 0 : i32
    %c0_i32_0 = arith.constant 0 : i32
    %c0_i32_1 = arith.constant 0 : i32
    return %c0_i32, %c0_i32_0 : i32, i32
  }
  func.func @transform_12(%arg0: i32) -> (i32, i32) {
    %c0_i32 = arith.constant 0 : i32
    %c0_i32_0 = arith.constant 0 : i32
    %c0_i32_1 = arith.constant 0 : i32
    return %c0_i32, %c0_i32_0 : i32, i32
  }
  func.func @transform_13(%arg0: i32) -> (i32, i32, i32) {
    %c0_i32 = arith.constant 0 : i32
    %c0_i32_0 = arith.constant 0 : i32
    %c0_i32_1 = arith.constant 0 : i32
    return %arg0, %c0_i32, %c0_i32_0 : i32, i32, i32
  }
}

module attributes {stable_mosaic.version = 11 : i64} {
  func.func @_ffn_sublayer_kernel(%arg0: i32, %arg1: memref<128x32xf32, #tpu.memory_space<vmem>>, %arg2: memref<1x32xf32, #tpu.memory_space<vmem>>, %arg3: memref<1x32xf32, #tpu.memory_space<vmem>>, %arg4: memref<32x64xf32, #tpu.memory_space<vmem>>, %arg5: memref<1x64xf32, #tpu.memory_space<vmem>>, %arg6: memref<64x32xf32, #tpu.memory_space<vmem>>, %arg7: memref<1x32xf32, #tpu.memory_space<vmem>>, %arg8: memref<128x32xf32, #tpu.memory_space<vmem>>) attributes {dimension_semantics = [#tpu.dimension_semantics<parallel>], iteration_bounds = array<i64: 1>, scalar_prefetch = 0 : i64, scratch_operands = 0 : i64, tpu.core_type = #tpu.core_type<tc>, window_params = [{transform_indices = @transform_0, window_bounds = array<i64: 128, 32>}, {pipeline_mode = #tpu.pipeline_mode<synchronous>, transform_indices = @transform_1, window_bounds = array<i64: 1, 32>}, {pipeline_mode = #tpu.pipeline_mode<synchronous>, transform_indices = @transform_2, window_bounds = array<i64: 1, 32>}, {pipeline_mode = #tpu.pipeline_mode<synchronous>, transform_indices = @transform_3, window_bounds = array<i64: 32, 64>}, {pipeline_mode = #tpu.pipeline_mode<synchronous>, transform_indices = @transform_4, window_bounds = array<i64: 1, 64>}, {pipeline_mode = #tpu.pipeline_mode<synchronous>, transform_indices = @transform_5, window_bounds = array<i64: 64, 32>}, {pipeline_mode = #tpu.pipeline_mode<synchronous>, transform_indices = @transform_6, window_bounds = array<i64: 1, 32>}, {transform_indices = @transform_7, window_bounds = array<i64: 128, 32>}]} {
    %c0 = arith.constant 0 : index
    %c0_0 = arith.constant 0 : index
    %0 = vector.load %arg1[%c0, %c0_0] : memref<128x32xf32, #tpu.memory_space<vmem>>, vector<128x32xf32>
    %c0_1 = arith.constant 0 : index
    %c0_2 = arith.constant 0 : index
    %1 = vector.load %arg2[%c0_1, %c0_2] : memref<1x32xf32, #tpu.memory_space<vmem>>, vector<1x32xf32>
    %c0_3 = arith.constant 0 : index
    %c0_4 = arith.constant 0 : index
    %2 = vector.load %arg3[%c0_3, %c0_4] : memref<1x32xf32, #tpu.memory_space<vmem>>, vector<1x32xf32>
    %cst = arith.constant dense<0.000000e+00> : vector<128xf32>
    %3 = vector.multi_reduction <add>, %0, %cst [1] : vector<128x32xf32> to vector<128xf32>
    %4 = vector.shape_cast %3 : vector<128xf32> to vector<128x1xf32>
    %cst_5 = arith.constant 3.200000e+01 : f32
    %5 = vector.broadcast %cst_5 : f32 to vector<128x1xf32>
    %6 = arith.divf %4, %5 : vector<128x1xf32>
    %7 = vector.broadcast %6 : vector<128x1xf32> to vector<128x32xf32>
    %8 = arith.subf %0, %7 : vector<128x32xf32>
    %9 = arith.mulf %8, %8 : vector<128x32xf32>
    %cst_6 = arith.constant dense<0.000000e+00> : vector<128xf32>
    %10 = vector.multi_reduction <add>, %9, %cst_6 [1] : vector<128x32xf32> to vector<128xf32>
    %11 = vector.shape_cast %10 : vector<128xf32> to vector<128x1xf32>
    %cst_7 = arith.constant 0.0322580636 : f32
    %12 = vector.broadcast %cst_7 : f32 to vector<128x1xf32>
    %13 = arith.mulf %11, %12 : vector<128x1xf32>
    %14 = vector.broadcast %1 : vector<1x32xf32> to vector<128x32xf32>
    %15 = arith.mulf %14, %8 : vector<128x32xf32>
    %16 = math.sqrt %13 : vector<128x1xf32>
    %cst_8 = arith.constant 9.99999997E-7 : f32
    %17 = vector.broadcast %cst_8 : f32 to vector<128x1xf32>
    %18 = arith.addf %16, %17 : vector<128x1xf32>
    %19 = vector.broadcast %18 : vector<128x1xf32> to vector<128x32xf32>
    %20 = arith.divf %15, %19 : vector<128x32xf32>
    %21 = vector.broadcast %2 : vector<1x32xf32> to vector<128x32xf32>
    %22 = arith.addf %20, %21 : vector<128x32xf32>
    %c0_9 = arith.constant 0 : index
    %c0_10 = arith.constant 0 : index
    %23 = vector.load %arg4[%c0_9, %c0_10] : memref<32x64xf32, #tpu.memory_space<vmem>>, vector<32x64xf32>
    %cst_11 = arith.constant dense<0.000000e+00> : vector<128x64xf32>
    %24 = tpu.matmul %22, %23, %cst_11 {dimension_numbers = #tpu.dot_dimension_numbers<[1], [0], [0], [1], [0, 0, 1, 1], [], []>} : vector<128x32xf32>, vector<32x64xf32>, vector<128x64xf32> -> vector<128x64xf32>
    %c0_12 = arith.constant 0 : index
    %c0_13 = arith.constant 0 : index
    %25 = vector.load %arg5[%c0_12, %c0_13] : memref<1x64xf32, #tpu.memory_space<vmem>>, vector<1x64xf32>
    %26 = vector.broadcast %25 : vector<1x64xf32> to vector<128x64xf32>
    %27 = arith.addf %24, %26 : vector<128x64xf32>
    %cst_14 = arith.constant 0.000000e+00 : f32
    %28 = vector.broadcast %cst_14 : f32 to vector<128x64xf32>
    %29 = arith.maximumf %27, %28 : vector<128x64xf32>
    %c0_15 = arith.constant 0 : index
    %c0_16 = arith.constant 0 : index
    %30 = vector.load %arg6[%c0_15, %c0_16] : memref<64x32xf32, #tpu.memory_space<vmem>>, vector<64x32xf32>
    %cst_17 = arith.constant dense<0.000000e+00> : vector<128x32xf32>
    %31 = tpu.matmul %29, %30, %cst_17 {dimension_numbers = #tpu.dot_dimension_numbers<[1], [0], [0], [1], [0, 0, 1, 1], [], []>} : vector<128x64xf32>, vector<64x32xf32>, vector<128x32xf32> -> vector<128x32xf32>
    %32 = arith.addf %0, %31 : vector<128x32xf32>
    %c0_18 = arith.constant 0 : index
    %c0_19 = arith.constant 0 : index
    %33 = vector.load %arg7[%c0_18, %c0_19] : memref<1x32xf32, #tpu.memory_space<vmem>>, vector<1x32xf32>
    %34 = vector.broadcast %33 : vector<1x32xf32> to vector<128x32xf32>
    %35 = arith.addf %32, %34 : vector<128x32xf32>
    %c0_20 = arith.constant 0 : index
    %c0_21 = arith.constant 0 : index
    %36 = vector.load %arg8[%c0_20, %c0_21] : memref<128x32xf32, #tpu.memory_space<vmem>>, vector<128x32xf32>
    tpu.vector_store %arg8[%c0_20, %c0_21], %35 {strides = array<i32>} : memref<128x32xf32, #tpu.memory_space<vmem>>, vector<128x32xf32>,
    return
  }
  func.func @transform_0(%arg0: i32) -> (i32, i32) {
    %c0_i32 = arith.constant 0 : i32
    %c0_i32_0 = arith.constant 0 : i32
    return %arg0, %c0_i32 : i32, i32
  }
  func.func @transform_1(%arg0: i32) -> (i32, i32) {
    %c0_i32 = arith.constant 0 : i32
    %c0_i32_0 = arith.constant 0 : i32
    %c0_i32_1 = arith.constant 0 : i32
    return %c0_i32, %c0_i32_0 : i32, i32
  }
  func.func @transform_2(%arg0: i32) -> (i32, i32) {
    %c0_i32 = arith.constant 0 : i32
    %c0_i32_0 = arith.constant 0 : i32
    %c0_i32_1 = arith.constant 0 : i32
    return %c0_i32, %c0_i32_0 : i32, i32
  }
  func.func @transform_3(%arg0: i32) -> (i32, i32) {
    %c0_i32 = arith.constant 0 : i32
    %c0_i32_0 = arith.constant 0 : i32
    %c0_i32_1 = arith.constant 0 : i32
    return %c0_i32, %c0_i32_0 : i32, i32
  }
  func.func @transform_4(%arg0: i32) -> (i32, i32) {
    %c0_i32 = arith.constant 0 : i32
    %c0_i32_0 = arith.constant 0 : i32
    %c0_i32_1 = arith.constant 0 : i32
    return %c0_i32, %c0_i32_0 : i32, i32
  }
  func.func @transform_5(%arg0: i32) -> (i32, i32) {
    %c0_i32 = arith.constant 0 : i32
    %c0_i32_0 = arith.constant 0 : i32
    %c0_i32_1 = arith.constant 0 : i32
    return %c0_i32, %c0_i32_0 : i32, i32
  }
  func.func @transform_6(%arg0: i32) -> (i32, i32) {
    %c0_i32 = arith.constant 0 : i32
    %c0_i32_0 = arith.constant 0 : i32
    %c0_i32_1 = arith.constant 0 : i32
    return %c0_i32, %c0_i32_0 : i32, i32
  }
  func.func @transform_7(%arg0: i32) -> (i32, i32) {
    %c0_i32 = arith.constant 0 : i32
    %c0_i32_0 = arith.constant 0 : i32
    return %arg0, %c0_i32 : i32, i32
  }
}

module attributes {stable_mosaic.version = 11 : i64} {
  func.func @_ln_kernel(%arg0: i32, %arg1: memref<128x32xf32, #tpu.memory_space<vmem>>, %arg2: memref<1x32xf32, #tpu.memory_space<vmem>>, %arg3: memref<1x32xf32, #tpu.memory_space<vmem>>, %arg4: memref<128x32xf32, #tpu.memory_space<vmem>>) attributes {dimension_semantics = [#tpu.dimension_semantics<parallel>], iteration_bounds = array<i64: 1>, scalar_prefetch = 0 : i64, scratch_operands = 0 : i64, tpu.core_type = #tpu.core_type<tc>, window_params = [{transform_indices = @transform_0, window_bounds = array<i64: 128, 32>}, {pipeline_mode = #tpu.pipeline_mode<synchronous>, transform_indices = @transform_1, window_bounds = array<i64: 1, 32>}, {pipeline_mode = #tpu.pipeline_mode<synchronous>, transform_indices = @transform_2, window_bounds = array<i64: 1, 32>}, {transform_indices = @transform_3, window_bounds = array<i64: 128, 32>}]} {
    %c0 = arith.constant 0 : index
    %c0_0 = arith.constant 0 : index
    %0 = vector.load %arg1[%c0, %c0_0] : memref<128x32xf32, #tpu.memory_space<vmem>>, vector<128x32xf32>
    %c0_1 = arith.constant 0 : index
    %c0_2 = arith.constant 0 : index
    %1 = vector.load %arg2[%c0_1, %c0_2] : memref<1x32xf32, #tpu.memory_space<vmem>>, vector<1x32xf32>
    %c0_3 = arith.constant 0 : index
    %c0_4 = arith.constant 0 : index
    %2 = vector.load %arg3[%c0_3, %c0_4] : memref<1x32xf32, #tpu.memory_space<vmem>>, vector<1x32xf32>
    %cst = arith.constant dense<0.000000e+00> : vector<128xf32>
    %3 = vector.multi_reduction <add>, %0, %cst [1] : vector<128x32xf32> to vector<128xf32>
    %4 = vector.shape_cast %3 : vector<128xf32> to vector<128x1xf32>
    %cst_5 = arith.constant 3.200000e+01 : f32
    %5 = vector.broadcast %cst_5 : f32 to vector<128x1xf32>
    %6 = arith.divf %4, %5 : vector<128x1xf32>
    %7 = vector.broadcast %6 : vector<128x1xf32> to vector<128x32xf32>
    %8 = arith.subf %0, %7 : vector<128x32xf32>
    %9 = arith.mulf %8, %8 : vector<128x32xf32>
    %cst_6 = arith.constant dense<0.000000e+00> : vector<128xf32>
    %10 = vector.multi_reduction <add>, %9, %cst_6 [1] : vector<128x32xf32> to vector<128xf32>
    %11 = vector.shape_cast %10 : vector<128xf32> to vector<128x1xf32>
    %cst_7 = arith.constant 0.0322580636 : f32
    %12 = vector.broadcast %cst_7 : f32 to vector<128x1xf32>
    %13 = arith.mulf %11, %12 : vector<128x1xf32>
    %14 = vector.broadcast %1 : vector<1x32xf32> to vector<128x32xf32>
    %15 = arith.mulf %14, %8 : vector<128x32xf32>
    %16 = math.sqrt %13 : vector<128x1xf32>
    %cst_8 = arith.constant 9.99999997E-7 : f32
    %17 = vector.broadcast %cst_8 : f32 to vector<128x1xf32>
    %18 = arith.addf %16, %17 : vector<128x1xf32>
    %19 = vector.broadcast %18 : vector<128x1xf32> to vector<128x32xf32>
    %20 = arith.divf %15, %19 : vector<128x32xf32>
    %21 = vector.broadcast %2 : vector<1x32xf32> to vector<128x32xf32>
    %22 = arith.addf %20, %21 : vector<128x32xf32>
    %c0_9 = arith.constant 0 : index
    %c0_10 = arith.constant 0 : index
    %23 = vector.load %arg4[%c0_9, %c0_10] : memref<128x32xf32, #tpu.memory_space<vmem>>, vector<128x32xf32>
    tpu.vector_store %arg4[%c0_9, %c0_10], %22 {strides = array<i32>} : memref<128x32xf32, #tpu.memory_space<vmem>>, vector<128x32xf32>,
    return
  }
  func.func @transform_0(%arg0: i32) -> (i32, i32) {
    %c0_i32 = arith.constant 0 : i32
    %c0_i32_0 = arith.constant 0 : i32
    return %arg0, %c0_i32 : i32, i32
  }
  func.func @transform_1(%arg0: i32) -> (i32, i32) {
    %c0_i32 = arith.constant 0 : i32
    %c0_i32_0 = arith.constant 0 : i32
    %c0_i32_1 = arith.constant 0 : i32
    return %c0_i32, %c0_i32_0 : i32, i32
  }
  func.func @transform_2(%arg0: i32) -> (i32, i32) {
    %c0_i32 = arith.constant 0 : i32
    %c0_i32_0 = arith.constant 0 : i32
    %c0_i32_1 = arith.constant 0 : i32
    return %c0_i32, %c0_i32_0 : i32, i32
  }
  func.func @transform_3(%arg0: i32) -> (i32, i32) {
    %c0_i32 = arith.constant 0 : i32
    %c0_i32_0 = arith.constant 0 : i32
    return %arg0, %c0_i32 : i32, i32
  }
}

module attributes {stable_mosaic.version = 11 : i64} {
  func.func @_attn_sublayer_kernel(%arg0: i32, %arg1: memref<1x8x32xf32, #tpu.memory_space<vmem>>, %arg2: memref<1x8x32xf32, #tpu.memory_space<vmem>>, %arg3: memref<1x8x8xf32, #tpu.memory_space<vmem>>, %arg4: memref<1x32xf32, #tpu.memory_space<vmem>>, %arg5: memref<1x32xf32, #tpu.memory_space<vmem>>, %arg6: memref<32x32xf32, #tpu.memory_space<vmem>>, %arg7: memref<1x32xf32, #tpu.memory_space<vmem>>, %arg8: memref<32x32xf32, #tpu.memory_space<vmem>>, %arg9: memref<1x32xf32, #tpu.memory_space<vmem>>, %arg10: memref<32x32xf32, #tpu.memory_space<vmem>>, %arg11: memref<1x32xf32, #tpu.memory_space<vmem>>, %arg12: memref<32x32xf32, #tpu.memory_space<vmem>>, %arg13: memref<1x32xf32, #tpu.memory_space<vmem>>, %arg14: memref<1x8x32xf32, #tpu.memory_space<vmem>>) attributes {dimension_semantics = [#tpu.dimension_semantics<parallel>], iteration_bounds = array<i64: 2>, scalar_prefetch = 0 : i64, scratch_operands = 0 : i64, tpu.core_type = #tpu.core_type<tc>, window_params = [{transform_indices = @transform_0, window_bounds = array<i64: 1, 8, 32>}, {transform_indices = @transform_1, window_bounds = array<i64: 1, 8, 32>}, {transform_indices = @transform_2, window_bounds = array<i64: 1, 8, 8>}, {pipeline_mode = #tpu.pipeline_mode<synchronous>, transform_indices = @transform_3, window_bounds = array<i64: 1, 32>}, {pipeline_mode = #tpu.pipeline_mode<synchronous>, transform_indices = @transform_4, window_bounds = array<i64: 1, 32>}, {pipeline_mode = #tpu.pipeline_mode<synchronous>, transform_indices = @transform_5, window_bounds = array<i64: 32, 32>}, {pipeline_mode = #tpu.pipeline_mode<synchronous>, transform_indices = @transform_6, window_bounds = array<i64: 1, 32>}, {pipeline_mode = #tpu.pipeline_mode<synchronous>, transform_indices = @transform_7, window_bounds = array<i64: 32, 32>}, {pipeline_mode = #tpu.pipeline_mode<synchronous>, transform_indices = @transform_8, window_bounds = array<i64: 1, 32>}, {pipeline_mode = #tpu.pipeline_mode<synchronous>, transform_indices = @transform_9, window_bounds = array<i64: 32, 32>}, {pipeline_mode = #tpu.pipeline_mode<synchronous>, transform_indices = @transform_10, window_bounds = array<i64: 1, 32>}, {pipeline_mode = #tpu.pipeline_mode<synchronous>, transform_indices = @transform_11, window_bounds = array<i64: 32, 32>}, {pipeline_mode = #tpu.pipeline_mode<synchronous>, transform_indices = @transform_12, window_bounds = array<i64: 1, 32>}, {transform_indices = @transform_13, window_bounds = array<i64: 1, 8, 32>}]} {
    %c0 = arith.constant 0 : index
    %c0_0 = arith.constant 0 : index
    %c0_1 = arith.constant 0 : index
    %0 = vector.load %arg1[%c0, %c0_0, %c0_1] : memref<1x8x32xf32, #tpu.memory_space<vmem>>, vector<1x8x32xf32>
    %1 = vector.shape_cast %0 : vector<1x8x32xf32> to vector<8x32xf32>
    %c0_2 = arith.constant 0 : index
    %c0_3 = arith.constant 0 : index
    %c0_4 = arith.constant 0 : index
    %2 = vector.load %arg2[%c0_2, %c0_3, %c0_4] : memref<1x8x32xf32, #tpu.memory_space<vmem>>, vector<1x8x32xf32>
    %3 = vector.shape_cast %2 : vector<1x8x32xf32> to vector<8x32xf32>
    %c0_5 = arith.constant 0 : index
    %c0_6 = arith.constant 0 : index
    %c0_7 = arith.constant 0 : index
    %4 = vector.load %arg3[%c0_5, %c0_6, %c0_7] : memref<1x8x8xf32, #tpu.memory_space<vmem>>, vector<1x8x8xf32>
    %5 = vector.shape_cast %4 : vector<1x8x8xf32> to vector<8x8xf32>
    %c0_8 = arith.constant 0 : index
    %c0_9 = arith.constant 0 : index
    %6 = vector.load %arg4[%c0_8, %c0_9] : memref<1x32xf32, #tpu.memory_space<vmem>>, vector<1x32xf32>
    %c0_10 = arith.constant 0 : index
    %c0_11 = arith.constant 0 : index
    %7 = vector.load %arg5[%c0_10, %c0_11] : memref<1x32xf32, #tpu.memory_space<vmem>>, vector<1x32xf32>
    %cst = arith.constant dense<0.000000e+00> : vector<8xf32>
    %8 = vector.multi_reduction <add>, %1, %cst [1] : vector<8x32xf32> to vector<8xf32>
    %9 = vector.shape_cast %8 : vector<8xf32> to vector<8x1xf32>
    %cst_12 = arith.constant 3.200000e+01 : f32
    %10 = vector.broadcast %cst_12 : f32 to vector<8x1xf32>
    %11 = arith.divf %9, %10 : vector<8x1xf32>
    %12 = vector.broadcast %11 : vector<8x1xf32> to vector<8x32xf32>
    %13 = arith.subf %1, %12 : vector<8x32xf32>
    %14 = arith.mulf %13, %13 : vector<8x32xf32>
    %cst_13 = arith.constant dense<0.000000e+00> : vector<8xf32>
    %15 = vector.multi_reduction <add>, %14, %cst_13 [1] : vector<8x32xf32> to vector<8xf32>
    %16 = vector.shape_cast %15 : vector<8xf32> to vector<8x1xf32>
    %cst_14 = arith.constant 0.0322580636 : f32
    %17 = vector.broadcast %cst_14 : f32 to vector<8x1xf32>
    %18 = arith.mulf %16, %17 : vector<8x1xf32>
    %19 = vector.broadcast %6 : vector<1x32xf32> to vector<8x32xf32>
    %20 = arith.mulf %19, %13 : vector<8x32xf32>
    %21 = math.sqrt %18 : vector<8x1xf32>
    %cst_15 = arith.constant 9.99999997E-7 : f32
    %22 = vector.broadcast %cst_15 : f32 to vector<8x1xf32>
    %23 = arith.addf %21, %22 : vector<8x1xf32>
    %24 = vector.broadcast %23 : vector<8x1xf32> to vector<8x32xf32>
    %25 = arith.divf %20, %24 : vector<8x32xf32>
    %26 = vector.broadcast %7 : vector<1x32xf32> to vector<8x32xf32>
    %27 = arith.addf %25, %26 : vector<8x32xf32>
    %c0_16 = arith.constant 0 : index
    %c0_17 = arith.constant 0 : index
    %28 = vector.load %arg4[%c0_16, %c0_17] : memref<1x32xf32, #tpu.memory_space<vmem>>, vector<1x32xf32>
    %c0_18 = arith.constant 0 : index
    %c0_19 = arith.constant 0 : index
    %29 = vector.load %arg5[%c0_18, %c0_19] : memref<1x32xf32, #tpu.memory_space<vmem>>, vector<1x32xf32>
    %cst_20 = arith.constant dense<0.000000e+00> : vector<8xf32>
    %30 = vector.multi_reduction <add>, %3, %cst_20 [1] : vector<8x32xf32> to vector<8xf32>
    %31 = vector.shape_cast %30 : vector<8xf32> to vector<8x1xf32>
    %cst_21 = arith.constant 3.200000e+01 : f32
    %32 = vector.broadcast %cst_21 : f32 to vector<8x1xf32>
    %33 = arith.divf %31, %32 : vector<8x1xf32>
    %34 = vector.broadcast %33 : vector<8x1xf32> to vector<8x32xf32>
    %35 = arith.subf %3, %34 : vector<8x32xf32>
    %36 = arith.mulf %35, %35 : vector<8x32xf32>
    %cst_22 = arith.constant dense<0.000000e+00> : vector<8xf32>
    %37 = vector.multi_reduction <add>, %36, %cst_22 [1] : vector<8x32xf32> to vector<8xf32>
    %38 = vector.shape_cast %37 : vector<8xf32> to vector<8x1xf32>
    %cst_23 = arith.constant 0.0322580636 : f32
    %39 = vector.broadcast %cst_23 : f32 to vector<8x1xf32>
    %40 = arith.mulf %38, %39 : vector<8x1xf32>
    %41 = vector.broadcast %28 : vector<1x32xf32> to vector<8x32xf32>
    %42 = arith.mulf %41, %35 : vector<8x32xf32>
    %43 = math.sqrt %40 : vector<8x1xf32>
    %cst_24 = arith.constant 9.99999997E-7 : f32
    %44 = vector.broadcast %cst_24 : f32 to vector<8x1xf32>
    %45 = arith.addf %43, %44 : vector<8x1xf32>
    %46 = vector.broadcast %45 : vector<8x1xf32> to vector<8x32xf32>
    %47 = arith.divf %42, %46 : vector<8x32xf32>
    %48 = vector.broadcast %29 : vector<1x32xf32> to vector<8x32xf32>
    %49 = arith.addf %47, %48 : vector<8x32xf32>
    %c0_25 = arith.constant 0 : index
    %c0_26 = arith.constant 0 : index
    %50 = vector.load %arg6[%c0_25, %c0_26] : memref<32x32xf32, #tpu.memory_space<vmem>>, vector<32x32xf32>
    %cst_27 = arith.constant dense<0.000000e+00> : vector<8x32xf32>
    %51 = tpu.matmul %27, %50, %cst_27 {dimension_numbers = #tpu.dot_dimension_numbers<[1], [0], [0], [1], [0, 0, 1, 1], [], []>} : vector<8x32xf32>, vector<32x32xf32>, vector<8x32xf32> -> vector<8x32xf32>
    %c0_28 = arith.constant 0 : index
    %c0_29 = arith.constant 0 : index
    %52 = vector.load %arg7[%c0_28, %c0_29] : memref<1x32xf32, #tpu.memory_space<vmem>>, vector<1x32xf32>
    %53 = vector.broadcast %52 : vector<1x32xf32> to vector<8x32xf32>
    %54 = arith.addf %51, %53 : vector<8x32xf32>
    %c0_30 = arith.constant 0 : index
    %c0_31 = arith.constant 0 : index
    %55 = vector.load %arg8[%c0_30, %c0_31] : memref<32x32xf32, #tpu.memory_space<vmem>>, vector<32x32xf32>
    %cst_32 = arith.constant dense<0.000000e+00> : vector<8x32xf32>
    %56 = tpu.matmul %49, %55, %cst_32 {dimension_numbers = #tpu.dot_dimension_numbers<[1], [0], [0], [1], [0, 0, 1, 1], [], []>} : vector<8x32xf32>, vector<32x32xf32>, vector<8x32xf32> -> vector<8x32xf32>
    %c0_33 = arith.constant 0 : index
    %c0_34 = arith.constant 0 : index
    %57 = vector.load %arg9[%c0_33, %c0_34] : memref<1x32xf32, #tpu.memory_space<vmem>>, vector<1x32xf32>
    %58 = vector.broadcast %57 : vector<1x32xf32> to vector<8x32xf32>
    %59 = arith.addf %56, %58 : vector<8x32xf32>
    %c0_35 = arith.constant 0 : index
    %c0_36 = arith.constant 0 : index
    %60 = vector.load %arg10[%c0_35, %c0_36] : memref<32x32xf32, #tpu.memory_space<vmem>>, vector<32x32xf32>
    %cst_37 = arith.constant dense<0.000000e+00> : vector<8x32xf32>
    %61 = tpu.matmul %49, %60, %cst_37 {dimension_numbers = #tpu.dot_dimension_numbers<[1], [0], [0], [1], [0, 0, 1, 1], [], []>} : vector<8x32xf32>, vector<32x32xf32>, vector<8x32xf32> -> vector<8x32xf32>
    %c0_38 = arith.constant 0 : index
    %c0_39 = arith.constant 0 : index
    %62 = vector.load %arg11[%c0_38, %c0_39] : memref<1x32xf32, #tpu.memory_space<vmem>>, vector<1x32xf32>
    %63 = vector.broadcast %62 : vector<1x32xf32> to vector<8x32xf32>
    %64 = arith.addf %61, %63 : vector<8x32xf32>
    %c0_40 = arith.constant 0 : index
    %c0_41 = arith.constant 0 : index
    %65 = vector.load %arg12[%c0_40, %c0_41] : memref<32x32xf32, #tpu.memory_space<vmem>>, vector<32x32xf32>
    %cst_42 = arith.constant 0.000000e+00 : f32
    %66 = vector.broadcast %cst_42 : f32 to vector<8x32xf32>
    %67 = vector.extract_strided_slice %54 {offsets = [0, 0], sizes = [8, 4], strides = [1, 1]} : vector<8x32xf32> to vector<8x4xf32>
    %68 = vector.extract_strided_slice %59 {offsets = [0, 0], sizes = [8, 4], strides = [1, 1]} : vector<8x32xf32> to vector<8x4xf32>
    %cst_43 = arith.constant dense<0.000000e+00> : vector<8x8xf32>
    %69 = tpu.matmul %67, %68, %cst_43 {dimension_numbers = #tpu.dot_dimension_numbers<[1], [1], [0], [0], [0, 0, 1, 0], [], []>} : vector<8x4xf32>, vector<8x4xf32>, vector<8x8xf32> -> vector<8x8xf32>
    %cst_44 = arith.constant 5.000000e-01 : f32
    %70 = vector.broadcast %cst_44 : f32 to vector<8x8xf32>
    %71 = arith.mulf %69, %70 : vector<8x8xf32>
    %cst_45 = arith.constant 0.000000e+00 : f32
    %72 = vector.broadcast %cst_45 : f32 to vector<8x8xf32>
    %73 = arith.cmpf oeq, %5, %72 : vector<8x8xf32>
    %cst_46 = arith.constant -1.000000e+09 : f32
    %74 = vector.broadcast %cst_46 : f32 to vector<8x8xf32>
    %75 = arith.select %73, %74, %71 : vector<8x8xi1>, vector<8x8xf32>
    %cst_47 = arith.constant dense<0xFF800000> : vector<8xf32>
    %76 = vector.multi_reduction <maximumf>, %75, %cst_47 [1] : vector<8x8xf32> to vector<8xf32>
    %77 = vector.shape_cast %76 : vector<8xf32> to vector<8x1xf32>
    %78 = vector.broadcast %77 : vector<8x1xf32> to vector<8x8xf32>
    %79 = arith.subf %75, %78 : vector<8x8xf32>
    %80 = math.exp %79 : vector<8x8xf32>
    %cst_48 = arith.constant dense<0.000000e+00> : vector<8xf32>
    %81 = vector.multi_reduction <add>, %80, %cst_48 [1] : vector<8x8xf32> to vector<8xf32>
    %82 = vector.shape_cast %81 : vector<8xf32> to vector<8x1xf32>
    %83 = vector.broadcast %82 : vector<8x1xf32> to vector<8x8xf32>
    %84 = arith.divf %80, %83 : vector<8x8xf32>
    %85 = vector.extract_strided_slice %64 {offsets = [0, 0], sizes = [8, 4], strides = [1, 1]} : vector<8x32xf32> to vector<8x4xf32>
    %cst_49 = arith.constant dense<0.000000e+00> : vector<8x4xf32>
    %86 = tpu.matmul %84, %85, %cst_49 {dimension_numbers = #tpu.dot_dimension_numbers<[1], [0], [0], [1], [0, 0, 1, 1], [], []>} : vector<8x8xf32>, vector<8x4xf32>, vector<8x4xf32> -> vector<8x4xf32>
    %87 = vector.extract_strided_slice %65 {offsets = [0, 0], sizes = [4, 32], strides = [1, 1]} : vector<32x32xf32> to vector<4x32xf32>
    %cst_50 = arith.constant dense<0.000000e+00> : vector<8x32xf32>
    %88 = tpu.matmul %86, %87, %cst_50 {dimension_numbers = #tpu.dot_dimension_numbers<[1], [0], [0], [1], [0, 0, 1, 1], [], []>} : vector<8x4xf32>, vector<4x32xf32>, vector<8x32xf32> -> vector<8x32xf32>
    %89 = arith.addf %66, %88 : vector<8x32xf32>
    %90 = vector.extract_strided_slice %54 {offsets = [0, 4], sizes = [8, 4], strides = [1, 1]} : vector<8x32xf32> to vector<8x4xf32>
    %91 = vector.extract_strided_slice %59 {offsets = [0, 4], sizes = [8, 4], strides = [1, 1]} : vector<8x32xf32> to vector<8x4xf32>
    %cst_51 = arith.constant dense<0.000000e+00> : vector<8x8xf32>
    %92 = tpu.matmul %90, %91, %cst_51 {dimension_numbers = #tpu.dot_dimension_numbers<[1], [1], [0], [0], [0, 0, 1, 0], [], []>} : vector<8x4xf32>, vector<8x4xf32>, vector<8x8xf32> -> vector<8x8xf32>
    %cst_52 = arith.constant 5.000000e-01 : f32
    %93 = vector.broadcast %cst_52 : f32 to vector<8x8xf32>
    %94 = arith.mulf %92, %93 : vector<8x8xf32>
    %cst_53 = arith.constant 0.000000e+00 : f32
    %95 = vector.broadcast %cst_53 : f32 to vector<8x8xf32>
    %96 = arith.cmpf oeq, %5, %95 : vector<8x8xf32>
    %cst_54 = arith.constant -1.000000e+09 : f32
    %97 = vector.broadcast %cst_54 : f32 to vector<8x8xf32>
    %98 = arith.select %96, %97, %94 : vector<8x8xi1>, vector<8x8xf32>
    %cst_55 = arith.constant dense<0xFF800000> : vector<8xf32>
    %99 = vector.multi_reduction <maximumf>, %98, %cst_55 [1] : vector<8x8xf32> to vector<8xf32>
    %100 = vector.shape_cast %99 : vector<8xf32> to vector<8x1xf32>
    %101 = vector.broadcast %100 : vector<8x1xf32> to vector<8x8xf32>
    %102 = arith.subf %98, %101 : vector<8x8xf32>
    %103 = math.exp %102 : vector<8x8xf32>
    %cst_56 = arith.constant dense<0.000000e+00> : vector<8xf32>
    %104 = vector.multi_reduction <add>, %103, %cst_56 [1] : vector<8x8xf32> to vector<8xf32>
    %105 = vector.shape_cast %104 : vector<8xf32> to vector<8x1xf32>
    %106 = vector.broadcast %105 : vector<8x1xf32> to vector<8x8xf32>
    %107 = arith.divf %103, %106 : vector<8x8xf32>
    %108 = vector.extract_strided_slice %64 {offsets = [0, 4], sizes = [8, 4], strides = [1, 1]} : vector<8x32xf32> to vector<8x4xf32>
    %cst_57 = arith.constant dense<0.000000e+00> : vector<8x4xf32>
    %109 = tpu.matmul %107, %108, %cst_57 {dimension_numbers = #tpu.dot_dimension_numbers<[1], [0], [0], [1], [0, 0, 1, 1], [], []>} : vector<8x8xf32>, vector<8x4xf32>, vector<8x4xf32> -> vector<8x4xf32>
    %110 = vector.extract_strided_slice %65 {offsets = [4, 0], sizes = [4, 32], strides = [1, 1]} : vector<32x32xf32> to vector<4x32xf32>
    %cst_58 = arith.constant dense<0.000000e+00> : vector<8x32xf32>
    %111 = tpu.matmul %109, %110, %cst_58 {dimension_numbers = #tpu.dot_dimension_numbers<[1], [0], [0], [1], [0, 0, 1, 1], [], []>} : vector<8x4xf32>, vector<4x32xf32>, vector<8x32xf32> -> vector<8x32xf32>
    %112 = arith.addf %89, %111 : vector<8x32xf32>
    %113 = vector.extract_strided_slice %54 {offsets = [0, 8], sizes = [8, 4], strides = [1, 1]} : vector<8x32xf32> to vector<8x4xf32>
    %114 = vector.extract_strided_slice %59 {offsets = [0, 8], sizes = [8, 4], strides = [1, 1]} : vector<8x32xf32> to vector<8x4xf32>
    %cst_59 = arith.constant dense<0.000000e+00> : vector<8x8xf32>
    %115 = tpu.matmul %113, %114, %cst_59 {dimension_numbers = #tpu.dot_dimension_numbers<[1], [1], [0], [0], [0, 0, 1, 0], [], []>} : vector<8x4xf32>, vector<8x4xf32>, vector<8x8xf32> -> vector<8x8xf32>
    %cst_60 = arith.constant 5.000000e-01 : f32
    %116 = vector.broadcast %cst_60 : f32 to vector<8x8xf32>
    %117 = arith.mulf %115, %116 : vector<8x8xf32>
    %cst_61 = arith.constant 0.000000e+00 : f32
    %118 = vector.broadcast %cst_61 : f32 to vector<8x8xf32>
    %119 = arith.cmpf oeq, %5, %118 : vector<8x8xf32>
    %cst_62 = arith.constant -1.000000e+09 : f32
    %120 = vector.broadcast %cst_62 : f32 to vector<8x8xf32>
    %121 = arith.select %119, %120, %117 : vector<8x8xi1>, vector<8x8xf32>
    %cst_63 = arith.constant dense<0xFF800000> : vector<8xf32>
    %122 = vector.multi_reduction <maximumf>, %121, %cst_63 [1] : vector<8x8xf32> to vector<8xf32>
    %123 = vector.shape_cast %122 : vector<8xf32> to vector<8x1xf32>
    %124 = vector.broadcast %123 : vector<8x1xf32> to vector<8x8xf32>
    %125 = arith.subf %121, %124 : vector<8x8xf32>
    %126 = math.exp %125 : vector<8x8xf32>
    %cst_64 = arith.constant dense<0.000000e+00> : vector<8xf32>
    %127 = vector.multi_reduction <add>, %126, %cst_64 [1] : vector<8x8xf32> to vector<8xf32>
    %128 = vector.shape_cast %127 : vector<8xf32> to vector<8x1xf32>
    %129 = vector.broadcast %128 : vector<8x1xf32> to vector<8x8xf32>
    %130 = arith.divf %126, %129 : vector<8x8xf32>
    %131 = vector.extract_strided_slice %64 {offsets = [0, 8], sizes = [8, 4], strides = [1, 1]} : vector<8x32xf32> to vector<8x4xf32>
    %cst_65 = arith.constant dense<0.000000e+00> : vector<8x4xf32>
    %132 = tpu.matmul %130, %131, %cst_65 {dimension_numbers = #tpu.dot_dimension_numbers<[1], [0], [0], [1], [0, 0, 1, 1], [], []>} : vector<8x8xf32>, vector<8x4xf32>, vector<8x4xf32> -> vector<8x4xf32>
    %133 = vector.extract_strided_slice %65 {offsets = [8, 0], sizes = [4, 32], strides = [1, 1]} : vector<32x32xf32> to vector<4x32xf32>
    %cst_66 = arith.constant dense<0.000000e+00> : vector<8x32xf32>
    %134 = tpu.matmul %132, %133, %cst_66 {dimension_numbers = #tpu.dot_dimension_numbers<[1], [0], [0], [1], [0, 0, 1, 1], [], []>} : vector<8x4xf32>, vector<4x32xf32>, vector<8x32xf32> -> vector<8x32xf32>
    %135 = arith.addf %112, %134 : vector<8x32xf32>
    %136 = vector.extract_strided_slice %54 {offsets = [0, 12], sizes = [8, 4], strides = [1, 1]} : vector<8x32xf32> to vector<8x4xf32>
    %137 = vector.extract_strided_slice %59 {offsets = [0, 12], sizes = [8, 4], strides = [1, 1]} : vector<8x32xf32> to vector<8x4xf32>
    %cst_67 = arith.constant dense<0.000000e+00> : vector<8x8xf32>
    %138 = tpu.matmul %136, %137, %cst_67 {dimension_numbers = #tpu.dot_dimension_numbers<[1], [1], [0], [0], [0, 0, 1, 0], [], []>} : vector<8x4xf32>, vector<8x4xf32>, vector<8x8xf32> -> vector<8x8xf32>
    %cst_68 = arith.constant 5.000000e-01 : f32
    %139 = vector.broadcast %cst_68 : f32 to vector<8x8xf32>
    %140 = arith.mulf %138, %139 : vector<8x8xf32>
    %cst_69 = arith.constant 0.000000e+00 : f32
    %141 = vector.broadcast %cst_69 : f32 to vector<8x8xf32>
    %142 = arith.cmpf oeq, %5, %141 : vector<8x8xf32>
    %cst_70 = arith.constant -1.000000e+09 : f32
    %143 = vector.broadcast %cst_70 : f32 to vector<8x8xf32>
    %144 = arith.select %142, %143, %140 : vector<8x8xi1>, vector<8x8xf32>
    %cst_71 = arith.constant dense<0xFF800000> : vector<8xf32>
    %145 = vector.multi_reduction <maximumf>, %144, %cst_71 [1] : vector<8x8xf32> to vector<8xf32>
    %146 = vector.shape_cast %145 : vector<8xf32> to vector<8x1xf32>
    %147 = vector.broadcast %146 : vector<8x1xf32> to vector<8x8xf32>
    %148 = arith.subf %144, %147 : vector<8x8xf32>
    %149 = math.exp %148 : vector<8x8xf32>
    %cst_72 = arith.constant dense<0.000000e+00> : vector<8xf32>
    %150 = vector.multi_reduction <add>, %149, %cst_72 [1] : vector<8x8xf32> to vector<8xf32>
    %151 = vector.shape_cast %150 : vector<8xf32> to vector<8x1xf32>
    %152 = vector.broadcast %151 : vector<8x1xf32> to vector<8x8xf32>
    %153 = arith.divf %149, %152 : vector<8x8xf32>
    %154 = vector.extract_strided_slice %64 {offsets = [0, 12], sizes = [8, 4], strides = [1, 1]} : vector<8x32xf32> to vector<8x4xf32>
    %cst_73 = arith.constant dense<0.000000e+00> : vector<8x4xf32>
    %155 = tpu.matmul %153, %154, %cst_73 {dimension_numbers = #tpu.dot_dimension_numbers<[1], [0], [0], [1], [0, 0, 1, 1], [], []>} : vector<8x8xf32>, vector<8x4xf32>, vector<8x4xf32> -> vector<8x4xf32>
    %156 = vector.extract_strided_slice %65 {offsets = [12, 0], sizes = [4, 32], strides = [1, 1]} : vector<32x32xf32> to vector<4x32xf32>
    %cst_74 = arith.constant dense<0.000000e+00> : vector<8x32xf32>
    %157 = tpu.matmul %155, %156, %cst_74 {dimension_numbers = #tpu.dot_dimension_numbers<[1], [0], [0], [1], [0, 0, 1, 1], [], []>} : vector<8x4xf32>, vector<4x32xf32>, vector<8x32xf32> -> vector<8x32xf32>
    %158 = arith.addf %135, %157 : vector<8x32xf32>
    %159 = vector.extract_strided_slice %54 {offsets = [0, 16], sizes = [8, 4], strides = [1, 1]} : vector<8x32xf32> to vector<8x4xf32>
    %160 = vector.extract_strided_slice %59 {offsets = [0, 16], sizes = [8, 4], strides = [1, 1]} : vector<8x32xf32> to vector<8x4xf32>
    %cst_75 = arith.constant dense<0.000000e+00> : vector<8x8xf32>
    %161 = tpu.matmul %159, %160, %cst_75 {dimension_numbers = #tpu.dot_dimension_numbers<[1], [1], [0], [0], [0, 0, 1, 0], [], []>} : vector<8x4xf32>, vector<8x4xf32>, vector<8x8xf32> -> vector<8x8xf32>
    %cst_76 = arith.constant 5.000000e-01 : f32
    %162 = vector.broadcast %cst_76 : f32 to vector<8x8xf32>
    %163 = arith.mulf %161, %162 : vector<8x8xf32>
    %cst_77 = arith.constant 0.000000e+00 : f32
    %164 = vector.broadcast %cst_77 : f32 to vector<8x8xf32>
    %165 = arith.cmpf oeq, %5, %164 : vector<8x8xf32>
    %cst_78 = arith.constant -1.000000e+09 : f32
    %166 = vector.broadcast %cst_78 : f32 to vector<8x8xf32>
    %167 = arith.select %165, %166, %163 : vector<8x8xi1>, vector<8x8xf32>
    %cst_79 = arith.constant dense<0xFF800000> : vector<8xf32>
    %168 = vector.multi_reduction <maximumf>, %167, %cst_79 [1] : vector<8x8xf32> to vector<8xf32>
    %169 = vector.shape_cast %168 : vector<8xf32> to vector<8x1xf32>
    %170 = vector.broadcast %169 : vector<8x1xf32> to vector<8x8xf32>
    %171 = arith.subf %167, %170 : vector<8x8xf32>
    %172 = math.exp %171 : vector<8x8xf32>
    %cst_80 = arith.constant dense<0.000000e+00> : vector<8xf32>
    %173 = vector.multi_reduction <add>, %172, %cst_80 [1] : vector<8x8xf32> to vector<8xf32>
    %174 = vector.shape_cast %173 : vector<8xf32> to vector<8x1xf32>
    %175 = vector.broadcast %174 : vector<8x1xf32> to vector<8x8xf32>
    %176 = arith.divf %172, %175 : vector<8x8xf32>
    %177 = vector.extract_strided_slice %64 {offsets = [0, 16], sizes = [8, 4], strides = [1, 1]} : vector<8x32xf32> to vector<8x4xf32>
    %cst_81 = arith.constant dense<0.000000e+00> : vector<8x4xf32>
    %178 = tpu.matmul %176, %177, %cst_81 {dimension_numbers = #tpu.dot_dimension_numbers<[1], [0], [0], [1], [0, 0, 1, 1], [], []>} : vector<8x8xf32>, vector<8x4xf32>, vector<8x4xf32> -> vector<8x4xf32>
    %179 = vector.extract_strided_slice %65 {offsets = [16, 0], sizes = [4, 32], strides = [1, 1]} : vector<32x32xf32> to vector<4x32xf32>
    %cst_82 = arith.constant dense<0.000000e+00> : vector<8x32xf32>
    %180 = tpu.matmul %178, %179, %cst_82 {dimension_numbers = #tpu.dot_dimension_numbers<[1], [0], [0], [1], [0, 0, 1, 1], [], []>} : vector<8x4xf32>, vector<4x32xf32>, vector<8x32xf32> -> vector<8x32xf32>
    %181 = arith.addf %158, %180 : vector<8x32xf32>
    %182 = vector.extract_strided_slice %54 {offsets = [0, 20], sizes = [8, 4], strides = [1, 1]} : vector<8x32xf32> to vector<8x4xf32>
    %183 = vector.extract_strided_slice %59 {offsets = [0, 20], sizes = [8, 4], strides = [1, 1]} : vector<8x32xf32> to vector<8x4xf32>
    %cst_83 = arith.constant dense<0.000000e+00> : vector<8x8xf32>
    %184 = tpu.matmul %182, %183, %cst_83 {dimension_numbers = #tpu.dot_dimension_numbers<[1], [1], [0], [0], [0, 0, 1, 0], [], []>} : vector<8x4xf32>, vector<8x4xf32>, vector<8x8xf32> -> vector<8x8xf32>
    %cst_84 = arith.constant 5.000000e-01 : f32
    %185 = vector.broadcast %cst_84 : f32 to vector<8x8xf32>
    %186 = arith.mulf %184, %185 : vector<8x8xf32>
    %cst_85 = arith.constant 0.000000e+00 : f32
    %187 = vector.broadcast %cst_85 : f32 to vector<8x8xf32>
    %188 = arith.cmpf oeq, %5, %187 : vector<8x8xf32>
    %cst_86 = arith.constant -1.000000e+09 : f32
    %189 = vector.broadcast %cst_86 : f32 to vector<8x8xf32>
    %190 = arith.select %188, %189, %186 : vector<8x8xi1>, vector<8x8xf32>
    %cst_87 = arith.constant dense<0xFF800000> : vector<8xf32>
    %191 = vector.multi_reduction <maximumf>, %190, %cst_87 [1] : vector<8x8xf32> to vector<8xf32>
    %192 = vector.shape_cast %191 : vector<8xf32> to vector<8x1xf32>
    %193 = vector.broadcast %192 : vector<8x1xf32> to vector<8x8xf32>
    %194 = arith.subf %190, %193 : vector<8x8xf32>
    %195 = math.exp %194 : vector<8x8xf32>
    %cst_88 = arith.constant dense<0.000000e+00> : vector<8xf32>
    %196 = vector.multi_reduction <add>, %195, %cst_88 [1] : vector<8x8xf32> to vector<8xf32>
    %197 = vector.shape_cast %196 : vector<8xf32> to vector<8x1xf32>
    %198 = vector.broadcast %197 : vector<8x1xf32> to vector<8x8xf32>
    %199 = arith.divf %195, %198 : vector<8x8xf32>
    %200 = vector.extract_strided_slice %64 {offsets = [0, 20], sizes = [8, 4], strides = [1, 1]} : vector<8x32xf32> to vector<8x4xf32>
    %cst_89 = arith.constant dense<0.000000e+00> : vector<8x4xf32>
    %201 = tpu.matmul %199, %200, %cst_89 {dimension_numbers = #tpu.dot_dimension_numbers<[1], [0], [0], [1], [0, 0, 1, 1], [], []>} : vector<8x8xf32>, vector<8x4xf32>, vector<8x4xf32> -> vector<8x4xf32>
    %202 = vector.extract_strided_slice %65 {offsets = [20, 0], sizes = [4, 32], strides = [1, 1]} : vector<32x32xf32> to vector<4x32xf32>
    %cst_90 = arith.constant dense<0.000000e+00> : vector<8x32xf32>
    %203 = tpu.matmul %201, %202, %cst_90 {dimension_numbers = #tpu.dot_dimension_numbers<[1], [0], [0], [1], [0, 0, 1, 1], [], []>} : vector<8x4xf32>, vector<4x32xf32>, vector<8x32xf32> -> vector<8x32xf32>
    %204 = arith.addf %181, %203 : vector<8x32xf32>
    %205 = vector.extract_strided_slice %54 {offsets = [0, 24], sizes = [8, 4], strides = [1, 1]} : vector<8x32xf32> to vector<8x4xf32>
    %206 = vector.extract_strided_slice %59 {offsets = [0, 24], sizes = [8, 4], strides = [1, 1]} : vector<8x32xf32> to vector<8x4xf32>
    %cst_91 = arith.constant dense<0.000000e+00> : vector<8x8xf32>
    %207 = tpu.matmul %205, %206, %cst_91 {dimension_numbers = #tpu.dot_dimension_numbers<[1], [1], [0], [0], [0, 0, 1, 0], [], []>} : vector<8x4xf32>, vector<8x4xf32>, vector<8x8xf32> -> vector<8x8xf32>
    %cst_92 = arith.constant 5.000000e-01 : f32
    %208 = vector.broadcast %cst_92 : f32 to vector<8x8xf32>
    %209 = arith.mulf %207, %208 : vector<8x8xf32>
    %cst_93 = arith.constant 0.000000e+00 : f32
    %210 = vector.broadcast %cst_93 : f32 to vector<8x8xf32>
    %211 = arith.cmpf oeq, %5, %210 : vector<8x8xf32>
    %cst_94 = arith.constant -1.000000e+09 : f32
    %212 = vector.broadcast %cst_94 : f32 to vector<8x8xf32>
    %213 = arith.select %211, %212, %209 : vector<8x8xi1>, vector<8x8xf32>
    %cst_95 = arith.constant dense<0xFF800000> : vector<8xf32>
    %214 = vector.multi_reduction <maximumf>, %213, %cst_95 [1] : vector<8x8xf32> to vector<8xf32>
    %215 = vector.shape_cast %214 : vector<8xf32> to vector<8x1xf32>
    %216 = vector.broadcast %215 : vector<8x1xf32> to vector<8x8xf32>
    %217 = arith.subf %213, %216 : vector<8x8xf32>
    %218 = math.exp %217 : vector<8x8xf32>
    %cst_96 = arith.constant dense<0.000000e+00> : vector<8xf32>
    %219 = vector.multi_reduction <add>, %218, %cst_96 [1] : vector<8x8xf32> to vector<8xf32>
    %220 = vector.shape_cast %219 : vector<8xf32> to vector<8x1xf32>
    %221 = vector.broadcast %220 : vector<8x1xf32> to vector<8x8xf32>
    %222 = arith.divf %218, %221 : vector<8x8xf32>
    %223 = vector.extract_strided_slice %64 {offsets = [0, 24], sizes = [8, 4], strides = [1, 1]} : vector<8x32xf32> to vector<8x4xf32>
    %cst_97 = arith.constant dense<0.000000e+00> : vector<8x4xf32>
    %224 = tpu.matmul %222, %223, %cst_97 {dimension_numbers = #tpu.dot_dimension_numbers<[1], [0], [0], [1], [0, 0, 1, 1], [], []>} : vector<8x8xf32>, vector<8x4xf32>, vector<8x4xf32> -> vector<8x4xf32>
    %225 = vector.extract_strided_slice %65 {offsets = [24, 0], sizes = [4, 32], strides = [1, 1]} : vector<32x32xf32> to vector<4x32xf32>
    %cst_98 = arith.constant dense<0.000000e+00> : vector<8x32xf32>
    %226 = tpu.matmul %224, %225, %cst_98 {dimension_numbers = #tpu.dot_dimension_numbers<[1], [0], [0], [1], [0, 0, 1, 1], [], []>} : vector<8x4xf32>, vector<4x32xf32>, vector<8x32xf32> -> vector<8x32xf32>
    %227 = arith.addf %204, %226 : vector<8x32xf32>
    %228 = vector.extract_strided_slice %54 {offsets = [0, 28], sizes = [8, 4], strides = [1, 1]} : vector<8x32xf32> to vector<8x4xf32>
    %229 = vector.extract_strided_slice %59 {offsets = [0, 28], sizes = [8, 4], strides = [1, 1]} : vector<8x32xf32> to vector<8x4xf32>
    %cst_99 = arith.constant dense<0.000000e+00> : vector<8x8xf32>
    %230 = tpu.matmul %228, %229, %cst_99 {dimension_numbers = #tpu.dot_dimension_numbers<[1], [1], [0], [0], [0, 0, 1, 0], [], []>} : vector<8x4xf32>, vector<8x4xf32>, vector<8x8xf32> -> vector<8x8xf32>
    %cst_100 = arith.constant 5.000000e-01 : f32
    %231 = vector.broadcast %cst_100 : f32 to vector<8x8xf32>
    %232 = arith.mulf %230, %231 : vector<8x8xf32>
    %cst_101 = arith.constant 0.000000e+00 : f32
    %233 = vector.broadcast %cst_101 : f32 to vector<8x8xf32>
    %234 = arith.cmpf oeq, %5, %233 : vector<8x8xf32>
    %cst_102 = arith.constant -1.000000e+09 : f32
    %235 = vector.broadcast %cst_102 : f32 to vector<8x8xf32>
    %236 = arith.select %234, %235, %232 : vector<8x8xi1>, vector<8x8xf32>
    %cst_103 = arith.constant dense<0xFF800000> : vector<8xf32>
    %237 = vector.multi_reduction <maximumf>, %236, %cst_103 [1] : vector<8x8xf32> to vector<8xf32>
    %238 = vector.shape_cast %237 : vector<8xf32> to vector<8x1xf32>
    %239 = vector.broadcast %238 : vector<8x1xf32> to vector<8x8xf32>
    %240 = arith.subf %236, %239 : vector<8x8xf32>
    %241 = math.exp %240 : vector<8x8xf32>
    %cst_104 = arith.constant dense<0.000000e+00> : vector<8xf32>
    %242 = vector.multi_reduction <add>, %241, %cst_104 [1] : vector<8x8xf32> to vector<8xf32>
    %243 = vector.shape_cast %242 : vector<8xf32> to vector<8x1xf32>
    %244 = vector.broadcast %243 : vector<8x1xf32> to vector<8x8xf32>
    %245 = arith.divf %241, %244 : vector<8x8xf32>
    %246 = vector.extract_strided_slice %64 {offsets = [0, 28], sizes = [8, 4], strides = [1, 1]} : vector<8x32xf32> to vector<8x4xf32>
    %cst_105 = arith.constant dense<0.000000e+00> : vector<8x4xf32>
    %247 = tpu.matmul %245, %246, %cst_105 {dimension_numbers = #tpu.dot_dimension_numbers<[1], [0], [0], [1], [0, 0, 1, 1], [], []>} : vector<8x8xf32>, vector<8x4xf32>, vector<8x4xf32> -> vector<8x4xf32>
    %248 = vector.extract_strided_slice %65 {offsets = [28, 0], sizes = [4, 32], strides = [1, 1]} : vector<32x32xf32> to vector<4x32xf32>
    %cst_106 = arith.constant dense<0.000000e+00> : vector<8x32xf32>
    %249 = tpu.matmul %247, %248, %cst_106 {dimension_numbers = #tpu.dot_dimension_numbers<[1], [0], [0], [1], [0, 0, 1, 1], [], []>} : vector<8x4xf32>, vector<4x32xf32>, vector<8x32xf32> -> vector<8x32xf32>
    %250 = arith.addf %227, %249 : vector<8x32xf32>
    %251 = arith.addf %1, %250 : vector<8x32xf32>
    %c0_107 = arith.constant 0 : index
    %c0_108 = arith.constant 0 : index
    %252 = vector.load %arg13[%c0_107, %c0_108] : memref<1x32xf32, #tpu.memory_space<vmem>>, vector<1x32xf32>
    %253 = vector.broadcast %252 : vector<1x32xf32> to vector<8x32xf32>
    %254 = arith.addf %251, %253 : vector<8x32xf32>
    %c0_109 = arith.constant 0 : index
    %c0_110 = arith.constant 0 : index
    %c0_111 = arith.constant 0 : index
    %255 = vector.load %arg14[%c0_109, %c0_110, %c0_111] : memref<1x8x32xf32, #tpu.memory_space<vmem>>, vector<1x8x32xf32>
    %256 = vector.shape_cast %255 : vector<1x8x32xf32> to vector<8x32xf32>
    %257 = vector.shape_cast %254 : vector<8x32xf32> to vector<1x8x32xf32>
    tpu.vector_store %arg14[%c0_109, %c0_110, %c0_111], %257 {strides = array<i32>} : memref<1x8x32xf32, #tpu.memory_space<vmem>>, vector<1x8x32xf32>,
    return
  }
  func.func @transform_0(%arg0: i32) -> (i32, i32, i32) {
    %c0_i32 = arith.constant 0 : i32
    %c0_i32_0 = arith.constant 0 : i32
    %c0_i32_1 = arith.constant 0 : i32
    return %arg0, %c0_i32, %c0_i32_0 : i32, i32, i32
  }
  func.func @transform_1(%arg0: i32) -> (i32, i32, i32) {
    %c0_i32 = arith.constant 0 : i32
    %c0_i32_0 = arith.constant 0 : i32
    %c0_i32_1 = arith.constant 0 : i32
    return %arg0, %c0_i32, %c0_i32_0 : i32, i32, i32
  }
  func.func @transform_2(%arg0: i32) -> (i32, i32, i32) {
    %c0_i32 = arith.constant 0 : i32
    %c0_i32_0 = arith.constant 0 : i32
    %c0_i32_1 = arith.constant 0 : i32
    return %arg0, %c0_i32, %c0_i32_0 : i32, i32, i32
  }
  func.func @transform_3(%arg0: i32) -> (i32, i32) {
    %c0_i32 = arith.constant 0 : i32
    %c0_i32_0 = arith.constant 0 : i32
    %c0_i32_1 = arith.constant 0 : i32
    return %c0_i32, %c0_i32_0 : i32, i32
  }
  func.func @transform_4(%arg0: i32) -> (i32, i32) {
    %c0_i32 = arith.constant 0 : i32
    %c0_i32_0 = arith.constant 0 : i32
    %c0_i32_1 = arith.constant 0 : i32
    return %c0_i32, %c0_i32_0 : i32, i32
  }
  func.func @transform_5(%arg0: i32) -> (i32, i32) {
    %c0_i32 = arith.constant 0 : i32
    %c0_i32_0 = arith.constant 0 : i32
    %c0_i32_1 = arith.constant 0 : i32
    return %c0_i32, %c0_i32_0 : i32, i32
  }
  func.func @transform_6(%arg0: i32) -> (i32, i32) {
    %c0_i32 = arith.constant 0 : i32
    %c0_i32_0 = arith.constant 0 : i32
    %c0_i32_1 = arith.constant 0 : i32
    return %c0_i32, %c0_i32_0 : i32, i32
  }
  func.func @transform_7(%arg0: i32) -> (i32, i32) {
    %c0_i32 = arith.constant 0 : i32
    %c0_i32_0 = arith.constant 0 : i32
    %c0_i32_1 = arith.constant 0 : i32
    return %c0_i32, %c0_i32_0 : i32, i32
  }
  func.func @transform_8(%arg0: i32) -> (i32, i32) {
    %c0_i32 = arith.constant 0 : i32
    %c0_i32_0 = arith.constant 0 : i32
    %c0_i32_1 = arith.constant 0 : i32
    return %c0_i32, %c0_i32_0 : i32, i32
  }
  func.func @transform_9(%arg0: i32) -> (i32, i32) {
    %c0_i32 = arith.constant 0 : i32
    %c0_i32_0 = arith.constant 0 : i32
    %c0_i32_1 = arith.constant 0 : i32
    return %c0_i32, %c0_i32_0 : i32, i32
  }
  func.func @transform_10(%arg0: i32) -> (i32, i32) {
    %c0_i32 = arith.constant 0 : i32
    %c0_i32_0 = arith.constant 0 : i32
    %c0_i32_1 = arith.constant 0 : i32
    return %c0_i32, %c0_i32_0 : i32, i32
  }
  func.func @transform_11(%arg0: i32) -> (i32, i32) {
    %c0_i32 = arith.constant 0 : i32
    %c0_i32_0 = arith.constant 0 : i32
    %c0_i32_1 = arith.constant 0 : i32
    return %c0_i32, %c0_i32_0 : i32, i32
  }
  func.func @transform_12(%arg0: i32) -> (i32, i32) {
    %c0_i32 = arith.constant 0 : i32
    %c0_i32_0 = arith.constant 0 : i32
    %c0_i32_1 = arith.constant 0 : i32
    return %c0_i32, %c0_i32_0 : i32, i32
  }
  func.func @transform_13(%arg0: i32) -> (i32, i32, i32) {
    %c0_i32 = arith.constant 0 : i32
    %c0_i32_0 = arith.constant 0 : i32
    %c0_i32_1 = arith.constant 0 : i32
    return %arg0, %c0_i32, %c0_i32_0 : i32, i32, i32
  }
}

module attributes {stable_mosaic.version = 11 : i64} {
  func.func @_attn_sublayer_kernel(%arg0: i32, %arg1: memref<1x8x32xf32, #tpu.memory_space<vmem>>, %arg2: memref<1x64x32xf32, #tpu.memory_space<vmem>>, %arg3: memref<1x8x64xf32, #tpu.memory_space<vmem>>, %arg4: memref<1x32xf32, #tpu.memory_space<vmem>>, %arg5: memref<1x32xf32, #tpu.memory_space<vmem>>, %arg6: memref<32x32xf32, #tpu.memory_space<vmem>>, %arg7: memref<1x32xf32, #tpu.memory_space<vmem>>, %arg8: memref<32x32xf32, #tpu.memory_space<vmem>>, %arg9: memref<1x32xf32, #tpu.memory_space<vmem>>, %arg10: memref<32x32xf32, #tpu.memory_space<vmem>>, %arg11: memref<1x32xf32, #tpu.memory_space<vmem>>, %arg12: memref<32x32xf32, #tpu.memory_space<vmem>>, %arg13: memref<1x32xf32, #tpu.memory_space<vmem>>, %arg14: memref<1x8x32xf32, #tpu.memory_space<vmem>>) attributes {dimension_semantics = [#tpu.dimension_semantics<parallel>], iteration_bounds = array<i64: 2>, scalar_prefetch = 0 : i64, scratch_operands = 0 : i64, tpu.core_type = #tpu.core_type<tc>, window_params = [{transform_indices = @transform_0, window_bounds = array<i64: 1, 8, 32>}, {transform_indices = @transform_1, window_bounds = array<i64: 1, 64, 32>}, {transform_indices = @transform_2, window_bounds = array<i64: 1, 8, 64>}, {pipeline_mode = #tpu.pipeline_mode<synchronous>, transform_indices = @transform_3, window_bounds = array<i64: 1, 32>}, {pipeline_mode = #tpu.pipeline_mode<synchronous>, transform_indices = @transform_4, window_bounds = array<i64: 1, 32>}, {pipeline_mode = #tpu.pipeline_mode<synchronous>, transform_indices = @transform_5, window_bounds = array<i64: 32, 32>}, {pipeline_mode = #tpu.pipeline_mode<synchronous>, transform_indices = @transform_6, window_bounds = array<i64: 1, 32>}, {pipeline_mode = #tpu.pipeline_mode<synchronous>, transform_indices = @transform_7, window_bounds = array<i64: 32, 32>}, {pipeline_mode = #tpu.pipeline_mode<synchronous>, transform_indices = @transform_8, window_bounds = array<i64: 1, 32>}, {pipeline_mode = #tpu.pipeline_mode<synchronous>, transform_indices = @transform_9, window_bounds = array<i64: 32, 32>}, {pipeline_mode = #tpu.pipeline_mode<synchronous>, transform_indices = @transform_10, window_bounds = array<i64: 1, 32>}, {pipeline_mode = #tpu.pipeline_mode<synchronous>, transform_indices = @transform_11, window_bounds = array<i64: 32, 32>}, {pipeline_mode = #tpu.pipeline_mode<synchronous>, transform_indices = @transform_12, window_bounds = array<i64: 1, 32>}, {transform_indices = @transform_13, window_bounds = array<i64: 1, 8, 32>}]} {
    %c0 = arith.constant 0 : index
    %c0_0 = arith.constant 0 : index
    %c0_1 = arith.constant 0 : index
    %0 = vector.load %arg1[%c0, %c0_0, %c0_1] : memref<1x8x32xf32, #tpu.memory_space<vmem>>, vector<1x8x32xf32>
    %1 = vector.shape_cast %0 : vector<1x8x32xf32> to vector<8x32xf32>
    %c0_2 = arith.constant 0 : index
    %c0_3 = arith.constant 0 : index
    %c0_4 = arith.constant 0 : index
    %2 = vector.load %arg2[%c0_2, %c0_3, %c0_4] : memref<1x64x32xf32, #tpu.memory_space<vmem>>, vector<1x64x32xf32>
    %3 = vector.shape_cast %2 : vector<1x64x32xf32> to vector<64x32xf32>
    %c0_5 = arith.constant 0 : index
    %c0_6 = arith.constant 0 : index
    %c0_7 = arith.constant 0 : index
    %4 = vector.load %arg3[%c0_5, %c0_6, %c0_7] : memref<1x8x64xf32, #tpu.memory_space<vmem>>, vector<1x8x64xf32>
    %5 = vector.shape_cast %4 : vector<1x8x64xf32> to vector<8x64xf32>
    %c0_8 = arith.constant 0 : index
    %c0_9 = arith.constant 0 : index
    %6 = vector.load %arg4[%c0_8, %c0_9] : memref<1x32xf32, #tpu.memory_space<vmem>>, vector<1x32xf32>
    %c0_10 = arith.constant 0 : index
    %c0_11 = arith.constant 0 : index
    %7 = vector.load %arg5[%c0_10, %c0_11] : memref<1x32xf32, #tpu.memory_space<vmem>>, vector<1x32xf32>
    %cst = arith.constant dense<0.000000e+00> : vector<8xf32>
    %8 = vector.multi_reduction <add>, %1, %cst [1] : vector<8x32xf32> to vector<8xf32>
    %9 = vector.shape_cast %8 : vector<8xf32> to vector<8x1xf32>
    %cst_12 = arith.constant 3.200000e+01 : f32
    %10 = vector.broadcast %cst_12 : f32 to vector<8x1xf32>
    %11 = arith.divf %9, %10 : vector<8x1xf32>
    %12 = vector.broadcast %11 : vector<8x1xf32> to vector<8x32xf32>
    %13 = arith.subf %1, %12 : vector<8x32xf32>
    %14 = arith.mulf %13, %13 : vector<8x32xf32>
    %cst_13 = arith.constant dense<0.000000e+00> : vector<8xf32>
    %15 = vector.multi_reduction <add>, %14, %cst_13 [1] : vector<8x32xf32> to vector<8xf32>
    %16 = vector.shape_cast %15 : vector<8xf32> to vector<8x1xf32>
    %cst_14 = arith.constant 0.0322580636 : f32
    %17 = vector.broadcast %cst_14 : f32 to vector<8x1xf32>
    %18 = arith.mulf %16, %17 : vector<8x1xf32>
    %19 = vector.broadcast %6 : vector<1x32xf32> to vector<8x32xf32>
    %20 = arith.mulf %19, %13 : vector<8x32xf32>
    %21 = math.sqrt %18 : vector<8x1xf32>
    %cst_15 = arith.constant 9.99999997E-7 : f32
    %22 = vector.broadcast %cst_15 : f32 to vector<8x1xf32>
    %23 = arith.addf %21, %22 : vector<8x1xf32>
    %24 = vector.broadcast %23 : vector<8x1xf32> to vector<8x32xf32>
    %25 = arith.divf %20, %24 : vector<8x32xf32>
    %26 = vector.broadcast %7 : vector<1x32xf32> to vector<8x32xf32>
    %27 = arith.addf %25, %26 : vector<8x32xf32>
    %c0_16 = arith.constant 0 : index
    %c0_17 = arith.constant 0 : index
    %28 = vector.load %arg6[%c0_16, %c0_17] : memref<32x32xf32, #tpu.memory_space<vmem>>, vector<32x32xf32>
    %cst_18 = arith.constant dense<0.000000e+00> : vector<8x32xf32>
    %29 = tpu.matmul %27, %28, %cst_18 {dimension_numbers = #tpu.dot_dimension_numbers<[1], [0], [0], [1], [0, 0, 1, 1], [], []>} : vector<8x32xf32>, vector<32x32xf32>, vector<8x32xf32> -> vector<8x32xf32>
    %c0_19 = arith.constant 0 : index
    %c0_20 = arith.constant 0 : index
    %30 = vector.load %arg7[%c0_19, %c0_20] : memref<1x32xf32, #tpu.memory_space<vmem>>, vector<1x32xf32>
    %31 = vector.broadcast %30 : vector<1x32xf32> to vector<8x32xf32>
    %32 = arith.addf %29, %31 : vector<8x32xf32>
    %c0_21 = arith.constant 0 : index
    %c0_22 = arith.constant 0 : index
    %33 = vector.load %arg8[%c0_21, %c0_22] : memref<32x32xf32, #tpu.memory_space<vmem>>, vector<32x32xf32>
    %cst_23 = arith.constant dense<0.000000e+00> : vector<64x32xf32>
    %34 = tpu.matmul %3, %33, %cst_23 {dimension_numbers = #tpu.dot_dimension_numbers<[1], [0], [0], [1], [0, 0, 1, 1], [], []>} : vector<64x32xf32>, vector<32x32xf32>, vector<64x32xf32> -> vector<64x32xf32>
    %c0_24 = arith.constant 0 : index
    %c0_25 = arith.constant 0 : index
    %35 = vector.load %arg9[%c0_24, %c0_25] : memref<1x32xf32, #tpu.memory_space<vmem>>, vector<1x32xf32>
    %36 = vector.broadcast %35 : vector<1x32xf32> to vector<64x32xf32>
    %37 = arith.addf %34, %36 : vector<64x32xf32>
    %c0_26 = arith.constant 0 : index
    %c0_27 = arith.constant 0 : index
    %38 = vector.load %arg10[%c0_26, %c0_27] : memref<32x32xf32, #tpu.memory_space<vmem>>, vector<32x32xf32>
    %cst_28 = arith.constant dense<0.000000e+00> : vector<64x32xf32>
    %39 = tpu.matmul %3, %38, %cst_28 {dimension_numbers = #tpu.dot_dimension_numbers<[1], [0], [0], [1], [0, 0, 1, 1], [], []>} : vector<64x32xf32>, vector<32x32xf32>, vector<64x32xf32> -> vector<64x32xf32>
    %c0_29 = arith.constant 0 : index
    %c0_30 = arith.constant 0 : index
    %40 = vector.load %arg11[%c0_29, %c0_30] : memref<1x32xf32, #tpu.memory_space<vmem>>, vector<1x32xf32>
    %41 = vector.broadcast %40 : vector<1x32xf32> to vector<64x32xf32>
    %42 = arith.addf %39, %41 : vector<64x32xf32>
    %c0_31 = arith.constant 0 : index
    %c0_32 = arith.constant 0 : index
    %43 = vector.load %arg12[%c0_31, %c0_32] : memref<32x32xf32, #tpu.memory_space<vmem>>, vector<32x32xf32>
    %cst_33 = arith.constant 0.000000e+00 : f32
    %44 = vector.broadcast %cst_33 : f32 to vector<8x32xf32>
    %45 = vector.extract_strided_slice %32 {offsets = [0, 0], sizes = [8, 4], strides = [1, 1]} : vector<8x32xf32> to vector<8x4xf32>
    %46 = vector.extract_strided_slice %37 {offsets = [0, 0], sizes = [64, 4], strides = [1, 1]} : vector<64x32xf32> to vector<64x4xf32>
    %cst_34 = arith.constant dense<0.000000e+00> : vector<8x64xf32>
    %47 = tpu.matmul %45, %46, %cst_34 {dimension_numbers = #tpu.dot_dimension_numbers<[1], [1], [0], [0], [0, 0, 1, 0], [], []>} : vector<8x4xf32>, vector<64x4xf32>, vector<8x64xf32> -> vector<8x64xf32>
    %cst_35 = arith.constant 5.000000e-01 : f32
    %48 = vector.broadcast %cst_35 : f32 to vector<8x64xf32>
    %49 = arith.mulf %47, %48 : vector<8x64xf32>
    %cst_36 = arith.constant 0.000000e+00 : f32
    %50 = vector.broadcast %cst_36 : f32 to vector<8x64xf32>
    %51 = arith.cmpf oeq, %5, %50 : vector<8x64xf32>
    %cst_37 = arith.constant -1.000000e+09 : f32
    %52 = vector.broadcast %cst_37 : f32 to vector<8x64xf32>
    %53 = arith.select %51, %52, %49 : vector<8x64xi1>, vector<8x64xf32>
    %cst_38 = arith.constant dense<0xFF800000> : vector<8xf32>
    %54 = vector.multi_reduction <maximumf>, %53, %cst_38 [1] : vector<8x64xf32> to vector<8xf32>
    %55 = vector.shape_cast %54 : vector<8xf32> to vector<8x1xf32>
    %56 = vector.broadcast %55 : vector<8x1xf32> to vector<8x64xf32>
    %57 = arith.subf %53, %56 : vector<8x64xf32>
    %58 = math.exp %57 : vector<8x64xf32>
    %cst_39 = arith.constant dense<0.000000e+00> : vector<8xf32>
    %59 = vector.multi_reduction <add>, %58, %cst_39 [1] : vector<8x64xf32> to vector<8xf32>
    %60 = vector.shape_cast %59 : vector<8xf32> to vector<8x1xf32>
    %61 = vector.broadcast %60 : vector<8x1xf32> to vector<8x64xf32>
    %62 = arith.divf %58, %61 : vector<8x64xf32>
    %63 = vector.extract_strided_slice %42 {offsets = [0, 0], sizes = [64, 4], strides = [1, 1]} : vector<64x32xf32> to vector<64x4xf32>
    %cst_40 = arith.constant dense<0.000000e+00> : vector<8x4xf32>
    %64 = tpu.matmul %62, %63, %cst_40 {dimension_numbers = #tpu.dot_dimension_numbers<[1], [0], [0], [1], [0, 0, 1, 1], [], []>} : vector<8x64xf32>, vector<64x4xf32>, vector<8x4xf32> -> vector<8x4xf32>
    %65 = vector.extract_strided_slice %43 {offsets = [0, 0], sizes = [4, 32], strides = [1, 1]} : vector<32x32xf32> to vector<4x32xf32>
    %cst_41 = arith.constant dense<0.000000e+00> : vector<8x32xf32>
    %66 = tpu.matmul %64, %65, %cst_41 {dimension_numbers = #tpu.dot_dimension_numbers<[1], [0], [0], [1], [0, 0, 1, 1], [], []>} : vector<8x4xf32>, vector<4x32xf32>, vector<8x32xf32> -> vector<8x32xf32>
    %67 = arith.addf %44, %66 : vector<8x32xf32>
    %68 = vector.extract_strided_slice %32 {offsets = [0, 4], sizes = [8, 4], strides = [1, 1]} : vector<8x32xf32> to vector<8x4xf32>
    %69 = vector.extract_strided_slice %37 {offsets = [0, 4], sizes = [64, 4], strides = [1, 1]} : vector<64x32xf32> to vector<64x4xf32>
    %cst_42 = arith.constant dense<0.000000e+00> : vector<8x64xf32>
    %70 = tpu.matmul %68, %69, %cst_42 {dimension_numbers = #tpu.dot_dimension_numbers<[1], [1], [0], [0], [0, 0, 1, 0], [], []>} : vector<8x4xf32>, vector<64x4xf32>, vector<8x64xf32> -> vector<8x64xf32>
    %cst_43 = arith.constant 5.000000e-01 : f32
    %71 = vector.broadcast %cst_43 : f32 to vector<8x64xf32>
    %72 = arith.mulf %70, %71 : vector<8x64xf32>
    %cst_44 = arith.constant 0.000000e+00 : f32
    %73 = vector.broadcast %cst_44 : f32 to vector<8x64xf32>
    %74 = arith.cmpf oeq, %5, %73 : vector<8x64xf32>
    %cst_45 = arith.constant -1.000000e+09 : f32
    %75 = vector.broadcast %cst_45 : f32 to vector<8x64xf32>
    %76 = arith.select %74, %75, %72 : vector<8x64xi1>, vector<8x64xf32>
    %cst_46 = arith.constant dense<0xFF800000> : vector<8xf32>
    %77 = vector.multi_reduction <maximumf>, %76, %cst_46 [1] : vector<8x64xf32> to vector<8xf32>
    %78 = vector.shape_cast %77 : vector<8xf32> to vector<8x1xf32>
    %79 = vector.broadcast %78 : vector<8x1xf32> to vector<8x64xf32>
    %80 = arith.subf %76, %79 : vector<8x64xf32>
    %81 = math.exp %80 : vector<8x64xf32>
    %cst_47 = arith.constant dense<0.000000e+00> : vector<8xf32>
    %82 = vector.multi_reduction <add>, %81, %cst_47 [1] : vector<8x64xf32> to vector<8xf32>
    %83 = vector.shape_cast %82 : vector<8xf32> to vector<8x1xf32>
    %84 = vector.broadcast %83 : vector<8x1xf32> to vector<8x64xf32>
    %85 = arith.divf %81, %84 : vector<8x64xf32>
    %86 = vector.extract_strided_slice %42 {offsets = [0, 4], sizes = [64, 4], strides = [1, 1]} : vector<64x32xf32> to vector<64x4xf32>
    %cst_48 = arith.constant dense<0.000000e+00> : vector<8x4xf32>
    %87 = tpu.matmul %85, %86, %cst_48 {dimension_numbers = #tpu.dot_dimension_numbers<[1], [0], [0], [1], [0, 0, 1, 1], [], []>} : vector<8x64xf32>, vector<64x4xf32>, vector<8x4xf32> -> vector<8x4xf32>
    %88 = vector.extract_strided_slice %43 {offsets = [4, 0], sizes = [4, 32], strides = [1, 1]} : vector<32x32xf32> to vector<4x32xf32>
    %cst_49 = arith.constant dense<0.000000e+00> : vector<8x32xf32>
    %89 = tpu.matmul %87, %88, %cst_49 {dimension_numbers = #tpu.dot_dimension_numbers<[1], [0], [0], [1], [0, 0, 1, 1], [], []>} : vector<8x4xf32>, vector<4x32xf32>, vector<8x32xf32> -> vector<8x32xf32>
    %90 = arith.addf %67, %89 : vector<8x32xf32>
    %91 = vector.extract_strided_slice %32 {offsets = [0, 8], sizes = [8, 4], strides = [1, 1]} : vector<8x32xf32> to vector<8x4xf32>
    %92 = vector.extract_strided_slice %37 {offsets = [0, 8], sizes = [64, 4], strides = [1, 1]} : vector<64x32xf32> to vector<64x4xf32>
    %cst_50 = arith.constant dense<0.000000e+00> : vector<8x64xf32>
    %93 = tpu.matmul %91, %92, %cst_50 {dimension_numbers = #tpu.dot_dimension_numbers<[1], [1], [0], [0], [0, 0, 1, 0], [], []>} : vector<8x4xf32>, vector<64x4xf32>, vector<8x64xf32> -> vector<8x64xf32>
    %cst_51 = arith.constant 5.000000e-01 : f32
    %94 = vector.broadcast %cst_51 : f32 to vector<8x64xf32>
    %95 = arith.mulf %93, %94 : vector<8x64xf32>
    %cst_52 = arith.constant 0.000000e+00 : f32
    %96 = vector.broadcast %cst_52 : f32 to vector<8x64xf32>
    %97 = arith.cmpf oeq, %5, %96 : vector<8x64xf32>
    %cst_53 = arith.constant -1.000000e+09 : f32
    %98 = vector.broadcast %cst_53 : f32 to vector<8x64xf32>
    %99 = arith.select %97, %98, %95 : vector<8x64xi1>, vector<8x64xf32>
    %cst_54 = arith.constant dense<0xFF800000> : vector<8xf32>
    %100 = vector.multi_reduction <maximumf>, %99, %cst_54 [1] : vector<8x64xf32> to vector<8xf32>
    %101 = vector.shape_cast %100 : vector<8xf32> to vector<8x1xf32>
    %102 = vector.broadcast %101 : vector<8x1xf32> to vector<8x64xf32>
    %103 = arith.subf %99, %102 : vector<8x64xf32>
    %104 = math.exp %103 : vector<8x64xf32>
    %cst_55 = arith.constant dense<0.000000e+00> : vector<8xf32>
    %105 = vector.multi_reduction <add>, %104, %cst_55 [1] : vector<8x64xf32> to vector<8xf32>
    %106 = vector.shape_cast %105 : vector<8xf32> to vector<8x1xf32>
    %107 = vector.broadcast %106 : vector<8x1xf32> to vector<8x64xf32>
    %108 = arith.divf %104, %107 : vector<8x64xf32>
    %109 = vector.extract_strided_slice %42 {offsets = [0, 8], sizes = [64, 4], strides = [1, 1]} : vector<64x32xf32> to vector<64x4xf32>
    %cst_56 = arith.constant dense<0.000000e+00> : vector<8x4xf32>
    %110 = tpu.matmul %108, %109, %cst_56 {dimension_numbers = #tpu.dot_dimension_numbers<[1], [0], [0], [1], [0, 0, 1, 1], [], []>} : vector<8x64xf32>, vector<64x4xf32>, vector<8x4xf32> -> vector<8x4xf32>
    %111 = vector.extract_strided_slice %43 {offsets = [8, 0], sizes = [4, 32], strides = [1, 1]} : vector<32x32xf32> to vector<4x32xf32>
    %cst_57 = arith.constant dense<0.000000e+00> : vector<8x32xf32>
    %112 = tpu.matmul %110, %111, %cst_57 {dimension_numbers = #tpu.dot_dimension_numbers<[1], [0], [0], [1], [0, 0, 1, 1], [], []>} : vector<8x4xf32>, vector<4x32xf32>, vector<8x32xf32> -> vector<8x32xf32>
    %113 = arith.addf %90, %112 : vector<8x32xf32>
    %114 = vector.extract_strided_slice %32 {offsets = [0, 12], sizes = [8, 4], strides = [1, 1]} : vector<8x32xf32> to vector<8x4xf32>
    %115 = vector.extract_strided_slice %37 {offsets = [0, 12], sizes = [64, 4], strides = [1, 1]} : vector<64x32xf32> to vector<64x4xf32>
    %cst_58 = arith.constant dense<0.000000e+00> : vector<8x64xf32>
    %116 = tpu.matmul %114, %115, %cst_58 {dimension_numbers = #tpu.dot_dimension_numbers<[1], [1], [0], [0], [0, 0, 1, 0], [], []>} : vector<8x4xf32>, vector<64x4xf32>, vector<8x64xf32> -> vector<8x64xf32>
    %cst_59 = arith.constant 5.000000e-01 : f32
    %117 = vector.broadcast %cst_59 : f32 to vector<8x64xf32>
    %118 = arith.mulf %116, %117 : vector<8x64xf32>
    %cst_60 = arith.constant 0.000000e+00 : f32
    %119 = vector.broadcast %cst_60 : f32 to vector<8x64xf32>
    %120 = arith.cmpf oeq, %5, %119 : vector<8x64xf32>
    %cst_61 = arith.constant -1.000000e+09 : f32
    %121 = vector.broadcast %cst_61 : f32 to vector<8x64xf32>
    %122 = arith.select %120, %121, %118 : vector<8x64xi1>, vector<8x64xf32>
    %cst_62 = arith.constant dense<0xFF800000> : vector<8xf32>
    %123 = vector.multi_reduction <maximumf>, %122, %cst_62 [1] : vector<8x64xf32> to vector<8xf32>
    %124 = vector.shape_cast %123 : vector<8xf32> to vector<8x1xf32>
    %125 = vector.broadcast %124 : vector<8x1xf32> to vector<8x64xf32>
    %126 = arith.subf %122, %125 : vector<8x64xf32>
    %127 = math.exp %126 : vector<8x64xf32>
    %cst_63 = arith.constant dense<0.000000e+00> : vector<8xf32>
    %128 = vector.multi_reduction <add>, %127, %cst_63 [1] : vector<8x64xf32> to vector<8xf32>
    %129 = vector.shape_cast %128 : vector<8xf32> to vector<8x1xf32>
    %130 = vector.broadcast %129 : vector<8x1xf32> to vector<8x64xf32>
    %131 = arith.divf %127, %130 : vector<8x64xf32>
    %132 = vector.extract_strided_slice %42 {offsets = [0, 12], sizes = [64, 4], strides = [1, 1]} : vector<64x32xf32> to vector<64x4xf32>
    %cst_64 = arith.constant dense<0.000000e+00> : vector<8x4xf32>
    %133 = tpu.matmul %131, %132, %cst_64 {dimension_numbers = #tpu.dot_dimension_numbers<[1], [0], [0], [1], [0, 0, 1, 1], [], []>} : vector<8x64xf32>, vector<64x4xf32>, vector<8x4xf32> -> vector<8x4xf32>
    %134 = vector.extract_strided_slice %43 {offsets = [12, 0], sizes = [4, 32], strides = [1, 1]} : vector<32x32xf32> to vector<4x32xf32>
    %cst_65 = arith.constant dense<0.000000e+00> : vector<8x32xf32>
    %135 = tpu.matmul %133, %134, %cst_65 {dimension_numbers = #tpu.dot_dimension_numbers<[1], [0], [0], [1], [0, 0, 1, 1], [], []>} : vector<8x4xf32>, vector<4x32xf32>, vector<8x32xf32> -> vector<8x32xf32>
    %136 = arith.addf %113, %135 : vector<8x32xf32>
    %137 = vector.extract_strided_slice %32 {offsets = [0, 16], sizes = [8, 4], strides = [1, 1]} : vector<8x32xf32> to vector<8x4xf32>
    %138 = vector.extract_strided_slice %37 {offsets = [0, 16], sizes = [64, 4], strides = [1, 1]} : vector<64x32xf32> to vector<64x4xf32>
    %cst_66 = arith.constant dense<0.000000e+00> : vector<8x64xf32>
    %139 = tpu.matmul %137, %138, %cst_66 {dimension_numbers = #tpu.dot_dimension_numbers<[1], [1], [0], [0], [0, 0, 1, 0], [], []>} : vector<8x4xf32>, vector<64x4xf32>, vector<8x64xf32> -> vector<8x64xf32>
    %cst_67 = arith.constant 5.000000e-01 : f32
    %140 = vector.broadcast %cst_67 : f32 to vector<8x64xf32>
    %141 = arith.mulf %139, %140 : vector<8x64xf32>
    %cst_68 = arith.constant 0.000000e+00 : f32
    %142 = vector.broadcast %cst_68 : f32 to vector<8x64xf32>
    %143 = arith.cmpf oeq, %5, %142 : vector<8x64xf32>
    %cst_69 = arith.constant -1.000000e+09 : f32
    %144 = vector.broadcast %cst_69 : f32 to vector<8x64xf32>
    %145 = arith.select %143, %144, %141 : vector<8x64xi1>, vector<8x64xf32>
    %cst_70 = arith.constant dense<0xFF800000> : vector<8xf32>
    %146 = vector.multi_reduction <maximumf>, %145, %cst_70 [1] : vector<8x64xf32> to vector<8xf32>
    %147 = vector.shape_cast %146 : vector<8xf32> to vector<8x1xf32>
    %148 = vector.broadcast %147 : vector<8x1xf32> to vector<8x64xf32>
    %149 = arith.subf %145, %148 : vector<8x64xf32>
    %150 = math.exp %149 : vector<8x64xf32>
    %cst_71 = arith.constant dense<0.000000e+00> : vector<8xf32>
    %151 = vector.multi_reduction <add>, %150, %cst_71 [1] : vector<8x64xf32> to vector<8xf32>
    %152 = vector.shape_cast %151 : vector<8xf32> to vector<8x1xf32>
    %153 = vector.broadcast %152 : vector<8x1xf32> to vector<8x64xf32>
    %154 = arith.divf %150, %153 : vector<8x64xf32>
    %155 = vector.extract_strided_slice %42 {offsets = [0, 16], sizes = [64, 4], strides = [1, 1]} : vector<64x32xf32> to vector<64x4xf32>
    %cst_72 = arith.constant dense<0.000000e+00> : vector<8x4xf32>
    %156 = tpu.matmul %154, %155, %cst_72 {dimension_numbers = #tpu.dot_dimension_numbers<[1], [0], [0], [1], [0, 0, 1, 1], [], []>} : vector<8x64xf32>, vector<64x4xf32>, vector<8x4xf32> -> vector<8x4xf32>
    %157 = vector.extract_strided_slice %43 {offsets = [16, 0], sizes = [4, 32], strides = [1, 1]} : vector<32x32xf32> to vector<4x32xf32>
    %cst_73 = arith.constant dense<0.000000e+00> : vector<8x32xf32>
    %158 = tpu.matmul %156, %157, %cst_73 {dimension_numbers = #tpu.dot_dimension_numbers<[1], [0], [0], [1], [0, 0, 1, 1], [], []>} : vector<8x4xf32>, vector<4x32xf32>, vector<8x32xf32> -> vector<8x32xf32>
    %159 = arith.addf %136, %158 : vector<8x32xf32>
    %160 = vector.extract_strided_slice %32 {offsets = [0, 20], sizes = [8, 4], strides = [1, 1]} : vector<8x32xf32> to vector<8x4xf32>
    %161 = vector.extract_strided_slice %37 {offsets = [0, 20], sizes = [64, 4], strides = [1, 1]} : vector<64x32xf32> to vector<64x4xf32>
    %cst_74 = arith.constant dense<0.000000e+00> : vector<8x64xf32>
    %162 = tpu.matmul %160, %161, %cst_74 {dimension_numbers = #tpu.dot_dimension_numbers<[1], [1], [0], [0], [0, 0, 1, 0], [], []>} : vector<8x4xf32>, vector<64x4xf32>, vector<8x64xf32> -> vector<8x64xf32>
    %cst_75 = arith.constant 5.000000e-01 : f32
    %163 = vector.broadcast %cst_75 : f32 to vector<8x64xf32>
    %164 = arith.mulf %162, %163 : vector<8x64xf32>
    %cst_76 = arith.constant 0.000000e+00 : f32
    %165 = vector.broadcast %cst_76 : f32 to vector<8x64xf32>
    %166 = arith.cmpf oeq, %5, %165 : vector<8x64xf32>
    %cst_77 = arith.constant -1.000000e+09 : f32
    %167 = vector.broadcast %cst_77 : f32 to vector<8x64xf32>
    %168 = arith.select %166, %167, %164 : vector<8x64xi1>, vector<8x64xf32>
    %cst_78 = arith.constant dense<0xFF800000> : vector<8xf32>
    %169 = vector.multi_reduction <maximumf>, %168, %cst_78 [1] : vector<8x64xf32> to vector<8xf32>
    %170 = vector.shape_cast %169 : vector<8xf32> to vector<8x1xf32>
    %171 = vector.broadcast %170 : vector<8x1xf32> to vector<8x64xf32>
    %172 = arith.subf %168, %171 : vector<8x64xf32>
    %173 = math.exp %172 : vector<8x64xf32>
    %cst_79 = arith.constant dense<0.000000e+00> : vector<8xf32>
    %174 = vector.multi_reduction <add>, %173, %cst_79 [1] : vector<8x64xf32> to vector<8xf32>
    %175 = vector.shape_cast %174 : vector<8xf32> to vector<8x1xf32>
    %176 = vector.broadcast %175 : vector<8x1xf32> to vector<8x64xf32>
    %177 = arith.divf %173, %176 : vector<8x64xf32>
    %178 = vector.extract_strided_slice %42 {offsets = [0, 20], sizes = [64, 4], strides = [1, 1]} : vector<64x32xf32> to vector<64x4xf32>
    %cst_80 = arith.constant dense<0.000000e+00> : vector<8x4xf32>
    %179 = tpu.matmul %177, %178, %cst_80 {dimension_numbers = #tpu.dot_dimension_numbers<[1], [0], [0], [1], [0, 0, 1, 1], [], []>} : vector<8x64xf32>, vector<64x4xf32>, vector<8x4xf32> -> vector<8x4xf32>
    %180 = vector.extract_strided_slice %43 {offsets = [20, 0], sizes = [4, 32], strides = [1, 1]} : vector<32x32xf32> to vector<4x32xf32>
    %cst_81 = arith.constant dense<0.000000e+00> : vector<8x32xf32>
    %181 = tpu.matmul %179, %180, %cst_81 {dimension_numbers = #tpu.dot_dimension_numbers<[1], [0], [0], [1], [0, 0, 1, 1], [], []>} : vector<8x4xf32>, vector<4x32xf32>, vector<8x32xf32> -> vector<8x32xf32>
    %182 = arith.addf %159, %181 : vector<8x32xf32>
    %183 = vector.extract_strided_slice %32 {offsets = [0, 24], sizes = [8, 4], strides = [1, 1]} : vector<8x32xf32> to vector<8x4xf32>
    %184 = vector.extract_strided_slice %37 {offsets = [0, 24], sizes = [64, 4], strides = [1, 1]} : vector<64x32xf32> to vector<64x4xf32>
    %cst_82 = arith.constant dense<0.000000e+00> : vector<8x64xf32>
    %185 = tpu.matmul %183, %184, %cst_82 {dimension_numbers = #tpu.dot_dimension_numbers<[1], [1], [0], [0], [0, 0, 1, 0], [], []>} : vector<8x4xf32>, vector<64x4xf32>, vector<8x64xf32> -> vector<8x64xf32>
    %cst_83 = arith.constant 5.000000e-01 : f32
    %186 = vector.broadcast %cst_83 : f32 to vector<8x64xf32>
    %187 = arith.mulf %185, %186 : vector<8x64xf32>
    %cst_84 = arith.constant 0.000000e+00 : f32
    %188 = vector.broadcast %cst_84 : f32 to vector<8x64xf32>
    %189 = arith.cmpf oeq, %5, %188 : vector<8x64xf32>
    %cst_85 = arith.constant -1.000000e+09 : f32
    %190 = vector.broadcast %cst_85 : f32 to vector<8x64xf32>
    %191 = arith.select %189, %190, %187 : vector<8x64xi1>, vector<8x64xf32>
    %cst_86 = arith.constant dense<0xFF800000> : vector<8xf32>
    %192 = vector.multi_reduction <maximumf>, %191, %cst_86 [1] : vector<8x64xf32> to vector<8xf32>
    %193 = vector.shape_cast %192 : vector<8xf32> to vector<8x1xf32>
    %194 = vector.broadcast %193 : vector<8x1xf32> to vector<8x64xf32>
    %195 = arith.subf %191, %194 : vector<8x64xf32>
    %196 = math.exp %195 : vector<8x64xf32>
    %cst_87 = arith.constant dense<0.000000e+00> : vector<8xf32>
    %197 = vector.multi_reduction <add>, %196, %cst_87 [1] : vector<8x64xf32> to vector<8xf32>
    %198 = vector.shape_cast %197 : vector<8xf32> to vector<8x1xf32>
    %199 = vector.broadcast %198 : vector<8x1xf32> to vector<8x64xf32>
    %200 = arith.divf %196, %199 : vector<8x64xf32>
    %201 = vector.extract_strided_slice %42 {offsets = [0, 24], sizes = [64, 4], strides = [1, 1]} : vector<64x32xf32> to vector<64x4xf32>
    %cst_88 = arith.constant dense<0.000000e+00> : vector<8x4xf32>
    %202 = tpu.matmul %200, %201, %cst_88 {dimension_numbers = #tpu.dot_dimension_numbers<[1], [0], [0], [1], [0, 0, 1, 1], [], []>} : vector<8x64xf32>, vector<64x4xf32>, vector<8x4xf32> -> vector<8x4xf32>
    %203 = vector.extract_strided_slice %43 {offsets = [24, 0], sizes = [4, 32], strides = [1, 1]} : vector<32x32xf32> to vector<4x32xf32>
    %cst_89 = arith.constant dense<0.000000e+00> : vector<8x32xf32>
    %204 = tpu.matmul %202, %203, %cst_89 {dimension_numbers = #tpu.dot_dimension_numbers<[1], [0], [0], [1], [0, 0, 1, 1], [], []>} : vector<8x4xf32>, vector<4x32xf32>, vector<8x32xf32> -> vector<8x32xf32>
    %205 = arith.addf %182, %204 : vector<8x32xf32>
    %206 = vector.extract_strided_slice %32 {offsets = [0, 28], sizes = [8, 4], strides = [1, 1]} : vector<8x32xf32> to vector<8x4xf32>
    %207 = vector.extract_strided_slice %37 {offsets = [0, 28], sizes = [64, 4], strides = [1, 1]} : vector<64x32xf32> to vector<64x4xf32>
    %cst_90 = arith.constant dense<0.000000e+00> : vector<8x64xf32>
    %208 = tpu.matmul %206, %207, %cst_90 {dimension_numbers = #tpu.dot_dimension_numbers<[1], [1], [0], [0], [0, 0, 1, 0], [], []>} : vector<8x4xf32>, vector<64x4xf32>, vector<8x64xf32> -> vector<8x64xf32>
    %cst_91 = arith.constant 5.000000e-01 : f32
    %209 = vector.broadcast %cst_91 : f32 to vector<8x64xf32>
    %210 = arith.mulf %208, %209 : vector<8x64xf32>
    %cst_92 = arith.constant 0.000000e+00 : f32
    %211 = vector.broadcast %cst_92 : f32 to vector<8x64xf32>
    %212 = arith.cmpf oeq, %5, %211 : vector<8x64xf32>
    %cst_93 = arith.constant -1.000000e+09 : f32
    %213 = vector.broadcast %cst_93 : f32 to vector<8x64xf32>
    %214 = arith.select %212, %213, %210 : vector<8x64xi1>, vector<8x64xf32>
    %cst_94 = arith.constant dense<0xFF800000> : vector<8xf32>
    %215 = vector.multi_reduction <maximumf>, %214, %cst_94 [1] : vector<8x64xf32> to vector<8xf32>
    %216 = vector.shape_cast %215 : vector<8xf32> to vector<8x1xf32>
    %217 = vector.broadcast %216 : vector<8x1xf32> to vector<8x64xf32>
    %218 = arith.subf %214, %217 : vector<8x64xf32>
    %219 = math.exp %218 : vector<8x64xf32>
    %cst_95 = arith.constant dense<0.000000e+00> : vector<8xf32>
    %220 = vector.multi_reduction <add>, %219, %cst_95 [1] : vector<8x64xf32> to vector<8xf32>
    %221 = vector.shape_cast %220 : vector<8xf32> to vector<8x1xf32>
    %222 = vector.broadcast %221 : vector<8x1xf32> to vector<8x64xf32>
    %223 = arith.divf %219, %222 : vector<8x64xf32>
    %224 = vector.extract_strided_slice %42 {offsets = [0, 28], sizes = [64, 4], strides = [1, 1]} : vector<64x32xf32> to vector<64x4xf32>
    %cst_96 = arith.constant dense<0.000000e+00> : vector<8x4xf32>
    %225 = tpu.matmul %223, %224, %cst_96 {dimension_numbers = #tpu.dot_dimension_numbers<[1], [0], [0], [1], [0, 0, 1, 1], [], []>} : vector<8x64xf32>, vector<64x4xf32>, vector<8x4xf32> -> vector<8x4xf32>
    %226 = vector.extract_strided_slice %43 {offsets = [28, 0], sizes = [4, 32], strides = [1, 1]} : vector<32x32xf32> to vector<4x32xf32>
    %cst_97 = arith.constant dense<0.000000e+00> : vector<8x32xf32>
    %227 = tpu.matmul %225, %226, %cst_97 {dimension_numbers = #tpu.dot_dimension_numbers<[1], [0], [0], [1], [0, 0, 1, 1], [], []>} : vector<8x4xf32>, vector<4x32xf32>, vector<8x32xf32> -> vector<8x32xf32>
    %228 = arith.addf %205, %227 : vector<8x32xf32>
    %229 = arith.addf %1, %228 : vector<8x32xf32>
    %c0_98 = arith.constant 0 : index
    %c0_99 = arith.constant 0 : index
    %230 = vector.load %arg13[%c0_98, %c0_99] : memref<1x32xf32, #tpu.memory_space<vmem>>, vector<1x32xf32>
    %231 = vector.broadcast %230 : vector<1x32xf32> to vector<8x32xf32>
    %232 = arith.addf %229, %231 : vector<8x32xf32>
    %c0_100 = arith.constant 0 : index
    %c0_101 = arith.constant 0 : index
    %c0_102 = arith.constant 0 : index
    %233 = vector.load %arg14[%c0_100, %c0_101, %c0_102] : memref<1x8x32xf32, #tpu.memory_space<vmem>>, vector<1x8x32xf32>
    %234 = vector.shape_cast %233 : vector<1x8x32xf32> to vector<8x32xf32>
    %235 = vector.shape_cast %232 : vector<8x32xf32> to vector<1x8x32xf32>
    tpu.vector_store %arg14[%c0_100, %c0_101, %c0_102], %235 {strides = array<i32>} : memref<1x8x32xf32, #tpu.memory_space<vmem>>, vector<1x8x32xf32>,
    return
  }
  func.func @transform_0(%arg0: i32) -> (i32, i32, i32) {
    %c0_i32 = arith.constant 0 : i32
    %c0_i32_0 = arith.constant 0 : i32
    %c0_i32_1 = arith.constant 0 : i32
    return %arg0, %c0_i32, %c0_i32_0 : i32, i32, i32
  }
  func.func @transform_1(%arg0: i32) -> (i32, i32, i32) {
    %c0_i32 = arith.constant 0 : i32
    %c0_i32_0 = arith.constant 0 : i32
    %c0_i32_1 = arith.constant 0 : i32
    return %arg0, %c0_i32, %c0_i32_0 : i32, i32, i32
  }
  func.func @transform_2(%arg0: i32) -> (i32, i32, i32) {
    %c0_i32 = arith.constant 0 : i32
    %c0_i32_0 = arith.constant 0 : i32
    %c0_i32_1 = arith.constant 0 : i32
    return %arg0, %c0_i32, %c0_i32_0 : i32, i32, i32
  }
  func.func @transform_3(%arg0: i32) -> (i32, i32) {
    %c0_i32 = arith.constant 0 : i32
    %c0_i32_0 = arith.constant 0 : i32
    %c0_i32_1 = arith.constant 0 : i32
    return %c0_i32, %c0_i32_0 : i32, i32
  }
  func.func @transform_4(%arg0: i32) -> (i32, i32) {
    %c0_i32 = arith.constant 0 : i32
    %c0_i32_0 = arith.constant 0 : i32
    %c0_i32_1 = arith.constant 0 : i32
    return %c0_i32, %c0_i32_0 : i32, i32
  }
  func.func @transform_5(%arg0: i32) -> (i32, i32) {
    %c0_i32 = arith.constant 0 : i32
    %c0_i32_0 = arith.constant 0 : i32
    %c0_i32_1 = arith.constant 0 : i32
    return %c0_i32, %c0_i32_0 : i32, i32
  }
  func.func @transform_6(%arg0: i32) -> (i32, i32) {
    %c0_i32 = arith.constant 0 : i32
    %c0_i32_0 = arith.constant 0 : i32
    %c0_i32_1 = arith.constant 0 : i32
    return %c0_i32, %c0_i32_0 : i32, i32
  }
  func.func @transform_7(%arg0: i32) -> (i32, i32) {
    %c0_i32 = arith.constant 0 : i32
    %c0_i32_0 = arith.constant 0 : i32
    %c0_i32_1 = arith.constant 0 : i32
    return %c0_i32, %c0_i32_0 : i32, i32
  }
  func.func @transform_8(%arg0: i32) -> (i32, i32) {
    %c0_i32 = arith.constant 0 : i32
    %c0_i32_0 = arith.constant 0 : i32
    %c0_i32_1 = arith.constant 0 : i32
    return %c0_i32, %c0_i32_0 : i32, i32
  }
  func.func @transform_9(%arg0: i32) -> (i32, i32) {
    %c0_i32 = arith.constant 0 : i32
    %c0_i32_0 = arith.constant 0 : i32
    %c0_i32_1 = arith.constant 0 : i32
    return %c0_i32, %c0_i32_0 : i32, i32
  }
  func.func @transform_10(%arg0: i32) -> (i32, i32) {
    %c0_i32 = arith.constant 0 : i32
    %c0_i32_0 = arith.constant 0 : i32
    %c0_i32_1 = arith.constant 0 : i32
    return %c0_i32, %c0_i32_0 : i32, i32
  }
  func.func @transform_11(%arg0: i32) -> (i32, i32) {
    %c0_i32 = arith.constant 0 : i32
    %c0_i32_0 = arith.constant 0 : i32
    %c0_i32_1 = arith.constant 0 : i32
    return %c0_i32, %c0_i32_0 : i32, i32
  }
  func.func @transform_12(%arg0: i32) -> (i32, i32) {
    %c0_i32 = arith.constant 0 : i32
    %c0_i32_0 = arith.constant 0 : i32
    %c0_i32_1 = arith.constant 0 : i32
    return %c0_i32, %c0_i32_0 : i32, i32
  }
  func.func @transform_13(%arg0: i32) -> (i32, i32, i32) {
    %c0_i32 = arith.constant 0 : i32
    %c0_i32_0 = arith.constant 0 : i32
    %c0_i32_1 = arith.constant 0 : i32
    return %arg0, %c0_i32, %c0_i32_0 : i32, i32, i32
  }
}

module attributes {stable_mosaic.version = 11 : i64} {
  func.func @_ffn_sublayer_kernel(%arg0: i32, %arg1: memref<16x32xf32, #tpu.memory_space<vmem>>, %arg2: memref<1x32xf32, #tpu.memory_space<vmem>>, %arg3: memref<1x32xf32, #tpu.memory_space<vmem>>, %arg4: memref<32x64xf32, #tpu.memory_space<vmem>>, %arg5: memref<1x64xf32, #tpu.memory_space<vmem>>, %arg6: memref<64x32xf32, #tpu.memory_space<vmem>>, %arg7: memref<1x32xf32, #tpu.memory_space<vmem>>, %arg8: memref<16x32xf32, #tpu.memory_space<vmem>>) attributes {dimension_semantics = [#tpu.dimension_semantics<parallel>], iteration_bounds = array<i64: 1>, scalar_prefetch = 0 : i64, scratch_operands = 0 : i64, tpu.core_type = #tpu.core_type<tc>, window_params = [{transform_indices = @transform_0, window_bounds = array<i64: 16, 32>}, {pipeline_mode = #tpu.pipeline_mode<synchronous>, transform_indices = @transform_1, window_bounds = array<i64: 1, 32>}, {pipeline_mode = #tpu.pipeline_mode<synchronous>, transform_indices = @transform_2, window_bounds = array<i64: 1, 32>}, {pipeline_mode = #tpu.pipeline_mode<synchronous>, transform_indices = @transform_3, window_bounds = array<i64: 32, 64>}, {pipeline_mode = #tpu.pipeline_mode<synchronous>, transform_indices = @transform_4, window_bounds = array<i64: 1, 64>}, {pipeline_mode = #tpu.pipeline_mode<synchronous>, transform_indices = @transform_5, window_bounds = array<i64: 64, 32>}, {pipeline_mode = #tpu.pipeline_mode<synchronous>, transform_indices = @transform_6, window_bounds = array<i64: 1, 32>}, {transform_indices = @transform_7, window_bounds = array<i64: 16, 32>}]} {
    %c0 = arith.constant 0 : index
    %c0_0 = arith.constant 0 : index
    %0 = vector.load %arg1[%c0, %c0_0] : memref<16x32xf32, #tpu.memory_space<vmem>>, vector<16x32xf32>
    %c0_1 = arith.constant 0 : index
    %c0_2 = arith.constant 0 : index
    %1 = vector.load %arg2[%c0_1, %c0_2] : memref<1x32xf32, #tpu.memory_space<vmem>>, vector<1x32xf32>
    %c0_3 = arith.constant 0 : index
    %c0_4 = arith.constant 0 : index
    %2 = vector.load %arg3[%c0_3, %c0_4] : memref<1x32xf32, #tpu.memory_space<vmem>>, vector<1x32xf32>
    %cst = arith.constant dense<0.000000e+00> : vector<16xf32>
    %3 = vector.multi_reduction <add>, %0, %cst [1] : vector<16x32xf32> to vector<16xf32>
    %4 = vector.shape_cast %3 : vector<16xf32> to vector<16x1xf32>
    %cst_5 = arith.constant 3.200000e+01 : f32
    %5 = vector.broadcast %cst_5 : f32 to vector<16x1xf32>
    %6 = arith.divf %4, %5 : vector<16x1xf32>
    %7 = vector.broadcast %6 : vector<16x1xf32> to vector<16x32xf32>
    %8 = arith.subf %0, %7 : vector<16x32xf32>
    %9 = arith.mulf %8, %8 : vector<16x32xf32>
    %cst_6 = arith.constant dense<0.000000e+00> : vector<16xf32>
    %10 = vector.multi_reduction <add>, %9, %cst_6 [1] : vector<16x32xf32> to vector<16xf32>
    %11 = vector.shape_cast %10 : vector<16xf32> to vector<16x1xf32>
    %cst_7 = arith.constant 0.0322580636 : f32
    %12 = vector.broadcast %cst_7 : f32 to vector<16x1xf32>
    %13 = arith.mulf %11, %12 : vector<16x1xf32>
    %14 = vector.broadcast %1 : vector<1x32xf32> to vector<16x32xf32>
    %15 = arith.mulf %14, %8 : vector<16x32xf32>
    %16 = math.sqrt %13 : vector<16x1xf32>
    %cst_8 = arith.constant 9.99999997E-7 : f32
    %17 = vector.broadcast %cst_8 : f32 to vector<16x1xf32>
    %18 = arith.addf %16, %17 : vector<16x1xf32>
    %19 = vector.broadcast %18 : vector<16x1xf32> to vector<16x32xf32>
    %20 = arith.divf %15, %19 : vector<16x32xf32>
    %21 = vector.broadcast %2 : vector<1x32xf32> to vector<16x32xf32>
    %22 = arith.addf %20, %21 : vector<16x32xf32>
    %c0_9 = arith.constant 0 : index
    %c0_10 = arith.constant 0 : index
    %23 = vector.load %arg4[%c0_9, %c0_10] : memref<32x64xf32, #tpu.memory_space<vmem>>, vector<32x64xf32>
    %cst_11 = arith.constant dense<0.000000e+00> : vector<16x64xf32>
    %24 = tpu.matmul %22, %23, %cst_11 {dimension_numbers = #tpu.dot_dimension_numbers<[1], [0], [0], [1], [0, 0, 1, 1], [], []>} : vector<16x32xf32>, vector<32x64xf32>, vector<16x64xf32> -> vector<16x64xf32>
    %c0_12 = arith.constant 0 : index
    %c0_13 = arith.constant 0 : index
    %25 = vector.load %arg5[%c0_12, %c0_13] : memref<1x64xf32, #tpu.memory_space<vmem>>, vector<1x64xf32>
    %26 = vector.broadcast %25 : vector<1x64xf32> to vector<16x64xf32>
    %27 = arith.addf %24, %26 : vector<16x64xf32>
    %cst_14 = arith.constant 0.000000e+00 : f32
    %28 = vector.broadcast %cst_14 : f32 to vector<16x64xf32>
    %29 = arith.maximumf %27, %28 : vector<16x64xf32>
    %c0_15 = arith.constant 0 : index
    %c0_16 = arith.constant 0 : index
    %30 = vector.load %arg6[%c0_15, %c0_16] : memref<64x32xf32, #tpu.memory_space<vmem>>, vector<64x32xf32>
    %cst_17 = arith.constant dense<0.000000e+00> : vector<16x32xf32>
    %31 = tpu.matmul %29, %30, %cst_17 {dimension_numbers = #tpu.dot_dimension_numbers<[1], [0], [0], [1], [0, 0, 1, 1], [], []>} : vector<16x64xf32>, vector<64x32xf32>, vector<16x32xf32> -> vector<16x32xf32>
    %32 = arith.addf %0, %31 : vector<16x32xf32>
    %c0_18 = arith.constant 0 : index
    %c0_19 = arith.constant 0 : index
    %33 = vector.load %arg7[%c0_18, %c0_19] : memref<1x32xf32, #tpu.memory_space<vmem>>, vector<1x32xf32>
    %34 = vector.broadcast %33 : vector<1x32xf32> to vector<16x32xf32>
    %35 = arith.addf %32, %34 : vector<16x32xf32>
    %c0_20 = arith.constant 0 : index
    %c0_21 = arith.constant 0 : index
    %36 = vector.load %arg8[%c0_20, %c0_21] : memref<16x32xf32, #tpu.memory_space<vmem>>, vector<16x32xf32>
    tpu.vector_store %arg8[%c0_20, %c0_21], %35 {strides = array<i32>} : memref<16x32xf32, #tpu.memory_space<vmem>>, vector<16x32xf32>,
    return
  }
  func.func @transform_0(%arg0: i32) -> (i32, i32) {
    %c0_i32 = arith.constant 0 : i32
    %c0_i32_0 = arith.constant 0 : i32
    return %arg0, %c0_i32 : i32, i32
  }
  func.func @transform_1(%arg0: i32) -> (i32, i32) {
    %c0_i32 = arith.constant 0 : i32
    %c0_i32_0 = arith.constant 0 : i32
    %c0_i32_1 = arith.constant 0 : i32
    return %c0_i32, %c0_i32_0 : i32, i32
  }
  func.func @transform_2(%arg0: i32) -> (i32, i32) {
    %c0_i32 = arith.constant 0 : i32
    %c0_i32_0 = arith.constant 0 : i32
    %c0_i32_1 = arith.constant 0 : i32
    return %c0_i32, %c0_i32_0 : i32, i32
  }
  func.func @transform_3(%arg0: i32) -> (i32, i32) {
    %c0_i32 = arith.constant 0 : i32
    %c0_i32_0 = arith.constant 0 : i32
    %c0_i32_1 = arith.constant 0 : i32
    return %c0_i32, %c0_i32_0 : i32, i32
  }
  func.func @transform_4(%arg0: i32) -> (i32, i32) {
    %c0_i32 = arith.constant 0 : i32
    %c0_i32_0 = arith.constant 0 : i32
    %c0_i32_1 = arith.constant 0 : i32
    return %c0_i32, %c0_i32_0 : i32, i32
  }
  func.func @transform_5(%arg0: i32) -> (i32, i32) {
    %c0_i32 = arith.constant 0 : i32
    %c0_i32_0 = arith.constant 0 : i32
    %c0_i32_1 = arith.constant 0 : i32
    return %c0_i32, %c0_i32_0 : i32, i32
  }
  func.func @transform_6(%arg0: i32) -> (i32, i32) {
    %c0_i32 = arith.constant 0 : i32
    %c0_i32_0 = arith.constant 0 : i32
    %c0_i32_1 = arith.constant 0 : i32
    return %c0_i32, %c0_i32_0 : i32, i32
  }
  func.func @transform_7(%arg0: i32) -> (i32, i32) {
    %c0_i32 = arith.constant 0 : i32
    %c0_i32_0 = arith.constant 0 : i32
    return %arg0, %c0_i32 : i32, i32
  }
}

module attributes {stable_mosaic.version = 11 : i64} {
  func.func @_ln_kernel(%arg0: i32, %arg1: memref<16x32xf32, #tpu.memory_space<vmem>>, %arg2: memref<1x32xf32, #tpu.memory_space<vmem>>, %arg3: memref<1x32xf32, #tpu.memory_space<vmem>>, %arg4: memref<16x32xf32, #tpu.memory_space<vmem>>) attributes {dimension_semantics = [#tpu.dimension_semantics<parallel>], iteration_bounds = array<i64: 1>, scalar_prefetch = 0 : i64, scratch_operands = 0 : i64, tpu.core_type = #tpu.core_type<tc>, window_params = [{transform_indices = @transform_0, window_bounds = array<i64: 16, 32>}, {pipeline_mode = #tpu.pipeline_mode<synchronous>, transform_indices = @transform_1, window_bounds = array<i64: 1, 32>}, {pipeline_mode = #tpu.pipeline_mode<synchronous>, transform_indices = @transform_2, window_bounds = array<i64: 1, 32>}, {transform_indices = @transform_3, window_bounds = array<i64: 16, 32>}]} {
    %c0 = arith.constant 0 : index
    %c0_0 = arith.constant 0 : index
    %0 = vector.load %arg1[%c0, %c0_0] : memref<16x32xf32, #tpu.memory_space<vmem>>, vector<16x32xf32>
    %c0_1 = arith.constant 0 : index
    %c0_2 = arith.constant 0 : index
    %1 = vector.load %arg2[%c0_1, %c0_2] : memref<1x32xf32, #tpu.memory_space<vmem>>, vector<1x32xf32>
    %c0_3 = arith.constant 0 : index
    %c0_4 = arith.constant 0 : index
    %2 = vector.load %arg3[%c0_3, %c0_4] : memref<1x32xf32, #tpu.memory_space<vmem>>, vector<1x32xf32>
    %cst = arith.constant dense<0.000000e+00> : vector<16xf32>
    %3 = vector.multi_reduction <add>, %0, %cst [1] : vector<16x32xf32> to vector<16xf32>
    %4 = vector.shape_cast %3 : vector<16xf32> to vector<16x1xf32>
    %cst_5 = arith.constant 3.200000e+01 : f32
    %5 = vector.broadcast %cst_5 : f32 to vector<16x1xf32>
    %6 = arith.divf %4, %5 : vector<16x1xf32>
    %7 = vector.broadcast %6 : vector<16x1xf32> to vector<16x32xf32>
    %8 = arith.subf %0, %7 : vector<16x32xf32>
    %9 = arith.mulf %8, %8 : vector<16x32xf32>
    %cst_6 = arith.constant dense<0.000000e+00> : vector<16xf32>
    %10 = vector.multi_reduction <add>, %9, %cst_6 [1] : vector<16x32xf32> to vector<16xf32>
    %11 = vector.shape_cast %10 : vector<16xf32> to vector<16x1xf32>
    %cst_7 = arith.constant 0.0322580636 : f32
    %12 = vector.broadcast %cst_7 : f32 to vector<16x1xf32>
    %13 = arith.mulf %11, %12 : vector<16x1xf32>
    %14 = vector.broadcast %1 : vector<1x32xf32> to vector<16x32xf32>
    %15 = arith.mulf %14, %8 : vector<16x32xf32>
    %16 = math.sqrt %13 : vector<16x1xf32>
    %cst_8 = arith.constant 9.99999997E-7 : f32
    %17 = vector.broadcast %cst_8 : f32 to vector<16x1xf32>
    %18 = arith.addf %16, %17 : vector<16x1xf32>
    %19 = vector.broadcast %18 : vector<16x1xf32> to vector<16x32xf32>
    %20 = arith.divf %15, %19 : vector<16x32xf32>
    %21 = vector.broadcast %2 : vector<1x32xf32> to vector<16x32xf32>
    %22 = arith.addf %20, %21 : vector<16x32xf32>
    %c0_9 = arith.constant 0 : index
    %c0_10 = arith.constant 0 : index
    %23 = vector.load %arg4[%c0_9, %c0_10] : memref<16x32xf32, #tpu.memory_space<vmem>>, vector<16x32xf32>
    tpu.vector_store %arg4[%c0_9, %c0_10], %22 {strides = array<i32>} : memref<16x32xf32, #tpu.memory_space<vmem>>, vector<16x32xf32>,
    return
  }
  func.func @transform_0(%arg0: i32) -> (i32, i32) {
    %c0_i32 = arith.constant 0 : i32
    %c0_i32_0 = arith.constant 0 : i32
    return %arg0, %c0_i32 : i32, i32
  }
  func.func @transform_1(%arg0: i32) -> (i32, i32) {
    %c0_i32 = arith.constant 0 : i32
    %c0_i32_0 = arith.constant 0 : i32
    %c0_i32_1 = arith.constant 0 : i32
    return %c0_i32, %c0_i32_0 : i32, i32
  }
  func.func @transform_2(%arg0: i32) -> (i32, i32) {
    %c0_i32 = arith.constant 0 : i32
    %c0_i32_0 = arith.constant 0 : i32
    %c0_i32_1 = arith.constant 0 : i32
    return %c0_i32, %c0_i32_0 : i32, i32
  }
  func.func @transform_3(%arg0: i32) -> (i32, i32) {
    %c0_i32 = arith.constant 0 : i32
    %c0_i32_0 = arith.constant 0 : i32
    return %arg0, %c0_i32 : i32, i32
  }
}

module attributes {stable_mosaic.version = 11 : i64} {
  func.func @_logits_logsoftmax_kernel(%arg0: i32, %arg1: memref<16x32xf32, #tpu.memory_space<vmem>>, %arg2: memref<32x16xf32, #tpu.memory_space<vmem>>, %arg3: memref<1x16xf32, #tpu.memory_space<vmem>>, %arg4: memref<16x16xf32, #tpu.memory_space<vmem>>) attributes {dimension_semantics = [#tpu.dimension_semantics<parallel>], iteration_bounds = array<i64: 1>, scalar_prefetch = 0 : i64, scratch_operands = 0 : i64, tpu.core_type = #tpu.core_type<tc>, window_params = [{transform_indices = @transform_0, window_bounds = array<i64: 16, 32>}, {pipeline_mode = #tpu.pipeline_mode<synchronous>, transform_indices = @transform_1, window_bounds = array<i64: 32, 16>}, {pipeline_mode = #tpu.pipeline_mode<synchronous>, transform_indices = @transform_2, window_bounds = array<i64: 1, 16>}, {transform_indices = @transform_3, window_bounds = array<i64: 16, 16>}]} {
    %c0 = arith.constant 0 : index
    %c0_0 = arith.constant 0 : index
    %0 = vector.load %arg1[%c0, %c0_0] : memref<16x32xf32, #tpu.memory_space<vmem>>, vector<16x32xf32>
    %c0_1 = arith.constant 0 : index
    %c0_2 = arith.constant 0 : index
    %1 = vector.load %arg2[%c0_1, %c0_2] : memref<32x16xf32, #tpu.memory_space<vmem>>, vector<32x16xf32>
    %cst = arith.constant dense<0.000000e+00> : vector<16x16xf32>
    %2 = tpu.matmul %0, %1, %cst {dimension_numbers = #tpu.dot_dimension_numbers<[1], [0], [0], [1], [0, 0, 1, 1], [], []>} : vector<16x32xf32>, vector<32x16xf32>, vector<16x16xf32> -> vector<16x16xf32>
    %c0_3 = arith.constant 0 : index
    %c0_4 = arith.constant 0 : index
    %3 = vector.load %arg3[%c0_3, %c0_4] : memref<1x16xf32, #tpu.memory_space<vmem>>, vector<1x16xf32>
    %4 = vector.broadcast %3 : vector<1x16xf32> to vector<16x16xf32>
    %5 = arith.addf %2, %4 : vector<16x16xf32>
    %cst_5 = arith.constant dense<0xFF800000> : vector<16xf32>
    %6 = vector.multi_reduction <maximumf>, %5, %cst_5 [1] : vector<16x16xf32> to vector<16xf32>
    %7 = vector.shape_cast %6 : vector<16xf32> to vector<16x1xf32>
    %8 = vector.broadcast %7 : vector<16x1xf32> to vector<16x16xf32>
    %9 = arith.subf %5, %8 : vector<16x16xf32>
    %10 = math.exp %9 : vector<16x16xf32>
    %cst_6 = arith.constant dense<0.000000e+00> : vector<16xf32>
    %11 = vector.multi_reduction <add>, %10, %cst_6 [1] : vector<16x16xf32> to vector<16xf32>
    %12 = vector.shape_cast %11 : vector<16xf32> to vector<16x1xf32>
    %13 = math.log %12 : vector<16x1xf32>
    %14 = vector.broadcast %13 : vector<16x1xf32> to vector<16x16xf32>
    %15 = arith.subf %9, %14 : vector<16x16xf32>
    %c0_7 = arith.constant 0 : index
    %c0_8 = arith.constant 0 : index
    %16 = vector.load %arg4[%c0_7, %c0_8] : memref<16x16xf32, #tpu.memory_space<vmem>>, vector<16x16xf32>
    tpu.vector_store %arg4[%c0_7, %c0_8], %15 {strides = array<i32>} : memref<16x16xf32, #tpu.memory_space<vmem>>, vector<16x16xf32>,
    return
  }
  func.func @transform_0(%arg0: i32) -> (i32, i32) {
    %c0_i32 = arith.constant 0 : i32
    %c0_i32_0 = arith.constant 0 : i32
    return %arg0, %c0_i32 : i32, i32
  }
  func.func @transform_1(%arg0: i32) -> (i32, i32) {
    %c0_i32 = arith.constant 0 : i32
    %c0_i32_0 = arith.constant 0 : i32
    %c0_i32_1 = arith.constant 0 : i32
    return %c0_i32, %c0_i32_0 : i32, i32
  }
  func.func @transform_2(%arg0: i32) -> (i32, i32) {
    %c0_i32 = arith.constant 0 : i32
    %c0_i32_0 = arith.constant 0 : i32
    %c0_i32_1 = arith.constant 0 : i32
    return %c0_i32, %c0_i32_0 : i32, i32
  }
  func.func @transform_3(%arg0: i32) -> (i32, i32) {
    %c0_i32 = arith.constant 0 : i32
    %c0_i32_0 = arith.constant 0 : i32
    return %arg0, %c0_i32 : i32, i32
  }
}

</mosaic_0001>

<bundles_post_ra>
// kernel: transformer_forward.24
= control target key start
LH: loop header
LB: loop body
LE: loop exit
PB: predicated region body
PF: predicated region fallthrough
CT: control target
= control target key end

     0   :  { %s812_s18 = smov 0   ;;  %s910_s0 = inlined_call_operand.vmem [shape: bf16[128,160], index: 0, kind: input, shape index: {}]   ;;  %s911_s1 = inlined_call_operand.vmem [shape: bf16[160,128], index: 1, kind: input, shape index: {}]   ;;  %s912_s2 = inlined_call_operand.vmem [shape: f32[1,128], index: 2, kind: input, shape index: {}]   ;;  %s913_s3 = inlined_call_operand.vmem [shape: bf16[128,128], index: 3, kind: input, shape index: {}]   ;;  %s914_s4 = inlined_call_operand.vmem [shape: f32[1,128], index: 4, kind: input, shape index: {}]   ;;  %s915_s5 = inlined_call_operand.vmem [shape: f32[128,128], index: 5, kind: output, shape index: {}]  }
   0x1 LB: > { %s653_s19 = sadd.s32 4294967295, %s779_s18   ;;  %p657_p0 = scmp.ge.s32.totalorder %s779_s18, 1  ;;  %s779_s18 = sphi %s812_s18, %s15_s18  }
   0x2   : > { %p189_p1 = scmp.lt.s32.totalorder %s779_s18, 3 }
   0x4   : > { %p190_p2 = pnand %p657_p0, %p189_p1 }
   0x5   : > { %v743_v0 = vld [vmem:[%s911_s1] sm:$0xff] (!%p190_p2)   ;;  %v781_v1 = vmov (!%p190_p2), 0   ;;  %s658_s22 = sshll.u32 (!%p190_p2), %s653_s19, 3  ;;  %v744_v2 = vld [vmem:[%s911_s1 + $0x8] sm:$0xff] (!%p190_p2)   ;;  %v745_v3 = vld [vmem:[%s911_s1 + $0x10] sm:$0xff] (!%p190_p2)   ;;  %vm363_vm0 = vcmask (!%p190_p2), 261120  }
   0x6   : > { %193 = sbr.rel (%p190_p2) target bundleno = 508 (0x1fc), region = 40  ;;  %376 = vmatprep.subr.bf16.mxu0 (!%p190_p2), %v781_v1  ;;  %p219_p3 = scmp.lt.s32.totalorder (!%p190_p2), %s658_s22, 15  ;;  %v746_v4 = vld [vmem:[%s911_s1 + $0x18] sm:$0xff] (!%p190_p2)   ;;  %v747_v6 = vld [vmem:[%s911_s1 + $0x20] sm:$0xff] (!%p190_p2)   ;;  %v766_v8 = vld [vmem:[%s913_s3 + $0x8] sm:$0xff] (!%p190_p2)  }
   0x7   : > { %377 = vmatpush1.bf16.msra.mxu0 (!%p190_p2), %v743_v0  ;;  %v765_v7 = vld [vmem:[%s913_s3] sm:$0xff] (!%p190_p2)   ;;  %v748_v9 = vld [vmem:[%s911_s1 + $0x28] sm:$0xff] (!%p190_p2)   ;;  %v767_v10 = vld [vmem:[%s913_s3 + $0x10] sm:$0xff] (!%p190_p2)  }
   0x8   : > { %378 = vmatprep.subr.bf16.mxu0 (!%p190_p2), %v781_v1  ;;  %710 = vmatprep.subr.bf16.mxu1 (!%p190_p2), %v765_v7  ;;  %v749_v11 = vld [vmem:[%s911_s1 + $0x30] sm:$0xff] (!%p190_p2)   ;;  %v768_v12 = vld [vmem:[%s913_s3 + $0x18] sm:$0xff] (!%p190_p2)   ;;  %v751_v14 = vld [vmem:[%s911_s1 + $0x40] sm:$0xff] (!%p190_p2)  }
   0x9   : > { %711 = vmatpush3.bf16.msra.mxu1 (!%p190_p2), %v765_v7  ;;  %v750_v13 = vld [vmem:[%s911_s1 + $0x38] sm:$0xff] (!%p190_p2)   ;;  %v752_v15 = vld [vmem:[%s911_s1 + $0x48] sm:$0xff] (!%p190_p2)   ;;  %v769_v23 = vld [vmem:[%s913_s3 + $0x20] sm:$0xff] (!%p190_p2)  }
   0xa   : > { %712 = vmatprep.subr.bf16.mxu1 (!%p190_p2), %v766_v8  ;;  %v770_v24 = vld [vmem:[%s913_s3 + $0x28] sm:$0xff] (!%p190_p2)   ;;  %v771_v25 = vld [vmem:[%s913_s3 + $0x30] sm:$0xff] (!%p190_p2)   ;;  %v772_v26 = vld [vmem:[%s913_s3 + $0x38] sm:$0xff] (!%p190_p2)  }
   0xb   : > { %379 = vmatpush1.bf16.msra.mxu0 (!%p190_p2), %v744_v2  ;;  %v663_v27 = vld [vmem:[%s912_s2] ss:$0 sm:$0xff] (!%p190_p2) }
   0xc   : > { %380 = vmatprep.subr.bf16.mxu0 (!%p190_p2), %v781_v1  ;;  %v686_v0 = vld [vmem:[%s914_s4] ss:$0 sm:$0xff] (!%p190_p2) }
   0xd   : > { %s917_s22 = smov (!%p219_p3, %s658_s22), 15  ;;  %713 = vmatpush3.bf16.msra.mxu1 %v766_v8 }
   0xe   : > { %s697_s27 = sshll.u32 %s917_s22, 3  ;;  %714 = vmatprep.subr.bf16.mxu1 %v767_v10 }
   0xf   : > { %s837_s30 = scalar_lea.vmem %s910_s0, %s697_s27  ;;  %381 = vmatpush1.bf16.msra.mxu0 %v745_v3  ;;  %s229_s21 = scalar_lea.vmem %s915_s5, %s697_s27 }
  0x10   : > { %382 = vmatprep.subr.bf16.mxu0 %v781_v1  ;;  %v755_v5 = vld [vmem:[%s837_s30 + $0x4] ss:$8 sps:$4 sm:$0xff]   ;;  %v753_v16 = vld [vmem:[%s837_s30] ss:$8 sps:$4 sm:$0xff]   ;;  %v756_v17 = vld [vmem:[%s837_s30 + $0x14] ss:$8 sps:$4 sm:$0xff]  }
  0x11   : > { %682 = vmatprep.mubr.msk.bf16.mxu0 %vm363_vm0, %v755_v5  ;;  %715 = vmatpush3.bf16.msra.mxu1 %v767_v10  ;;  %v758_v18 = vld [vmem:[%s837_s30 + $0x10] ss:$8 sps:$4 sm:$0xff]   ;;  %v759_v19 = vld [vmem:[%s837_s30 + $0x24] ss:$8 sps:$4 sm:$0xff]   ;;  %v761_v20 = vld [vmem:[%s837_s30 + $0x20] ss:$8 sps:$4 sm:$0xff]  }
  0x12   : > { %716 = vmatprep.subr.bf16.mxu1 %v768_v12  ;;  %v762_v21 = vld [vmem:[%s837_s30 + $0x34] ss:$8 sps:$4 sm:$0xff]   ;;  %v764_v22 = vld [vmem:[%s837_s30 + $0x30] ss:$8 sps:$4 sm:$0xff]  }
  0x13   : > { %383 = vmatpush1.bf16.msra.mxu0 %v746_v4 }
  0x14   : > { %384 = vmatprep.subr.bf16.mxu0 %v781_v1 }
  0x15   : > { %717 = vmatpush3.bf16.msra.mxu1 %v768_v12 }
  0x16   : > { %718 = vmatprep.subr.bf16.mxu1 %v769_v23 }
  0x17   : > { %385 = vmatpush1.bf16.msra.mxu0 %v747_v6 }
  0x18   : > { %386 = vmatprep.subr.bf16.mxu0 %v781_v1 }
  0x19   : > { %719 = vmatpush3.bf16.msra.mxu1 %v769_v23 }
  0x1a   : > { %720 = vmatprep.subr.bf16.mxu1 %v770_v24 }
  0x1b   : > { %387 = vmatpush1.bf16.msra.mxu0 %v748_v9 }
  0x1c   : > { %388 = vmatprep.subr.bf16.mxu0 %v781_v1 }
  0x1d   : > { %721 = vmatpush3.bf16.msra.mxu1 %v770_v24 }
  0x1e   : > { %722 = vmatprep.subr.bf16.mxu1 %v771_v25 }
  0x1f   : > { %389 = vmatpush1.bf16.msra.mxu0 %v749_v11 }
  0x20   : > { %390 = vmatprep.subr.bf16.mxu0 %v781_v1 }
  0x21   : > { %723 = vmatpush3.bf16.msra.mxu1 %v771_v25 }
  0x22   : > { %724 = vmatprep.subr.bf16.mxu1 %v772_v26 }
  0x23   : > { %391 = vmatpush1.bf16.msra.mxu0 %v750_v13 }
  0x24   : > { %392 = vmatprep.subr.bf16.mxu0 %v781_v1 }
  0x25   : > { %725 = vmatpush3.bf16.msra.mxu1 %v772_v26 }
  0x27   : > { %393 = vmatpush1.bf16.msra.mxu0 %v751_v14 }
  0x28   : > { %394 = vmatprep.subr.bf16.mxu0 %v781_v1 }
  0x2b   : > { %395 = vmatpush1.bf16.msra.mxu0 %v752_v15 }
  0x2e   : > { %409 = vmatmul.mubr.bf16.vlgmr.msra.gmra.mrb[0].mxu0 %v753_v16 }
  0x2f   : > { %683 = vmatprep.mubr.msk.bf16.mxu0 %vm363_vm0, %v756_v17 }
  0x36   : > { %417 = vmatmul.mubr.bf16.gmra.mrb[4].mxu0 %v758_v18 }
  0x37   : > { %684 = vmatprep.mubr.msk.bf16.mxu0 %vm363_vm0, %v759_v19 }
  0x3e   : > { %425 = vmatmul.mubr.bf16.gmra.mrb[8].mxu0 %v761_v20 }
  0x3f   : > { %685 = vmatprep.mubr.msk.bf16.mxu0 %vm363_vm0, %v762_v21 }
  0x46   : > { %433 = vmatmul.mubr.bf16.gmra.mrb[12].mxu0 %v764_v22 }
 0x101   : > { %v410_v28 = vpop.f32.mrb[0].mxu0 }
 0x102   : > { %v411_v29 = vadd.f32 %v663_v27, %v410_v28  ;;  %v412_v30 = vpop.f32.mrb[1].mxu0 }
 0x103   : > { %v413_v31 = vpop.f32.mrb[2].mxu0 }
 0x104   : > { %v414_v32 = vadd.f32 %v663_v27, %v413_v31  ;;  %v415_v33 = vpop.f32.mrb[3].mxu0  ;;  %v441_v34 = vmax.f32 %v411_v29, 0.0 }
 0x106   : > { %v442_v35 = vmax.f32 %v414_v32, 0.0 }
 0x108   : > { %v449_v36 = vpack.c.bf16 %v442_v35, %v441_v34 }
 0x109   : > { %v418_v37 = vpop.f32.mrb[4].mxu0 }
 0x10a   : > { %v419_v38 = vadd.f32 %v663_v27, %v418_v37  ;;  %v420_v39 = vpop.f32.mrb[5].mxu0  ;;  %726 = vmatprep.mubr.bf16.mxu1 %v449_v36 }
 0x10b   : > { %v421_v40 = vpop.f32.mrb[6].mxu0 }
 0x10c   : > { %v422_v41 = vadd.f32 %v663_v27, %v421_v40  ;;  %v423_v42 = vpop.f32.mrb[7].mxu0  ;;  %v443_v43 = vmax.f32 %v419_v38, 0.0 }
 0x10e   : > { %v444_v44 = vmax.f32 %v422_v41, 0.0 }
 0x110   : > { %v450_v45 = vpack.c.bf16 %v444_v44, %v443_v43 }
 0x111   : > { %v426_v46 = vpop.f32.mrb[8].mxu0 }
 0x112   : > { %v427_v47 = vadd.f32 %v663_v27, %v426_v46  ;;  %v428_v48 = vpop.f32.mrb[9].mxu0  ;;  %727 = vmatmul.mubr.bf16.vlgmr.msra.gmra.mrb[0].mxu1 %v450_v45 }
 0x113   : > { %v429_v49 = vpop.f32.mrb[10].mxu0 }
 0x114   : > { %v430_v50 = vadd.f32 %v663_v27, %v429_v49  ;;  %v431_v51 = vpop.f32.mrb[11].mxu0  ;;  %v445_v52 = vmax.f32 %v427_v47, 0.0 }
 0x116   : > { %v446_v53 = vmax.f32 %v430_v50, 0.0 }
 0x118   : > { %v451_v54 = vpack.c.bf16 %v446_v53, %v445_v52 }
 0x119   : > { %v434_v55 = vpop.f32.mrb[12].mxu0 }
 0x11a   : > { %v435_v56 = vadd.f32 %v663_v27, %v434_v55  ;;  %v436_v57 = vpop.f32.mrb[13].mxu0  ;;  %730 = vmatprep.mubr.bf16.mxu1 %v451_v54 }
 0x11b   : > { %v437_v58 = vpop.f32.mrb[14].mxu0 }
 0x11c   : > { %v438_v59 = vadd.f32 %v663_v27, %v437_v58  ;;  %v439_v60 = vpop.f32.mrb[15].mxu0  ;;  %v447_v61 = vmax.f32 %v435_v56, 0.0 }
 0x11e   : > { %v448_v62 = vmax.f32 %v438_v59, 0.0 }
 0x120   : > { %v452_v63 = vpack.c.bf16 %v448_v62, %v447_v61 }
 0x122   : > { %731 = vmatmul.mubr.bf16.gmra.mrb[4].mxu1 %v452_v63 }
 0x1e5   : > { %v728_v1 = vpop.f32.mrb[0].mxu1 }
 0x1e6   : > { %v567_v2 = vadd.f32 %v728_v1, %v686_v0  ;;  %v558_v3 = vpop.f32.mrb[1].mxu1 }
 0x1e7   : > { %v559_v4 = vadd.f32 %v686_v0, %v558_v3  ;;  %v729_v5 = vpop.f32.mrb[2].mxu1 }
 0x1e8   : > { %591 = vst [vmem:[%s229_s21 + $0x10] sm:$0xff] %v567_v2  ;;  %v570_v6 = vadd.f32 %v729_v5, %v686_v0  ;;  %v561_v7 = vpop.f32.mrb[3].mxu1 }
 0x1e9   : > { %589 = vst [vmem:[%s229_s21] sm:$0xff] %v559_v4  ;;  %v562_v8 = vadd.f32 %v686_v0, %v561_v7 }
 0x1ea   : > { %592 = vst [vmem:[%s229_s21 + $0x18] sm:$0xff] %v570_v6 }
 0x1eb   : > { %590 = vst [vmem:[%s229_s21 + $0x8] sm:$0xff] %v562_v8 }
 0x1f5   : > { %v732_v9 = vpop.f32.mrb[4].mxu1 }
 0x1f6   : > { %v583_v10 = vadd.f32 %v732_v9, %v686_v0  ;;  %v574_v11 = vpop.f32.mrb[5].mxu1 }
 0x1f7   : > { %v575_v12 = vadd.f32 %v686_v0, %v574_v11  ;;  %v733_v13 = vpop.f32.mrb[6].mxu1 }
 0x1f8   : > { %595 = vst [vmem:[%s229_s21 + $0x30] sm:$0xff] %v583_v10  ;;  %v586_v14 = vadd.f32 %v733_v13, %v686_v0  ;;  %v577_v15 = vpop.f32.mrb[7].mxu1 }
 0x1f9   : > { %593 = vst [vmem:[%s229_s21 + $0x20] sm:$0xff] %v575_v12  ;;  %v578_v16 = vadd.f32 %v686_v0, %v577_v15 }
 0x1fa   : > { %596 = vst [vmem:[%s229_s21 + $0x38] sm:$0xff] %v586_v14 }
 0x1fb   : > { %594 = vst [vmem:[%s229_s21 + $0x28] sm:$0xff] %v578_v16 }
 0x1fc PF: > { %s15_s18 = sadd.s32 1, %s779_s18  }
 0x1fd   : > { %p12_p4 = scmp.ge.s32.totalorder %s15_s18, 4  }
 0x1ff   :  { %14 = sbr.rel (!%p12_p4) target bundleno = 1 (0x1), region = 70 }

// kernel: transformer_forward.26
= control target key start
LH: loop header
LB: loop body
LE: loop exit
PB: predicated region body
PF: predicated region fallthrough
CT: control target
= control target key end

     0   :  { %vm44_vm0 = vcmask 261120   ;;  %s1855_s0 = inlined_call_operand.vmem [shape: f32[128,32], index: 0, kind: input, shape index: {}]   ;;  %s1856_s3 = inlined_call_operand.vmem [shape: f32[32,64], index: 3, kind: input, shape index: {}]   ;;  %s1857_s5 = inlined_call_operand.vmem [shape: f32[64,32], index: 5, kind: input, shape index: {}]   ;;  %s1858_s1 = inlined_call_operand.vmem [shape: f32[1,32], index: 1, kind: input, shape index: {}]   ;;  %s1859_s2 = inlined_call_operand.vmem [shape: f32[1,32], index: 2, kind: input, shape index: {}]   ;;  %s1860_s4 = inlined_call_operand.vmem [shape: f32[1,64], index: 4, kind: input, shape index: {}]   ;;  %s1861_s6 = inlined_call_operand.vmem [shape: f32[1,32], index: 6, kind: input, shape index: {}]   ;;  %s1862_s7 = inlined_call_operand.vmem [shape: f32[128,32], index: 7, kind: output, shape index: {}]  }
   0x1   :  { %v26_v0 = vld [vmem:[%s1855_s0] sm:$0xff]  ;;  %v28_v1 = vld [vmem:[%s1855_s0 + $0x10] sm:$0xff]  ;;  %v27_v2 = vld [vmem:[%s1855_s0 + $0x8] sm:$0xff] }
   0x2   :  { %v45_v3 = vsel %vm44_vm0, %v26_v0, 0.0  ;;  %v51_v4 = vsel %vm44_vm0, %v28_v1, 0.0  ;;  %v29_v5 = vld [vmem:[%s1855_s0 + $0x18] sm:$0xff]  ;;  %v48_v6 = vsel %vm44_vm0, %v27_v2, 0.0  ;;  %v30_v8 = vld [vmem:[%s1855_s0 + $0x20] sm:$0xff]  ;;  %v31_v9 = vld [vmem:[%s1855_s0 + $0x28] sm:$0xff] }
   0x3   :  { %46 = vadd.xlane.f32.xlu0 %v45_v3  ;;  %52 = vadd.xlane.f32.xlu1 %v51_v4  ;;  %v54_v7 = vsel %vm44_vm0, %v29_v5, 0.0  ;;  %v57_v10 = vsel %vm44_vm0, %v30_v8, 0.0  ;;  %v60_v11 = vsel %vm44_vm0, %v31_v9, 0.0  ;;  %v1222_v12 = vld [vmem:[%s1855_s0 + $0x30] sm:$0xff]  ;;  %v1227_v13 = vld [vmem:[%s1855_s0 + $0x38] sm:$0xff]  ;;  %v1236_v16 = vld [vmem:[%s1855_s0 + $0x40] sm:$0xff] }
   0x4   :  { %v63_v14 = vsel %vm44_vm0, %v1222_v12, 0.0  ;;  %v66_v15 = vsel %vm44_vm0, %v1227_v13, 0.0  ;;  %v1241_v17 = vld [vmem:[%s1855_s0 + $0x48] sm:$0xff]  ;;  %v69_v18 = vsel %vm44_vm0, %v1236_v16, 0.0  ;;  %v1250_v20 = vld [vmem:[%s1855_s0 + $0x50] sm:$0xff]  ;;  %v1255_v21 = vld [vmem:[%s1855_s0 + $0x58] sm:$0xff] }
   0x5   :  { %v72_v19 = vsel %vm44_vm0, %v1241_v17, 0.0  ;;  %v75_v22 = vsel %vm44_vm0, %v1250_v20, 0.0  ;;  %v78_v23 = vsel %vm44_vm0, %v1255_v21, 0.0  ;;  %v1264_v24 = vld [vmem:[%s1855_s0 + $0x60] sm:$0xff]  ;;  %v1269_v25 = vld [vmem:[%s1855_s0 + $0x68] sm:$0xff]  ;;  %v1278_v28 = vld [vmem:[%s1855_s0 + $0x70] sm:$0xff] }
   0x6   :  { %v81_v26 = vsel %vm44_vm0, %v1264_v24, 0.0  ;;  %v84_v27 = vsel %vm44_vm0, %v1269_v25, 0.0  ;;  %v1283_v29 = vld [vmem:[%s1855_s0 + $0x78] sm:$0xff]  ;;  %v87_v30 = vsel %vm44_vm0, %v1278_v28, 0.0 }
   0x7   :  { %49 = vadd.xlane.f32.xlu0 %v48_v6  ;;  %55 = vadd.xlane.f32.xlu1 %v54_v7  ;;  %v90_v31 = vsel %vm44_vm0, %v1283_v29, 0.0 }
   0xb   :  { %58 = vadd.xlane.f32.xlu0 %v57_v10  ;;  %61 = vadd.xlane.f32.xlu1 %v60_v11 }
   0xf   :  { %64 = vadd.xlane.f32.xlu0 %v63_v14  ;;  %67 = vadd.xlane.f32.xlu1 %v66_v15 }
  0x13   :  { %70 = vadd.xlane.f32.xlu0 %v69_v18  ;;  %73 = vadd.xlane.f32.xlu1 %v72_v19 }
  0x17   :  { %76 = vadd.xlane.f32.xlu0 %v75_v22  ;;  %79 = vadd.xlane.f32.xlu1 %v78_v23 }
  0x1b   :  { %82 = vadd.xlane.f32.xlu0 %v81_v26  ;;  %85 = vadd.xlane.f32.xlu1 %v84_v27 }
  0x1f   :  { %88 = vadd.xlane.f32.xlu0 %v87_v30  ;;  %91 = vadd.xlane.f32.xlu1 %v90_v31 }
  0x90   :  { %v47_v32 = vpop.xlane.xlu0 %46  ;;  %v53_v33 = vpop.xlane.xlu1 %52 }
  0x91   :  { %v94_v34 = vmul.f32 0.03125, %v47_v32  ;;  %v96_v35 = vmul.f32 0.03125, %v53_v33 }
  0x93   :  { %v1289_v36 = vsub.f32 %v26_v0, %v94_v34  ;;  %v1291_v37 = vsub.f32 %v28_v1, %v96_v35 }
  0x94   :  { %v50_v38 = vpop.xlane.xlu0 %49  ;;  %v56_v39 = vpop.xlane.xlu1 %55 }
  0x95   :  { %v95_v40 = vmul.f32 0.03125, %v50_v38  ;;  %v97_v41 = vmul.f32 0.03125, %v56_v39  ;;  %v126_v42 = vmul.f32 %v1289_v36, %v1289_v36  ;;  %v128_v43 = vmul.f32 %v1291_v37, %v1291_v37 }
  0x97   :  { %v1297_v44 = vsub.f32 %v27_v2, %v95_v40  ;;  %v1299_v45 = vsub.f32 %v29_v5, %v97_v41  ;;  %v142_v46 = vsel %vm44_vm0, %v126_v42, 0.0  ;;  %v148_v51 = vsel %vm44_vm0, %v128_v43, 0.0 }
  0x98   :  { %v59_v47 = vpop.xlane.xlu0 %58  ;;  %v62_v48 = vpop.xlane.xlu1 %61  ;;  %143 = vadd.xlane.f32.xlu0 %v142_v46 }
  0x99   :  { %v98_v49 = vmul.f32 0.03125, %v59_v47  ;;  %v99_v50 = vmul.f32 0.03125, %v62_v48  ;;  %v127_v52 = vmul.f32 %v1297_v44, %v1297_v44  ;;  %v129_v53 = vmul.f32 %v1299_v45, %v1299_v45 }
  0x9b   :  { %v1307_v54 = vsub.f32 %v30_v8, %v98_v49  ;;  %v1309_v55 = vsub.f32 %v31_v9, %v99_v50  ;;  %v145_v56 = vsel %vm44_vm0, %v127_v52, 0.0  ;;  %v151_v61 = vsel %vm44_vm0, %v129_v53, 0.0  ;;  %v411_v53 = vld [vmem:[%s1856_s3 + $0x8] sm:$0xff] }
  0x9c   :  { %v65_v57 = vpop.xlane.xlu0 %64  ;;  %v68_v58 = vpop.xlane.xlu1 %67  ;;  %149 = vadd.xlane.f32.xlu0 %v148_v51  ;;  %146 = vadd.xlane.f32.xlu1 %v145_v56 }
  0x9d   :  { %v100_v59 = vmul.f32 0.03125, %v65_v57  ;;  %v101_v60 = vmul.f32 0.03125, %v68_v58  ;;  %v130_v62 = vmul.f32 %v1307_v54, %v1307_v54  ;;  %v131_v63 = vmul.f32 %v1309_v55, %v1309_v55  ;;  %v412_v57 = vld [vmem:[%s1856_s3 + $0x10] sm:$0xff]  ;;  %v413_v58 = vld [vmem:[%s1856_s3 + $0x18] sm:$0xff] }
  0x9f   :  { %v1318_v0 = vsub.f32 %v1222_v12, %v100_v59  ;;  %v1321_v1 = vsub.f32 %v1227_v13, %v101_v60  ;;  %v154_v2 = vsel %vm44_vm0, %v130_v62, 0.0  ;;  %v157_v7 = vsel %vm44_vm0, %v131_v63, 0.0  ;;  %v630_v60 = vld [vmem:[%s1857_s5] sm:$0xff]  ;;  %v632_v62 = vld [vmem:[%s1857_s5 + $0x10] sm:$0xff] }
  0xa0   :  { %v71_v3 = vpop.xlane.xlu0 %70  ;;  %v74_v4 = vpop.xlane.xlu1 %73  ;;  %152 = vadd.xlane.f32.xlu1 %v151_v61  ;;  %155 = vadd.xlane.f32.xlu0 %v154_v2  ;;  %v1047_v59 = vpack.c.bf16 %v413_v58, %v412_v57  ;;  %v631_v61 = vld [vmem:[%s1857_s5 + $0x8] sm:$0xff]  ;;  %v633_v2 = vld [vmem:[%s1857_s5 + $0x18] sm:$0xff] }
  0xa1   :  { %v102_v5 = vmul.f32 0.03125, %v71_v3  ;;  %v103_v6 = vmul.f32 0.03125, %v74_v4  ;;  %v132_v8 = vmul.f32 %v1318_v0, %v1318_v0  ;;  %v133_v9 = vmul.f32 %v1321_v1, %v1321_v1  ;;  %v634_v4 = vld [vmem:[%s1857_s5 + $0x20] sm:$0xff] }
  0xa2   :  { %v1400_v63 = vpack.c.bf16 %v631_v61, %v630_v60  ;;  %v1407_v3 = vpack.c.bf16 %v633_v2, %v632_v62 }
  0xa3   :  { %v1330_v10 = vsub.f32 %v1236_v16, %v102_v5  ;;  %v1333_v11 = vsub.f32 %v1241_v17, %v103_v6  ;;  %v160_v12 = vsel %vm44_vm0, %v132_v8, 0.0  ;;  %v163_v19 = vsel %vm44_vm0, %v133_v9, 0.0  ;;  %v635_v5 = vld [vmem:[%s1857_s5 + $0x28] sm:$0xff] }
  0xa4   :  { %v77_v13 = vpop.xlane.xlu0 %76  ;;  %v80_v14 = vpop.xlane.xlu1 %79  ;;  %158 = vadd.xlane.f32.xlu1 %v157_v7  ;;  %161 = vadd.xlane.f32.xlu0 %v160_v12  ;;  %v1417_v6 = vpack.c.bf16 %v635_v5, %v634_v4 }
  0xa5   :  { %v104_v15 = vmul.f32 0.03125, %v77_v13  ;;  %v105_v18 = vmul.f32 0.03125, %v80_v14  ;;  %v134_v22 = vmul.f32 %v1330_v10, %v1330_v10  ;;  %v135_v16 = vmul.f32 %v1333_v11, %v1333_v11  ;;  %1067 = vmatprep.subr.bf16.mxu1 %v1400_v63 }
  0xa6   :  { %1071 = vmatpush3.bf16.msra.mxu1 %v1400_v63 }
  0xa7   :  { %v1342_v23 = vsub.f32 %v1250_v20, %v104_v15  ;;  %v1345_v17 = vsub.f32 %v1255_v21, %v105_v18  ;;  %v166_v26 = vsel %vm44_vm0, %v134_v22, 0.0  ;;  %v169_v33 = vsel %vm44_vm0, %v135_v16, 0.0  ;;  %1068 = vmatprep.subr.bf16.mxu1 %v1407_v3  ;;  %v1435_v16 = vld [vmem:[%s1858_s1] ss:$0 sm:$0xff] }
  0xa8   :  { %v83_v27 = vpop.xlane.xlu0 %82  ;;  %v86_v30 = vpop.xlane.xlu1 %85  ;;  %164 = vadd.xlane.f32.xlu1 %v163_v19  ;;  %167 = vadd.xlane.f32.xlu0 %v166_v26 }
  0xa9   :  { %v106_v31 = vmul.f32 0.03125, %v83_v27  ;;  %v107_v32 = vmul.f32 0.03125, %v86_v30  ;;  %v136_v34 = vmul.f32 %v1342_v23, %v1342_v23  ;;  %v137_v20 = vmul.f32 %v1345_v17, %v1345_v17 }
  0xaa   :  { %1072 = vmatpush3.bf16.msra.mxu1 %v1407_v3 }
  0xab   :  { %v1354_v35 = vsub.f32 %v1264_v24, %v106_v31  ;;  %v1357_v21 = vsub.f32 %v1269_v25, %v107_v32  ;;  %v172_v38 = vsel %vm44_vm0, %v136_v34, 0.0  ;;  %v175_v43 = vsel %vm44_vm0, %v137_v20, 0.0  ;;  %1069 = vmatprep.subr.bf16.mxu1 %v1417_v6 }
  0xac   :  { %v89_v39 = vpop.xlane.xlu0 %88  ;;  %v92_v40 = vpop.xlane.xlu1 %91  ;;  %170 = vadd.xlane.f32.xlu1 %v169_v33  ;;  %173 = vadd.xlane.f32.xlu0 %v172_v38  ;;  %v1445_v33 = vmul.f32 %v1435_v16, %v1289_v36  ;;  %v1449_v34 = vmul.f32 %v1435_v16, %v1291_v37  ;;  %v1453_v20 = vmul.f32 %v1435_v16, %v1297_v44 }
  0xad   :  { %v108_v41 = vmul.f32 0.03125, %v89_v39  ;;  %v109_v42 = vmul.f32 0.03125, %v92_v40  ;;  %v138_v46 = vmul.f32 %v1354_v35, %v1354_v35  ;;  %v139_v24 = vmul.f32 %v1357_v21, %v1357_v21 }
  0xae   :  { %1073 = vmatpush3.bf16.msra.mxu1 %v1417_v6  ;;  %v1457_v39 = vmul.f32 %v1435_v16, %v1299_v45  ;;  %v1461_v40 = vmul.f32 %v1435_v16, %v1307_v54 }
  0xaf   :  { %v1366_v47 = vsub.f32 %v1278_v28, %v108_v41  ;;  %v1369_v25 = vsub.f32 %v1283_v29, %v109_v42  ;;  %v178_v48 = vsel %vm44_vm0, %v138_v46, 0.0  ;;  %v181_v50 = vsel %vm44_vm0, %v139_v24, 0.0  ;;  %v410_v29 = vld [vmem:[%s1856_s3] sm:$0xff] }
  0xb0   :  { %176 = vadd.xlane.f32.xlu1 %v175_v43  ;;  %179 = vadd.xlane.f32.xlu0 %v178_v48  ;;  %v1043_v56 = vpack.c.bf16 %v411_v53, %v410_v29 }
  0xb1   :  { %v140_v49 = vmul.f32 %v1366_v47, %v1366_v47  ;;  %v141_v51 = vmul.f32 %v1369_v25, %v1369_v25 }
  0xb2   :  { %1044 = vmatprep.subr.bf16.mxu0 %v1043_v56 }
  0xb3   :  { %v184_v52 = vsel %vm44_vm0, %v140_v49, 0.0  ;;  %v187_v28 = vsel %vm44_vm0, %v141_v51, 0.0  ;;  %1046 = vmatpush3.bf16.msra.mxu0 %v1043_v56 }
  0xb4   :  { %182 = vadd.xlane.f32.xlu1 %v181_v50  ;;  %185 = vadd.xlane.f32.xlu0 %v184_v52 }
  0xb5   :  { %1048 = vmatprep.subr.bf16.mxu0 %v1047_v59 }
  0xb7   :  { %1050 = vmatpush3.bf16.msra.mxu0 %v1047_v59 }
  0xb8   :  { %188 = vadd.xlane.f32.xlu1 %v187_v28  ;;  %1052 = vmatprep.subr.bf16.mxu0 %v1400_v63 }
 0x125   :  { %v144_v7 = vpop.xlane.xlu0 %143 }
 0x126   :  { %v190_v8 = vmul.f32 0.032258064, %v144_v7 }
 0x128   :  { %1075 = vrsqrt.f32 %v190_v8  ;;  %vm230_vm1 = vcmp.eq.f32.partialorder %v190_v8, inf  ;;  %v233_v36 = vand.u32 2147483648, %v190_v8  ;;  %vm232_vm3 = vcmp.eq.f32.partialorder %v190_v8, 0.0 }
 0x129   :  { %v147_v9 = vpop.xlane.xlu1 %146  ;;  %v150_v12 = vpop.xlane.xlu0 %149 }
 0x12a   :  { %v1422_v13 = vmul.f32 0.032258064, %v147_v9  ;;  %v1424_v14 = vmul.f32 0.032258064, %v150_v12 }
 0x12c   :  { %1077 = vrsqrt.f32 %v1422_v13  ;;  %vm237_vm2 = vcmp.eq.f32.partialorder %v1422_v13, inf  ;;  %vm239_vm4 = vcmp.eq.f32.partialorder %v1422_v13, 0.0  ;;  %v240_v45 = vand.u32 2147483648, %v1422_v13 }
 0x12d   :  { %1079 = vrsqrt.f32 %v1424_v14  ;;  %v153_v15 = vpop.xlane.xlu1 %152  ;;  %v156_v18 = vpop.xlane.xlu0 %155  ;;  %vm244_vm5 = vcmp.eq.f32.partialorder %v1424_v14, inf  ;;  %vm246_vm6 = vcmp.eq.f32.partialorder %v1424_v14, 0.0  ;;  %v247_v49 = vand.u32 2147483648, %v1424_v14 }
 0x12e   :  { %v1428_v19 = vmul.f32 0.032258064, %v153_v15  ;;  %v1430_v22 = vmul.f32 0.032258064, %v156_v18 }
 0x130   :  { %1081 = vrsqrt.f32 %v1428_v19  ;;  %vm251_vm7 = vcmp.eq.f32.partialorder %v1428_v19, inf  ;;  %vm253_vm8 = vcmp.eq.f32.partialorder %v1428_v19, 0.0  ;;  %v254_v50 = vand.u32 2147483648, %v1428_v19 }
 0x131   :  { %1083 = vrsqrt.f32 %v1430_v22  ;;  %v159_v26 = vpop.xlane.xlu1 %158  ;;  %v162_v27 = vpop.xlane.xlu0 %161  ;;  %vm258_vm9 = vcmp.eq.f32.partialorder %v1430_v22, inf  ;;  %vm260_vm10 = vcmp.eq.f32.partialorder %v1430_v22, 0.0  ;;  %v261_v53 = vand.u32 2147483648, %v1430_v22 }
 0x132   :  { %v1076_v30 = vpop.eup %1075  ;;  %v1439_v31 = vmul.f32 0.032258064, %v159_v26  ;;  %v1441_v32 = vmul.f32 0.032258064, %v162_v27 }
 0x133   :  { %v229_v38 = vmul.f32 %v1076_v30, %v190_v8 }
 0x134   :  { %1085 = vrsqrt.f32 %v1439_v31  ;;  %vm265_vm11 = vcmp.eq.f32.partialorder %v1439_v31, inf  ;;  %v268_v2 = vand.u32 2147483648, %v1439_v31  ;;  %vm272_vm12 = vcmp.eq.f32.partialorder %v1441_v32, inf }
 0x135   :  { %1087 = vrsqrt.f32 %v1441_v32  ;;  %v165_v37 = vpop.xlane.xlu1 %164  ;;  %v168_v44 = vpop.xlane.xlu0 %167  ;;  %v231_v24 = vsel %vm230_vm1, %v190_v8, %v229_v38  ;;  %vm267_vm13 = vcmp.eq.f32.partialorder %v1439_v31, 0.0  ;;  %v275_v5 = vand.u32 2147483648, %v1441_v32 }
 0x136   :  { %v1078_v41 = vpop.eup %1077  ;;  %v1468_v42 = vmul.f32 0.032258064, %v165_v37  ;;  %v1470_v54 = vmul.f32 0.032258064, %v168_v44  ;;  %v234_v56 = vsel %vm232_vm3, %v233_v36, %v231_v24  ;;  %vm274_vm14 = vcmp.eq.f32.partialorder %v1441_v32, 0.0 }
 0x137   :  { %v1080_v43 = vpop.eup %1079  ;;  %v236_v46 = vmul.f32 %v1078_v41, %v1422_v13  ;;  %v340_v9 = vadd.f32 1e-06, %v234_v56 }
 0x138   :  { %v243_v48 = vmul.f32 %v1080_v43, %v1424_v14  ;;  %1089 = vrsqrt.f32 %v1468_v42  ;;  %vm279_vm15 = vcmp.eq.f32.partialorder %v1468_v42, inf  ;;  %vm286_vm1 = vcmp.eq.f32.partialorder %v1470_v54, inf }
 0x139   :  { %1091 = vrsqrt.f32 %v1470_v54  ;;  %v171_v51 = vpop.xlane.xlu1 %170  ;;  %v174_v52 = vpop.xlane.xlu0 %173  ;;  %v238_v29 = vsel %vm237_vm2, %v1422_v13, %v236_v46  ;;  %v282_v13 = vand.u32 2147483648, %v1468_v42  ;;  %v289_v30 = vand.u32 2147483648, %v1470_v54 }
 0x13a   :  { %v1082_v28 = vpop.eup %1081  ;;  %v245_v58 = vsel %vm244_vm5, %v1424_v14, %v243_v48  ;;  %v1494_v60 = vmul.f32 0.032258064, %v171_v51  ;;  %v1496_v61 = vmul.f32 0.032258064, %v174_v52  ;;  %v241_v4 = vsel %vm239_vm4, %v240_v45, %v238_v29 }
 0x13b   :  { %v1084_v57 = vpop.eup %1083  ;;  %v250_v59 = vmul.f32 %v1082_v28, %v1428_v19  ;;  %v248_v15 = vsel %vm246_vm6, %v247_v49, %v245_v58  ;;  %v341_v44 = vadd.f32 1e-06, %v241_v4  ;;  %vm281_vm2 = vcmp.eq.f32.partialorder %v1468_v42, 0.0 }
 0x13c   :  { %v257_v62 = vmul.f32 %v1084_v57, %v1430_v22  ;;  %1093 = vrsqrt.f32 %v1494_v60  ;;  %vm288_vm3 = vcmp.eq.f32.partialorder %v1470_v54, 0.0  ;;  %vm293_vm4 = vcmp.eq.f32.partialorder %v1494_v60, inf }
 0x13d   :  { %v177_v7 = vpop.xlane.xlu1 %176  ;;  %v180_v8 = vpop.xlane.xlu0 %179  ;;  %v252_v18 = vsel %vm251_vm7, %v1428_v19, %v250_v59  ;;  %1095 = vrsqrt.f32 %v1496_v61  ;;  %v342_v43 = vadd.f32 1e-06, %v248_v15  ;;  %vm295_vm5 = vcmp.eq.f32.partialorder %v1494_v60, 0.0 }
 0x13e   :  { %v1086_v12 = vpop.eup %1085  ;;  %v259_v27 = vsel %vm258_vm9, %v1430_v22, %v257_v62  ;;  %v1523_v36 = vmul.f32 0.032258064, %v177_v7  ;;  %v1525_v37 = vmul.f32 0.032258064, %v180_v8  ;;  %v255_v41 = vsel %vm253_vm8, %v254_v50, %v252_v18 }
 0x13f   :  { %v1088_v26 = vpop.eup %1087  ;;  %v264_v14 = vmul.f32 %v1086_v12, %v1439_v31  ;;  %1097 = vrcp.f32 %v340_v9  ;;  %v262_v24 = vsel %vm260_vm10, %v261_v53, %v259_v27  ;;  %v296_v48 = vand.u32 2147483648, %v1494_v60 }
 0x140   :  { %v271_v38 = vmul.f32 %v1088_v26, %v1441_v32  ;;  %vm300_vm6 = vcmp.eq.f32.partialorder %v1496_v61, inf  ;;  %1099 = vrsqrt.f32 %v1523_v36  ;;  %vm302_vm7 = vcmp.eq.f32.partialorder %v1496_v61, 0.0 }
 0x141   :  { %v183_v45 = vpop.xlane.xlu1 %182  ;;  %v186_v19 = vpop.xlane.xlu0 %185  ;;  %v266_v50 = vsel %vm265_vm11, %v1439_v31, %v264_v14  ;;  %v303_v22 = vand.u32 2147483648, %v1496_v61  ;;  %1101 = vrsqrt.f32 %v1525_v37  ;;  %v343_v29 = vadd.f32 1e-06, %v255_v41 }
 0x142   :  { %v1090_v46 = vpop.eup %1089  ;;  %v273_v52 = vsel %vm272_vm12, %v1441_v32, %v271_v38  ;;  %v1551_v53 = vmul.f32 %v1435_v16, %v1309_v55  ;;  %v1553_v56 = vmul.f32 0.032258064, %v183_v45  ;;  %v1555_v57 = vmul.f32 0.032258064, %v186_v19 }
 0x143   :  { %v1092_v49 = vpop.eup %1091  ;;  %v278_v51 = vmul.f32 %v1090_v46, %v1468_v42  ;;  %v344_v59 = vadd.f32 1e-06, %v262_v24  ;;  %v269_v62 = vsel %vm267_vm13, %v268_v2, %v266_v50  ;;  %vm307_vm8 = vcmp.eq.f32.partialorder %v1523_v36, inf }
 0x144   :  { %v285_v28 = vmul.f32 %v1092_v49, %v1470_v54  ;;  %1103 = vrcp.f32 %v341_v44  ;;  %v276_v8 = vsel %vm274_vm14, %v275_v5, %v273_v52  ;;  %vm309_vm9 = vcmp.eq.f32.partialorder %v1523_v36, 0.0 }
 0x145   :  { %v189_v58 = vpop.xlane.xlu1 %188  ;;  %v280_v55 = vsel %vm279_vm15, %v1468_v42, %v278_v51  ;;  %1105 = vrsqrt.f32 %v1553_v56  ;;  %v310_v12 = vand.u32 2147483648, %v1523_v36  ;;  %vm314_vm10 = vcmp.eq.f32.partialorder %v1525_v37, inf  ;;  %v1596_v42 = vld [vmem:[%s1859_s2] ss:$0 sm:$0xff] }
 0x146   :  { %v1560_v4 = vmul.f32 0.032258064, %v189_v58  ;;  %v1094_v7 = vpop.eup %1093  ;;  %v287_v9 = vsel %vm286_vm1, %v1470_v54, %v285_v28  ;;  %1107 = vrsqrt.f32 %v1555_v57  ;;  %vm316_vm11 = vcmp.eq.f32.partialorder %v1525_v37, 0.0 }
 0x147   :  { %v1096_v31 = vpop.eup %1095  ;;  %v292_v2 = vmul.f32 %v1094_v7, %v1494_v60  ;;  %v283_v5 = vsel %vm281_vm2, %v282_v13, %v280_v55  ;;  %v290_v15 = vsel %vm288_vm3, %v289_v30, %v287_v9  ;;  %v317_v26 = vand.u32 2147483648, %v1525_v37 }
 0x148   :  { %v299_v32 = vmul.f32 %v1096_v31, %v1496_v61  ;;  %1109 = vrsqrt.f32 %v1560_v4  ;;  %vm321_vm12 = vcmp.eq.f32.partialorder %v1553_v56, inf  ;;  %v345_v54 = vadd.f32 1e-06, %v269_v62 }
 0x149   :  { %v294_v18 = vsel %vm293_vm4, %v1494_v60, %v292_v2  ;;  %v1098_v27 = vpop.eup %1097  ;;  %1111 = vrcp.f32 %v342_v43  ;;  %vm323_vm13 = vcmp.eq.f32.partialorder %v1553_v56, 0.0  ;;  %v346_v44 = vadd.f32 1e-06, %v276_v8 }
 0x14a   :  { %v297_v14 = vsel %vm295_vm5, %v296_v48, %v294_v18  ;;  %v301_v38 = vsel %vm300_vm6, %v1496_v61, %v299_v32  ;;  %v1100_v13 = vpop.eup %1099  ;;  %v357_v60 = vmul.f32 %v1098_v27, %v1445_v33  ;;  %1113 = vrcp.f32 %v343_v29 }
 0x14b   :  { %v304_v30 = vsel %vm302_vm7, %v303_v22, %v301_v38  ;;  %v306_v41 = vmul.f32 %v1100_v13, %v1523_v36  ;;  %1115 = vrcp.f32 %v344_v59  ;;  %v347_v45 = vadd.f32 1e-06, %v283_v5  ;;  %v1102_v24 = vpop.eup %1101 }
 0x14c   :  { %v348_v46 = vadd.f32 1e-06, %v290_v15  ;;  %v324_v48 = vand.u32 2147483648, %v1553_v56  ;;  %v394_v43 = vadd.f32 %v1596_v42, %v357_v60  ;;  %1117 = vrcp.f32 %v345_v54 }
 0x14d   :  { %v349_v19 = vadd.f32 1e-06, %v297_v14  ;;  %v308_v61 = vsel %vm307_vm8, %v1523_v36, %v306_v41  ;;  %v313_v33 = vmul.f32 %v1102_v24, %v1525_v37  ;;  %1119 = vrcp.f32 %v346_v44 }
 0x14e   :  { %v350_v49 = vadd.f32 1e-06, %v304_v30  ;;  %v1104_v50 = vpop.eup %1103  ;;  %v311_v51 = vsel %vm309_vm9, %v310_v12, %v308_v61  ;;  %vm328_vm14 = vcmp.eq.f32.partialorder %v1555_v57, inf  ;;  %vm330_vm15 = vcmp.eq.f32.partialorder %v1555_v57, 0.0  ;;  %979 = vmatprep.mubr.msk.f32.mxu0 %vm44_vm0, %v394_v43 }
 0x14f   :  { %1121 = vrcp.f32 %v347_v45  ;;  %v1106_v22 = vpop.eup %1105  ;;  %v315_v52 = vsel %vm314_vm10, %v1525_v37, %v313_v33  ;;  %v359_v28 = vmul.f32 %v1104_v50, %v1453_v20  ;;  %v351_v29 = vadd.f32 1e-06, %v311_v51 }
 0x150   :  { %1123 = vrcp.f32 %v348_v46  ;;  %v1108_v58 = vpop.eup %1107  ;;  %v318_v36 = vsel %vm316_vm11, %v317_v26, %v315_v52  ;;  %v320_v59 = vmul.f32 %v1106_v22, %v1553_v56  ;;  %v331_v62 = vand.u32 2147483648, %v1555_v57 }
 0x151   :  { %1125 = vrcp.f32 %v349_v19  ;;  %v327_v8 = vmul.f32 %v1108_v58, %v1555_v57  ;;  %v395_v55 = vadd.f32 %v1596_v42, %v359_v28  ;;  %v352_v9 = vadd.f32 1e-06, %v318_v36 }
 0x152   :  { %v1110_v7 = vpop.eup %1109  ;;  %1127 = vrcp.f32 %v350_v49  ;;  %v322_v20 = vsel %vm321_vm12, %v1553_v56, %v320_v59  ;;  %vm335_vm1 = vcmp.eq.f32.partialorder %v1560_v4, inf  ;;  %vm337_vm2 = vcmp.eq.f32.partialorder %v1560_v4, 0.0 }
 0x153   :  { %v334_v31 = vmul.f32 %v1110_v7, %v1560_v4  ;;  %v1112_v37 = vpop.eup %1111  ;;  %v325_v2 = vsel %vm323_vm13, %v324_v48, %v322_v20  ;;  %v329_v12 = vsel %vm328_vm14, %v1555_v57, %v327_v8  ;;  %v338_v32 = vand.u32 2147483648, %v1560_v4  ;;  %980 = vmatmul.mubr.msk.f32.vlgmr.msra.gmra.mrb[0].mxu0 %vm44_vm0, %v395_v55 }
 0x154   :  { %1129 = vrcp.f32 %v351_v29  ;;  %v1114_v5 = vpop.eup %1113  ;;  %v332_v15 = vsel %vm330_vm15, %v331_v62, %v329_v12  ;;  %v361_v26 = vmul.f32 %v1112_v37, %v1449_v34  ;;  %v353_v27 = vadd.f32 1e-06, %v325_v2  ;;  %1054 = vmatpush3.bf16.msra.mxu0 %v1400_v63 }
 0x155   :  { %v336_v18 = vsel %vm335_vm1, %v1560_v4, %v334_v31  ;;  %v1116_v56 = vpop.eup %1115  ;;  %v354_v14 = vadd.f32 1e-06, %v332_v15  ;;  %v363_v54 = vmul.f32 %v1114_v5, %v1457_v39  ;;  %1131 = vrcp.f32 %v352_v9  ;;  %1056 = vmatprep.subr.bf16.mxu0 %v1407_v3 }
 0x156   :  { %v339_v38 = vsel %vm337_vm2, %v338_v32, %v336_v18  ;;  %v1118_v13 = vpop.eup %1117  ;;  %v218_v57 = vmul.f32 %v1435_v16, %v1318_v0  ;;  %v396_v30 = vadd.f32 %v1596_v42, %v361_v26  ;;  %v365_v4 = vmul.f32 %v1116_v56, %v1461_v40 }
 0x157   :  { %v1120_v34 = vpop.eup %1119  ;;  %v219_v63 = vmul.f32 %v1435_v16, %v1321_v1  ;;  %v220_v60 = vmul.f32 %v1435_v16, %v1330_v10  ;;  %v397_v39 = vadd.f32 %v1596_v42, %v363_v54  ;;  %v367_v44 = vmul.f32 %v1118_v13, %v1551_v53 }
 0x158   :  { %v355_v45 = vadd.f32 1e-06, %v339_v38  ;;  %982 = vmatprep.mubr.msk.f32.mxu0 %vm44_vm0, %v396_v30  ;;  %v398_v0 = vadd.f32 %v1596_v42, %v365_v4  ;;  %v369_v46 = vmul.f32 %v1120_v34, %v218_v57  ;;  %1133 = vrcp.f32 %v353_v27  ;;  %1058 = vmatpush3.bf16.msra.mxu0 %v1407_v3 }
 0x159   :  { %v1122_v41 = vpop.eup %1121  ;;  %983 = vmatmul.mubr.msk.f32.gmra.mrb[2].mxu0 %vm44_vm0, %v397_v39  ;;  %v399_v1 = vadd.f32 %v1596_v42, %v367_v44  ;;  %1135 = vrcp.f32 %v354_v14  ;;  %1060 = vmatprep.subr.bf16.mxu0 %v1417_v6  ;;  %v221_v19 = vmul.f32 %v1435_v16, %v1333_v11  ;;  %v222_v3 = vmul.f32 %v1435_v16, %v1342_v23 }
 0x15a   :  { %v1124_v40 = vpop.eup %1123  ;;  %v371_v10 = vmul.f32 %v1122_v41, %v219_v63  ;;  %985 = vmatprep.mubr.msk.f32.mxu0 %vm44_vm0, %v398_v0  ;;  %v400_v24 = vadd.f32 %v1596_v42, %v369_v46  ;;  %1137 = vrcp.f32 %v355_v45  ;;  %v223_v11 = vmul.f32 %v1435_v16, %v1345_v17 }
 0x15b   :  { %v1126_v53 = vpop.eup %1125  ;;  %v373_v48 = vmul.f32 %v1124_v40, %v220_v60  ;;  %v224_v23 = vmul.f32 %v1435_v16, %v1354_v35  ;;  %v225_v59 = vmul.f32 %v1435_v16, %v1357_v21  ;;  %v226_v17 = vmul.f32 %v1435_v16, %v1366_v47 }
 0x15c   :  { %v1128_v43 = vpop.eup %1127  ;;  %1062 = vmatpush3.bf16.msra.mxu0 %v1417_v6  ;;  %v401_v33 = vadd.f32 %v1596_v42, %v371_v10  ;;  %v375_v49 = vmul.f32 %v1126_v53, %v221_v19  ;;  %v227_v9 = vmul.f32 %v1435_v16, %v1369_v25  ;;  %v636_v25 = vld [vmem:[%s1857_s5 + $0x30] sm:$0xff]  ;;  %v637_v16 = vld [vmem:[%s1857_s5 + $0x38] sm:$0xff]  ;;  %vm638_vm3 = vcmask 523264  }
 0x15d   :  { %986 = vmatmul.mubr.msk.f32.gmra.mrb[4].mxu0 %vm44_vm0, %v399_v1  ;;  %v402_v50 = vadd.f32 %v1596_v42, %v373_v48  ;;  %v377_v51 = vmul.f32 %v1128_v43, %v222_v3  ;;  %v1063_v37 = vpack.c.bf16 %v637_v16, %v636_v25  ;;  %v1142_v16 = vld [vmem:[%s1855_s0 + $0x10] sm:$0xff] }
 0x15e   :  { %v1130_v61 = vpop.eup %1129  ;;  %988 = vmatprep.mubr.msk.f32.mxu0 %vm44_vm0, %v400_v24  ;;  %v403_v6 = vadd.f32 %v1596_v42, %v375_v49 }
 0x15f   :  { %v1132_v22 = vpop.eup %1131  ;;  %v379_v52 = vmul.f32 %v1130_v61, %v223_v11  ;;  %v404_v29 = vadd.f32 %v1596_v42, %v377_v51  ;;  %1064 = vmatprep.subr.bf16.mxu0 %v1063_v37  ;;  %1070 = vmatprep.subr.bf16.mxu1 %v1063_v37 }
 0x160   :  { %v381_v58 = vmul.f32 %v1132_v22, %v224_v23  ;;  %1066 = vmatpush3.bf16.msra.mxu0 %v1063_v37  ;;  %1074 = vmatpush3.bf16.msra.mxu1 %v1063_v37 }
 0x161   :  { %989 = vmatmul.mubr.msk.f32.gmra.mrb[6].mxu0 %vm44_vm0, %v401_v33  ;;  %v405_v35 = vadd.f32 %v1596_v42, %v379_v52 }
 0x162   :  { %v1134_v28 = vpop.eup %1133  ;;  %991 = vmatprep.mubr.msk.f32.mxu0 %vm44_vm0, %v402_v50  ;;  %v406_v8 = vadd.f32 %v1596_v42, %v381_v58 }
 0x163   :  { %v1136_v36 = vpop.eup %1135  ;;  %v383_v62 = vmul.f32 %v1134_v28, %v225_v59 }
 0x164   :  { %v1138_v7 = vpop.eup %1137  ;;  %v385_v55 = vmul.f32 %v1136_v36, %v226_v17  ;;  %v1725_v17 = vld [vmem:[%s1861_s6] ss:$0 sm:$0xff] }
 0x165   :  { %992 = vmatmul.mubr.msk.f32.gmra.mrb[8].mxu0 %vm44_vm0, %v403_v6  ;;  %v407_v21 = vadd.f32 %v1596_v42, %v383_v62  ;;  %v387_v20 = vmul.f32 %v1138_v7, %v227_v9 }
 0x166   :  { %994 = vmatprep.mubr.msk.f32.mxu0 %vm44_vm0, %v404_v29  ;;  %v408_v47 = vadd.f32 %v1596_v42, %v385_v55 }
 0x167   :  { %v409_v31 = vadd.f32 %v1596_v42, %v387_v20  ;;  %v893_v42 = vld [vmem:[%s1860_s4] ss:$0 sm:$0xff] }
 0x169   :  { %995 = vmatmul.mubr.msk.f32.gmra.mrb[10].mxu0 %vm44_vm0, %v405_v35  ;;  %v1139_v35 = vld [vmem:[%s1855_s0 + $0x8] sm:$0xff] }
 0x16a   :  { %997 = vmatprep.mubr.msk.f32.mxu0 %vm44_vm0, %v406_v8  ;;  %v1140_v8 = vld [vmem:[%s1855_s0] sm:$0xff] }
 0x16d   :  { %998 = vmatmul.mubr.msk.f32.gmra.mrb[12].mxu0 %vm44_vm0, %v407_v21 }
 0x16e   :  { %1000 = vmatprep.mubr.msk.f32.mxu0 %vm44_vm0, %v408_v47  ;;  %v1141_v47 = vld [vmem:[%s1855_s0 + $0x18] sm:$0xff] }
 0x171   :  { %1001 = vmatmul.mubr.msk.f32.gmra.mrb[14].mxu0 %vm44_vm0, %v409_v31 }
 0x226   :  { %v981_v2 = vpop.f32.mrb[0].mxu0 }
 0x227   :  { %v541_v12 = vadd.f32 %v981_v2, %v893_v42  ;;  %v535_v32 = vpop.f32.mrb[1].mxu0 }
 0x228   :  { %v536_v5 = vadd.f32 %v893_v42, %v535_v32  ;;  %v1143_v32 = vld [vmem:[%s1855_s0 + $0x28] sm:$0xff] }
 0x229   :  { %v615_v18 = vmax.f32 %v541_v12, 0.0 }
 0x22a   :  { %v614_v15 = vmax.f32 %v536_v5, 0.0 }
 0x22c   :  { %v984_v26 = vpop.f32.mrb[2].mxu0  ;;  %1019 = vmatprep.mubr.msk.f32.mxu0 %vm638_vm3, %v614_v15 }
 0x22d   :  { %v551_v27 = vadd.f32 %v984_v26, %v893_v42  ;;  %v545_v56 = vpop.f32.mrb[3].mxu0  ;;  %1020 = vmatmul.mubr.msk.f32.vlgmr.msra.gmra.mrb[16].mxu0 %vm638_vm3, %v615_v18  ;;  %v1144_v18 = vld [vmem:[%s1855_s0 + $0x20] sm:$0xff] }
 0x22e   :  { %v546_v14 = vadd.f32 %v893_v42, %v545_v56 }
 0x22f   :  { %v617_v13 = vmax.f32 %v551_v27, 0.0 }
 0x230   :  { %v616_v38 = vmax.f32 %v546_v14, 0.0  ;;  %v987_v54 = vpop.f32.mrb[4].mxu0 }
 0x231   :  { %v561_v57 = vadd.f32 %v987_v54, %v893_v42  ;;  %v555_v30 = vpop.f32.mrb[5].mxu0 }
 0x232   :  { %v556_v4 = vadd.f32 %v893_v42, %v555_v30  ;;  %1022 = vmatprep.mubr.msk.f32.mxu1 %vm638_vm3, %v616_v38  ;;  %v1145_v38 = vld [vmem:[%s1855_s0 + $0x38] sm:$0xff] }
 0x233   :  { %1023 = vmatmul.mubr.msk.f32.vlgmr.msra.gmra.mrb[0].mxu1 %vm638_vm3, %v617_v13  ;;  %v619_v60 = vmax.f32 %v561_v57, 0.0  ;;  %v1146_v57 = vld [vmem:[%s1855_s0 + $0x30] sm:$0xff] }
 0x234   :  { %v618_v34 = vmax.f32 %v556_v4, 0.0  ;;  %v990_v63 = vpop.f32.mrb[6].mxu0 }
 0x235   :  { %v571_v39 = vadd.f32 %v990_v63, %v893_v42  ;;  %v565_v44 = vpop.f32.mrb[7].mxu0 }
 0x236   :  { %v566_v41 = vadd.f32 %v893_v42, %v565_v44  ;;  %1025 = vmatprep.mubr.msk.f32.mxu1 %vm638_vm3, %v618_v34 }
 0x237   :  { %1026 = vmatmul.mubr.msk.f32.gmra.mrb[2].mxu1 %vm638_vm3, %v619_v60  ;;  %v621_v46 = vmax.f32 %v571_v39, 0.0  ;;  %v1147_v60 = vld [vmem:[%s1855_s0 + $0x48] sm:$0xff] }
 0x238   :  { %v620_v45 = vmax.f32 %v566_v41, 0.0  ;;  %v993_v0 = vpop.f32.mrb[8].mxu0  ;;  %v1148_v41 = vld [vmem:[%s1855_s0 + $0x40] sm:$0xff] }
 0x239   :  { %v581_v40 = vadd.f32 %v993_v0, %v893_v42  ;;  %v575_v1 = vpop.f32.mrb[9].mxu0 }
 0x23a   :  { %v576_v10 = vadd.f32 %v893_v42, %v575_v1  ;;  %1028 = vmatprep.mubr.msk.f32.mxu1 %vm638_vm3, %v620_v45  ;;  %v1149_v1 = vld [vmem:[%s1855_s0 + $0x58] sm:$0xff] }
 0x23b   :  { %1029 = vmatmul.mubr.msk.f32.gmra.mrb[4].mxu1 %vm638_vm3, %v621_v46  ;;  %v623_v48 = vmax.f32 %v581_v40, 0.0 }
 0x23c   :  { %v622_v53 = vmax.f32 %v576_v10, 0.0  ;;  %v996_v24 = vpop.f32.mrb[10].mxu0 }
 0x23d   :  { %v591_v43 = vadd.f32 %v996_v24, %v893_v42  ;;  %v585_v19 = vpop.f32.mrb[11].mxu0  ;;  %v1150_v24 = vld [vmem:[%s1855_s0 + $0x50] sm:$0xff] }
 0x23e   :  { %v586_v3 = vadd.f32 %v893_v42, %v585_v19  ;;  %1031 = vmatprep.mubr.msk.f32.mxu1 %vm638_vm3, %v622_v53 }
 0x23f   :  { %1032 = vmatmul.mubr.msk.f32.gmra.mrb[6].mxu1 %vm638_vm3, %v623_v48  ;;  %v625_v49 = vmax.f32 %v591_v43, 0.0 }
 0x240   :  { %v624_v61 = vmax.f32 %v586_v3, 0.0  ;;  %v999_v33 = vpop.f32.mrb[12].mxu0 }
 0x241   :  { %v601_v50 = vadd.f32 %v999_v33, %v893_v42  ;;  %v595_v51 = vpop.f32.mrb[13].mxu0 }
 0x242   :  { %v596_v22 = vadd.f32 %v893_v42, %v595_v51  ;;  %1034 = vmatprep.mubr.msk.f32.mxu1 %vm638_vm3, %v624_v61  ;;  %v1151_v61 = vld [vmem:[%s1855_s0 + $0x68] sm:$0xff] }
 0x243   :  { %1035 = vmatmul.mubr.msk.f32.gmra.mrb[8].mxu1 %vm638_vm3, %v625_v49  ;;  %v627_v6 = vmax.f32 %v601_v50, 0.0  ;;  %v1152_v50 = vld [vmem:[%s1855_s0 + $0x60] sm:$0xff] }
 0x244   :  { %v626_v11 = vmax.f32 %v596_v22, 0.0  ;;  %v1002_v23 = vpop.f32.mrb[14].mxu0 }
 0x245   :  { %v611_v52 = vadd.f32 %v1002_v23, %v893_v42  ;;  %v605_v28 = vpop.f32.mrb[15].mxu0 }
 0x246   :  { %v606_v29 = vadd.f32 %v893_v42, %v605_v28  ;;  %1037 = vmatprep.mubr.msk.f32.mxu1 %vm638_vm3, %v626_v11 }
 0x247   :  { %1038 = vmatmul.mubr.msk.f32.gmra.mrb[10].mxu1 %vm638_vm3, %v627_v6  ;;  %v629_v36 = vmax.f32 %v611_v52, 0.0  ;;  %v1153_v6 = vld [vmem:[%s1855_s0 + $0x78] sm:$0xff] }
 0x248   :  { %v628_v58 = vmax.f32 %v606_v29, 0.0  ;;  %v1154_v29 = vld [vmem:[%s1855_s0 + $0x70] sm:$0xff] }
 0x24a   :  { %1040 = vmatprep.mubr.msk.f32.mxu1 %vm638_vm3, %v628_v58 }
 0x24b   :  { %1041 = vmatmul.mubr.msk.f32.gmra.mrb[12].mxu1 %vm638_vm3, %v629_v36 }
 0x300   :  { %v1021_v59 = vpop.f32.mrb[16].mxu0 }
 0x301   :  { %v833_v62 = vadd.f32 %v1139_v35, %v1021_v59  ;;  %v753_v7 = vpop.f32.mrb[17].mxu0 }
 0x302   :  { %v832_v55 = vadd.f32 %v1140_v8, %v753_v7 }
 0x303   :  { %v856_v9 = vadd.f32 %v1725_v17, %v833_v62 }
 0x304   :  { %v855_v21 = vadd.f32 %v1725_v17, %v832_v55 }
 0x305   :  { %872 = vst.msk [vmem:[%s1862_s7 + $0x8] sm:$0xff] %vm44_vm0, %v856_v9 }
 0x306   :  { %871 = vst.msk [vmem:[%s1862_s7] sm:$0xff] %vm44_vm0, %v855_v21  ;;  %v1024_v20 = vpop.f32.mrb[0].mxu1 }
 0x307   :  { %v835_v31 = vadd.f32 %v1141_v47, %v1024_v20  ;;  %v763_v25 = vpop.f32.mrb[1].mxu1 }
 0x308   :  { %v834_v37 = vadd.f32 %v1142_v16, %v763_v25 }
 0x309   :  { %v858_v42 = vadd.f32 %v1725_v17, %v835_v31 }
 0x30a   :  { %v857_v2 = vadd.f32 %v1725_v17, %v834_v37  ;;  %v1027_v12 = vpop.f32.mrb[2].mxu1 }
 0x30b   :  { %874 = vst.msk [vmem:[%s1862_s7 + $0x18] sm:$0xff] %vm44_vm0, %v858_v42  ;;  %v837_v5 = vadd.f32 %v1143_v32, %v1027_v12  ;;  %v773_v15 = vpop.f32.mrb[3].mxu1 }
 0x30c   :  { %873 = vst.msk [vmem:[%s1862_s7 + $0x10] sm:$0xff] %vm44_vm0, %v857_v2  ;;  %v836_v26 = vadd.f32 %v1144_v18, %v773_v15 }
 0x30d   :  { %v860_v27 = vadd.f32 %v1725_v17, %v837_v5 }
 0x30e   :  { %v859_v56 = vadd.f32 %v1725_v17, %v836_v26  ;;  %v1030_v14 = vpop.f32.mrb[4].mxu1 }
 0x30f   :  { %876 = vst.msk [vmem:[%s1862_s7 + $0x28] sm:$0xff] %vm44_vm0, %v860_v27  ;;  %v839_v54 = vadd.f32 %v1145_v38, %v1030_v14  ;;  %v783_v13 = vpop.f32.mrb[5].mxu1 }
 0x310   :  { %875 = vst.msk [vmem:[%s1862_s7 + $0x20] sm:$0xff] %vm44_vm0, %v859_v56  ;;  %v838_v30 = vadd.f32 %v1146_v57, %v783_v13 }
 0x311   :  { %v862_v4 = vadd.f32 %v1725_v17, %v839_v54 }
 0x312   :  { %v861_v34 = vadd.f32 %v1725_v17, %v838_v30  ;;  %v1033_v63 = vpop.f32.mrb[6].mxu1 }
 0x313   :  { %878 = vst.msk [vmem:[%s1862_s7 + $0x38] sm:$0xff] %vm44_vm0, %v862_v4  ;;  %v841_v39 = vadd.f32 %v1147_v60, %v1033_v63  ;;  %v793_v44 = vpop.f32.mrb[7].mxu1 }
 0x314   :  { %877 = vst.msk [vmem:[%s1862_s7 + $0x30] sm:$0xff] %vm44_vm0, %v861_v34  ;;  %v840_v45 = vadd.f32 %v1148_v41, %v793_v44 }
 0x315   :  { %v864_v0 = vadd.f32 %v1725_v17, %v841_v39 }
 0x316   :  { %v863_v46 = vadd.f32 %v1725_v17, %v840_v45  ;;  %v1036_v40 = vpop.f32.mrb[8].mxu1 }
 0x317   :  { %880 = vst.msk [vmem:[%s1862_s7 + $0x48] sm:$0xff] %vm44_vm0, %v864_v0  ;;  %v843_v10 = vadd.f32 %v1149_v1, %v1036_v40  ;;  %v803_v53 = vpop.f32.mrb[9].mxu1 }
 0x318   :  { %879 = vst.msk [vmem:[%s1862_s7 + $0x40] sm:$0xff] %vm44_vm0, %v863_v46  ;;  %v842_v48 = vadd.f32 %v1150_v24, %v803_v53 }
 0x319   :  { %v866_v43 = vadd.f32 %v1725_v17, %v843_v10 }
 0x31a   :  { %v865_v19 = vadd.f32 %v1725_v17, %v842_v48  ;;  %v1039_v3 = vpop.f32.mrb[10].mxu1 }
 0x31b   :  { %882 = vst.msk [vmem:[%s1862_s7 + $0x58] sm:$0xff] %vm44_vm0, %v866_v43  ;;  %v845_v33 = vadd.f32 %v1151_v61, %v1039_v3  ;;  %v813_v49 = vpop.f32.mrb[11].mxu1 }
 0x31c   :  { %881 = vst.msk [vmem:[%s1862_s7 + $0x50] sm:$0xff] %vm44_vm0, %v865_v19  ;;  %v844_v51 = vadd.f32 %v1152_v50, %v813_v49 }
 0x31d   :  { %v868_v22 = vadd.f32 %v1725_v17, %v845_v33 }
 0x31e   :  { %v867_v11 = vadd.f32 %v1725_v17, %v844_v51  ;;  %v1042_v23 = vpop.f32.mrb[12].mxu1 }
 0x31f   :  { %884 = vst.msk [vmem:[%s1862_s7 + $0x68] sm:$0xff] %vm44_vm0, %v868_v22  ;;  %v847_v52 = vadd.f32 %v1153_v6, %v1042_v23  ;;  %v823_v28 = vpop.f32.mrb[13].mxu1 }
 0x320   :  { %883 = vst.msk [vmem:[%s1862_s7 + $0x60] sm:$0xff] %vm44_vm0, %v867_v11  ;;  %v846_v58 = vadd.f32 %v1154_v29, %v823_v28 }
 0x321   :  { %v870_v36 = vadd.f32 %v1725_v17, %v847_v52 }
 0x322   :  { %v869_v59 = vadd.f32 %v1725_v17, %v846_v58 }
 0x323   :  { %886 = vst.msk [vmem:[%s1862_s7 + $0x78] sm:$0xff] %vm44_vm0, %v870_v36 }
 0x324   :  { %885 = vst.msk [vmem:[%s1862_s7 + $0x70] sm:$0xff] %vm44_vm0, %v869_v59 }

// kernel: transformer_forward.33
= control target key start
LH: loop header
LB: loop body
LE: loop exit
PB: predicated region body
PF: predicated region fallthrough
CT: control target
= control target key end

     0   :  { %vm32_vm0 = vcmask 261120   ;;  %s951_s0 = inlined_call_operand.vmem [shape: f32[128,32], index: 0, kind: input, shape index: {}]   ;;  %s952_s1 = inlined_call_operand.vmem [shape: f32[1,32], index: 1, kind: input, shape index: {}]   ;;  %s953_s2 = inlined_call_operand.vmem [shape: f32[1,32], index: 2, kind: input, shape index: {}]   ;;  %s954_s3 = inlined_call_operand.vmem [shape: f32[128,32], index: 3, kind: output, shape index: {}]  }
   0x1   :  { %v14_v0 = vld [vmem:[%s951_s0] sm:$0xff]  ;;  %v16_v1 = vld [vmem:[%s951_s0 + $0x10] sm:$0xff]  ;;  %v15_v2 = vld [vmem:[%s951_s0 + $0x8] sm:$0xff] }
   0x2   :  { %v33_v3 = vsel %vm32_vm0, %v14_v0, 0.0  ;;  %v39_v4 = vsel %vm32_vm0, %v16_v1, 0.0  ;;  %v17_v5 = vld [vmem:[%s951_s0 + $0x18] sm:$0xff]  ;;  %v36_v6 = vsel %vm32_vm0, %v15_v2, 0.0  ;;  %v18_v8 = vld [vmem:[%s951_s0 + $0x20] sm:$0xff]  ;;  %v19_v9 = vld [vmem:[%s951_s0 + $0x28] sm:$0xff] }
   0x3   :  { %34 = vadd.xlane.f32.xlu0 %v33_v3  ;;  %40 = vadd.xlane.f32.xlu1 %v39_v4  ;;  %v42_v7 = vsel %vm32_vm0, %v17_v5, 0.0  ;;  %v45_v10 = vsel %vm32_vm0, %v18_v8, 0.0  ;;  %v48_v11 = vsel %vm32_vm0, %v19_v9, 0.0  ;;  %v531_v12 = vld [vmem:[%s951_s0 + $0x30] sm:$0xff]  ;;  %v536_v13 = vld [vmem:[%s951_s0 + $0x38] sm:$0xff]  ;;  %v545_v16 = vld [vmem:[%s951_s0 + $0x40] sm:$0xff] }
   0x4   :  { %v51_v14 = vsel %vm32_vm0, %v531_v12, 0.0  ;;  %v54_v15 = vsel %vm32_vm0, %v536_v13, 0.0  ;;  %v550_v17 = vld [vmem:[%s951_s0 + $0x48] sm:$0xff]  ;;  %v57_v18 = vsel %vm32_vm0, %v545_v16, 0.0  ;;  %v559_v20 = vld [vmem:[%s951_s0 + $0x50] sm:$0xff]  ;;  %v564_v21 = vld [vmem:[%s951_s0 + $0x58] sm:$0xff] }
   0x5   :  { %v60_v19 = vsel %vm32_vm0, %v550_v17, 0.0  ;;  %v63_v22 = vsel %vm32_vm0, %v559_v20, 0.0  ;;  %v66_v23 = vsel %vm32_vm0, %v564_v21, 0.0  ;;  %v573_v24 = vld [vmem:[%s951_s0 + $0x60] sm:$0xff]  ;;  %v578_v25 = vld [vmem:[%s951_s0 + $0x68] sm:$0xff]  ;;  %v587_v28 = vld [vmem:[%s951_s0 + $0x70] sm:$0xff] }
   0x6   :  { %v69_v26 = vsel %vm32_vm0, %v573_v24, 0.0  ;;  %v72_v27 = vsel %vm32_vm0, %v578_v25, 0.0  ;;  %v592_v29 = vld [vmem:[%s951_s0 + $0x78] sm:$0xff]  ;;  %v75_v30 = vsel %vm32_vm0, %v587_v28, 0.0 }
   0x7   :  { %37 = vadd.xlane.f32.xlu0 %v36_v6  ;;  %43 = vadd.xlane.f32.xlu1 %v42_v7  ;;  %v78_v31 = vsel %vm32_vm0, %v592_v29, 0.0 }
   0xb   :  { %46 = vadd.xlane.f32.xlu0 %v45_v10  ;;  %49 = vadd.xlane.f32.xlu1 %v48_v11 }
   0xf   :  { %52 = vadd.xlane.f32.xlu0 %v51_v14  ;;  %55 = vadd.xlane.f32.xlu1 %v54_v15 }
  0x13   :  { %58 = vadd.xlane.f32.xlu0 %v57_v18  ;;  %61 = vadd.xlane.f32.xlu1 %v60_v19 }
  0x17   :  { %64 = vadd.xlane.f32.xlu0 %v63_v22  ;;  %67 = vadd.xlane.f32.xlu1 %v66_v23 }
  0x1b   :  { %70 = vadd.xlane.f32.xlu0 %v69_v26  ;;  %73 = vadd.xlane.f32.xlu1 %v72_v27 }
  0x1f   :  { %76 = vadd.xlane.f32.xlu0 %v75_v30  ;;  %79 = vadd.xlane.f32.xlu1 %v78_v31 }
  0x90   :  { %v35_v32 = vpop.xlane.xlu0 %34  ;;  %v41_v33 = vpop.xlane.xlu1 %40 }
  0x91   :  { %v82_v34 = vmul.f32 0.03125, %v35_v32  ;;  %v84_v35 = vmul.f32 0.03125, %v41_v33 }
  0x93   :  { %v598_v36 = vsub.f32 %v14_v0, %v82_v34  ;;  %v600_v37 = vsub.f32 %v16_v1, %v84_v35 }
  0x94   :  { %v38_v38 = vpop.xlane.xlu0 %37  ;;  %v44_v39 = vpop.xlane.xlu1 %43 }
  0x95   :  { %v83_v40 = vmul.f32 0.03125, %v38_v38  ;;  %v85_v41 = vmul.f32 0.03125, %v44_v39  ;;  %v114_v42 = vmul.f32 %v598_v36, %v598_v36  ;;  %v116_v43 = vmul.f32 %v600_v37, %v600_v37 }
  0x97   :  { %v606_v44 = vsub.f32 %v15_v2, %v83_v40  ;;  %v608_v45 = vsub.f32 %v17_v5, %v85_v41  ;;  %v130_v46 = vsel %vm32_vm0, %v114_v42, 0.0  ;;  %v136_v51 = vsel %vm32_vm0, %v116_v43, 0.0 }
  0x98   :  { %v47_v47 = vpop.xlane.xlu0 %46  ;;  %v50_v48 = vpop.xlane.xlu1 %49  ;;  %131 = vadd.xlane.f32.xlu0 %v130_v46 }
  0x99   :  { %v86_v49 = vmul.f32 0.03125, %v47_v47  ;;  %v87_v50 = vmul.f32 0.03125, %v50_v48  ;;  %v115_v52 = vmul.f32 %v606_v44, %v606_v44  ;;  %v117_v53 = vmul.f32 %v608_v45, %v608_v45 }
  0x9b   :  { %v616_v54 = vsub.f32 %v18_v8, %v86_v49  ;;  %v618_v55 = vsub.f32 %v19_v9, %v87_v50  ;;  %v133_v56 = vsel %vm32_vm0, %v115_v52, 0.0  ;;  %v139_v61 = vsel %vm32_vm0, %v117_v53, 0.0 }
  0x9c   :  { %v53_v57 = vpop.xlane.xlu0 %52  ;;  %v56_v58 = vpop.xlane.xlu1 %55  ;;  %137 = vadd.xlane.f32.xlu0 %v136_v51  ;;  %134 = vadd.xlane.f32.xlu1 %v133_v56 }
  0x9d   :  { %v88_v59 = vmul.f32 0.03125, %v53_v57  ;;  %v89_v60 = vmul.f32 0.03125, %v56_v58  ;;  %v118_v62 = vmul.f32 %v616_v54, %v616_v54  ;;  %v119_v63 = vmul.f32 %v618_v55, %v618_v55 }
  0x9f   :  { %v627_v0 = vsub.f32 %v531_v12, %v88_v59  ;;  %v630_v1 = vsub.f32 %v536_v13, %v89_v60  ;;  %v142_v2 = vsel %vm32_vm0, %v118_v62, 0.0  ;;  %v145_v7 = vsel %vm32_vm0, %v119_v63, 0.0  ;;  %v691_v62 = vld [vmem:[%s952_s1] ss:$0 sm:$0xff] }
  0xa0   :  { %v59_v3 = vpop.xlane.xlu0 %58  ;;  %v62_v4 = vpop.xlane.xlu1 %61  ;;  %140 = vadd.xlane.f32.xlu1 %v139_v61  ;;  %143 = vadd.xlane.f32.xlu0 %v142_v2 }
  0xa1   :  { %v90_v5 = vmul.f32 0.03125, %v59_v3  ;;  %v91_v6 = vmul.f32 0.03125, %v62_v4  ;;  %v120_v8 = vmul.f32 %v627_v0, %v627_v0  ;;  %v121_v9 = vmul.f32 %v630_v1, %v630_v1 }
  0xa2   :  { %v700_v3 = vmul.f32 %v691_v62, %v598_v36  ;;  %v704_v4 = vmul.f32 %v691_v62, %v600_v37  ;;  %v721_v37 = vmul.f32 %v691_v62, %v616_v54 }
  0xa3   :  { %v639_v10 = vsub.f32 %v545_v16, %v90_v5  ;;  %v642_v11 = vsub.f32 %v550_v17, %v91_v6  ;;  %v148_v12 = vsel %vm32_vm0, %v120_v8, 0.0  ;;  %v151_v19 = vsel %vm32_vm0, %v121_v9, 0.0 }
  0xa4   :  { %v65_v13 = vpop.xlane.xlu0 %64  ;;  %v68_v14 = vpop.xlane.xlu1 %67  ;;  %146 = vadd.xlane.f32.xlu1 %v145_v7  ;;  %149 = vadd.xlane.f32.xlu0 %v148_v12  ;;  %v709_v8 = vmul.f32 %v691_v62, %v606_v44  ;;  %v713_v9 = vmul.f32 %v691_v62, %v608_v45 }
  0xa5   :  { %v92_v15 = vmul.f32 0.03125, %v65_v13  ;;  %v93_v18 = vmul.f32 0.03125, %v68_v14  ;;  %v122_v22 = vmul.f32 %v639_v10, %v639_v10  ;;  %v123_v16 = vmul.f32 %v642_v11, %v642_v11 }
  0xa7   :  { %v651_v23 = vsub.f32 %v559_v20, %v92_v15  ;;  %v654_v17 = vsub.f32 %v564_v21, %v93_v18  ;;  %v154_v26 = vsel %vm32_vm0, %v122_v22, 0.0  ;;  %v157_v33 = vsel %vm32_vm0, %v123_v16, 0.0 }
  0xa8   :  { %v71_v27 = vpop.xlane.xlu0 %70  ;;  %v74_v30 = vpop.xlane.xlu1 %73  ;;  %152 = vadd.xlane.f32.xlu1 %v151_v19  ;;  %155 = vadd.xlane.f32.xlu0 %v154_v26 }
  0xa9   :  { %v94_v31 = vmul.f32 0.03125, %v71_v27  ;;  %v95_v32 = vmul.f32 0.03125, %v74_v30  ;;  %v124_v34 = vmul.f32 %v651_v23, %v651_v23  ;;  %v125_v20 = vmul.f32 %v654_v17, %v654_v17 }
  0xab   :  { %v663_v35 = vsub.f32 %v573_v24, %v94_v31  ;;  %v666_v21 = vsub.f32 %v578_v25, %v95_v32  ;;  %v160_v38 = vsel %vm32_vm0, %v124_v34, 0.0  ;;  %v163_v43 = vsel %vm32_vm0, %v125_v20, 0.0 }
  0xac   :  { %v77_v39 = vpop.xlane.xlu0 %76  ;;  %v80_v40 = vpop.xlane.xlu1 %79  ;;  %158 = vadd.xlane.f32.xlu1 %v157_v33  ;;  %161 = vadd.xlane.f32.xlu0 %v160_v38 }
  0xad   :  { %v96_v41 = vmul.f32 0.03125, %v77_v39  ;;  %v97_v42 = vmul.f32 0.03125, %v80_v40  ;;  %v126_v46 = vmul.f32 %v663_v35, %v663_v35  ;;  %v127_v24 = vmul.f32 %v666_v21, %v666_v21 }
  0xaf   :  { %v675_v47 = vsub.f32 %v587_v28, %v96_v41  ;;  %v678_v25 = vsub.f32 %v592_v29, %v97_v42  ;;  %v166_v48 = vsel %vm32_vm0, %v126_v46, 0.0  ;;  %v169_v50 = vsel %vm32_vm0, %v127_v24, 0.0 }
  0xb0   :  { %164 = vadd.xlane.f32.xlu1 %v163_v43  ;;  %167 = vadd.xlane.f32.xlu0 %v166_v48 }
  0xb1   :  { %v128_v49 = vmul.f32 %v675_v47, %v675_v47  ;;  %v129_v51 = vmul.f32 %v678_v25, %v678_v25 }
  0xb3   :  { %v172_v52 = vsel %vm32_vm0, %v128_v49, 0.0  ;;  %v175_v28 = vsel %vm32_vm0, %v129_v51, 0.0 }
  0xb4   :  { %170 = vadd.xlane.f32.xlu1 %v169_v50  ;;  %173 = vadd.xlane.f32.xlu0 %v172_v52 }
  0xb8   :  { %176 = vadd.xlane.f32.xlu1 %v175_v28 }
 0x125   :  { %v132_v29 = vpop.xlane.xlu0 %131 }
 0x126   :  { %v178_v53 = vmul.f32 0.032258064, %v132_v29 }
 0x128   :  { %420 = vrsqrt.f32 %v178_v53  ;;  %vm218_vm1 = vcmp.eq.f32.partialorder %v178_v53, inf  ;;  %vm220_vm2 = vcmp.eq.f32.partialorder %v178_v53, 0.0  ;;  %v221_v14 = vand.u32 2147483648, %v178_v53 }
 0x129   :  { %v135_v56 = vpop.xlane.xlu1 %134  ;;  %v138_v57 = vpop.xlane.xlu0 %137 }
 0x12a   :  { %v179_v58 = vmul.f32 0.032258064, %v135_v56  ;;  %v180_v59 = vmul.f32 0.032258064, %v138_v57 }
 0x12c   :  { %422 = vrsqrt.f32 %v179_v58  ;;  %vm225_vm3 = vcmp.eq.f32.partialorder %v179_v58, inf  ;;  %vm227_vm4 = vcmp.eq.f32.partialorder %v179_v58, 0.0  ;;  %v228_v15 = vand.u32 2147483648, %v179_v58 }
 0x12d   :  { %424 = vrsqrt.f32 %v180_v59  ;;  %v141_v60 = vpop.xlane.xlu1 %140  ;;  %v144_v61 = vpop.xlane.xlu0 %143  ;;  %vm232_vm5 = vcmp.eq.f32.partialorder %v180_v59, inf  ;;  %vm234_vm6 = vcmp.eq.f32.partialorder %v180_v59, 0.0  ;;  %v235_v31 = vand.u32 2147483648, %v180_v59 }
 0x12e   :  { %v693_v63 = vmul.f32 0.032258064, %v141_v60  ;;  %v695_v2 = vmul.f32 0.032258064, %v144_v61 }
 0x130   :  { %426 = vrsqrt.f32 %v693_v63  ;;  %vm239_vm7 = vcmp.eq.f32.partialorder %v693_v63, inf  ;;  %vm241_vm8 = vcmp.eq.f32.partialorder %v693_v63, 0.0  ;;  %v242_v33 = vand.u32 2147483648, %v693_v63 }
 0x131   :  { %428 = vrsqrt.f32 %v695_v2  ;;  %v147_v5 = vpop.xlane.xlu1 %146  ;;  %v150_v6 = vpop.xlane.xlu0 %149  ;;  %vm246_vm9 = vcmp.eq.f32.partialorder %v695_v2, inf  ;;  %vm248_vm10 = vcmp.eq.f32.partialorder %v695_v2, 0.0  ;;  %v249_v41 = vand.u32 2147483648, %v695_v2 }
 0x132   :  { %v421_v7 = vpop.eup %420  ;;  %v715_v12 = vmul.f32 0.032258064, %v147_v5  ;;  %v717_v36 = vmul.f32 0.032258064, %v150_v6 }
 0x133   :  { %v217_v13 = vmul.f32 %v421_v7, %v178_v53 }
 0x134   :  { %430 = vrsqrt.f32 %v715_v12  ;;  %vm253_vm11 = vcmp.eq.f32.partialorder %v715_v12, inf  ;;  %vm255_vm12 = vcmp.eq.f32.partialorder %v715_v12, 0.0  ;;  %v256_v28 = vand.u32 2147483648, %v715_v12 }
 0x135   :  { %v219_v44 = vsel %vm218_vm1, %v178_v53, %v217_v13  ;;  %432 = vrsqrt.f32 %v717_v36  ;;  %v153_v45 = vpop.xlane.xlu1 %152  ;;  %v156_v18 = vpop.xlane.xlu0 %155  ;;  %vm260_vm13 = vcmp.eq.f32.partialorder %v717_v36, inf  ;;  %vm262_vm14 = vcmp.eq.f32.partialorder %v717_v36, 0.0 }
 0x136   :  { %v423_v19 = vpop.eup %422  ;;  %v222_v22 = vsel %vm220_vm2, %v221_v14, %v219_v44  ;;  %v725_v54 = vmul.f32 0.032258064, %v153_v45  ;;  %v727_v16 = vmul.f32 0.032258064, %v156_v18  ;;  %v263_v7 = vand.u32 2147483648, %v717_v36 }
 0x137   :  { %v425_v26 = vpop.eup %424  ;;  %v328_v27 = vadd.f32 1e-06, %v222_v22  ;;  %v224_v30 = vmul.f32 %v423_v19, %v179_v58  ;;  %v780_v19 = vld [vmem:[%s953_s2] ss:$0 sm:$0xff] }
 0x138   :  { %v231_v32 = vmul.f32 %v425_v26, %v180_v59  ;;  %434 = vrsqrt.f32 %v725_v54  ;;  %vm267_vm15 = vcmp.eq.f32.partialorder %v725_v54, inf  ;;  %vm269_vm1 = vcmp.eq.f32.partialorder %v725_v54, 0.0 }
 0x139   :  { %436 = vrcp.f32 %v328_v27  ;;  %v226_v34 = vsel %vm225_vm3, %v179_v58, %v224_v30  ;;  %v159_v20 = vpop.xlane.xlu1 %158  ;;  %v162_v48 = vpop.xlane.xlu0 %161  ;;  %v270_v45 = vand.u32 2147483648, %v725_v54  ;;  %vm274_vm2 = vcmp.eq.f32.partialorder %v727_v16, inf }
 0x13a   :  { %v427_v38 = vpop.eup %426  ;;  %v229_v39 = vsel %vm227_vm4, %v228_v15, %v226_v34  ;;  %v233_v40 = vsel %vm232_vm5, %v180_v59, %v231_v32  ;;  %438 = vrsqrt.f32 %v727_v16  ;;  %v745_v51 = vmul.f32 0.032258064, %v159_v20 }
 0x13b   :  { %v429_v42 = vpop.eup %428  ;;  %v329_v43 = vadd.f32 1e-06, %v229_v39  ;;  %v236_v46 = vsel %vm234_vm6, %v235_v31, %v233_v40  ;;  %v238_v24 = vmul.f32 %v427_v38, %v693_v63  ;;  %v757_v57 = vmul.f32 0.032258064, %v162_v48 }
 0x13c   :  { %v330_v49 = vadd.f32 1e-06, %v236_v46  ;;  %v245_v50 = vmul.f32 %v429_v42, %v695_v2  ;;  %v277_v39 = vand.u32 2147483648, %v727_v16  ;;  %vm276_vm3 = vcmp.eq.f32.partialorder %v727_v16, 0.0 }
 0x13d   :  { %440 = vrcp.f32 %v329_v43  ;;  %v240_v52 = vsel %vm239_vm7, %v693_v63, %v238_v24  ;;  %v165_v58 = vpop.xlane.xlu1 %164  ;;  %vm281_vm4 = vcmp.eq.f32.partialorder %v745_v51, inf  ;;  %vm283_vm5 = vcmp.eq.f32.partialorder %v745_v51, 0.0 }
 0x13e   :  { %v431_v29 = vpop.eup %430  ;;  %442 = vrcp.f32 %v330_v49  ;;  %v243_v53 = vsel %vm241_vm8, %v242_v33, %v240_v52  ;;  %v247_v56 = vsel %vm246_vm9, %v695_v2, %v245_v50  ;;  %v168_v2 = vpop.xlane.xlu0 %167  ;;  %v785_v32 = vmul.f32 0.032258064, %v165_v58 }
 0x13f   :  { %v433_v59 = vpop.eup %432  ;;  %v331_v60 = vadd.f32 1e-06, %v243_v53  ;;  %v250_v61 = vsel %vm248_vm10, %v249_v41, %v247_v56  ;;  %v252_v5 = vmul.f32 %v431_v29, %v715_v12  ;;  %444 = vrsqrt.f32 %v745_v51 }
 0x140   :  { %v332_v6 = vadd.f32 1e-06, %v250_v61  ;;  %v259_v63 = vmul.f32 %v433_v59, %v717_v36  ;;  %v205_v49 = vmul.f32 %v691_v62, %v618_v55  ;;  %v206_v52 = vmul.f32 %v691_v62, %v627_v0 }
 0x141   :  { %446 = vrcp.f32 %v331_v60  ;;  %v254_v13 = vsel %vm253_vm11, %v715_v12, %v252_v5  ;;  %v171_v33 = vpop.xlane.xlu1 %170  ;;  %v284_v55 = vand.u32 2147483648, %v745_v51  ;;  %vm288_vm6 = vcmp.eq.f32.partialorder %v757_v57, inf }
 0x142   :  { %v435_v14 = vpop.eup %434  ;;  %448 = vrcp.f32 %v332_v6  ;;  %v257_v44 = vsel %vm255_vm12, %v256_v28, %v254_v13  ;;  %v261_v15 = vsel %vm260_vm13, %v717_v36, %v259_v63  ;;  %v787_v36 = vmul.f32 0.032258064, %v168_v2  ;;  %v174_v53 = vpop.xlane.xlu0 %173 }
 0x143   :  { %v437_v18 = vpop.eup %436  ;;  %v333_v22 = vadd.f32 1e-06, %v257_v44  ;;  %v264_v26 = vsel %vm262_vm14, %v263_v7, %v261_v15  ;;  %v266_v27 = vmul.f32 %v435_v14, %v725_v54  ;;  %450 = vrsqrt.f32 %v757_v57 }
 0x144   :  { %v439_v12 = vpop.eup %438  ;;  %v345_v30 = vmul.f32 %v437_v18, %v700_v3  ;;  %v334_v31 = vadd.f32 1e-06, %v264_v26  ;;  %v807_v24 = vmul.f32 0.032258064, %v171_v33  ;;  %v207_v28 = vmul.f32 %v691_v62, %v630_v1 }
 0x145   :  { %452 = vrcp.f32 %v333_v22  ;;  %v268_v34 = vsel %vm267_vm15, %v725_v54, %v266_v27  ;;  %v273_v20 = vmul.f32 %v439_v12, %v727_v16  ;;  %v177_v56 = vpop.xlane.xlu1 %176  ;;  %v834_v6 = vmul.f32 0.032258064, %v174_v53 }
 0x146   :  { %v382_v38 = vadd.f32 %v780_v19, %v345_v30  ;;  %454 = vrcp.f32 %v334_v31  ;;  %v271_v3 = vsel %vm269_vm1, %v270_v45, %v268_v34  ;;  %v836_v63 = vmul.f32 0.032258064, %v177_v56 }
 0x147   :  { %v441_v40 = vpop.eup %440  ;;  %v335_v41 = vadd.f32 1e-06, %v271_v3  ;;  %v275_v42 = vsel %vm274_vm2, %v727_v16, %v273_v20  ;;  %456 = vrsqrt.f32 %v785_v32  ;;  %vm290_vm7 = vcmp.eq.f32.partialorder %v757_v57, 0.0 }
 0x148   :  { %v443_v43 = vpop.eup %442  ;;  %398 = vst.msk [vmem:[%s954_s3] sm:$0xff] %vm32_vm0, %v382_v38  ;;  %v347_v46 = vmul.f32 %v441_v40, %v709_v8  ;;  %v278_v54 = vsel %vm276_vm3, %v277_v39, %v275_v42  ;;  %458 = vrsqrt.f32 %v787_v36  ;;  %vm295_vm8 = vcmp.eq.f32.partialorder %v785_v32, inf }
 0x149   :  { %v445_v48 = vpop.eup %444  ;;  %v349_v16 = vmul.f32 %v443_v43, %v704_v4  ;;  %460 = vrcp.f32 %v335_v41  ;;  %v336_v50 = vadd.f32 1e-06, %v278_v54  ;;  %vm297_vm9 = vcmp.eq.f32.partialorder %v785_v32, 0.0 }
 0x14a   :  { %v383_v8 = vadd.f32 %v780_v19, %v347_v46  ;;  %v280_v29 = vmul.f32 %v445_v48, %v745_v51  ;;  %v298_v33 = vand.u32 2147483648, %v785_v32  ;;  %vm302_vm10 = vcmp.eq.f32.partialorder %v787_v36, inf }
 0x14b   :  { %v447_v58 = vpop.eup %446  ;;  %v384_v59 = vadd.f32 %v780_v19, %v349_v16  ;;  %462 = vrcp.f32 %v336_v50  ;;  %v305_v3 = vand.u32 2147483648, %v787_v36  ;;  %vm304_vm11 = vcmp.eq.f32.partialorder %v787_v36, 0.0 }
 0x14c   :  { %v449_v4 = vpop.eup %448  ;;  %399 = vst.msk [vmem:[%s954_s3 + $0x8] sm:$0xff] %vm32_vm0, %v383_v8  ;;  %v351_v0 = vmul.f32 %v447_v58, %v713_v9  ;;  %v282_v1 = vsel %vm281_vm4, %v745_v51, %v280_v29  ;;  %464 = vrsqrt.f32 %v807_v24  ;;  %v208_v9 = vmul.f32 %v691_v62, %v639_v10 }
 0x14d   :  { %v451_v60 = vpop.eup %450  ;;  %400 = vst.msk [vmem:[%s954_s3 + $0x10] sm:$0xff] %vm32_vm0, %v384_v59  ;;  %v353_v61 = vmul.f32 %v449_v4, %v721_v37  ;;  %v285_v5 = vsel %vm283_vm5, %v284_v55, %v282_v1  ;;  %v291_v37 = vand.u32 2147483648, %v757_v57  ;;  %466 = vrsqrt.f32 %v834_v6 }
 0x14e   :  { %v385_v51 = vadd.f32 %v780_v19, %v351_v0  ;;  %v337_v7 = vadd.f32 1e-06, %v285_v5  ;;  %v287_v13 = vmul.f32 %v451_v60, %v757_v57  ;;  %vm309_vm12 = vcmp.eq.f32.partialorder %v807_v24, inf }
 0x14f   :  { %v453_v2 = vpop.eup %452  ;;  %v386_v14 = vadd.f32 %v780_v19, %v353_v61  ;;  %vm311_vm13 = vcmp.eq.f32.partialorder %v807_v24, 0.0  ;;  %v210_v29 = vmul.f32 %v691_v62, %v651_v23  ;;  %vm316_vm14 = vcmp.eq.f32.partialorder %v834_v6, inf }
 0x150   :  { %v455_v44 = vpop.eup %454  ;;  %401 = vst.msk [vmem:[%s954_s3 + $0x18] sm:$0xff] %vm32_vm0, %v385_v51  ;;  %v355_v10 = vmul.f32 %v453_v2, %v205_v49  ;;  %468 = vrcp.f32 %v337_v7  ;;  %v289_v15 = vsel %vm288_vm6, %v757_v57, %v287_v13  ;;  %v319_v55 = vand.u32 2147483648, %v834_v6 }
 0x151   :  { %v457_v45 = vpop.eup %456  ;;  %402 = vst.msk [vmem:[%s954_s3 + $0x20] sm:$0xff] %vm32_vm0, %v386_v14  ;;  %v357_v18 = vmul.f32 %v455_v44, %v206_v52  ;;  %v292_v22 = vsel %vm290_vm7, %v291_v37, %v289_v15  ;;  %470 = vrsqrt.f32 %v836_v63  ;;  %v209_v52 = vmul.f32 %v691_v62, %v642_v11 }
 0x152   :  { %v459_v26 = vpop.eup %458  ;;  %v387_v27 = vadd.f32 %v780_v19, %v355_v10  ;;  %v338_v12 = vadd.f32 1e-06, %v292_v22  ;;  %v294_v30 = vmul.f32 %v457_v45, %v785_v32  ;;  %vm318_vm15 = vcmp.eq.f32.partialorder %v834_v6, 0.0 }
 0x153   :  { %v461_v57 = vpop.eup %460  ;;  %v388_v31 = vadd.f32 %v780_v19, %v357_v18  ;;  %v301_v34 = vmul.f32 %v459_v26, %v787_v36  ;;  %vm323_vm1 = vcmp.eq.f32.partialorder %v836_v63, inf  ;;  %v326_v1 = vand.u32 2147483648, %v836_v63 }
 0x154   :  { %403 = vst.msk [vmem:[%s954_s3 + $0x28] sm:$0xff] %vm32_vm0, %v387_v27  ;;  %v359_v20 = vmul.f32 %v461_v57, %v207_v28  ;;  %472 = vrcp.f32 %v338_v12  ;;  %v296_v38 = vsel %vm295_vm8, %v785_v32, %v294_v30  ;;  %vm325_vm2 = vcmp.eq.f32.partialorder %v836_v63, 0.0 }
 0x155   :  { %v463_v39 = vpop.eup %462  ;;  %404 = vst.msk [vmem:[%s954_s3 + $0x30] sm:$0xff] %vm32_vm0, %v388_v31  ;;  %v299_v40 = vsel %vm297_vm9, %v298_v33, %v296_v38  ;;  %v303_v41 = vsel %vm302_vm10, %v787_v36, %v301_v34  ;;  %v312_v36 = vand.u32 2147483648, %v807_v24  ;;  %v211_v7 = vmul.f32 %v691_v62, %v654_v17 }
 0x156   :  { %v465_v42 = vpop.eup %464  ;;  %v389_v43 = vadd.f32 %v780_v19, %v359_v20  ;;  %v361_v46 = vmul.f32 %v463_v39, %v208_v9  ;;  %v339_v54 = vadd.f32 1e-06, %v299_v40  ;;  %v306_v48 = vsel %vm304_vm11, %v305_v3, %v303_v41 }
 0x157   :  { %v340_v32 = vadd.f32 1e-06, %v306_v48  ;;  %v308_v49 = vmul.f32 %v465_v42, %v807_v24  ;;  %v467_v50 = vpop.eup %466  ;;  %v212_v14 = vmul.f32 %v691_v62, %v663_v35  ;;  %v213_v17 = vmul.f32 %v691_v62, %v666_v21 }
 0x158   :  { %405 = vst.msk [vmem:[%s954_s3 + $0x38] sm:$0xff] %vm32_vm0, %v389_v43  ;;  %v390_v16 = vadd.f32 %v780_v19, %v361_v46  ;;  %474 = vrcp.f32 %v339_v54  ;;  %v315_v56 = vmul.f32 %v467_v50, %v834_v6  ;;  %v214_v18 = vmul.f32 %v691_v62, %v675_v47 }
 0x159   :  { %476 = vrcp.f32 %v340_v32  ;;  %v310_v28 = vsel %vm309_vm12, %v807_v24, %v308_v49  ;;  %v215_v26 = vmul.f32 %v691_v62, %v678_v25 }
 0x15a   :  { %v469_v8 = vpop.eup %468  ;;  %406 = vst.msk [vmem:[%s954_s3 + $0x40] sm:$0xff] %vm32_vm0, %v390_v16  ;;  %v313_v53 = vsel %vm311_vm13, %v312_v36, %v310_v28  ;;  %v317_v24 = vsel %vm316_vm14, %v834_v6, %v315_v56 }
 0x15b   :  { %v471_v58 = vpop.eup %470  ;;  %v363_v59 = vmul.f32 %v469_v8, %v209_v52  ;;  %v341_v11 = vadd.f32 1e-06, %v313_v53  ;;  %v320_v0 = vsel %vm318_vm15, %v319_v55, %v317_v24 }
 0x15c   :  { %v322_v23 = vmul.f32 %v471_v58, %v836_v63  ;;  %v342_v61 = vadd.f32 1e-06, %v320_v0 }
 0x15d   :  { %v391_v4 = vadd.f32 %v780_v19, %v363_v59  ;;  %478 = vrcp.f32 %v341_v11 }
 0x15e   :  { %v473_v60 = vpop.eup %472  ;;  %v324_v5 = vsel %vm323_vm1, %v836_v63, %v322_v23  ;;  %480 = vrcp.f32 %v342_v61 }
 0x15f   :  { %407 = vst.msk [vmem:[%s954_s3 + $0x48] sm:$0xff] %vm32_vm0, %v391_v4  ;;  %v365_v6 = vmul.f32 %v473_v60, %v210_v29  ;;  %v327_v9 = vsel %vm325_vm2, %v326_v1, %v324_v5 }
 0x160   :  { %v343_v51 = vadd.f32 1e-06, %v327_v9 }
 0x161   :  { %v392_v13 = vadd.f32 %v780_v19, %v365_v6 }
 0x162   :  { %v475_v2 = vpop.eup %474  ;;  %482 = vrcp.f32 %v343_v51 }
 0x163   :  { %v477_v63 = vpop.eup %476  ;;  %408 = vst.msk [vmem:[%s954_s3 + $0x50] sm:$0xff] %vm32_vm0, %v392_v13  ;;  %v367_v37 = vmul.f32 %v475_v2, %v211_v7 }
 0x164   :  { %v369_v44 = vmul.f32 %v477_v63, %v212_v14 }
 0x165   :  { %v393_v10 = vadd.f32 %v780_v19, %v367_v37 }
 0x166   :  { %v394_v15 = vadd.f32 %v780_v19, %v369_v44 }
 0x167   :  { %v479_v45 = vpop.eup %478  ;;  %409 = vst.msk [vmem:[%s954_s3 + $0x58] sm:$0xff] %vm32_vm0, %v393_v10 }
 0x168   :  { %410 = vst.msk [vmem:[%s954_s3 + $0x60] sm:$0xff] %vm32_vm0, %v394_v15  ;;  %v371_v35 = vmul.f32 %v479_v45, %v213_v17  ;;  %v481_v22 = vpop.eup %480 }
 0x169   :  { %v373_v27 = vmul.f32 %v481_v22, %v214_v18 }
 0x16a   :  { %v395_v21 = vadd.f32 %v780_v19, %v371_v35 }
 0x16b   :  { %v396_v30 = vadd.f32 %v780_v19, %v373_v27 }
 0x16c   :  { %v483_v12 = vpop.eup %482  ;;  %411 = vst.msk [vmem:[%s954_s3 + $0x68] sm:$0xff] %vm32_vm0, %v395_v21 }
 0x16d   :  { %v375_v57 = vmul.f32 %v483_v12, %v215_v26  ;;  %412 = vst.msk [vmem:[%s954_s3 + $0x70] sm:$0xff] %vm32_vm0, %v396_v30 }
 0x16f   :  { %v397_v47 = vadd.f32 %v780_v19, %v375_v57 }
 0x171   :  { %413 = vst.msk [vmem:[%s954_s3 + $0x78] sm:$0xff] %vm32_vm0, %v397_v47 }

// kernel: transformer_forward.25
= control target key start
LH: loop header
LB: loop body
LE: loop exit
PB: predicated region body
PF: predicated region fallthrough
CT: control target
= control target key end

     0   :  { %s8287_s25 = smov 0   ;;  %s10251_s0 = inlined_call_operand.vmem [shape: f32[2,64,32], index: 0, kind: input, shape index: {}, may-alias: {0,1}]   ;;  %s10252_s1 = inlined_call_operand.vmem [shape: f32[2,64,32], index: 1, kind: input, shape index: {}, may-alias: {0,1}]   ;;  %s10253_s2 = inlined_call_operand.vmem [shape: f32[2,64,64], index: 2, kind: input, shape index: {}]   ;;  %s10254_s3 = inlined_call_operand.vmem [shape: f32[1,32], index: 3, kind: input, shape index: {}]   ;;  %s10255_s4 = inlined_call_operand.vmem [shape: f32[1,32], index: 4, kind: input, shape index: {}]   ;;  %s10256_s5 = inlined_call_operand.vmem [shape: f32[32,32], index: 5, kind: input, shape index: {}]   ;;  %s10257_s6 = inlined_call_operand.vmem [shape: f32[1,32], index: 6, kind: input, shape index: {}]   ;;  %s10258_s7 = inlined_call_operand.vmem [shape: f32[32,32], index: 7, kind: input, shape index: {}]   ;;  %s10259_s8 = inlined_call_operand.vmem [shape: f32[1,32], index: 8, kind: input, shape index: {}]   ;;  %s10260_s9 = inlined_call_operand.vmem [shape: f32[32,32], index: 9, kind: input, shape index: {}]   ;;  %s10261_s10 = inlined_call_operand.vmem [shape: f32[1,32], index: 10, kind: input, shape index: {}]   ;;  %s10262_s11 = inlined_call_operand.vmem [shape: f32[32,32], index: 11, kind: input, shape index: {}]   ;;  %s10263_s12 = inlined_call_operand.vmem [shape: f32[1,32], index: 12, kind: input, shape index: {}]   ;;  %s10264_s13 = inlined_call_operand.vmem [shape: f32[2,64,32], index: 13, kind: output, shape index: {}]  }
   0x1 LB: > { %s5874_s26 = sadd.s32 4294967295, %s8208_s25   ;;  %p5878_p0 = scmp.ge.s32.totalorder %s8208_s25, 1  ;;  %s8208_s25 = sphi %s8287_s25, %s23_s25  }
   0x2   : > { %p407_p1 = scmp.lt.s32.totalorder %s8208_s25, 3 }
   0x4   : > { %p408_p2 = pnand %p5878_p0, %p407_p1 }
   0x6   : > { %411 = sbr.rel (%p408_p2) target bundleno = 3966 (0xf7e), region = 72 }
   0xd   : > { %p461_p3 = scmp.lt.s32.totalorder %s5874_s26, 1  ;;  %vm507_vm0 = vcmask 261120   ;;  %s8210_s28 = smov 124  }
   0xe   : > { %s8211_s29 = smov 120   ;;  %s8213_s17 = smov 112  }
   0xf   : > { %s10284_s26 = smov (!%p461_p3, %s5874_s26), 1  ;;  %s8214_s20 = smov 108  }
  0x10   : > { %s8295_s27 = sshll.u32 %s10284_s26, 6  ;;  %s8215_s21 = smov 104  }
  0x11   : > { %s470_s30 = scalar_lea.vmem %s10252_s1, %s8295_s27  ;;  %s8315_s16 = scalar_lea.vmem %s10251_s0, %s8295_s27 }
  0x12   : > { %v489_v0 = vld [vmem:[%s470_s30] sm:$0xff]  ;;  %v491_v1 = vld [vmem:[%s470_s30 + $0x10] sm:$0xff]  ;;  %v490_v2 = vld [vmem:[%s470_s30 + $0x8] sm:$0xff]  ;;  %s8882_s26 = scalar_lea.vmem %s10253_s2, %s8295_s27  ;;  %s8216_s24 = smov 100  }
  0x13   : > { %v697_v3 = vsel %vm507_vm0, %v489_v0, 0.0  ;;  %v703_v4 = vsel %vm507_vm0, %v491_v1, 0.0  ;;  %v492_v5 = vld [vmem:[%s470_s30 + $0x18] sm:$0xff]  ;;  %v700_v6 = vsel %vm507_vm0, %v490_v2, 0.0  ;;  %v493_v8 = vld [vmem:[%s470_s30 + $0x20] sm:$0xff]  ;;  %v494_v9 = vld [vmem:[%s470_s30 + $0x28] sm:$0xff] }
  0x14   : > { %698 = vadd.xlane.f32.xlu0 %v697_v3  ;;  %704 = vadd.xlane.f32.xlu1 %v703_v4  ;;  %v706_v7 = vsel %vm507_vm0, %v492_v5, 0.0  ;;  %v709_v10 = vsel %vm507_vm0, %v493_v8, 0.0  ;;  %v712_v11 = vsel %vm507_vm0, %v494_v9, 0.0  ;;  %v8307_v12 = vld [vmem:[%s470_s30 + $0x30] sm:$0xff]  ;;  %v8309_v13 = vld [vmem:[%s470_s30 + $0x38] sm:$0xff]  ;;  %v8322_v16 = vld [vmem:[%s8315_s16] sm:$0xff] }
  0x15   : > { %v715_v14 = vsel %vm507_vm0, %v8307_v12, 0.0  ;;  %v718_v15 = vsel %vm507_vm0, %v8309_v13, 0.0  ;;  %v8325_v17 = vld [vmem:[%s8315_s16 + $0x8] sm:$0xff]  ;;  %v508_v18 = vsel %vm507_vm0, %v8322_v16, 0.0  ;;  %v8332_v20 = vld [vmem:[%s8315_s16 + $0x10] sm:$0xff]  ;;  %v8335_v21 = vld [vmem:[%s8315_s16 + $0x18] sm:$0xff] }
  0x16   : > { %v511_v19 = vsel %vm507_vm0, %v8325_v17, 0.0  ;;  %v514_v22 = vsel %vm507_vm0, %v8332_v20, 0.0  ;;  %v517_v23 = vsel %vm507_vm0, %v8335_v21, 0.0  ;;  %v8342_v24 = vld [vmem:[%s8315_s16 + $0x20] sm:$0xff]  ;;  %v8345_v25 = vld [vmem:[%s8315_s16 + $0x28] sm:$0xff]  ;;  %v8352_v28 = vld [vmem:[%s8315_s16 + $0x30] sm:$0xff] }
  0x17   : > { %v520_v26 = vsel %vm507_vm0, %v8342_v24, 0.0  ;;  %v523_v27 = vsel %vm507_vm0, %v8345_v25, 0.0  ;;  %v8355_v29 = vld [vmem:[%s8315_s16 + $0x38] sm:$0xff]  ;;  %v526_v30 = vsel %vm507_vm0, %v8352_v28, 0.0  ;;  %s8212_s30 = smov 116  }
  0x18   : > { %701 = vadd.xlane.f32.xlu0 %v700_v6  ;;  %707 = vadd.xlane.f32.xlu1 %v706_v7  ;;  %v529_v31 = vsel %vm507_vm0, %v8355_v29, 0.0 }
  0x1c   : > { %710 = vadd.xlane.f32.xlu0 %v709_v10  ;;  %713 = vadd.xlane.f32.xlu1 %v712_v11 }
  0x20   : > { %716 = vadd.xlane.f32.xlu0 %v715_v14  ;;  %719 = vadd.xlane.f32.xlu1 %v718_v15 }
  0x24   : > { %509 = vadd.xlane.f32.xlu0 %v508_v18  ;;  %512 = vadd.xlane.f32.xlu1 %v511_v19 }
  0x28   : > { %515 = vadd.xlane.f32.xlu0 %v514_v22  ;;  %518 = vadd.xlane.f32.xlu1 %v517_v23 }
  0x2c   : > { %521 = vadd.xlane.f32.xlu0 %v520_v26  ;;  %524 = vadd.xlane.f32.xlu1 %v523_v27 }
  0x30   : > { %527 = vadd.xlane.f32.xlu0 %v526_v30  ;;  %530 = vadd.xlane.f32.xlu1 %v529_v31 }
  0xa1   : > { %v699_v32 = vpop.xlane.xlu0 %698  ;;  %v705_v33 = vpop.xlane.xlu1 %704 }
  0xa2   : > { %v721_v34 = vmul.f32 0.03125, %v699_v32  ;;  %v723_v35 = vmul.f32 0.03125, %v705_v33 }
  0xa4   : > { %v8361_v36 = vsub.f32 %v489_v0, %v721_v34  ;;  %v8363_v37 = vsub.f32 %v491_v1, %v723_v35 }
  0xa5   : > { %v702_v38 = vpop.xlane.xlu0 %701  ;;  %v708_v39 = vpop.xlane.xlu1 %707 }
  0xa6   : > { %v722_v40 = vmul.f32 0.03125, %v702_v38  ;;  %v724_v41 = vmul.f32 0.03125, %v708_v39  ;;  %v737_v42 = vmul.f32 %v8361_v36, %v8361_v36  ;;  %v739_v43 = vmul.f32 %v8363_v37, %v8363_v37 }
  0xa8   : > { %v8369_v44 = vsub.f32 %v490_v2, %v722_v40  ;;  %v8371_v45 = vsub.f32 %v492_v5, %v724_v41  ;;  %v745_v46 = vsel %vm507_vm0, %v737_v42, 0.0  ;;  %v751_v51 = vsel %vm507_vm0, %v739_v43, 0.0 }
  0xa9   : > { %v711_v47 = vpop.xlane.xlu0 %710  ;;  %746 = vadd.xlane.f32.xlu0 %v745_v46  ;;  %v714_v48 = vpop.xlane.xlu1 %713 }
  0xaa   : > { %v725_v49 = vmul.f32 0.03125, %v711_v47  ;;  %v726_v50 = vmul.f32 0.03125, %v714_v48  ;;  %v738_v52 = vmul.f32 %v8369_v44, %v8369_v44  ;;  %v740_v53 = vmul.f32 %v8371_v45, %v8371_v45 }
  0xac   : > { %v8379_v54 = vsub.f32 %v493_v8, %v725_v49  ;;  %v8381_v55 = vsub.f32 %v494_v9, %v726_v50  ;;  %v748_v57 = vsel %vm507_vm0, %v738_v52, 0.0  ;;  %v754_v61 = vsel %vm507_vm0, %v740_v53, 0.0  ;;  %v1014_v53 = vld [vmem:[%s10258_s7 + $0x8] sm:$0xff] }
  0xad   : > { %v717_v56 = vpop.xlane.xlu0 %716  ;;  %752 = vadd.xlane.f32.xlu0 %v751_v51  ;;  %v720_v58 = vpop.xlane.xlu1 %719  ;;  %749 = vadd.xlane.f32.xlu1 %v748_v57  ;;  %v1015_v57 = vld [vmem:[%s10258_s7 + $0x10] sm:$0xff] }
  0xae   : > { %v727_v59 = vmul.f32 0.03125, %v717_v56  ;;  %v728_v60 = vmul.f32 0.03125, %v720_v58  ;;  %v741_v62 = vmul.f32 %v8379_v54, %v8379_v54  ;;  %v742_v63 = vmul.f32 %v8381_v55, %v8381_v55  ;;  %v1016_v58 = vld [vmem:[%s10258_s7 + $0x18] sm:$0xff] }
  0xb0   : > { %v8390_v0 = vsub.f32 %v8307_v12, %v727_v59  ;;  %v8393_v1 = vsub.f32 %v8309_v13, %v728_v60  ;;  %v757_v2 = vsel %vm507_vm0, %v741_v62, 0.0  ;;  %v760_v7 = vsel %vm507_vm0, %v742_v63, 0.0  ;;  %v873_v60 = vld [vmem:[%s10256_s5] sm:$0xff]  ;;  %v875_v63 = vld [vmem:[%s10256_s5 + $0x10] sm:$0xff] }
  0xb1   : > { %v510_v3 = vpop.xlane.xlu0 %509  ;;  %v513_v4 = vpop.xlane.xlu1 %512  ;;  %755 = vadd.xlane.f32.xlu1 %v754_v61  ;;  %758 = vadd.xlane.f32.xlu0 %v757_v2  ;;  %v7183_v59 = vpack.c.bf16 %v1016_v58, %v1015_v57  ;;  %v874_v61 = vld [vmem:[%s10256_s5 + $0x8] sm:$0xff]  ;;  %v876_v2 = vld [vmem:[%s10256_s5 + $0x18] sm:$0xff] }
  0xb2   : > { %v533_v5 = vmul.f32 0.03125, %v510_v3  ;;  %v534_v6 = vmul.f32 0.03125, %v513_v4  ;;  %v743_v8 = vmul.f32 %v8390_v0, %v8390_v0  ;;  %v744_v9 = vmul.f32 %v8393_v1, %v8393_v1  ;;  %v1153_v4 = vld [vmem:[%s10260_s9] sm:$0xff] }
  0xb3   : > { %v7171_v62 = vpack.c.bf16 %v874_v61, %v873_v60  ;;  %v7175_v3 = vpack.c.bf16 %v876_v2, %v875_v63 }
  0xb4   : > { %v8402_v10 = vsub.f32 %v8322_v16, %v533_v5  ;;  %v8405_v11 = vsub.f32 %v8325_v17, %v534_v6  ;;  %v763_v12 = vsel %vm507_vm0, %v743_v8, 0.0  ;;  %v766_v22 = vsel %vm507_vm0, %v744_v9, 0.0  ;;  %v1154_v5 = vld [vmem:[%s10260_s9 + $0x8] sm:$0xff] }
  0xb5   : > { %v516_v13 = vpop.xlane.xlu0 %515  ;;  %v519_v14 = vpop.xlane.xlu1 %518  ;;  %761 = vadd.xlane.f32.xlu1 %v760_v7  ;;  %764 = vadd.xlane.f32.xlu0 %v763_v12  ;;  %v8481_v6 = vpack.c.bf16 %v1154_v5, %v1153_v4 }
  0xb6   : > { %v535_v15 = vmul.f32 0.03125, %v516_v13  ;;  %v536_v18 = vmul.f32 0.03125, %v519_v14  ;;  %v549_v19 = vmul.f32 %v8402_v10, %v8402_v10  ;;  %v550_v16 = vmul.f32 %v8405_v11, %v8405_v11  ;;  %7172 = vmatprep.subr.bf16.mxu0 %v7171_v62 }
  0xb7   : > { %7174 = vmatpush3.bf16.msra.mxu0 %v7171_v62 }
  0xb8   : > { %v8414_v23 = vsub.f32 %v8332_v20, %v535_v15  ;;  %v8417_v17 = vsub.f32 %v8335_v21, %v536_v18  ;;  %v557_v26 = vsel %vm507_vm0, %v549_v19, 0.0  ;;  %v560_v33 = vsel %vm507_vm0, %v550_v16, 0.0  ;;  %7176 = vmatprep.subr.bf16.mxu0 %v7175_v3  ;;  %v8494_v16 = vld [vmem:[%s10254_s3] ss:$0 sm:$0xff] }
  0xb9   : > { %v522_v27 = vpop.xlane.xlu0 %521  ;;  %v525_v30 = vpop.xlane.xlu1 %524  ;;  %767 = vadd.xlane.f32.xlu1 %v766_v22  ;;  %558 = vadd.xlane.f32.xlu0 %v557_v26 }
  0xba   : > { %v537_v31 = vmul.f32 0.03125, %v522_v27  ;;  %v538_v32 = vmul.f32 0.03125, %v525_v30  ;;  %v551_v34 = vmul.f32 %v8414_v23, %v8414_v23  ;;  %v552_v20 = vmul.f32 %v8417_v17, %v8417_v17 }
  0xbb   : > { %7178 = vmatpush3.bf16.msra.mxu0 %v7175_v3  ;;  %v8499_v27 = vmul.f32 %v8494_v16, %v8363_v37  ;;  %v8516_v37 = vmul.f32 %v8494_v16, %v8371_v45 }
  0xbc   : > { %v8426_v35 = vsub.f32 %v8342_v24, %v537_v31  ;;  %v8429_v21 = vsub.f32 %v8345_v25, %v538_v32  ;;  %v563_v38 = vsel %vm507_vm0, %v551_v34, 0.0  ;;  %v566_v43 = vsel %vm507_vm0, %v552_v20, 0.0  ;;  %7188 = vmatprep.subr.bf16.mxu0 %v8481_v6 }
  0xbd   : > { %v528_v39 = vpop.xlane.xlu0 %527  ;;  %v531_v40 = vpop.xlane.xlu1 %530  ;;  %561 = vadd.xlane.f32.xlu1 %v560_v33  ;;  %564 = vadd.xlane.f32.xlu0 %v563_v38  ;;  %v8508_v20 = vmul.f32 %v8494_v16, %v8361_v36  ;;  %v8512_v38 = vmul.f32 %v8494_v16, %v8369_v44 }
  0xbe   : > { %v539_v41 = vmul.f32 0.03125, %v528_v39  ;;  %v540_v42 = vmul.f32 0.03125, %v531_v40  ;;  %v553_v46 = vmul.f32 %v8426_v35, %v8426_v35  ;;  %v554_v24 = vmul.f32 %v8429_v21, %v8429_v21 }
  0xbf   : > { %v8520_v39 = vmul.f32 %v8494_v16, %v8379_v54  ;;  %v8524_v40 = vmul.f32 %v8494_v16, %v8381_v55 }
  0xc0   : > { %v8438_v47 = vsub.f32 %v8352_v28, %v539_v41  ;;  %v8441_v25 = vsub.f32 %v8355_v29, %v540_v42  ;;  %v569_v48 = vsel %vm507_vm0, %v553_v46, 0.0  ;;  %v572_v50 = vsel %vm507_vm0, %v554_v24, 0.0  ;;  %v1013_v29 = vld [vmem:[%s10258_s7] sm:$0xff] }
  0xc1   : > { %567 = vadd.xlane.f32.xlu1 %v566_v43  ;;  %570 = vadd.xlane.f32.xlu0 %v569_v48  ;;  %v7179_v56 = vpack.c.bf16 %v1014_v53, %v1013_v29 }
  0xc2   : > { %v555_v49 = vmul.f32 %v8438_v47, %v8438_v47  ;;  %v556_v51 = vmul.f32 %v8441_v25, %v8441_v25 }
  0xc3   : > { %7180 = vmatprep.subr.bf16.mxu1 %v7179_v56 }
  0xc4   : > { %v575_v52 = vsel %vm507_vm0, %v555_v49, 0.0  ;;  %v578_v28 = vsel %vm507_vm0, %v556_v51, 0.0  ;;  %7182 = vmatpush3.bf16.msra.mxu1 %v7179_v56 }
  0xc5   : > { %573 = vadd.xlane.f32.xlu1 %v572_v50  ;;  %576 = vadd.xlane.f32.xlu0 %v575_v52 }
  0xc6   : > { %7184 = vmatprep.subr.bf16.mxu1 %v7183_v59 }
  0xc8   : > { %7186 = vmatpush3.bf16.msra.mxu1 %v7183_v59 }
  0xc9   : > { %579 = vadd.xlane.f32.xlu1 %v578_v28 }
 0x136   : > { %v747_v7 = vpop.xlane.xlu0 %746 }
 0x137   : > { %v769_v8 = vmul.f32 0.032258064, %v747_v7 }
 0x139   : > { %7874 = vrsqrt.f32 %v769_v8  ;;  %vm787_vm1 = vcmp.eq.f32.partialorder %v769_v8, inf  ;;  %vm789_vm2 = vcmp.eq.f32.partialorder %v769_v8, 0.0  ;;  %v790_v36 = vand.u32 2147483648, %v769_v8 }
 0x13a   : > { %v753_v9 = vpop.xlane.xlu0 %752  ;;  %v750_v12 = vpop.xlane.xlu1 %749 }
 0x13b   : > { %v8484_v13 = vmul.f32 0.032258064, %v753_v9  ;;  %v770_v14 = vmul.f32 0.032258064, %v750_v12 }
 0x13d   : > { %7876 = vrsqrt.f32 %v8484_v13  ;;  %vm801_vm3 = vcmp.eq.f32.partialorder %v8484_v13, inf  ;;  %vm803_vm4 = vcmp.eq.f32.partialorder %v8484_v13, 0.0  ;;  %v804_v44 = vand.u32 2147483648, %v8484_v13 }
 0x13e   : > { %7878 = vrsqrt.f32 %v770_v14  ;;  %v756_v15 = vpop.xlane.xlu1 %755  ;;  %v759_v18 = vpop.xlane.xlu0 %758  ;;  %vm794_vm5 = vcmp.eq.f32.partialorder %v770_v14, inf  ;;  %vm796_vm6 = vcmp.eq.f32.partialorder %v770_v14, 0.0  ;;  %v797_v50 = vand.u32 2147483648, %v770_v14 }
 0x13f   : > { %v8487_v19 = vmul.f32 0.032258064, %v756_v15  ;;  %v8489_v22 = vmul.f32 0.032258064, %v759_v18 }
 0x141   : > { %7880 = vrsqrt.f32 %v8487_v19  ;;  %vm808_vm7 = vcmp.eq.f32.partialorder %v8487_v19, inf  ;;  %vm810_vm8 = vcmp.eq.f32.partialorder %v8487_v19, 0.0  ;;  %v811_v57 = vand.u32 2147483648, %v8487_v19 }
 0x142   : > { %7882 = vrsqrt.f32 %v8489_v22  ;;  %v762_v30 = vpop.xlane.xlu1 %761  ;;  %v765_v31 = vpop.xlane.xlu0 %764  ;;  %vm815_vm9 = vcmp.eq.f32.partialorder %v8489_v22, inf  ;;  %v818_v2 = vand.u32 2147483648, %v8489_v22  ;;  %vm817_vm12 = vcmp.eq.f32.partialorder %v8489_v22, 0.0 }
 0x143   : > { %v7875_v26 = vpop.eup %7874  ;;  %v8502_v33 = vmul.f32 0.032258064, %v762_v30  ;;  %v8504_v34 = vmul.f32 0.032258064, %v765_v31 }
 0x144   : > { %v786_v32 = vmul.f32 %v7875_v26, %v769_v8 }
 0x145   : > { %7884 = vrsqrt.f32 %v8502_v33  ;;  %vm822_vm10 = vcmp.eq.f32.partialorder %v8502_v33, inf  ;;  %v825_v5 = vand.u32 2147483648, %v8502_v33  ;;  %vm829_vm11 = vcmp.eq.f32.partialorder %v8504_v34, inf }
 0x146   : > { %7886 = vrsqrt.f32 %v8504_v34  ;;  %v768_v45 = vpop.xlane.xlu1 %767  ;;  %v559_v54 = vpop.xlane.xlu0 %558  ;;  %v788_v24 = vsel %vm787_vm1, %v769_v8, %v786_v32  ;;  %vm824_vm13 = vcmp.eq.f32.partialorder %v8502_v33, 0.0  ;;  %vm831_vm15 = vcmp.eq.f32.partialorder %v8504_v34, 0.0 }
 0x147   : > { %v7877_v41 = vpop.eup %7876  ;;  %v8532_v43 = vmul.f32 0.032258064, %v768_v45  ;;  %v8534_v46 = vmul.f32 0.032258064, %v559_v54  ;;  %v791_v49 = vsel %vm789_vm2, %v790_v36, %v788_v24 }
 0x148   : > { %v7879_v42 = vpop.eup %7878  ;;  %v800_v55 = vmul.f32 %v7877_v41, %v8484_v13  ;;  %v841_v53 = vadd.f32 1e-06, %v791_v49 }
 0x149   : > { %v793_v48 = vmul.f32 %v7879_v42, %v770_v14  ;;  %7888 = vrsqrt.f32 %v8532_v43  ;;  %vm836_vm14 = vcmp.eq.f32.partialorder %v8532_v43, inf  ;;  %v839_v18 = vand.u32 2147483648, %v8532_v43 }
 0x14a   : > { %v802_v52 = vsel %vm801_vm3, %v8484_v13, %v800_v55  ;;  %7890 = vrsqrt.f32 %v8534_v46  ;;  %v562_v28 = vpop.xlane.xlu1 %561  ;;  %v565_v29 = vpop.xlane.xlu0 %564  ;;  %v832_v13 = vand.u32 2147483648, %v8504_v34 }
 0x14b   : > { %v795_v51 = vsel %vm794_vm5, %v770_v14, %v793_v48  ;;  %v7881_v56 = vpop.eup %7880  ;;  %v8545_v58 = vmul.f32 0.032258064, %v562_v28  ;;  %v8547_v59 = vmul.f32 0.032258064, %v565_v29  ;;  %7892 = vrcp.f32 %v841_v53 }
 0x14c   : > { %v798_v60 = vsel %vm796_vm6, %v797_v50, %v795_v51  ;;  %v7883_v61 = vpop.eup %7882  ;;  %v807_v62 = vmul.f32 %v7881_v56, %v8487_v19  ;;  %v805_v3 = vsel %vm803_vm4, %v804_v44, %v802_v52  ;;  %vm838_vm4 = vcmp.eq.f32.partialorder %v8532_v43, 0.0 }
 0x14d   : > { %v842_v63 = vadd.f32 1e-06, %v798_v60  ;;  %7894 = vrsqrt.f32 %v8545_v58  ;;  %v814_v12 = vmul.f32 %v7883_v61, %v8489_v22  ;;  %v843_v30 = vadd.f32 1e-06, %v805_v3  ;;  %v8619_v3 = vld [vmem:[%s10255_s4] ss:$0 sm:$0xff] }
 0x14e   : > { %v809_v4 = vsel %vm808_vm7, %v8487_v19, %v807_v62  ;;  %7896 = vrsqrt.f32 %v8547_v59  ;;  %v568_v7 = vpop.xlane.xlu1 %567  ;;  %v571_v8 = vpop.xlane.xlu0 %570  ;;  %vm612_vm1 = vcmp.eq.f32.partialorder %v8545_v58, inf  ;;  %v615_v41 = vand.u32 2147483648, %v8545_v58 }
 0x14f   : > { %v7885_v9 = vpop.eup %7884  ;;  %v8568_v14 = vmul.f32 0.032258064, %v568_v7  ;;  %v8572_v26 = vmul.f32 0.032258064, %v571_v8  ;;  %7898 = vrcp.f32 %v842_v63  ;;  %v812_v32 = vsel %vm810_vm8, %v811_v57, %v809_v4 }
 0x150   : > { %v7887_v15 = vpop.eup %7886  ;;  %v821_v31 = vmul.f32 %v7885_v9, %v8502_v33  ;;  %vm619_vm2 = vcmp.eq.f32.partialorder %v8547_v59, inf  ;;  %v816_v42 = vsel %vm815_vm9, %v8489_v22, %v814_v12  ;;  %v622_v55 = vand.u32 2147483648, %v8547_v59 }
 0x151   : > { %7900 = vrsqrt.f32 %v8568_v14  ;;  %v828_v36 = vmul.f32 %v7887_v15, %v8504_v34  ;;  %vm626_vm3 = vcmp.eq.f32.partialorder %v8568_v14, inf  ;;  %vm614_vm5 = vcmp.eq.f32.partialorder %v8545_v58, 0.0 }
 0x152   : > { %7902 = vrsqrt.f32 %v8572_v26  ;;  %v574_v44 = vpop.xlane.xlu1 %573  ;;  %v577_v45 = vpop.xlane.xlu0 %576  ;;  %v844_v50 = vadd.f32 1e-06, %v812_v32  ;;  %v823_v51 = vsel %vm822_vm10, %v8502_v33, %v821_v31  ;;  %v629_v52 = vand.u32 2147483648, %v8568_v14 }
 0x153   : > { %v7889_v54 = vpop.eup %7888  ;;  %v8588_v19 = vmul.f32 0.032258064, %v574_v44  ;;  %v8593_v49 = vmul.f32 0.032258064, %v577_v45  ;;  %7904 = vrcp.f32 %v843_v30  ;;  %vm633_vm6 = vcmp.eq.f32.partialorder %v8572_v26, inf }
 0x154   : > { %v7891_v24 = vpop.eup %7890  ;;  %v835_v48 = vmul.f32 %v7889_v54, %v8532_v43  ;;  %v830_v29 = vsel %vm829_vm11, %v8504_v34, %v828_v36  ;;  %vm621_vm7 = vcmp.eq.f32.partialorder %v8547_v59, 0.0  ;;  %v636_v56 = vand.u32 2147483648, %v8572_v26 }
 0x155   : > { %7906 = vrsqrt.f32 %v8588_v19  ;;  %v7893_v28 = vpop.eup %7892  ;;  %v604_v53 = vmul.f32 %v7891_v24, %v8534_v46  ;;  %vm628_vm8 = vcmp.eq.f32.partialorder %v8568_v14, 0.0  ;;  %vm640_vm9 = vcmp.eq.f32.partialorder %v8588_v19, inf }
 0x156   : > { %7908 = vrsqrt.f32 %v8593_v49  ;;  %v580_v57 = vpop.xlane.xlu1 %579  ;;  %v837_v61 = vsel %vm836_vm14, %v8532_v43, %v835_v48  ;;  %v643_v62 = vand.u32 2147483648, %v8588_v19  ;;  %v850_v4 = vmul.f32 %v7893_v28, %v8508_v20 }
 0x157   : > { %v7895_v60 = vpop.eup %7894  ;;  %v8614_v63 = vmul.f32 0.032258064, %v580_v57  ;;  %7910 = vrcp.f32 %v844_v50  ;;  %v819_v9 = vsel %vm817_vm12, %v818_v2, %v816_v42  ;;  %v826_v12 = vsel %vm824_vm13, %v825_v5, %v823_v51 }
 0x158   : > { %v7897_v7 = vpop.eup %7896  ;;  %v611_v8 = vmul.f32 %v7895_v60, %v8545_v58  ;;  %vm635_vm10 = vcmp.eq.f32.partialorder %v8572_v26, 0.0  ;;  %vm642_vm11 = vcmp.eq.f32.partialorder %v8588_v19, 0.0  ;;  %vm647_vm14 = vcmp.eq.f32.partialorder %v8593_v49, inf }
 0x159   : > { %v618_v15 = vmul.f32 %v7897_v7, %v8547_v59  ;;  %v650_v20 = vand.u32 2147483648, %v8593_v49  ;;  %7912 = vrsqrt.f32 %v8614_v63  ;;  %v7899_v30 = vpop.eup %7898  ;;  %v657_v33 = vand.u32 2147483648, %v8614_v63 }
 0x15a   : > { %v613_v22 = vsel %vm612_vm1, %v8545_v58, %v611_v8  ;;  %v8642_v2 = vadd.f32 %v8619_v3, %v850_v4  ;;  %v845_v5 = vadd.f32 1e-06, %v819_v9  ;;  %vm649_vm12 = vcmp.eq.f32.partialorder %v8593_v49, 0.0 }
 0x15b   : > { %v7901_v31 = vpop.eup %7900  ;;  %v620_v32 = vsel %vm619_vm2, %v8547_v59, %v618_v15  ;;  %vm654_vm13 = vcmp.eq.f32.partialorder %v8614_v63, inf  ;;  %v852_v36 = vmul.f32 %v7899_v30, %v8512_v38  ;;  %v846_v44 = vadd.f32 1e-06, %v826_v12 }
 0x15c   : > { %v833_v45 = vsel %vm831_vm15, %v832_v13, %v830_v29  ;;  %v7903_v54 = vpop.eup %7902  ;;  %v625_v42 = vmul.f32 %v7901_v31, %v8568_v14  ;;  %vm656_vm1 = vcmp.eq.f32.partialorder %v8614_v63, 0.0  ;;  %6579 = vmatprep.mubr.msk.f32.mxu1 %vm507_vm0, %v8642_v2  ;;  %7914 = vrcp.f32 %v845_v5 }
 0x15d   : > { %v847_v24 = vadd.f32 1e-06, %v833_v45  ;;  %vm605_vm2 = vcmp.eq.f32.partialorder %v8534_v46, inf  ;;  %v632_v38 = vmul.f32 %v7903_v54, %v8572_v26  ;;  %v8661_v48 = vadd.f32 %v8619_v3, %v852_v36  ;;  %v7905_v13 = vpop.eup %7904 }
 0x15e   : > { %7916 = vrcp.f32 %v846_v44  ;;  %v606_v34 = vsel %vm605_vm2, %v8534_v46, %v604_v53  ;;  %v627_v50 = vsel %vm626_vm3, %v8568_v14, %v625_v42  ;;  %vm607_vm15 = vcmp.eq.f32.partialorder %v8534_v46, 0.0 }
 0x15f   : > { %7918 = vrcp.f32 %v847_v24  ;;  %v608_v51 = vand.u32 2147483648, %v8534_v46  ;;  %v7907_v28 = vpop.eup %7906  ;;  %v634_v29 = vsel %vm633_vm6, %v8572_v26, %v632_v38  ;;  %6580 = vmatmul.mubr.msk.f32.vlgmr.msra.gmra.mrb[0].mxu1 %vm507_vm0, %v8661_v48  ;;  %v854_v53 = vmul.f32 %v7905_v13, %v8499_v27 }
 0x160   : > { %v840_v57 = vsel %vm838_vm4, %v839_v18, %v837_v61  ;;  %v616_v46 = vsel %vm614_vm5, %v615_v41, %v613_v22  ;;  %v7909_v60 = vpop.eup %7908  ;;  %v639_v4 = vmul.f32 %v7907_v28, %v8588_v19  ;;  %v623_v43 = vsel %vm621_vm7, %v622_v55, %v620_v32 }
 0x161   : > { %v609_v7 = vsel %vm607_vm15, %v608_v51, %v606_v34  ;;  %v848_v8 = vadd.f32 1e-06, %v840_v57  ;;  %v660_v9 = vadd.f32 1e-06, %v616_v46  ;;  %v646_v12 = vmul.f32 %v7909_v60, %v8593_v49  ;;  %v7911_v18 = vpop.eup %7910 }
 0x162   : > { %v8686_v27 = vadd.f32 %v8619_v3, %v854_v53  ;;  %v659_v15 = vadd.f32 1e-06, %v609_v7  ;;  %v641_v58 = vsel %vm640_vm9, %v8588_v19, %v639_v4  ;;  %v661_v41 = vadd.f32 1e-06, %v623_v43 }
 0x163   : > { %7920 = vrcp.f32 %v848_v8  ;;  %v630_v61 = vsel %vm628_vm8, %v629_v52, %v627_v50  ;;  %v7913_v30 = vpop.eup %7912  ;;  %v648_v22 = vsel %vm647_vm14, %v8593_v49, %v646_v12  ;;  %v856_v59 = vmul.f32 %v7911_v18, %v8516_v37 }
 0x164   : > { %6582 = vmatprep.mubr.msk.f32.mxu1 %vm507_vm0, %v8686_v27  ;;  %7922 = vrcp.f32 %v659_v15  ;;  %v662_v55 = vadd.f32 1e-06, %v630_v61  ;;  %v653_v5 = vmul.f32 %v7913_v30, %v8614_v63  ;;  %v637_v14 = vsel %vm635_vm10, %v636_v56, %v634_v29  ;;  %v1155_v29 = vld [vmem:[%s10260_s9 + $0x10] sm:$0xff] }
 0x165   : > { %7924 = vrcp.f32 %v660_v9  ;;  %v644_v52 = vsel %vm642_vm11, %v643_v62, %v641_v58  ;;  %v8715_v31 = vadd.f32 %v8619_v3, %v856_v59  ;;  %v663_v37 = vadd.f32 1e-06, %v637_v14 }
 0x166   : > { %7926 = vrcp.f32 %v661_v41  ;;  %v664_v32 = vadd.f32 1e-06, %v644_v52  ;;  %v7915_v36 = vpop.eup %7914  ;;  %v783_v44 = vmul.f32 %v8494_v16, %v8390_v0  ;;  %v655_v26 = vsel %vm654_vm13, %v8614_v63, %v653_v5 }
 0x167   : > { %7928 = vrcp.f32 %v662_v55  ;;  %v651_v19 = vsel %vm649_vm12, %v650_v20, %v648_v22  ;;  %6583 = vmatmul.mubr.msk.f32.gmra.mrb[2].mxu1 %vm507_vm0, %v8715_v31  ;;  %v858_v62 = vmul.f32 %v7915_v36, %v8520_v39  ;;  %v658_v0 = vsel %vm656_vm1, %v657_v33, %v655_v26 }
 0x168   : > { %v7917_v56 = vpop.eup %7916  ;;  %7930 = vrcp.f32 %v663_v37  ;;  %v665_v45 = vadd.f32 1e-06, %v651_v19  ;;  %v666_v24 = vadd.f32 1e-06, %v658_v0  ;;  %v784_v39 = vmul.f32 %v8494_v16, %v8393_v1 }
 0x169   : > { %v7919_v54 = vpop.eup %7918  ;;  %v860_v42 = vmul.f32 %v7917_v56, %v8524_v40  ;;  %7932 = vrcp.f32 %v664_v32  ;;  %v8735_v49 = vadd.f32 %v8619_v3, %v858_v62  ;;  %v595_v40 = vmul.f32 %v8494_v16, %v8402_v10  ;;  %v1156_v10 = vld [vmem:[%s10260_s9 + $0x18] sm:$0xff] }
 0x16a   : > { %v862_v20 = vmul.f32 %v7919_v54, %v783_v44  ;;  %7934 = vrcp.f32 %v665_v45  ;;  %v596_v13 = vmul.f32 %v8494_v16, %v8405_v11  ;;  %v597_v1 = vmul.f32 %v8494_v16, %v8414_v23 }
 0x16b   : > { %v870_v38 = vadd.f32 %v8619_v3, %v860_v42  ;;  %7936 = vrcp.f32 %v666_v24  ;;  %6585 = vmatprep.mubr.msk.f32.mxu1 %vm507_vm0, %v8735_v49  ;;  %v598_v11 = vmul.f32 %v8494_v16, %v8417_v17  ;;  %v599_v23 = vmul.f32 %v8494_v16, %v8426_v35 }
 0x16c   : > { %v871_v63 = vadd.f32 %v8619_v3, %v862_v20  ;;  %v600_v9 = vmul.f32 %v8494_v16, %v8429_v21  ;;  %v7191_v17 = vpack.c.bf16 %v1156_v10, %v1155_v29  ;;  %v601_v18 = vmul.f32 %v8494_v16, %v8438_v47 }
 0x16d   : > { %v7921_v33 = vpop.eup %7920  ;;  %6586 = vmatmul.mubr.msk.f32.gmra.mrb[4].mxu1 %vm507_vm0, %v870_v38  ;;  %v602_v47 = vmul.f32 %v8494_v16, %v8441_v25  ;;  %v5898_v25 = vld [vmem:[%s10259_s8] ss:$0 sm:$0xff]  ;;  %vm1273_vm3 = vcmask 31744   ;;  %vm1451_vm6 = vcmask 523264   ;;  %vm2129_vm13 = vcmask 1043456  }
 0x16e   : > { %v7923_v34 = vpop.eup %7922  ;;  %6588 = vmatprep.mubr.msk.f32.mxu1 %vm507_vm0, %v871_v63  ;;  %v864_v50 = vmul.f32 %v7921_v33, %v784_v39  ;;  %vm8804_vm4 = vmpackc.low %vm1273_vm3, %vm1273_vm3 }
 0x16f   : > { %v7925_v51 = vpop.eup %7924  ;;  %v668_v28 = vmul.f32 %v7923_v34, %v595_v40 }
 0x170   : > { %v7927_v53 = vpop.eup %7926  ;;  %v872_v57 = vadd.f32 %v8619_v3, %v864_v50  ;;  %v670_v46 = vmul.f32 %v7925_v51, %v596_v13 }
 0x171   : > { %v7929_v60 = vpop.eup %7928  ;;  %v689_v4 = vadd.f32 %v8619_v3, %v668_v28  ;;  %v672_v7 = vmul.f32 %v7927_v53, %v597_v1  ;;  %v5907_v53 = vld [vmem:[%s10261_s10] ss:$0 sm:$0xff] }
 0x172   : > { %v7931_v8 = vpop.eup %7930  ;;  %6589 = vmatmul.mubr.msk.f32.gmra.mrb[6].mxu1 %vm507_vm0, %v872_v57  ;;  %v690_v12 = vadd.f32 %v8619_v3, %v670_v46  ;;  %v674_v15 = vmul.f32 %v7929_v60, %v598_v11 }
 0x173   : > { %v7933_v43 = vpop.eup %7932  ;;  %6559 = vmatprep.mubr.msk.f32.mxu0 %vm507_vm0, %v689_v4  ;;  %v691_v35 = vadd.f32 %v8619_v3, %v672_v7  ;;  %v676_v58 = vmul.f32 %v7931_v8, %v599_v23 }
 0x174   : > { %v7935_v41 = vpop.eup %7934  ;;  %6560 = vmatmul.mubr.msk.f32.vlgmr.msra.gmra.mrb[0].mxu0 %vm507_vm0, %v690_v12  ;;  %v692_v21 = vadd.f32 %v8619_v3, %v674_v15  ;;  %v678_v61 = vmul.f32 %v7933_v43, %v600_v9 }
 0x175   : > { %v7937_v30 = vpop.eup %7936  ;;  %6562 = vmatprep.mubr.msk.f32.mxu0 %vm507_vm0, %v691_v35  ;;  %v693_v22 = vadd.f32 %v8619_v3, %v676_v58  ;;  %v680_v59 = vmul.f32 %v7935_v41, %v601_v18  ;;  %7190 = vmatpush3.bf16.msra.mxu0 %v8481_v6 }
 0x176   : > { %7192 = vmatprep.subr.bf16.mxu0 %v7191_v17  ;;  %v694_v55 = vadd.f32 %v8619_v3, %v678_v61  ;;  %v682_v5 = vmul.f32 %v7937_v30, %v602_v47 }
 0x177   : > { %v695_v14 = vadd.f32 %v8619_v3, %v680_v59 }
 0x178   : > { %6563 = vmatmul.mubr.msk.f32.gmra.mrb[2].mxu0 %vm507_vm0, %v692_v21  ;;  %v696_v52 = vadd.f32 %v8619_v3, %v682_v5 }
 0x179   : > { %6565 = vmatprep.mubr.msk.f32.mxu0 %vm507_vm0, %v693_v22  ;;  %7194 = vmatpush3.bf16.msra.mxu0 %v7191_v17 }
 0x17c   : > { %6566 = vmatmul.mubr.msk.f32.gmra.mrb[4].mxu0 %vm507_vm0, %v694_v55 }
 0x17d   : > { %6568 = vmatprep.mubr.msk.f32.mxu0 %vm507_vm0, %v695_v14 }
 0x180   : > { %6569 = vmatmul.mubr.msk.f32.gmra.mrb[6].mxu0 %vm507_vm0, %v696_v52 }
 0x181   : > { %6599 = vmatprep.mubr.msk.f32.mxu0 %vm507_vm0, %v8642_v2 }
 0x184   : > { %6600 = vmatmul.mubr.msk.f32.vlgmr.msra.gmra.mrb[8].mxu0 %vm507_vm0, %v8661_v48 }
 0x185   : > { %6602 = vmatprep.mubr.msk.f32.mxu0 %vm507_vm0, %v8686_v27 }
 0x188   : > { %6603 = vmatmul.mubr.msk.f32.gmra.mrb[10].mxu0 %vm507_vm0, %v8715_v31 }
 0x189   : > { %6605 = vmatprep.mubr.msk.f32.mxu0 %vm507_vm0, %v8735_v49 }
 0x18c   : > { %6606 = vmatmul.mubr.msk.f32.gmra.mrb[12].mxu0 %vm507_vm0, %v870_v38  ;;  %v5889_v38 = vld [vmem:[%s10257_s6] ss:$0 sm:$0xff] }
 0x18d   : > { %6608 = vmatprep.mubr.msk.f32.mxu0 %vm507_vm0, %v871_v63 }
 0x190   : > { %6609 = vmatmul.mubr.msk.f32.gmra.mrb[14].mxu0 %vm507_vm0, %v872_v57 }
 0x232   : > { %v6581_v6 = vpop.f32.mrb[0].mxu1 }
 0x233   : > { %v1120_v16 = vadd.f32 %v6581_v6, %v5898_v25  ;;  %v1114_v3 = vpop.f32.mrb[1].mxu1 }
 0x234   : > { %v1115_v2 = vadd.f32 %v5898_v25, %v1114_v3 }
 0x236   : > { %v7195_v27 = vpack.c.bf16 %v1120_v16, %v1115_v2  ;;  %v8808_v31 = vpack.i.bf16 %v1120_v16, %v1115_v2  ;;  %v8885_v2 = vld [vmem:[%s8882_s26 + $0x8] sm:$0xff] }
 0x237   : > { %vm1436_vm5 = vcmp.eq.f32.partialorder %v8885_v2, 0.0 }
 0x238   : > { %7197 = vmatprep.subr.msk.bf16.mxu1 %vm8804_vm4, %v7195_v27 }
 0x239   : > { %7200 = vmatpush3.bf16.xpose.msk.msra.mxu1 %vm8804_vm4, %v7195_v27  ;;  %v8888_v27 = vld [vmem:[%s8882_s26] sm:$0xff] }
 0x23a   : > { %v6584_v37 = vpop.f32.mrb[2].mxu1  ;;  %vm1435_vm7 = vcmp.eq.f32.partialorder %v8888_v27, 0.0 }
 0x23b   : > { %v1130_v32 = vadd.f32 %v6584_v37, %v5898_v25  ;;  %v1124_v36 = vpop.f32.mrb[3].mxu1 }
 0x23c   : > { %v1125_v44 = vadd.f32 %v5898_v25, %v1124_v36 }
 0x23e   : > { %v7201_v26 = vpack.c.bf16 %v1130_v32, %v1125_v44  ;;  %v8814_v19 = vpack.i.bf16 %v1130_v32, %v1125_v44  ;;  %v8893_v44 = vld [vmem:[%s8882_s26 + $0x18] sm:$0xff] }
 0x23f   : > { %vm1438_vm8 = vcmp.eq.f32.partialorder %v8893_v44, 0.0 }
 0x240   : > { %v6587_v56 = vpop.f32.mrb[4].mxu1  ;;  %7203 = vmatprep.subr.msk.bf16.mxu1 %vm8804_vm4, %v7201_v26 }
 0x241   : > { %v1140_v62 = vadd.f32 %v6587_v56, %v5898_v25  ;;  %v1134_v45 = vpop.f32.mrb[5].mxu1  ;;  %7206 = vmatpush3.bf16.xpose.msk.msra.mxu1 %vm8804_vm4, %v7201_v26  ;;  %v8896_v56 = vld [vmem:[%s8882_s26 + $0x10] sm:$0xff] }
 0x242   : > { %v1135_v0 = vadd.f32 %v5898_v25, %v1134_v45  ;;  %vm1437_vm9 = vcmp.eq.f32.partialorder %v8896_v56, 0.0 }
 0x244   : > { %v7207_v54 = vpack.c.bf16 %v1140_v62, %v1135_v0  ;;  %v8820_v42 = vpack.i.bf16 %v1140_v62, %v1135_v0 }
 0x245   : > { %v6590_v24 = vpop.f32.mrb[6].mxu1 }
 0x246   : > { %v1150_v49 = vadd.f32 %v6590_v24, %v5898_v25  ;;  %v1144_v20 = vpop.f32.mrb[7].mxu1  ;;  %7209 = vmatprep.subr.msk.bf16.mxu1 %vm8804_vm4, %v7207_v54 }
 0x247   : > { %v1145_v39 = vadd.f32 %v5898_v25, %v1144_v20  ;;  %v6561_v63 = vpop.f32.mrb[0].mxu0 }
 0x248   : > { %v974_v33 = vpop.f32.mrb[1].mxu0  ;;  %v8842_v11 = vadd.f32 %v6561_v63, %v5889_v38  ;;  %v8910_v63 = vld [vmem:[%s8882_s26 + $0x20] sm:$0xff] }
 0x249   : > { %v8827_v40 = vadd.f32 %v5889_v38, %v974_v33  ;;  %v7213_v34 = vpack.c.bf16 %v1150_v49, %v1145_v39  ;;  %v8829_v13 = vpack.i.bf16 %v1150_v49, %v1145_v39  ;;  %7212 = vmatpush3.bf16.xpose.msk.msra.mxu1 %vm8804_vm4, %v7207_v54  ;;  %vm1439_vm11 = vcmp.eq.f32.partialorder %v8910_v63, 0.0 }
 0x24b   : > { %v6564_v50 = vpop.f32.mrb[2].mxu0  ;;  %6627 = vmatprep.mubr.msk.f32.mxu1 %vm1273_vm3, %v8827_v40  ;;  %7215 = vmatprep.subr.msk.bf16.mxu1 %vm8804_vm4, %v7213_v34 }
 0x24c   : > { %v984_v51 = vpop.f32.mrb[3].mxu0  ;;  %v8848_v7 = vadd.f32 %v6564_v50, %v5889_v38 }
 0x24d   : > { %v8844_v46 = vadd.f32 %v5889_v38, %v984_v51 }
 0x24f   : > { %v6567_v1 = vpop.f32.mrb[4].mxu0 }
 0x250   : > { %v994_v28 = vpop.f32.mrb[5].mxu0  ;;  %v8858_v35 = vadd.f32 %v6567_v1, %v5889_v38 }
 0x251   : > { %7218 = vmatpush3.bf16.xpose.msk.msra.mxu1 %vm8804_vm4, %v7213_v34  ;;  %v8850_v8 = vadd.f32 %v5889_v38, %v994_v28 }
 0x253   : > { %v6570_v29 = vpop.f32.mrb[6].mxu0 }
 0x254   : > { %v1004_v10 = vpop.f32.mrb[7].mxu0  ;;  %v8868_v47 = vadd.f32 %v6570_v29, %v5889_v38 }
 0x255   : > { %v8860_v58 = vadd.f32 %v5889_v38, %v1004_v10  ;;  %v8907_v38 = vld [vmem:[%s8882_s26 + $0x28] sm:$0xff]  ;;  %v8921_v10 = vld [vmem:[%s8882_s26 + $0x38] sm:$0xff] }
 0x256   : > { %vm1440_vm10 = vcmp.eq.f32.partialorder %v8907_v38, 0.0  ;;  %vm1442_vm14 = vcmp.eq.f32.partialorder %v8921_v10, 0.0 }
 0x257   : > { %v6601_v57 = vpop.f32.mrb[8].mxu0 }
 0x258   : > { %v1236_v60 = vadd.f32 %v6601_v57, %v5907_v53  ;;  %v1230_v23 = vpop.f32.mrb[9].mxu0  ;;  %6628 = vmatmul.mubr.msk.f32.vlgmr.msra.gmra.mrb[8].mxu1 %vm1273_vm3, %v8842_v11  ;;  %v8924_v57 = vld [vmem:[%s8882_s26 + $0x30] sm:$0xff] }
 0x259   : > { %v1231_v4 = vadd.f32 %v5907_v53, %v1230_v23  ;;  %6630 = vmatprep.mubr.msk.f32.mxu1 %vm1273_vm3, %v8844_v46  ;;  %10275 = vst [vmem:[#allocation4_spill] sm:$0xff] %v8924_v57  ;;  %vm1441_vm12 = vcmp.eq.f32.partialorder %v8924_v57, 0.0 }
 0x25b   : > { %v6604_v9 = vpop.f32.mrb[10].mxu0  ;;  %v7219_v12 = vpack.c.bf16 %v1236_v60, %v1231_v4  ;;  %v8854_v15 = vpack.i.bf16 %v1236_v60, %v1231_v4 }
 0x25c   : > { %v1246_v17 = vadd.f32 %v6604_v9, %v5907_v53  ;;  %v1240_v43 = vpop.f32.mrb[11].mxu0  ;;  %6631 = vmatmul.mubr.msk.f32.gmra.mrb[10].mxu1 %vm1273_vm3, %v8848_v7 }
 0x25d   : > { %10273 = vst [vmem:[#allocation2_spill] sm:$0xff] %v8854_v15  ;;  %v1241_v18 = vadd.f32 %v5907_v53, %v1240_v43  ;;  %7220 = vmatprep.subr.bf16.mxu0 %v7219_v12  ;;  %6633 = vmatprep.mubr.msk.f32.mxu1 %vm1273_vm3, %v8850_v8 }
 0x25e   : > { %7222 = vmatpush3.bf16.msra.mxu0 %v7219_v12 }
 0x25f   : > { %v6607_v41 = vpop.f32.mrb[12].mxu0  ;;  %v7223_v21 = vpack.c.bf16 %v1246_v17, %v1241_v18  ;;  %v8864_v61 = vpack.i.bf16 %v1246_v17, %v1241_v18 }
 0x260   : > { %v1256_v30 = vadd.f32 %v6607_v41, %v5907_v53  ;;  %v1250_v22 = vpop.f32.mrb[13].mxu0  ;;  %6634 = vmatmul.mubr.msk.f32.gmra.mrb[12].mxu1 %vm1273_vm3, %v8858_v35 }
 0x261   : > { %10274 = vst [vmem:[#allocation3_spill] sm:$0xff] %v8864_v61  ;;  %v1251_v59 = vadd.f32 %v5907_v53, %v1250_v22  ;;  %7224 = vmatprep.subr.bf16.mxu0 %v7223_v21  ;;  %6636 = vmatprep.mubr.msk.f32.mxu1 %vm1273_vm3, %v8860_v58 }
 0x262   : > { %7226 = vmatpush3.bf16.msra.mxu0 %v7223_v21 }
 0x263   : > { %v6610_v55 = vpop.f32.mrb[14].mxu0  ;;  %v7227_v5 = vpack.c.bf16 %v1256_v30, %v1251_v59  ;;  %v8872_v14 = vpack.i.bf16 %v1256_v30, %v1251_v59 }
 0x264   : > { %v1266_v52 = vadd.f32 %v6610_v55, %v5907_v53  ;;  %v1260_v25 = vpop.f32.mrb[15].mxu0  ;;  %6637 = vmatmul.mubr.msk.f32.gmra.mrb[14].mxu1 %vm1273_vm3, %v8868_v47 }
 0x265   : > { %v1261_v6 = vadd.f32 %v5907_v53, %v1260_v25  ;;  %7228 = vmatprep.subr.bf16.mxu0 %v7227_v5 }
 0x266   : > { %7230 = vmatpush3.bf16.msra.mxu0 %v7227_v5 }
 0x267   : > { %v7231_v16 = vpack.c.bf16 %v1266_v52, %v1261_v6  ;;  %v8876_v3 = vpack.i.bf16 %v1266_v52, %v1261_v6 }
 0x269   : > { %7232 = vmatprep.subr.bf16.mxu0 %v7231_v16 }
 0x26a   : > { %7234 = vmatpush3.bf16.msra.mxu0 %v7231_v16 }
 0x32b   : > { %v6629_v37 = vpop.f32.mrb[8].mxu1 }
 0x32c   : > { %v1428_v32 = vmul.f32 0.5, %v6629_v37  ;;  %v1388_v36 = vpop.f32.mrb[9].mxu1 }
 0x32d   : > { %v1427_v26 = vmul.f32 0.5, %v1388_v36 }
 0x32e   : > { %v1444_v62 = vsel %vm1436_vm5, -1e+09, %v1428_v32 }
 0x32f   : > { %v6632_v45 = vpop.f32.mrb[10].mxu1  ;;  %v1455_v0 = vsel %vm1451_vm6, %v1444_v62, -inf  ;;  %v1443_v54 = vsel %vm1435_vm7, -1e+09, %v1427_v26 }
 0x330   : > { %v1430_v24 = vmul.f32 0.5, %v6632_v45  ;;  %1456 = vmax.xlane.f32.xlu1 %v1455_v0  ;;  %v1398_v49 = vpop.f32.mrb[11].mxu1  ;;  %v1452_v20 = vsel %vm1451_vm6, %v1443_v54, -inf }
 0x331   : > { %v1429_v39 = vmul.f32 0.5, %v1398_v49  ;;  %1453 = vmax.xlane.f32.xlu0 %v1452_v20 }
 0x332   : > { %v1446_v33 = vsel %vm1438_vm8, -1e+09, %v1430_v24 }
 0x333   : > { %v6635_v34 = vpop.f32.mrb[12].mxu1  ;;  %v1461_v50 = vsel %vm1451_vm6, %v1446_v33, -inf  ;;  %v1445_v51 = vsel %vm1437_vm9, -1e+09, %v1429_v39 }
 0x334   : > { %v1432_v1 = vmul.f32 0.5, %v6635_v34  ;;  %1462 = vmax.xlane.f32.xlu1 %v1461_v50  ;;  %v1408_v28 = vpop.f32.mrb[13].mxu1  ;;  %v1458_v29 = vsel %vm1451_vm6, %v1445_v51, -inf }
 0x335   : > { %v1431_v53 = vmul.f32 0.5, %v1408_v28  ;;  %1459 = vmax.xlane.f32.xlu0 %v1458_v29 }
 0x336   : > { %v1448_v60 = vsel %vm1440_vm10, -1e+09, %v1432_v1 }
 0x337   : > { %v6638_v23 = vpop.f32.mrb[14].mxu1  ;;  %v1467_v4 = vsel %vm1451_vm6, %v1448_v60, -inf  ;;  %v1447_v9 = vsel %vm1439_vm11, -1e+09, %v1431_v53 }
 0x338   : > { %v1434_v12 = vmul.f32 0.5, %v6638_v23  ;;  %1468 = vmax.xlane.f32.xlu1 %v1467_v4  ;;  %v1418_v17 = vpop.f32.mrb[15].mxu1  ;;  %v1464_v43 = vsel %vm1451_vm6, %v1447_v9, -inf }
 0x339   : > { %v1433_v18 = vmul.f32 0.5, %v1418_v17  ;;  %1465 = vmax.xlane.f32.xlu0 %v1464_v43 }
 0x33a   : > { %v1450_v41 = vsel %vm1442_vm14, -1e+09, %v1434_v12 }
 0x33b   : > { %v1473_v21 = vsel %vm1451_vm6, %v1450_v41, -inf  ;;  %v1449_v30 = vsel %vm1441_vm12, -1e+09, %v1433_v18 }
 0x33c   : > { %1474 = vmax.xlane.f32.xlu1 %v1473_v21  ;;  %v1470_v22 = vsel %vm1451_vm6, %v1449_v30, -inf }
 0x33d   : > { %1471 = vmax.xlane.f32.xlu0 %v1470_v22 }
 0x3bd   : > { %v1457_v59 = vpop.xlane.xlu1 %1456 }
 0x3be   : > { %v1477_v55 = vsub.f32 %v1444_v62, %v1457_v59  ;;  %v1454_v5 = vpop.xlane.xlu0 %1453 }
 0x3bf   : > { %v1476_v52 = vsub.f32 %v1443_v54, %v1454_v5 }
 0x3c0   : > { %v1486_v25 = vmul.f32 1.442695, %v1477_v55 }
 0x3c1   : > { %v1484_v6 = vmul.f32 1.442695, %v1476_v52  ;;  %v1463_v26 = vpop.xlane.xlu1 %1462 }
 0x3c2   : > { %7938 = vpow2.f32 %v1486_v25  ;;  %v1460_v62 = vpop.xlane.xlu0 %1459  ;;  %v1479_v45 = vsub.f32 %v1446_v33, %v1463_v26 }
 0x3c3   : > { %7940 = vpow2.f32 %v1484_v6  ;;  %v1478_v0 = vsub.f32 %v1445_v51, %v1460_v62 }
 0x3c4   : > { %v1490_v49 = vmul.f32 1.442695, %v1479_v45 }
 0x3c5   : > { %v1469_v54 = vpop.xlane.xlu1 %1468  ;;  %v1488_v39 = vmul.f32 1.442695, %v1478_v0 }
 0x3c6   : > { %v1466_v24 = vpop.xlane.xlu0 %1465  ;;  %v1481_v20 = vsub.f32 %v1448_v60, %v1469_v54  ;;  %7942 = vpow2.f32 %v1490_v49 }
 0x3c7   : > { %v1480_v34 = vsub.f32 %v1447_v9, %v1466_v24  ;;  %7944 = vpow2.f32 %v1488_v39 }
 0x3c8   : > { %v1494_v50 = vmul.f32 1.442695, %v1481_v20 }
 0x3c9   : > { %v1492_v1 = vmul.f32 1.442695, %v1480_v34  ;;  %v1475_v9 = vpop.xlane.xlu1 %1474 }
 0x3ca   : > { %7946 = vpow2.f32 %v1494_v50  ;;  %v1483_v12 = vsub.f32 %v1450_v41, %v1475_v9  ;;  %v1472_v17 = vpop.xlane.xlu0 %1471 }
 0x3cb   : > { %7948 = vpow2.f32 %v1492_v1  ;;  %v1482_v18 = vsub.f32 %v1449_v30, %v1472_v17 }
 0x3cc   : > { %v8940_v16 = vpop.eup %7938  ;;  %v1498_v43 = vmul.f32 1.442695, %v1483_v12 }
 0x3cd   : > { %v8942_v37 = vpop.eup %7940  ;;  %v1503_v32 = vsel %vm1451_vm6, %v8940_v16, 0.0  ;;  %v1496_v21 = vmul.f32 1.442695, %v1482_v18 }
 0x3ce   : > { %1504 = vadd.xlane.f32.xlu1 %v1503_v32  ;;  %v1500_v36 = vsel %vm1451_vm6, %v8942_v37, 0.0  ;;  %7950 = vpow2.f32 %v1498_v43 }
 0x3cf   : > { %1501 = vadd.xlane.f32.xlu0 %v1500_v36  ;;  %7952 = vpow2.f32 %v1496_v21 }
 0x3d0   : > { %v8952_v28 = vpop.eup %7942 }
 0x3d1   : > { %v8954_v29 = vpop.eup %7944  ;;  %v1509_v33 = vsel %vm1451_vm6, %v8952_v28, 0.0 }
 0x3d2   : > { %v1506_v53 = vsel %vm1451_vm6, %v8954_v29, 0.0 }
 0x3d4   : > { %v8958_v51 = vpop.eup %7946 }
 0x3d5   : > { %v8962_v60 = vpop.eup %7948  ;;  %v1515_v23 = vsel %vm1451_vm6, %v8958_v51, 0.0 }
 0x3d6   : > { %v1512_v4 = vsel %vm1451_vm6, %v8962_v60, 0.0 }
 0x3d8   : > { %v8988_v41 = vpop.eup %7950 }
 0x3d9   : > { %v1521_v30 = vsel %vm1451_vm6, %v8988_v41, 0.0  ;;  %v8994_v22 = vpop.eup %7952 }
 0x3da   : > { %v1518_v59 = vsel %vm1451_vm6, %v8994_v22, 0.0 }
 0x3df   : > { %7600 = vrot.lane.b32.xlu1 %v8814_v19, %s8210_s28 }
 0x3e5   : > { %7595 = vrot.lane.b32.xlu0 %v8808_v31, %s8210_s28 }
 0x403   : > { %1510 = vadd.xlane.f32.xlu1 %v1509_v33 }
 0x404   : > { %1507 = vadd.xlane.f32.xlu0 %v1506_v53 }
 0x407   : > { %1516 = vadd.xlane.f32.xlu1 %v1515_v23 }
 0x408   : > { %1513 = vadd.xlane.f32.xlu0 %v1512_v4 }
 0x418   : > { %7610 = vrot.lane.b32.xlu1 %v8829_v13, %s8210_s28 }
 0x41c   : > { %1671 = vrot.lane.b32.xlu1 %v8842_v11, %s8210_s28 }
 0x41e   : > { %7605 = vrot.lane.b32.xlu0 %v8820_v42, %s8210_s28 }
 0x422   : > { %1669 = vrot.lane.b32.xlu0 %v8827_v40, %s8210_s28 }
 0x426   : > { %1673 = vrot.lane.b32.xlu0 %v8844_v46, %s8210_s28 }
 0x42a   : > { %1677 = vrot.lane.b32.xlu0 %v8850_v8, %s8210_s28 }
 0x42e   : > { %1681 = vrot.lane.b32.xlu0 %v8860_v58, %s8210_s28 }
 0x432   : > { %7615 = vrot.lane.b32.xlu0 %v8808_v31, %s8211_s29 }
 0x436   : > { %7625 = vrot.lane.b32.xlu0 %v8820_v42, %s8211_s29 }
 0x43a   : > { %2368 = vrot.lane.b32.xlu0 %v8827_v40, %s8211_s29 }
 0x43e   : > { %2372 = vrot.lane.b32.xlu0 %v8844_v46, %s8211_s29 }
 0x440   : > { %1522 = vadd.xlane.f32.xlu1 %v1521_v30 }
 0x442   : > { %2376 = vrot.lane.b32.xlu0 %v8850_v8, %s8211_s29 }
 0x444   : > { %1519 = vadd.xlane.f32.xlu1 %v1518_v59 }
 0x446   : > { %2380 = vrot.lane.b32.xlu0 %v8860_v58, %s8211_s29 }
 0x455   : > { %1675 = vrot.lane.b32.xlu1 %v8848_v7, %s8210_s28 }
 0x459   : > { %1679 = vrot.lane.b32.xlu1 %v8858_v35, %s8210_s28 }
 0x45b   : > { %v1505_v55 = vpop.xlane.xlu1 %1504 }
 0x45c   : > { %7954 = vrcp.f32 %v1505_v55  ;;  %v1502_v5 = vpop.xlane.xlu0 %1501 }
 0x45d   : > { %7956 = vrcp.f32 %v1502_v5  ;;  %1683 = vrot.lane.b32.xlu1 %v8868_v47, %s8210_s28 }
 0x45f   : > { %v7601_v36 = vpop.permute.xlu1 %7600 }
 0x460   : > { %v7596_v52 = vpop.permute.xlu0 %7595  ;;  %v7603_v45 = vunpack.i.h.bf16 %v7601_v36  ;;  %v7602_v0 = vunpack.i.l.bf16 %v7601_v36 }
 0x461   : > { %v7598_v25 = vunpack.i.h.bf16 %v7596_v52  ;;  %v7597_v6 = vunpack.i.l.bf16 %v7596_v52  ;;  %7620 = vrot.lane.b32.xlu1 %v8814_v19, %s8211_s29 }
 0x462   : > { %v7241_v49 = vpack.c.bf16 %v7603_v45, %v7602_v0 }
 0x463   : > { %v7235_v32 = vpack.c.bf16 %v7598_v25, %v7597_v6 }
 0x465   : > { %7630 = vrot.lane.b32.xlu1 %v8829_v13, %s8211_s29  ;;  %7237 = vmatprep.subr.msk.bf16.mxu0 %vm8804_vm4, %v7235_v32 }
 0x466   : > { %v7955_v26 = vpop.eup %7954 }
 0x467   : > { %v7957_v62 = vpop.eup %7956  ;;  %v1527_v24 = vmul.f32 %v7955_v26, %v8940_v16 }
 0x468   : > { %v1525_v54 = vmul.f32 %v7957_v62, %v8942_v37 }
 0x469   : > { %2370 = vrot.lane.b32.xlu1 %v8842_v11, %s8211_s29 }
 0x46a   : > { %6655 = vmatprep.mubr.msk.f32.mxu0 %vm1451_vm6, %v1525_v54 }
 0x46b   : > { %6656 = vmatmul.mubr.msk.f32.vlgmr.msra.gmra.mrb[16].mxu0 %vm1451_vm6, %v1527_v24 }
 0x46c   : > { %7240 = vmatpush3.bf16.xpose.msk.msra.mxu0 %vm8804_vm4, %v7235_v32 }
 0x46d   : > { %7243 = vmatprep.subr.msk.bf16.mxu0 %vm8804_vm4, %v7241_v49  ;;  %2374 = vrot.lane.b32.xlu1 %v8848_v7, %s8211_s29 }
 0x471   : > { %2378 = vrot.lane.b32.xlu1 %v8858_v35, %s8211_s29 }
 0x474   : > { %7246 = vmatpush3.bf16.xpose.msk.msra.mxu0 %vm8804_vm4, %v7241_v49 }
 0x475   : > { %2382 = vrot.lane.b32.xlu1 %v8868_v47, %s8211_s29 }
 0x490   : > { %v1511_v16 = vpop.xlane.xlu1 %1510 }
 0x491   : > { %7958 = vrcp.f32 %v1511_v16  ;;  %v1508_v37 = vpop.xlane.xlu0 %1507 }
 0x492   : > { %7960 = vrcp.f32 %v1508_v37 }
 0x494   : > { %v1517_v20 = vpop.xlane.xlu1 %1516 }
 0x495   : > { %7962 = vrcp.f32 %v1517_v20  ;;  %v1514_v39 = vpop.xlane.xlu0 %1513 }
 0x496   : > { %7964 = vrcp.f32 %v1514_v39 }
 0x498   : > { %v7611_v34 = vpop.permute.xlu1 %7610 }
 0x499   : > { %v7606_v50 = vpop.permute.xlu0 %7605  ;;  %v7613_v1 = vunpack.i.h.bf16 %v7611_v34  ;;  %v7612_v33 = vunpack.i.l.bf16 %v7611_v34 }
 0x49a   : > { %v7608_v53 = vunpack.i.h.bf16 %v7606_v50  ;;  %v7607_v23 = vunpack.i.l.bf16 %v7606_v50 }
 0x49b   : > { %v7959_v4 = vpop.eup %7958  ;;  %v7253_v18 = vpack.c.bf16 %v7613_v1, %v7612_v33 }
 0x49c   : > { %v7961_v9 = vpop.eup %7960  ;;  %v7247_v12 = vpack.c.bf16 %v7608_v53, %v7607_v23  ;;  %v1531_v21 = vmul.f32 %v7959_v4, %v8952_v28  ;;  %v1672_v26 = vpop.permute.xlu1 %1671 }
 0x49d   : > { %v1670_v17 = vpop.permute.xlu0 %1669  ;;  %v1529_v43 = vmul.f32 %v7961_v9, %v8954_v29 }
 0x49e   : > { %7249 = vmatprep.subr.msk.bf16.mxu0 %vm8804_vm4, %v7247_v12 }
 0x49f   : > { %v7963_v30 = vpop.eup %7962  ;;  %6658 = vmatprep.mubr.msk.f32.mxu0 %vm1451_vm6, %v1529_v43  ;;  %7252 = vmatpush3.bf16.xpose.msk.msra.mxu0 %vm8804_vm4, %v7247_v12 }
 0x4a0   : > { %v7965_v59 = vpop.eup %7964  ;;  %6659 = vmatmul.mubr.msk.f32.gmra.mrb[18].mxu0 %vm1451_vm6, %v1531_v21  ;;  %7255 = vmatprep.subr.msk.bf16.mxu0 %vm8804_vm4, %v7253_v18  ;;  %v1535_v5 = vmul.f32 %v7963_v30, %v8958_v51 }
 0x4a1   : > { %v1674_v55 = vpop.permute.xlu0 %1673  ;;  %v1533_v29 = vmul.f32 %v7965_v59, %v8962_v60 }
 0x4a3   : > { %6661 = vmatprep.mubr.msk.f32.mxu0 %vm1451_vm6, %v1533_v29 }
 0x4a4   : > { %6662 = vmatmul.mubr.msk.f32.gmra.mrb[20].mxu0 %vm1451_vm6, %v1535_v5 }
 0x4a5   : > { %v1678_v28 = vpop.permute.xlu0 %1677 }
 0x4a7   : > { %7258 = vmatpush3.bf16.xpose.msk.msra.mxu0 %vm8804_vm4, %v7253_v18 }
 0x4a9   : > { %v1682_v52 = vpop.permute.xlu0 %1681 }
 0x4ad   : > { %v7616_v25 = vpop.permute.xlu0 %7615 }
 0x4ae   : > { %v7618_v6 = vunpack.i.h.bf16 %v7616_v25  ;;  %v7617_v32 = vunpack.i.l.bf16 %v7616_v25 }
 0x4b0   : > { %v7275_v36 = vpack.c.bf16 %v7618_v6, %v7617_v32 }
 0x4b1   : > { %v7626_v50 = vpop.permute.xlu0 %7625 }
 0x4b2   : > { %7277 = vmatprep.subr.msk.bf16.mxu0 %vm8804_vm4, %v7275_v36 }
 0x4b5   : > { %v2369_v53 = vpop.permute.xlu0 %2368 }
 0x4cd   : > { %v1523_v60 = vpop.xlane.xlu1 %1522 }
 0x4ce   : > { %7966 = vrcp.f32 %v1523_v60 }
 0x4d1   : > { %v1520_v51 = vpop.xlane.xlu1 %1519 }
 0x4d2   : > { %7968 = vrcp.f32 %v1520_v51 }
 0x4d5   : > { %v1676_v62 = vpop.permute.xlu1 %1675 }
 0x4d8   : > { %v7967_v0 = vpop.eup %7966 }
 0x4d9   : > { %v1680_v45 = vpop.permute.xlu1 %1679  ;;  %v1539_v16 = vmul.f32 %v7967_v0, %v8988_v41  ;;  %v7628_v41 = vunpack.i.h.bf16 %v7626_v50 }
 0x4dc   : > { %v7969_v54 = vpop.eup %7968 }
 0x4dd   : > { %v1684_v24 = vpop.permute.xlu1 %1683  ;;  %v1537_v49 = vmul.f32 %v7969_v54, %v8994_v22  ;;  %v7627_v22 = vunpack.i.l.bf16 %v7626_v50 }
 0x4df   : > { %6664 = vmatprep.mubr.msk.f32.mxu0 %vm1451_vm6, %v1537_v49  ;;  %v7287_v1 = vpack.c.bf16 %v7628_v41, %v7627_v22 }
 0x4e0   : > { %6665 = vmatmul.mubr.msk.f32.gmra.mrb[22].mxu0 %vm1451_vm6, %v1539_v16 }
 0x4e1   : > { %v7621_v37 = vpop.permute.xlu1 %7620  ;;  %6683 = vmatprep.mubr.msk.f32.mxu0 %vm1273_vm3, %v1670_v17  ;;  %v2373_v17 = vpop.permute.xlu0 %2372 }
 0x4e2   : > { %v7623_v20 = vunpack.i.h.bf16 %v7621_v37  ;;  %v7622_v39 = vunpack.i.l.bf16 %v7621_v37 }
 0x4e4   : > { %v7281_v34 = vpack.c.bf16 %v7623_v20, %v7622_v39  ;;  %6684 = vmatmul.mubr.msk.f32.vlgmr.msra.gmra.mrb[24].mxu0 %vm1273_vm3, %v1672_v26 }
 0x4e5   : > { %7280 = vmatpush3.bf16.xpose.msk.msra.mxu0 %vm8804_vm4, %v7275_v36  ;;  %6686 = vmatprep.mubr.msk.f32.mxu0 %vm1273_vm3, %v1674_v55  ;;  %v7631_v33 = vpop.permute.xlu1 %7630  ;;  %v2377_v18 = vpop.permute.xlu0 %2376 }
 0x4e6   : > { %7283 = vmatprep.subr.msk.bf16.mxu0 %vm8804_vm4, %v7281_v34  ;;  %v7633_v23 = vunpack.i.h.bf16 %v7631_v33  ;;  %v7632_v4 = vunpack.i.l.bf16 %v7631_v33 }
 0x4e8   : > { %6687 = vmatmul.mubr.msk.f32.gmra.mrb[26].mxu0 %vm1273_vm3, %v1676_v62  ;;  %v7293_v9 = vpack.c.bf16 %v7633_v23, %v7632_v4 }
 0x4e9   : > { %6689 = vmatprep.mubr.msk.f32.mxu0 %vm1273_vm3, %v1678_v28  ;;  %v2371_v12 = vpop.permute.xlu1 %2370  ;;  %v2381_v30 = vpop.permute.xlu0 %2380 }
 0x4ec   : > { %6690 = vmatmul.mubr.msk.f32.gmra.mrb[28].mxu0 %vm1273_vm3, %v1680_v45 }
 0x4ed   : > { %7286 = vmatpush3.bf16.xpose.msk.msra.mxu0 %vm8804_vm4, %v7281_v34  ;;  %6692 = vmatprep.mubr.msk.f32.mxu0 %vm1273_vm3, %v1682_v52  ;;  %v2375_v43 = vpop.permute.xlu1 %2374 }
 0x4ee   : > { %7289 = vmatprep.subr.msk.bf16.mxu0 %vm8804_vm4, %v7287_v1 }
 0x4f0   : > { %6693 = vmatmul.mubr.msk.f32.gmra.mrb[30].mxu0 %vm1273_vm3, %v1684_v24 }
 0x4f1   : > { %6767 = vmatprep.mubr.msk.f32.mxu0 %vm1273_vm3, %v2369_v53  ;;  %v2379_v21 = vpop.permute.xlu1 %2378 }
 0x4f5   : > { %7292 = vmatpush3.bf16.xpose.msk.msra.mxu0 %vm8804_vm4, %v7287_v1  ;;  %v2383_v59 = vpop.permute.xlu1 %2382 }
 0x4f6   : > { %7295 = vmatprep.subr.msk.bf16.mxu0 %vm8804_vm4, %v7293_v9 }
 0x4fd   : > { %7298 = vmatpush3.bf16.xpose.msk.msra.mxu0 %vm8804_vm4, %v7293_v9 }
 0x504   : > { %6768 = vmatmul.mubr.msk.f32.vlgmr.msra.gmra.mrb[32].mxu0 %vm1273_vm3, %v2371_v12 }
 0x505   : > { %6770 = vmatprep.mubr.msk.f32.mxu0 %vm1273_vm3, %v2373_v17 }
 0x508   : > { %6771 = vmatmul.mubr.msk.f32.gmra.mrb[34].mxu0 %vm1273_vm3, %v2375_v43 }
 0x509   : > { %6773 = vmatprep.mubr.msk.f32.mxu0 %vm1273_vm3, %v2377_v18 }
 0x50c   : > { %6774 = vmatmul.mubr.msk.f32.gmra.mrb[36].mxu0 %vm1273_vm3, %v2379_v21 }
 0x50d   : > { %6776 = vmatprep.mubr.msk.f32.mxu0 %vm1273_vm3, %v2381_v30 }
 0x510   : > { %6777 = vmatmul.mubr.msk.f32.gmra.mrb[38].mxu0 %vm1273_vm3, %v2383_v59 }
 0x53e   : > { %v9084_v55 = vpop.f32.mrb[16].mxu0 }
 0x53f   : > { %v9086_v29 = vpop.f32.mrb[17].mxu0 }
 0x573   : > { %v9088_v5 = vpop.f32.mrb[18].mxu0 }
 0x574   : > { %v9090_v28 = vpop.f32.mrb[19].mxu0 }
 0x577   : > { %v9092_v52 = vpop.f32.mrb[20].mxu0 }
 0x578   : > { %v9094_v25 = vpop.f32.mrb[21].mxu0 }
 0x5b3   : > { %v9096_v6 = vpop.f32.mrb[22].mxu0 }
 0x5b4   : > { %10276 = vst [vmem:[#allocation5_spill] sm:$0xff] %v9096_v6  ;;  %v9098_v32 = vpop.f32.mrb[23].mxu0 }
 0x5b5   : > { %10277 = vst [vmem:[#allocation6_spill] sm:$0xff] %v9098_v32 }
 0x5b7   : > { %v6685_v36 = vpop.f32.mrb[24].mxu0 }
 0x5b8   : > { %v1839_v26 = vmul.f32 0.5, %v6685_v36  ;;  %v1799_v60 = vpop.f32.mrb[25].mxu0 }
 0x5b9   : > { %v1838_v51 = vmul.f32 0.5, %v1799_v60 }
 0x5ba   : > { %v1847_v62 = vsel %vm1436_vm5, -1e+09, %v1839_v26 }
 0x5bb   : > { %v6688_v45 = vpop.f32.mrb[26].mxu0  ;;  %v1857_v0 = vsel %vm1451_vm6, %v1847_v62, -inf  ;;  %v1846_v54 = vsel %vm1435_vm7, -1e+09, %v1838_v51 }
 0x5bc   : > { %v1841_v24 = vmul.f32 0.5, %v6688_v45  ;;  %1858 = vmax.xlane.f32.xlu1 %v1857_v0  ;;  %v1809_v49 = vpop.f32.mrb[27].mxu0  ;;  %v1854_v16 = vsel %vm1451_vm6, %v1846_v54, -inf }
 0x5bd   : > { %v1840_v37 = vmul.f32 0.5, %v1809_v49  ;;  %1855 = vmax.xlane.f32.xlu0 %v1854_v16 }
 0x5be   : > { %v1849_v20 = vsel %vm1438_vm8, -1e+09, %v1841_v24 }
 0x5bf   : > { %v6691_v39 = vpop.f32.mrb[28].mxu0  ;;  %v1863_v34 = vsel %vm1451_vm6, %v1849_v20, -inf  ;;  %v1848_v1 = vsel %vm1437_vm9, -1e+09, %v1840_v37 }
 0x5c0   : > { %v1843_v50 = vmul.f32 0.5, %v6691_v39  ;;  %v1819_v41 = vpop.f32.mrb[29].mxu0  ;;  %v1860_v12 = vsel %vm1451_vm6, %v1848_v1, -inf }
 0x5c1   : > { %v1842_v22 = vmul.f32 0.5, %v1819_v41  ;;  %1864 = vmax.xlane.f32.xlu0 %v1863_v34 }
 0x5c2   : > { %v1851_v33 = vsel %vm1440_vm10, -1e+09, %v1843_v50 }
 0x5c3   : > { %v6694_v53 = vpop.f32.mrb[30].mxu0  ;;  %v1869_v23 = vsel %vm1451_vm6, %v1851_v33, -inf  ;;  %v1850_v43 = vsel %vm1439_vm11, -1e+09, %v1842_v22 }
 0x5c4   : > { %v1845_v4 = vmul.f32 0.5, %v6694_v53  ;;  %1870 = vmax.xlane.f32.xlu1 %v1869_v23  ;;  %v1829_v9 = vpop.f32.mrb[31].mxu0  ;;  %v1866_v30 = vsel %vm1451_vm6, %v1850_v43, -inf }
 0x5c5   : > { %v1844_v17 = vmul.f32 0.5, %v1829_v9  ;;  %1861 = vmax.xlane.f32.xlu0 %v1860_v12 }
 0x5c6   : > { %v1853_v18 = vsel %vm1442_vm14, -1e+09, %v1845_v4 }
 0x5c7   : > { %v1875_v21 = vsel %vm1451_vm6, %v1853_v18, -inf  ;;  %v1852_v59 = vsel %vm1441_vm12, -1e+09, %v1844_v17 }
 0x5c8   : > { %1876 = vmax.xlane.f32.xlu1 %v1875_v21  ;;  %v1872_v36 = vsel %vm1451_vm6, %v1852_v59, -inf }
 0x5c9   : > { %1867 = vmax.xlane.f32.xlu0 %v1866_v30 }
 0x5cd   : > { %1873 = vmax.xlane.f32.xlu0 %v1872_v36 }
 0x5d7   : > { %v9124_v26 = vpop.f32.mrb[32].mxu0 }
 0x5d8   : > { %v9126_v60 = vpop.f32.mrb[33].mxu0 }
 0x5d9   : > { %7640 = vrot.lane.b32.xlu1 %v8864_v61, %s8210_s28 }
 0x5db   : > { %v9130_v51 = vpop.f32.mrb[34].mxu0 }
 0x5dc   : > { %v9132_v45 = vpop.f32.mrb[35].mxu0 }
 0x5df   : > { %v9134_v0 = vpop.f32.mrb[36].mxu0 }
 0x5e0   : > { %v9136_v24 = vpop.f32.mrb[37].mxu0 }
 0x5e3   : > { %v9138_v49 = vpop.f32.mrb[38].mxu0  ;;  %7635 = vrot.lane.b32.xlu0 %v8854_v15, %s8210_s28 }
 0x5e4   : > { %v9142_v16 = vpop.f32.mrb[39].mxu0 }
 0x649   : > { %v1859_v37 = vpop.xlane.xlu1 %1858 }
 0x64a   : > { %v1879_v39 = vsub.f32 %v1847_v62, %v1859_v37  ;;  %v1856_v34 = vpop.xlane.xlu0 %1855 }
 0x64b   : > { %v1878_v50 = vsub.f32 %v1846_v54, %v1856_v34 }
 0x64c   : > { %v1888_v41 = vmul.f32 1.442695, %v1879_v39 }
 0x64d   : > { %v1886_v22 = vmul.f32 1.442695, %v1878_v50 }
 0x64e   : > { %7970 = vpow2.f32 %v1888_v41  ;;  %v1865_v53 = vpop.xlane.xlu0 %1864 }
 0x64f   : > { %7972 = vpow2.f32 %v1886_v22  ;;  %v1881_v23 = vsub.f32 %v1849_v20, %v1865_v53 }
 0x651   : > { %v1892_v4 = vmul.f32 1.442695, %v1881_v23  ;;  %v1871_v9 = vpop.xlane.xlu1 %1870 }
 0x652   : > { %v1883_v12 = vsub.f32 %v1851_v33, %v1871_v9  ;;  %v1862_v17 = vpop.xlane.xlu0 %1861 }
 0x653   : > { %7974 = vpow2.f32 %v1892_v4  ;;  %v1880_v21 = vsub.f32 %v1848_v1, %v1862_v17 }
 0x654   : > { %v1896_v30 = vmul.f32 1.442695, %v1883_v12 }
 0x655   : > { %v1890_v36 = vmul.f32 1.442695, %v1880_v21  ;;  %v1877_v6 = vpop.xlane.xlu1 %1876 }
 0x656   : > { %7976 = vpow2.f32 %v1896_v30  ;;  %v1885_v32 = vsub.f32 %v1853_v18, %v1877_v6  ;;  %v1868_v62 = vpop.xlane.xlu0 %1867 }
 0x657   : > { %7978 = vpow2.f32 %v1890_v36  ;;  %v1882_v54 = vsub.f32 %v1850_v43, %v1868_v62 }
 0x658   : > { %v9144_v37 = vpop.eup %7970  ;;  %v1900_v39 = vmul.f32 1.442695, %v1885_v32 }
 0x659   : > { %v9146_v34 = vpop.eup %7972  ;;  %v1894_v20 = vmul.f32 1.442695, %v1882_v54  ;;  %v1905_v33 = vsel %vm1451_vm6, %v9144_v37, 0.0  ;;  %v7641_v43 = vpop.permute.xlu1 %7640 }
 0x65a   : > { %7980 = vpow2.f32 %v1900_v39  ;;  %1906 = vadd.xlane.f32.xlu1 %v1905_v33  ;;  %v1874_v1 = vpop.xlane.xlu0 %1873  ;;  %v1902_v50 = vsel %vm1451_vm6, %v9146_v34, 0.0  ;;  %v7643_v9 = vunpack.i.h.bf16 %v7641_v43  ;;  %v7642_v12 = vunpack.i.l.bf16 %v7641_v43 }
 0x65b   : > { %7982 = vpow2.f32 %v1894_v20  ;;  %v1884_v6 = vsub.f32 %v1852_v59, %v1874_v1  ;;  %1903 = vadd.xlane.f32.xlu0 %v1902_v50  ;;  %v2537_v50 = vmul.f32 0.5, %v9126_v60 }
 0x65c   : > { %v7263_v62 = vpack.c.bf16 %v7643_v9, %v7642_v12  ;;  %v2541_v12 = vmul.f32 0.5, %v9136_v24  ;;  %v2543_v24 = vmul.f32 0.5, %v9142_v16 }
 0x65d   : > { %v9152_v18 = vpop.eup %7974  ;;  %v1898_v41 = vmul.f32 1.442695, %v1884_v6  ;;  %v2538_v6 = vmul.f32 0.5, %v9124_v26  ;;  %v9208_v43 = vsel %vm1435_vm7, -1e+09, %v2537_v50  ;;  %v2542_v26 = vmul.f32 0.5, %v9134_v0 }
 0x65e   : > { %v7636_v32 = vpop.permute.xlu0 %7635  ;;  %v1911_v22 = vsel %vm1451_vm6, %v9152_v18, 0.0 }
 0x65f   : > { %7984 = vpow2.f32 %v1898_v41  ;;  %v7638_v53 = vunpack.i.h.bf16 %v7636_v32  ;;  %v7637_v23 = vunpack.i.l.bf16 %v7636_v32  ;;  %1912 = vadd.xlane.f32.xlu1 %v1911_v22  ;;  %v2539_v41 = vmul.f32 0.5, %v9132_v45 }
 0x660   : > { %v9156_v4 = vpop.eup %7976  ;;  %v2553_v32 = vsel %vm1451_vm6, %v9208_v43, -inf  ;;  %v9215_v22 = vsel %vm1436_vm5, -1e+09, %v2538_v6 }
 0x661   : > { %v9158_v17 = vpop.eup %7978  ;;  %v1917_v59 = vsel %vm1451_vm6, %v9156_v4, 0.0  ;;  %v7259_v21 = vpack.c.bf16 %v7638_v53, %v7637_v23  ;;  %v2540_v53 = vmul.f32 0.5, %v9130_v51  ;;  %v9220_v60 = vsel %vm1437_vm9, -1e+09, %v2539_v41 }
 0x662   : > { %v1908_v30 = vsel %vm1451_vm6, %v9158_v17, 0.0  ;;  %v2559_v23 = vsel %vm1451_vm6, %v9220_v60, -inf  ;;  %v2556_v45 = vsel %vm1451_vm6, %v9215_v22, -inf  ;;  %v9233_v51 = vsel %vm1440_vm10, -1e+09, %v2542_v26 }
 0x663   : > { %1918 = vadd.xlane.f32.xlu1 %v1917_v59  ;;  %1909 = vadd.xlane.f32.xlu0 %v1908_v30  ;;  %v9229_v9 = vsel %vm1438_vm8, -1e+09, %v2540_v53  ;;  %v2544_v59 = vmul.f32 0.5, %v9138_v49  ;;  %v9243_v30 = vsel %vm1439_vm11, -1e+09, %v2541_v12 }
 0x664   : > { %v9164_v36 = vpop.eup %7980  ;;  %7260 = vmatprep.subr.bf16.mxu1 %v7259_v21  ;;  %v2562_v0 = vsel %vm1451_vm6, %v9229_v9, -inf  ;;  %v2565_v49 = vsel %vm1451_vm6, %v9243_v30, -inf }
 0x665   : > { %v9166_v54 = vpop.eup %7982  ;;  %7262 = vmatpush3.bf16.msra.mxu1 %v7259_v21  ;;  %v1923_v39 = vsel %vm1451_vm6, %v9164_v36, 0.0  ;;  %v2568_v21 = vsel %vm1451_vm6, %v9233_v51, -inf }
 0x666   : > { %7264 = vmatprep.subr.bf16.mxu1 %v7263_v62  ;;  %v1914_v20 = vsel %vm1451_vm6, %v9166_v54, 0.0 }
 0x667   : > { %1924 = vadd.xlane.f32.xlu1 %v1923_v39  ;;  %1915 = vadd.xlane.f32.xlu0 %v1914_v20  ;;  %v9256_v20 = vsel %vm1441_vm12, -1e+09, %v2543_v24 }
 0x669   : > { %v9172_v33 = vpop.eup %7984  ;;  %7266 = vmatpush3.bf16.msra.mxu1 %v7263_v62  ;;  %v9247_v62 = vsel %vm1442_vm14, -1e+09, %v2544_v59 }
 0x66a   : > { %v1920_v1 = vsel %vm1451_vm6, %v9172_v33, 0.0  ;;  %v2574_v39 = vsel %vm1451_vm6, %v9247_v62, -inf }
 0x66b   : > { %1921 = vadd.xlane.f32.xlu1 %v1920_v1  ;;  %v2571_v1 = vsel %vm1451_vm6, %v9256_v20, -inf }
 0x67c   : > { %7650 = vrot.lane.b32.xlu1 %v8876_v3, %s8210_s28 }
 0x67d   : > { %7645 = vrot.lane.b32.xlu0 %v8872_v14, %s8210_s28 }
 0x680   : > { %7660 = vrot.lane.b32.xlu1 %v8814_v19, %s8212_s30 }
 0x681   : > { %7655 = vrot.lane.b32.xlu0 %v8808_v31, %s8212_s30 }
 0x684   : > { %7670 = vrot.lane.b32.xlu1 %v8829_v13, %s8212_s30 }
 0x685   : > { %7665 = vrot.lane.b32.xlu0 %v8820_v42, %s8212_s30 }
 0x688   : > { %2936 = vrot.lane.b32.xlu1 %v8842_v11, %s8212_s30 }
 0x689   : > { %2934 = vrot.lane.b32.xlu0 %v8827_v40, %s8212_s30 }
 0x68c   : > { %2940 = vrot.lane.b32.xlu1 %v8848_v7, %s8212_s30 }
 0x68d   : > { %2938 = vrot.lane.b32.xlu0 %v8844_v46, %s8212_s30 }
 0x690   : > { %2944 = vrot.lane.b32.xlu1 %v8858_v35, %s8212_s30 }
 0x691   : > { %2942 = vrot.lane.b32.xlu0 %v8850_v8, %s8212_s30 }
 0x694   : > { %2948 = vrot.lane.b32.xlu1 %v8868_v47, %s8212_s30 }
 0x695   : > { %2946 = vrot.lane.b32.xlu0 %v8860_v58, %s8212_s30 }
 0x6b4   : > { %2554 = vmax.xlane.f32.xlu0 %v2553_v32 }
 0x6b8   : > { %2560 = vmax.xlane.f32.xlu0 %v2559_v23  ;;  %2557 = vmax.xlane.f32.xlu1 %v2556_v45 }
 0x6bc   : > { %2563 = vmax.xlane.f32.xlu0 %v2562_v0  ;;  %2569 = vmax.xlane.f32.xlu1 %v2568_v21 }
 0x6c0   : > { %2566 = vmax.xlane.f32.xlu0 %v2565_v49  ;;  %2575 = vmax.xlane.f32.xlu1 %v2574_v39 }
 0x6c4   : > { %2572 = vmax.xlane.f32.xlu0 %v2571_v1 }
 0x6d1   : > { %7680 = vrot.lane.b32.xlu1 %v8864_v61, %s8211_s29 }
 0x6da   : > { %7675 = vrot.lane.b32.xlu0 %v8854_v15, %s8211_s29 }
 0x6e7   : > { %v1907_v16 = vpop.xlane.xlu1 %1906 }
 0x6e8   : > { %v1904_v50 = vpop.xlane.xlu0 %1903 }
 0x6e9   : > { %7986 = vrcp.f32 %v1904_v50 }
 0x6ea   : > { %7988 = vrcp.f32 %v1907_v16 }
 0x6ec   : > { %v1913_v6 = vpop.xlane.xlu1 %1912 }
 0x6f0   : > { %v1919_v41 = vpop.xlane.xlu1 %1918  ;;  %v1910_v32 = vpop.xlane.xlu0 %1909 }
 0x6f1   : > { %7990 = vrcp.f32 %v1910_v32 }
 0x6f2   : > { %7992 = vrcp.f32 %v1913_v6 }
 0x6f3   : > { %v7987_v53 = vpop.eup %7986 }
 0x6f4   : > { %v1925_v26 = vpop.xlane.xlu1 %1924  ;;  %v1916_v23 = vpop.xlane.xlu0 %1915  ;;  %v1927_v45 = vmul.f32 %v7987_v53, %v9146_v34 }
 0x6f5   : > { %7994 = vrcp.f32 %v1916_v23  ;;  %v7989_v32 = vpop.eup %7988 }
 0x6f6   : > { %6711 = vmatprep.mubr.msk.f32.mxu1 %vm1451_vm6, %v1927_v45  ;;  %7996 = vrcp.f32 %v1919_v41  ;;  %v1929_v41 = vmul.f32 %v7989_v32, %v9144_v37 }
 0x6f8   : > { %v1922_v12 = vpop.xlane.xlu1 %1921  ;;  %v7646_v59 = vpop.permute.xlu0 %7645 }
 0x6f9   : > { %v7648_v0 = vunpack.i.h.bf16 %v7646_v59  ;;  %v7647_v21 = vunpack.i.l.bf16 %v7646_v59  ;;  %7998 = vrcp.f32 %v1922_v12 }
 0x6fa   : > { %8000 = vrcp.f32 %v1925_v26 }
 0x6fb   : > { %v7267_v24 = vpack.c.bf16 %v7648_v0, %v7647_v21  ;;  %v7991_v57 = vpop.eup %7990 }
 0x6fc   : > { %v7651_v49 = vpop.permute.xlu1 %7650  ;;  %v7656_v39 = vpop.permute.xlu0 %7655  ;;  %v1931_v12 = vmul.f32 %v7991_v57, %v9158_v17 }
 0x6fd   : > { %v7653_v1 = vunpack.i.h.bf16 %v7651_v49  ;;  %v7652_v50 = vunpack.i.l.bf16 %v7651_v49  ;;  %v7658_v15 = vunpack.i.h.bf16 %v7656_v39  ;;  %v7657_v61 = vunpack.i.l.bf16 %v7656_v39  ;;  %7268 = vmatprep.subr.bf16.mxu1 %v7267_v24 }
 0x6fe   : > { %7270 = vmatpush3.bf16.msra.mxu1 %v7267_v24 }
 0x6ff   : > { %v7315_v34 = vpack.c.bf16 %v7658_v15, %v7657_v61  ;;  %v7271_v16 = vpack.c.bf16 %v7653_v1, %v7652_v50  ;;  %v7993_v15 = vpop.eup %7992 }
 0x700   : > { %v7661_v53 = vpop.permute.xlu1 %7660  ;;  %v7666_v45 = vpop.permute.xlu0 %7665  ;;  %v1933_v26 = vmul.f32 %v7993_v15, %v9152_v18 }
 0x701   : > { %v7663_v59 = vunpack.i.h.bf16 %v7661_v53  ;;  %v7662_v6 = vunpack.i.l.bf16 %v7661_v53  ;;  %7272 = vmatprep.subr.bf16.mxu1 %v7271_v16  ;;  %7317 = vmatprep.subr.msk.bf16.mxu0 %vm8804_vm4, %v7315_v34  ;;  %v7995_v0 = vpop.eup %7994  ;;  %v7668_v21 = vunpack.i.h.bf16 %v7666_v45  ;;  %v7667_v24 = vunpack.i.l.bf16 %v7666_v45 }
 0x702   : > { %7274 = vmatpush3.bf16.msra.mxu1 %v7271_v16  ;;  %7320 = vmatpush3.bf16.xpose.msk.msra.mxu0 %vm8804_vm4, %v7315_v34  ;;  %v7997_v37 = vpop.eup %7996  ;;  %v1935_v49 = vmul.f32 %v7995_v0, %v9166_v54 }
 0x703   : > { %v7321_v23 = vpack.c.bf16 %v7663_v59, %v7662_v6  ;;  %v7999_v39 = vpop.eup %7998  ;;  %v7327_v1 = vpack.c.bf16 %v7668_v21, %v7667_v24  ;;  %v1937_v17 = vmul.f32 %v7997_v37, %v9156_v4 }
 0x704   : > { %v2935_v61 = vpop.permute.xlu0 %2934  ;;  %v7671_v57 = vpop.permute.xlu1 %7670  ;;  %v1939_v18 = vmul.f32 %v7999_v39, %v9172_v33 }
 0x705   : > { %6712 = vmatmul.mubr.msk.f32.vlgmr.msra.gmra.mrb[16].mxu1 %vm1451_vm6, %v1929_v41  ;;  %7323 = vmatprep.subr.msk.bf16.mxu0 %vm8804_vm4, %v7321_v23  ;;  %v8001_v50 = vpop.eup %8000  ;;  %v7673_v34 = vunpack.i.h.bf16 %v7671_v57  ;;  %v7672_v54 = vunpack.i.l.bf16 %v7671_v57 }
 0x706   : > { %6837 = vmatprep.mubr.msk.f32.mxu0 %vm1273_vm3, %v2935_v61  ;;  %6714 = vmatprep.mubr.msk.f32.mxu1 %vm1451_vm6, %v1931_v12  ;;  %v1941_v16 = vmul.f32 %v8001_v50, %v9164_v36 }
 0x707   : > { %v7333_v32 = vpack.c.bf16 %v7673_v34, %v7672_v54 }
 0x708   : > { %v2937_v4 = vpop.permute.xlu1 %2936  ;;  %v2939_v33 = vpop.permute.xlu0 %2938 }
 0x709   : > { %6715 = vmatmul.mubr.msk.f32.gmra.mrb[18].mxu1 %vm1451_vm6, %v1933_v26 }
 0x70a   : > { %6717 = vmatprep.mubr.msk.f32.mxu1 %vm1451_vm6, %v1935_v49  ;;  %7326 = vmatpush3.bf16.xpose.msk.msra.mxu0 %vm8804_vm4, %v7321_v23 }
 0x70b   : > { %7329 = vmatprep.subr.msk.bf16.mxu0 %vm8804_vm4, %v7327_v1 }
 0x70c   : > { %v2941_v53 = vpop.permute.xlu1 %2940  ;;  %v2943_v36 = vpop.permute.xlu0 %2942 }
 0x70d   : > { %6718 = vmatmul.mubr.msk.f32.gmra.mrb[20].mxu1 %vm1451_vm6, %v1937_v17 }
 0x70e   : > { %6720 = vmatprep.mubr.msk.f32.mxu1 %vm1451_vm6, %v1939_v18 }
 0x710   : > { %v2945_v45 = vpop.permute.xlu1 %2944  ;;  %v2947_v59 = vpop.permute.xlu0 %2946 }
 0x711   : > { %6721 = vmatmul.mubr.msk.f32.gmra.mrb[22].mxu1 %vm1451_vm6, %v1941_v16 }
 0x712   : > { %7332 = vmatpush3.bf16.xpose.msk.msra.mxu0 %vm8804_vm4, %v7327_v1 }
 0x713   : > { %7335 = vmatprep.subr.msk.bf16.mxu0 %vm8804_vm4, %v7333_v32 }
 0x714   : > { %v2949_v6 = vpop.permute.xlu1 %2948 }
 0x71a   : > { %7338 = vmatpush3.bf16.xpose.msk.msra.mxu0 %vm8804_vm4, %v7333_v32 }
 0x721   : > { %6838 = vmatmul.mubr.msk.f32.vlgmr.msra.gmra.mrb[40].mxu0 %vm1273_vm3, %v2937_v4 }
 0x722   : > { %6840 = vmatprep.mubr.msk.f32.mxu0 %vm1273_vm3, %v2939_v33 }
 0x725   : > { %6841 = vmatmul.mubr.msk.f32.gmra.mrb[42].mxu0 %vm1273_vm3, %v2941_v53 }
 0x726   : > { %6843 = vmatprep.mubr.msk.f32.mxu0 %vm1273_vm3, %v2943_v36 }
 0x729   : > { %6844 = vmatmul.mubr.msk.f32.gmra.mrb[44].mxu0 %vm1273_vm3, %v2945_v45 }
 0x72a   : > { %6846 = vmatprep.mubr.msk.f32.mxu0 %vm1273_vm3, %v2947_v59 }
 0x72d   : > { %6847 = vmatmul.mubr.msk.f32.gmra.mrb[46].mxu0 %vm1273_vm3, %v2949_v6 }
 0x741   : > { %v2555_v41 = vpop.xlane.xlu0 %2554 }
 0x742   : > { %v2577_v23 = vsub.f32 %v9208_v43, %v2555_v41 }
 0x744   : > { %v2585_v15 = vmul.f32 1.442695, %v2577_v23 }
 0x745   : > { %v2558_v61 = vpop.xlane.xlu1 %2557  ;;  %v2561_v12 = vpop.xlane.xlu0 %2560 }
 0x746   : > { %8002 = vpow2.f32 %v2585_v15  ;;  %v2578_v0 = vsub.f32 %v9215_v22, %v2558_v61  ;;  %v2579_v21 = vsub.f32 %v9220_v60, %v2561_v12 }
 0x748   : > { %v2587_v24 = vmul.f32 1.442695, %v2578_v0  ;;  %v2589_v26 = vmul.f32 1.442695, %v2579_v21 }
 0x749   : > { %v2570_v37 = vpop.xlane.xlu1 %2569  ;;  %v2564_v49 = vpop.xlane.xlu0 %2563 }
 0x74a   : > { %8004 = vpow2.f32 %v2587_v24  ;;  %v2582_v39 = vsub.f32 %v9233_v51, %v2570_v37  ;;  %v2580_v1 = vsub.f32 %v9229_v9, %v2564_v49 }
 0x74b   : > { %8006 = vpow2.f32 %v2589_v26 }
 0x74c   : > { %v2591_v57 = vmul.f32 1.442695, %v2580_v1  ;;  %v2595_v43 = vmul.f32 1.442695, %v2582_v39 }
 0x74d   : > { %v2576_v17 = vpop.xlane.xlu1 %2575  ;;  %v2567_v50 = vpop.xlane.xlu0 %2566 }
 0x74e   : > { %v2584_v18 = vsub.f32 %v9247_v62, %v2576_v17  ;;  %v2581_v22 = vsub.f32 %v9243_v30, %v2567_v50  ;;  %8008 = vpow2.f32 %v2591_v57 }
 0x74f   : > { %8010 = vpow2.f32 %v2595_v43 }
 0x750   : > { %v9311_v60 = vpop.eup %8002  ;;  %v2593_v34 = vmul.f32 1.442695, %v2581_v22  ;;  %v2599_v54 = vmul.f32 1.442695, %v2584_v18 }
 0x751   : > { %v2573_v16 = vpop.xlane.xlu0 %2572  ;;  %v2601_v51 = vsel %vm1451_vm6, %v9311_v60, 0.0  ;;  %v7681_v43 = vpop.permute.xlu1 %7680 }
 0x752   : > { %v2583_v9 = vsub.f32 %v9256_v20, %v2573_v16  ;;  %2602 = vadd.xlane.f32.xlu0 %v2601_v51  ;;  %8012 = vpow2.f32 %v2593_v34  ;;  %v1269_v20 = vld [vmem:[%s10262_s11] sm:$0xff]  ;;  %v7683_v16 = vunpack.i.h.bf16 %v7681_v43  ;;  %v7682_v51 = vunpack.i.l.bf16 %v7681_v43 }
 0x753   : > { %8014 = vpow2.f32 %v2599_v54  ;;  %v2104_v36 = vrot.slane %v1269_v20, 4 }
 0x754   : > { %v9316_v32 = vpop.eup %8004  ;;  %v2597_v30 = vmul.f32 1.442695, %v2583_v9 }
 0x755   : > { %v9318_v4 = vpop.eup %8006  ;;  %v2604_v62 = vsel %vm1451_vm6, %v9316_v32, 0.0  ;;  %6723 = vmatprep.subr.msk.mxu1 %vm2129_vm13, %v2104_v36  ;;  %v7676_v21 = vpop.permute.xlu0 %7675 }
 0x756   : > { %2605 = vadd.xlane.f32.xlu1 %v2604_v62  ;;  %v2607_v33 = vsel %vm1451_vm6, %v9318_v4, 0.0  ;;  %8016 = vpow2.f32 %v2597_v30  ;;  %6724 = vmatpush3.msk.msra.mxu1 %vm2129_vm13, %v2104_v36  ;;  %v7678_v24 = vunpack.i.h.bf16 %v7676_v21  ;;  %v7677_v26 = vunpack.i.l.bf16 %v7676_v21 }
 0x757   : > { %2608 = vadd.xlane.f32.xlu0 %v2607_v33  ;;  %6737 = vmatprep.subr.msk.mxu1 %vm2129_vm13, %v1269_v20  ;;  %v7303_v62 = vpack.c.bf16 %v7683_v16, %v7682_v51 }
 0x758   : > { %v9327_v53 = vpop.eup %8008  ;;  %v7299_v39 = vpack.c.bf16 %v7678_v24, %v7677_v26 }
 0x759   : > { %v2610_v45 = vsel %vm1451_vm6, %v9327_v53, 0.0  ;;  %v9331_v59 = vpop.eup %8010 }
 0x75a   : > { %2611 = vadd.xlane.f32.xlu1 %v2610_v45  ;;  %v2616_v41 = vsel %vm1451_vm6, %v9331_v59, 0.0 }
 0x75c   : > { %v9335_v6 = vpop.eup %8012 }
 0x75d   : > { %v2613_v23 = vsel %vm1451_vm6, %v9335_v6, 0.0  ;;  %v9342_v15 = vpop.eup %8014 }
 0x75e   : > { %2617 = vadd.xlane.f32.xlu1 %v2616_v41  ;;  %2614 = vadd.xlane.f32.xlu0 %v2613_v23  ;;  %v2622_v61 = vsel %vm1451_vm6, %v9342_v15, 0.0 }
 0x760   : > { %v9346_v12 = vpop.eup %8016 }
 0x761   : > { %v2619_v0 = vsel %vm1451_vm6, %v9346_v12, 0.0 }
 0x762   : > { %2623 = vadd.xlane.f32.xlu1 %v2622_v61 }
 0x766   : > { %2620 = vadd.xlane.f32.xlu1 %v2619_v0  ;;  %v10278_v0 = vld [vmem:[#allocation6_spill] sm:$0xff] }
 0x774   : > { %7685 = vrot.lane.b32.xlu0 %v8872_v14, %s8211_s29 }
 0x777   : > { %7690 = vrot.lane.b32.xlu1 %v8876_v3, %s8211_s29 }
 0x778   : > { %7695 = vrot.lane.b32.xlu0 %v8808_v31, %s8213_s17 }
 0x77b   : > { %7700 = vrot.lane.b32.xlu1 %v8814_v19, %s8213_s17 }
 0x77c   : > { %7705 = vrot.lane.b32.xlu0 %v8820_v42, %s8213_s17 }
 0x77f   : > { %7710 = vrot.lane.b32.xlu1 %v8829_v13, %s8213_s17 }
 0x780   : > { %3500 = vrot.lane.b32.xlu0 %v8827_v40, %s8213_s17 }
 0x783   : > { %3502 = vrot.lane.b32.xlu1 %v8842_v11, %s8213_s17 }
 0x784   : > { %3504 = vrot.lane.b32.xlu0 %v8844_v46, %s8213_s17 }
 0x787   : > { %3506 = vrot.lane.b32.xlu1 %v8848_v7, %s8213_s17 }
 0x788   : > { %3508 = vrot.lane.b32.xlu0 %v8850_v8, %s8213_s17 }
 0x78b   : > { %3510 = vrot.lane.b32.xlu1 %v8858_v35, %s8213_s17 }
 0x78c   : > { %3512 = vrot.lane.b32.xlu0 %v8860_v58, %s8213_s17 }
 0x78f   : > { %3514 = vrot.lane.b32.xlu1 %v8868_v47, %s8213_s17 }
 0x7d8   : > { %v6713_v37 = vpop.f32.mrb[16].mxu1 }
 0x7d9   : > { %v2064_v49 = vpop.f32.mrb[17].mxu1 }
 0x7da   : > { %6725 = vmatprep.mubr.msk.f32.mxu1 %vm1273_vm3, %v2064_v49 }
 0x7db   : > { %6726 = vmatmul.mubr.msk.f32.vlgmr.msra.gmra.mrb[24].mxu1 %vm1273_vm3, %v6713_v37 }
 0x7dc   : > { %6738 = vmatpush3.msk.msra.mxu1 %vm2129_vm13, %v1269_v20  ;;  %v6716_v1 = vpop.f32.mrb[18].mxu1 }
 0x7dd   : > { %7300 = vmatprep.subr.bf16.mxu1 %v7299_v39  ;;  %v2074_v57 = vpop.f32.mrb[19].mxu1 }
 0x7de   : > { %6728 = vmatprep.mubr.msk.f32.mxu1 %vm1273_vm3, %v2074_v57 }
 0x7df   : > { %6729 = vmatmul.mubr.msk.f32.gmra.mrb[26].mxu1 %vm1273_vm3, %v6716_v1  ;;  %v2603_v18 = vpop.xlane.xlu0 %2602 }
 0x7e0   : > { %v6719_v17 = vpop.f32.mrb[20].mxu1  ;;  %8018 = vrcp.f32 %v2603_v18 }
 0x7e1   : > { %v2084_v50 = vpop.f32.mrb[21].mxu1 }
 0x7e2   : > { %6731 = vmatprep.mubr.msk.f32.mxu1 %vm1273_vm3, %v2084_v50 }
 0x7e3   : > { %v2606_v22 = vpop.xlane.xlu1 %2605  ;;  %6732 = vmatmul.mubr.msk.f32.gmra.mrb[28].mxu1 %vm1273_vm3, %v6719_v17 }
 0x7e4   : > { %v6722_v34 = vpop.f32.mrb[22].mxu1  ;;  %v2609_v9 = vpop.xlane.xlu0 %2608  ;;  %8020 = vrcp.f32 %v2606_v22 }
 0x7e5   : > { %v2094_v54 = vpop.f32.mrb[23].mxu1  ;;  %8022 = vrcp.f32 %v2609_v9 }
 0x7e6   : > { %6734 = vmatprep.mubr.msk.f32.mxu1 %vm1273_vm3, %v2094_v54 }
 0x7e7   : > { %6735 = vmatmul.mubr.msk.f32.gmra.mrb[30].mxu1 %vm1273_vm3, %v6722_v34  ;;  %v2612_v30 = vpop.xlane.xlu1 %2611 }
 0x7e8   : > { %6739 = vmatprep.mubr.msk.f32.mxu1 %vm1273_vm3, %v9086_v29  ;;  %8024 = vrcp.f32 %v2612_v30 }
 0x7eb   : > { %6740 = vmatmul.mubr.msk.f32.vlgmr.msra.gmra.mrb[24].mxu1 %vm1273_vm3, %v9084_v55  ;;  %v2618_v33 = vpop.xlane.xlu1 %2617  ;;  %v2615_v20 = vpop.xlane.xlu0 %2614 }
 0x7ec   : > { %7302 = vmatpush3.bf16.msra.mxu1 %v7299_v39  ;;  %6742 = vmatprep.mubr.msk.f32.mxu1 %vm1273_vm3, %v9090_v28  ;;  %v8019_v55 = vpop.eup %8018  ;;  %8026 = vrcp.f32 %v2615_v20  ;;  %v10279_v39 = vld [vmem:[#allocation5_spill] sm:$0xff] }
 0x7ed   : > { %7304 = vmatprep.subr.bf16.mxu1 %v7303_v62  ;;  %v2626_v37 = vmul.f32 %v8019_v55, %v9311_v60  ;;  %8028 = vrcp.f32 %v2618_v33 }
 0x7ee   : > { %v8021_v9 = vpop.eup %8020 }
 0x7ef   : > { %6743 = vmatmul.mubr.msk.f32.gmra.mrb[26].mxu1 %vm1273_vm3, %v9088_v5  ;;  %v2624_v36 = vpop.xlane.xlu1 %2623  ;;  %v7686_v45 = vpop.permute.xlu0 %7685 }
 0x7f0   : > { %7306 = vmatpush3.bf16.msra.mxu1 %v7303_v62  ;;  %6745 = vmatprep.mubr.msk.f32.mxu1 %vm1273_vm3, %v9094_v25  ;;  %v7688_v29 = vunpack.i.h.bf16 %v7686_v45  ;;  %v7687_v41 = vunpack.i.l.bf16 %v7686_v45 }
 0x7f2   : > { %v7307_v23 = vpack.c.bf16 %v7688_v29, %v7687_v41 }
 0x7f3   : > { %6746 = vmatmul.mubr.msk.f32.gmra.mrb[28].mxu1 %vm1273_vm3, %v9092_v52  ;;  %v2621_v28 = vpop.xlane.xlu1 %2620  ;;  %v7696_v61 = vpop.permute.xlu0 %7695 }
 0x7f4   : > { %6748 = vmatprep.mubr.msk.f32.mxu1 %vm1273_vm3, %v10278_v0  ;;  %v7698_v5 = vunpack.i.h.bf16 %v7696_v61  ;;  %v7697_v21 = vunpack.i.l.bf16 %v7696_v61  ;;  %7308 = vmatprep.subr.bf16.mxu1 %v7307_v23  ;;  %v6839_v24 = vpop.f32.mrb[40].mxu0  ;;  %8030 = vrcp.f32 %v2621_v28  ;;  %v8023_v28 = vpop.eup %8022 }
 0x7f5   : > { %v3104_v25 = vmul.f32 0.5, %v6839_v24  ;;  %7310 = vmatpush3.bf16.msra.mxu1 %v7307_v23  ;;  %v3064_v26 = vpop.f32.mrb[41].mxu0  ;;  %8032 = vrcp.f32 %v2624_v36 }
 0x7f6   : > { %v7355_v49 = vpack.c.bf16 %v7698_v5, %v7697_v21  ;;  %v3103_v52 = vmul.f32 0.5, %v3064_v26  ;;  %v2628_v21 = vmul.f32 %v8021_v9, %v9316_v32 }
 0x7f7   : > { %6749 = vmatmul.mubr.msk.f32.gmra.mrb[30].mxu1 %vm1273_vm3, %v10279_v39  ;;  %v9406_v1 = vsel %vm1436_vm5, -1e+09, %v3104_v25  ;;  %v7691_v57 = vpop.permute.xlu1 %7690  ;;  %v7706_v43 = vpop.permute.xlu0 %7705 }
 0x7f8   : > { %6795 = vmatprep.mubr.msk.f32.mxu1 %vm1451_vm6, %v2626_v37  ;;  %v9411_v17 = vsel %vm1435_vm7, -1e+09, %v3103_v52  ;;  %v7693_v50 = vunpack.i.h.bf16 %v7691_v57  ;;  %v7692_v60 = vunpack.i.l.bf16 %v7691_v57  ;;  %v6842_v18 = vpop.f32.mrb[42].mxu0  ;;  %7357 = vmatprep.subr.msk.bf16.mxu0 %vm8804_vm4, %v7355_v49  ;;  %v3122_v22 = vsel %vm1451_vm6, %v9406_v1, -inf  ;;  %v8025_v25 = vpop.eup %8024 }
 0x7f9   : > { %7360 = vmatpush3.bf16.xpose.msk.msra.mxu0 %vm8804_vm4, %v7355_v49  ;;  %v3074_v34 = vpop.f32.mrb[43].mxu0  ;;  %v3119_v54 = vsel %vm1451_vm6, %v9411_v17, -inf  ;;  %3123 = vmax.xlane.f32.xlu1 %v3122_v22  ;;  %v7708_v30 = vunpack.i.h.bf16 %v7706_v43  ;;  %v3106_v62 = vmul.f32 0.5, %v6842_v18  ;;  %v7707_v45 = vunpack.i.l.bf16 %v7706_v43  ;;  %v8027_v49 = vpop.eup %8026 }
 0x7fa   : > { %v3105_v16 = vmul.f32 0.5, %v3074_v34  ;;  %3120 = vmax.xlane.f32.xlu0 %v3119_v54  ;;  %v7311_v51 = vpack.c.bf16 %v7693_v50, %v7692_v60  ;;  %v2630_v57 = vmul.f32 %v8023_v28, %v9318_v4  ;;  %v2632_v22 = vmul.f32 %v8025_v25, %v9327_v53  ;;  %v8029_v34 = vpop.eup %8028 }
 0x7fb   : > { %v7701_v20 = vpop.permute.xlu1 %7700  ;;  %v3501_v33 = vpop.permute.xlu0 %3500  ;;  %v9431_v26 = vsel %vm1438_vm8, -1e+09, %v3106_v62  ;;  %v7367_v52 = vpack.c.bf16 %v7708_v30, %v7707_v45 }
 0x7fc   : > { %v9423_v29 = vsel %vm1437_vm9, -1e+09, %v3105_v16  ;;  %v7703_v41 = vunpack.i.h.bf16 %v7701_v20  ;;  %v7702_v55 = vunpack.i.l.bf16 %v7701_v20  ;;  %7312 = vmatprep.subr.bf16.mxu1 %v7311_v51  ;;  %v6845_v23 = vpop.f32.mrb[44].mxu0  ;;  %6907 = vmatprep.mubr.msk.f32.mxu0 %vm1273_vm3, %v3501_v33  ;;  %v3128_v18 = vsel %vm1451_vm6, %v9431_v26, -inf }
 0x7fd   : > { %v3108_v61 = vmul.f32 0.5, %v6845_v23  ;;  %7314 = vmatpush3.bf16.msra.mxu1 %v7311_v51  ;;  %v3084_v0 = vpop.f32.mrb[45].mxu0  ;;  %v3125_v5 = vsel %vm1451_vm6, %v9423_v29, -inf  ;;  %v2634_v51 = vmul.f32 %v8027_v49, %v9335_v6  ;;  %v2636_v33 = vmul.f32 %v8029_v34, %v9331_v59 }
 0x7fe   : > { %v7361_v24 = vpack.c.bf16 %v7703_v41, %v7702_v55  ;;  %3126 = vmax.xlane.f32.xlu0 %v3125_v5  ;;  %v3107_v36 = vmul.f32 0.5, %v3084_v0  ;;  %v8031_v9 = vpop.eup %8030  ;;  %v10281_v0 = vld [vmem:[#allocation3_spill] sm:$0xff] }
 0x7ff   : > { %v9435_v37 = vsel %vm1440_vm10, -1e+09, %v3108_v61  ;;  %v7711_v43 = vpop.permute.xlu1 %7710  ;;  %v8033_v45 = vpop.eup %8032  ;;  %v2638_v55 = vmul.f32 %v8031_v9, %v9346_v12 }
 0x800   : > { %6796 = vmatmul.mubr.msk.f32.vlgmr.msra.gmra.mrb[32].mxu1 %vm1451_vm6, %v2628_v21  ;;  %v6848_v39 = vpop.f32.mrb[46].mxu0  ;;  %7363 = vmatprep.subr.msk.bf16.mxu0 %vm8804_vm4, %v7361_v24  ;;  %v3134_v32 = vsel %vm1451_vm6, %v9435_v37, -inf  ;;  %v9453_v4 = vsel %vm1439_vm11, -1e+09, %v3107_v36  ;;  %v7713_v30 = vunpack.i.h.bf16 %v7711_v43  ;;  %v7712_v62 = vunpack.i.l.bf16 %v7711_v43  ;;  %v3505_v61 = vpop.permute.xlu0 %3504  ;;  %v10282_v36 = vld [vmem:[#allocation2_spill] sm:$0xff] }
 0x801   : > { %v3110_v50 = vmul.f32 0.5, %v6848_v39  ;;  %7366 = vmatpush3.bf16.xpose.msk.msra.mxu0 %vm8804_vm4, %v7361_v24  ;;  %3135 = vmax.xlane.f32.xlu1 %v3134_v32  ;;  %v3094_v60 = vpop.f32.mrb[47].mxu0  ;;  %v3131_v20 = vsel %vm1451_vm6, %v9453_v4, -inf  ;;  %v2640_v28 = vmul.f32 %v8033_v45, %v9342_v15  ;;  %v9493_v24 = vld [vmem:[%s10262_s11 + $0x8] sm:$0xff] }
 0x802   : > { %6798 = vmatprep.mubr.msk.f32.mxu1 %vm1451_vm6, %v2630_v57  ;;  %7369 = vmatprep.subr.msk.bf16.mxu0 %vm8804_vm4, %v7367_v52  ;;  %v3109_v16 = vmul.f32 0.5, %v3094_v60  ;;  %v7373_v23 = vpack.c.bf16 %v7713_v30, %v7712_v62 }
 0x803   : > { %v9457_v54 = vsel %vm1442_vm14, -1e+09, %v3110_v50  ;;  %3129 = vmax.xlane.f32.xlu0 %v3128_v18  ;;  %v3503_v12 = vpop.permute.xlu1 %3502  ;;  %6807 = vmatprep.subr.msk.mxu1 %vm2129_vm13, %v9493_v24 }
 0x804   : > { %6799 = vmatmul.mubr.msk.f32.gmra.mrb[34].mxu1 %vm1451_vm6, %v2632_v22  ;;  %v3140_v53 = vsel %vm1451_vm6, %v9457_v54, -inf  ;;  %v9469_v6 = vsel %vm1441_vm12, -1e+09, %v3109_v16  ;;  %v3509_v21 = vpop.permute.xlu0 %3508 }
 0x805   : > { %3141 = vmax.xlane.f32.xlu1 %v3140_v53  ;;  %6801 = vmatprep.mubr.msk.f32.mxu1 %vm1451_vm6, %v2634_v51  ;;  %v3137_v59 = vsel %vm1451_vm6, %v9469_v6, -inf }
 0x806   : > { %6808 = vmatpush3.msk.msra.mxu1 %vm2129_vm13, %v9493_v24 }
 0x807   : > { %3132 = vmax.xlane.f32.xlu0 %v3131_v20  ;;  %v3507_v5 = vpop.permute.xlu1 %3506 }
 0x808   : > { %6802 = vmatmul.mubr.msk.f32.gmra.mrb[36].mxu1 %vm1451_vm6, %v2636_v33  ;;  %v3513_v25 = vpop.permute.xlu0 %3512 }
 0x809   : > { %6804 = vmatprep.mubr.msk.f32.mxu1 %vm1451_vm6, %v2638_v55  ;;  %7372 = vmatpush3.bf16.xpose.msk.msra.mxu0 %vm8804_vm4, %v7367_v52 }
 0x80a   : > { %7375 = vmatprep.subr.msk.bf16.mxu0 %vm8804_vm4, %v7373_v23 }
 0x80b   : > { %3138 = vmax.xlane.f32.xlu0 %v3137_v59  ;;  %v3511_v15 = vpop.permute.xlu1 %3510 }
 0x80c   : > { %6805 = vmatmul.mubr.msk.f32.gmra.mrb[38].mxu1 %vm1451_vm6, %v2640_v28 }
 0x80f   : > { %v3515_v49 = vpop.permute.xlu1 %3514 }
 0x811   : > { %7378 = vmatpush3.bf16.xpose.msk.msra.mxu0 %vm8804_vm4, %v7373_v23 }
 0x816   : > { %7720 = vrot.lane.b32.xlu1 %v10281_v0, %s8212_s30 }
 0x818   : > { %6908 = vmatmul.mubr.msk.f32.vlgmr.msra.gmra.mrb[48].mxu0 %vm1273_vm3, %v3503_v12 }
 0x819   : > { %6910 = vmatprep.mubr.msk.f32.mxu0 %vm1273_vm3, %v3505_v61 }
 0x81c   : > { %6911 = vmatmul.mubr.msk.f32.gmra.mrb[50].mxu0 %vm1273_vm3, %v3507_v5 }
 0x81d   : > { %6913 = vmatprep.mubr.msk.f32.mxu0 %vm1273_vm3, %v3509_v21 }
 0x820   : > { %6914 = vmatmul.mubr.msk.f32.gmra.mrb[52].mxu0 %vm1273_vm3, %v3511_v15 }
 0x821   : > { %7715 = vrot.lane.b32.xlu0 %v10282_v36, %s8212_s30  ;;  %6916 = vmatprep.mubr.msk.f32.mxu0 %vm1273_vm3, %v3513_v25 }
 0x824   : > { %6917 = vmatmul.mubr.msk.f32.gmra.mrb[54].mxu0 %vm1273_vm3, %v3515_v49 }
 0x886   : > { %v3124_v52 = vpop.xlane.xlu1 %3123 }
 0x887   : > { %v3121_v39 = vpop.xlane.xlu0 %3120  ;;  %v3144_v32 = vsub.f32 %v9406_v1, %v3124_v52 }
 0x888   : > { %v3143_v57 = vsub.f32 %v9411_v17, %v3121_v39 }
 0x889   : > { %v3153_v43 = vmul.f32 1.442695, %v3144_v32 }
 0x88a   : > { %v3151_v50 = vmul.f32 1.442695, %v3143_v57 }
 0x88b   : > { %v3127_v60 = vpop.xlane.xlu0 %3126  ;;  %8034 = vpow2.f32 %v3153_v43 }
 0x88c   : > { %v3145_v18 = vsub.f32 %v9423_v29, %v3127_v60  ;;  %8036 = vpow2.f32 %v3151_v50 }
 0x88e   : > { %v3155_v22 = vmul.f32 1.442695, %v3145_v18  ;;  %v3136_v34 = vpop.xlane.xlu1 %3135 }
 0x88f   : > { %v3148_v16 = vsub.f32 %v9435_v37, %v3136_v34 }
 0x890   : > { %8038 = vpow2.f32 %v3155_v22  ;;  %v3130_v51 = vpop.xlane.xlu0 %3129 }
 0x891   : > { %v3146_v9 = vsub.f32 %v9431_v26, %v3130_v51  ;;  %v3161_v62 = vmul.f32 1.442695, %v3148_v16 }
 0x892   : > { %v3142_v30 = vpop.xlane.xlu1 %3141 }
 0x893   : > { %v3157_v1 = vmul.f32 1.442695, %v3146_v9  ;;  %v3150_v17 = vsub.f32 %v9457_v54, %v3142_v30 }
 0x894   : > { %v3133_v53 = vpop.xlane.xlu0 %3132 }
 0x895   : > { %8040 = vpow2.f32 %v3157_v1  ;;  %v3147_v20 = vsub.f32 %v9453_v4, %v3133_v53  ;;  %v9511_v33 = vpop.eup %8034  ;;  %v3165_v45 = vmul.f32 1.442695, %v3150_v17 }
 0x896   : > { %v9513_v29 = vpop.eup %8036  ;;  %8042 = vpow2.f32 %v3161_v62  ;;  %v3170_v55 = vsel %vm1451_vm6, %v9511_v33, 0.0  ;;  %v7721_v60 = vpop.permute.xlu1 %7720 }
 0x897   : > { %v3159_v37 = vmul.f32 1.442695, %v3147_v20  ;;  %v3167_v23 = vsel %vm1451_vm6, %v9513_v29, 0.0  ;;  %3171 = vadd.xlane.f32.xlu1 %v3170_v55  ;;  %v7723_v18 = vunpack.i.h.bf16 %v7721_v60  ;;  %v7722_v22 = vunpack.i.l.bf16 %v7721_v60 }
 0x898   : > { %v3139_v26 = vpop.xlane.xlu0 %3138  ;;  %3168 = vadd.xlane.f32.xlu0 %v3167_v23 }
 0x899   : > { %8044 = vpow2.f32 %v3159_v37  ;;  %v3149_v54 = vsub.f32 %v9469_v6, %v3139_v26  ;;  %v7343_v51 = vpack.c.bf16 %v7723_v18, %v7722_v22 }
 0x89a   : > { %v9520_v4 = vpop.eup %8038  ;;  %8046 = vpow2.f32 %v3165_v45 }
 0x89b   : > { %v3163_v59 = vmul.f32 1.442695, %v3149_v54  ;;  %v3173_v28 = vsel %vm1451_vm6, %v9520_v4, 0.0 }
 0x89c   : > { %v7716_v12 = vpop.permute.xlu0 %7715  ;;  %3174 = vadd.xlane.f32.xlu0 %v3173_v28 }
 0x89d   : > { %v7718_v61 = vunpack.i.h.bf16 %v7716_v12  ;;  %v7717_v5 = vunpack.i.l.bf16 %v7716_v12  ;;  %8048 = vpow2.f32 %v3163_v59 }
 0x89f   : > { %v9524_v21 = vpop.eup %8040  ;;  %v7339_v15 = vpack.c.bf16 %v7718_v61, %v7717_v5 }
 0x8a0   : > { %v3176_v25 = vsel %vm1451_vm6, %v9524_v21, 0.0  ;;  %v9528_v6 = vpop.eup %8042 }
 0x8a1   : > { %3177 = vadd.xlane.f32.xlu1 %v3176_v25  ;;  %7340 = vmatprep.subr.bf16.mxu1 %v7339_v15  ;;  %v3182_v52 = vsel %vm1451_vm6, %v9528_v6, 0.0 }
 0x8a3   : > { %v9530_v49 = vpop.eup %8044 }
 0x8a4   : > { %v3179_v39 = vsel %vm1451_vm6, %v9530_v49, 0.0  ;;  %v9536_v32 = vpop.eup %8046 }
 0x8a5   : > { %3183 = vadd.xlane.f32.xlu1 %v3182_v52  ;;  %3180 = vadd.xlane.f32.xlu0 %v3179_v39  ;;  %v3188_v57 = vsel %vm1451_vm6, %v9536_v32, 0.0 }
 0x8a7   : > { %v9540_v43 = vpop.eup %8048 }
 0x8a8   : > { %v3185_v50 = vsel %vm1451_vm6, %v9540_v43, 0.0 }
 0x8a9   : > { %3189 = vadd.xlane.f32.xlu1 %v3188_v57 }
 0x8ad   : > { %3186 = vadd.xlane.f32.xlu1 %v3185_v50 }
 0x8bb   : > { %7725 = vrot.lane.b32.xlu0 %v8872_v14, %s8212_s30 }
 0x8be   : > { %7730 = vrot.lane.b32.xlu1 %v8876_v3, %s8212_s30 }
 0x8bf   : > { %7735 = vrot.lane.b32.xlu0 %v8808_v31, %s8214_s20 }
 0x8c2   : > { %7740 = vrot.lane.b32.xlu1 %v8814_v19, %s8214_s20 }
 0x8c3   : > { %7745 = vrot.lane.b32.xlu0 %v8820_v42, %s8214_s20 }
 0x8c6   : > { %7750 = vrot.lane.b32.xlu1 %v8829_v13, %s8214_s20 }
 0x8c7   : > { %4066 = vrot.lane.b32.xlu0 %v8827_v40, %s8214_s20 }
 0x8ca   : > { %4068 = vrot.lane.b32.xlu1 %v8842_v11, %s8214_s20 }
 0x8cb   : > { %4070 = vrot.lane.b32.xlu0 %v8844_v46, %s8214_s20 }
 0x8ce   : > { %4072 = vrot.lane.b32.xlu1 %v8848_v7, %s8214_s20 }
 0x8cf   : > { %4074 = vrot.lane.b32.xlu0 %v8850_v8, %s8214_s20 }
 0x8d2   : > { %4076 = vrot.lane.b32.xlu1 %v8858_v35, %s8214_s20 }
 0x8d3   : > { %4078 = vrot.lane.b32.xlu0 %v8860_v58, %s8214_s20  ;;  %v6797_v34 = vpop.f32.mrb[32].mxu1 }
 0x8d4   : > { %v2755_v16 = vpop.f32.mrb[33].mxu1 }
 0x8d5   : > { %6809 = vmatprep.mubr.msk.f32.mxu1 %vm1273_vm3, %v2755_v16 }
 0x8d6   : > { %4080 = vrot.lane.b32.xlu1 %v8868_v47, %s8214_s20  ;;  %6810 = vmatmul.mubr.msk.f32.vlgmr.msra.gmra.mrb[24].mxu1 %vm1273_vm3, %v6797_v34 }
 0x8d7   : > { %7342 = vmatpush3.bf16.msra.mxu1 %v7339_v15  ;;  %v6800_v9 = vpop.f32.mrb[34].mxu1 }
 0x8d8   : > { %7344 = vmatprep.subr.bf16.mxu1 %v7343_v51  ;;  %v2765_v30 = vpop.f32.mrb[35].mxu1 }
 0x8d9   : > { %6812 = vmatprep.mubr.msk.f32.mxu1 %vm1273_vm3, %v2765_v30 }
 0x8da   : > { %6813 = vmatmul.mubr.msk.f32.gmra.mrb[26].mxu1 %vm1273_vm3, %v6800_v9 }
 0x8db   : > { %7346 = vmatpush3.bf16.msra.mxu1 %v7343_v51  ;;  %v6803_v62 = vpop.f32.mrb[36].mxu1 }
 0x8dc   : > { %v2775_v1 = vpop.f32.mrb[37].mxu1 }
 0x8dd   : > { %6815 = vmatprep.mubr.msk.f32.mxu1 %vm1273_vm3, %v2775_v1 }
 0x8de   : > { %6816 = vmatmul.mubr.msk.f32.gmra.mrb[28].mxu1 %vm1273_vm3, %v6803_v62 }
 0x8df   : > { %v6806_v17 = vpop.f32.mrb[38].mxu1 }
 0x8e0   : > { %v2785_v53 = vpop.f32.mrb[39].mxu1 }
 0x8e1   : > { %6818 = vmatprep.mubr.msk.f32.mxu1 %vm1273_vm3, %v2785_v53 }
 0x8e2   : > { %6819 = vmatmul.mubr.msk.f32.gmra.mrb[30].mxu1 %vm1273_vm3, %v6806_v17 }
 0x8eb   : > { %v6909_v20 = vpop.f32.mrb[48].mxu0 }
 0x8ec   : > { %v3630_v45 = vpop.f32.mrb[49].mxu0  ;;  %v3670_v28 = vmul.f32 0.5, %v6909_v20 }
 0x8ed   : > { %v3669_v37 = vmul.f32 0.5, %v3630_v45 }
 0x8ee   : > { %v9594_v52 = vsel %vm1436_vm5, -1e+09, %v3670_v28 }
 0x8ef   : > { %v9582_v55 = vsel %vm1435_vm7, -1e+09, %v3669_v37  ;;  %v6912_v26 = vpop.f32.mrb[50].mxu0  ;;  %v3688_v34 = vsel %vm1451_vm6, %v9594_v52, -inf }
 0x8f0   : > { %v3640_v23 = vpop.f32.mrb[51].mxu0  ;;  %v3685_v54 = vsel %vm1451_vm6, %v9582_v55, -inf  ;;  %v3672_v12 = vmul.f32 0.5, %v6912_v26 }
 0x8f1   : > { %v3671_v59 = vmul.f32 0.5, %v3640_v23 }
 0x8f2   : > { %3686 = vmax.xlane.f32.xlu0 %v3685_v54  ;;  %v9598_v39 = vsel %vm1438_vm8, -1e+09, %v3672_v12 }
 0x8f3   : > { %v9588_v61 = vsel %vm1437_vm9, -1e+09, %v3671_v59  ;;  %v6915_v5 = vpop.f32.mrb[52].mxu0  ;;  %v3694_v22 = vsel %vm1451_vm6, %v9598_v39, -inf }
 0x8f4   : > { %v3650_v15 = vpop.f32.mrb[53].mxu0  ;;  %v3691_v25 = vsel %vm1451_vm6, %v9588_v61, -inf  ;;  %v3674_v57 = vmul.f32 0.5, %v6915_v5 }
 0x8f5   : > { %v3673_v50 = vmul.f32 0.5, %v3650_v15 }
 0x8f6   : > { %3692 = vmax.xlane.f32.xlu0 %v3691_v25  ;;  %v9606_v16 = vsel %vm1440_vm10, -1e+09, %v3674_v57 }
 0x8f7   : > { %v6918_v60 = vpop.f32.mrb[54].mxu0  ;;  %v9610_v51 = vsel %vm1439_vm11, -1e+09, %v3673_v50  ;;  %v3700_v1 = vsel %vm1451_vm6, %v9606_v16, -inf }
 0x8f8   : > { %v3660_v18 = vpop.f32.mrb[55].mxu0  ;;  %v3676_v9 = vmul.f32 0.5, %v6918_v60  ;;  %v3697_v62 = vsel %vm1451_vm6, %v9610_v51, -inf }
 0x8f9   : > { %v3675_v30 = vmul.f32 0.5, %v3660_v18 }
 0x8fa   : > { %3695 = vmax.xlane.f32.xlu0 %v3694_v22  ;;  %3689 = vmax.xlane.f32.xlu1 %v3688_v34  ;;  %v9618_v17 = vsel %vm1442_vm14, -1e+09, %v3676_v9 }
 0x8fb   : > { %v9622_v53 = vsel %vm1441_vm12, -1e+09, %v3675_v30  ;;  %v3706_v45 = vsel %vm1451_vm6, %v9618_v17, -inf }
 0x8fc   : > { %v3703_v20 = vsel %vm1451_vm6, %v9622_v53, -inf }
 0x8fe   : > { %3698 = vmax.xlane.f32.xlu0 %v3697_v62  ;;  %3701 = vmax.xlane.f32.xlu1 %v3700_v1 }
 0x902   : > { %3704 = vmax.xlane.f32.xlu0 %v3703_v20  ;;  %3707 = vmax.xlane.f32.xlu1 %v3706_v45  ;;  %v3360_v45 = vrot.slane %v9493_v24, 4 }
 0x913   : > { %7760 = vrot.lane.b32.xlu1 %v10281_v0, %s8213_s17 }
 0x918   : > { %7755 = vrot.lane.b32.xlu0 %v10282_v36, %s8213_s17 }
 0x924   : > { %v3172_v26 = vpop.xlane.xlu1 %3171 }
 0x925   : > { %v3169_v37 = vpop.xlane.xlu0 %3168 }
 0x926   : > { %8050 = vrcp.f32 %v3169_v37 }
 0x927   : > { %8052 = vrcp.f32 %v3172_v26 }
 0x929   : > { %v3175_v23 = vpop.xlane.xlu0 %3174 }
 0x92a   : > { %8054 = vrcp.f32 %v3175_v23 }
 0x92e   : > { %v3178_v54 = vpop.xlane.xlu1 %3177 }
 0x92f   : > { %8056 = vrcp.f32 %v3178_v54 }
 0x930   : > { %v8051_v59 = vpop.eup %8050 }
 0x931   : > { %v3192_v5 = vmul.f32 %v8051_v59, %v9513_v29  ;;  %v8053_v26 = vpop.eup %8052 }
 0x932   : > { %v3184_v28 = vpop.xlane.xlu1 %3183  ;;  %v3181_v12 = vpop.xlane.xlu0 %3180 }
 0x933   : > { %6865 = vmatprep.mubr.msk.f32.mxu1 %vm1451_vm6, %v3192_v5  ;;  %8058 = vrcp.f32 %v3181_v12 }
 0x934   : > { %8060 = vrcp.f32 %v3184_v28  ;;  %v8055_v59 = vpop.eup %8054  ;;  %v3194_v28 = vmul.f32 %v8053_v26, %v9511_v33 }
 0x936   : > { %v3190_v15 = vpop.xlane.xlu1 %3189  ;;  %v7726_v25 = vpop.permute.xlu0 %7725 }
 0x937   : > { %v7728_v57 = vunpack.i.h.bf16 %v7726_v25  ;;  %v7727_v50 = vunpack.i.l.bf16 %v7726_v25 }
 0x939   : > { %v7347_v60 = vpack.c.bf16 %v7728_v57, %v7727_v50  ;;  %v8057_v24 = vpop.eup %8056 }
 0x93a   : > { %v3187_v18 = vpop.xlane.xlu1 %3186  ;;  %v7736_v22 = vpop.permute.xlu0 %7735  ;;  %v3198_v33 = vmul.f32 %v8057_v24, %v9524_v21 }
 0x93b   : > { %v7738_v34 = vunpack.i.h.bf16 %v7736_v22  ;;  %v7737_v9 = vunpack.i.l.bf16 %v7736_v22  ;;  %7348 = vmatprep.subr.bf16.mxu1 %v7347_v60  ;;  %8062 = vrcp.f32 %v3187_v18 }
 0x93c   : > { %7350 = vmatpush3.bf16.msra.mxu1 %v7347_v60  ;;  %8064 = vrcp.f32 %v3190_v15  ;;  %v3196_v60 = vmul.f32 %v8055_v59, %v9520_v4 }
 0x93d   : > { %v7395_v30 = vpack.c.bf16 %v7738_v34, %v7737_v9  ;;  %v8059_v18 = vpop.eup %8058 }
 0x93e   : > { %v7731_v62 = vpop.permute.xlu1 %7730  ;;  %v7746_v29 = vpop.permute.xlu0 %7745  ;;  %v3200_v15 = vmul.f32 %v8059_v18, %v9530_v49 }
 0x93f   : > { %v7733_v1 = vunpack.i.h.bf16 %v7731_v62  ;;  %v7732_v20 = vunpack.i.l.bf16 %v7731_v62  ;;  %7397 = vmatprep.subr.msk.bf16.mxu0 %vm8804_vm4, %v7395_v30  ;;  %v7748_v12 = vunpack.i.h.bf16 %v7746_v29  ;;  %v7747_v5 = vunpack.i.l.bf16 %v7746_v29  ;;  %v8061_v4 = vpop.eup %8060 }
 0x940   : > { %7400 = vmatpush3.bf16.xpose.msk.msra.mxu0 %vm8804_vm4, %v7395_v30  ;;  %v3202_v29 = vmul.f32 %v8061_v4, %v9528_v6 }
 0x941   : > { %v7351_v37 = vpack.c.bf16 %v7733_v1, %v7732_v20  ;;  %v7407_v22 = vpack.c.bf16 %v7748_v12, %v7747_v5 }
 0x942   : > { %v7741_v23 = vpop.permute.xlu1 %7740  ;;  %v4067_v54 = vpop.permute.xlu0 %4066 }
 0x943   : > { %v7743_v25 = vunpack.i.h.bf16 %v7741_v23  ;;  %v7742_v57 = vunpack.i.l.bf16 %v7741_v23  ;;  %7352 = vmatprep.subr.bf16.mxu1 %v7351_v37  ;;  %6977 = vmatprep.mubr.msk.f32.mxu0 %vm1273_vm3, %v4067_v54 }
 0x944   : > { %7354 = vmatpush3.bf16.msra.mxu1 %v7351_v37 }
 0x945   : > { %v7401_v50 = vpack.c.bf16 %v7743_v25, %v7742_v57  ;;  %6877 = vmatprep.subr.msk.mxu1 %vm2129_vm13, %v3360_v45  ;;  %v8063_v9 = vpop.eup %8062 }
 0x946   : > { %v7751_v34 = vpop.permute.xlu1 %7750  ;;  %v8065_v1 = vpop.eup %8064  ;;  %v3204_v20 = vmul.f32 %v8063_v9, %v9540_v43 }
 0x947   : > { %6866 = vmatmul.mubr.msk.f32.vlgmr.msra.gmra.mrb[40].mxu1 %vm1451_vm6, %v3194_v28  ;;  %7403 = vmatprep.subr.msk.bf16.mxu0 %vm8804_vm4, %v7401_v50  ;;  %v7753_v30 = vunpack.i.h.bf16 %v7751_v34  ;;  %v7752_v62 = vunpack.i.l.bf16 %v7751_v34  ;;  %v3206_v21 = vmul.f32 %v8065_v1, %v9536_v32  ;;  %v4071_v6 = vpop.permute.xlu0 %4070 }
 0x948   : > { %6868 = vmatprep.mubr.msk.f32.mxu1 %vm1451_vm6, %v3196_v60  ;;  %7406 = vmatpush3.bf16.xpose.msk.msra.mxu0 %vm8804_vm4, %v7401_v50 }
 0x949   : > { %7409 = vmatprep.subr.msk.bf16.mxu0 %vm8804_vm4, %v7407_v22  ;;  %6878 = vmatpush3.msk.msra.mxu1 %vm2129_vm13, %v3360_v45  ;;  %v7413_v37 = vpack.c.bf16 %v7753_v30, %v7752_v62 }
 0x94a   : > { %v4069_v49 = vpop.permute.xlu1 %4068 }
 0x94b   : > { %6869 = vmatmul.mubr.msk.f32.gmra.mrb[42].mxu1 %vm1451_vm6, %v3198_v33  ;;  %v4075_v45 = vpop.permute.xlu0 %4074 }
 0x94c   : > { %6871 = vmatprep.mubr.msk.f32.mxu1 %vm1451_vm6, %v3200_v15 }
 0x94e   : > { %v4073_v43 = vpop.permute.xlu1 %4072 }
 0x94f   : > { %6872 = vmatmul.mubr.msk.f32.gmra.mrb[44].mxu1 %vm1451_vm6, %v3202_v29  ;;  %v4079_v23 = vpop.permute.xlu0 %4078 }
 0x950   : > { %6874 = vmatprep.mubr.msk.f32.mxu1 %vm1451_vm6, %v3204_v20  ;;  %7412 = vmatpush3.bf16.xpose.msk.msra.mxu0 %vm8804_vm4, %v7407_v22 }
 0x951   : > { %7415 = vmatprep.subr.msk.bf16.mxu0 %vm8804_vm4, %v7413_v37 }
 0x952   : > { %v4077_v26 = vpop.permute.xlu1 %4076 }
 0x953   : > { %6875 = vmatmul.mubr.msk.f32.gmra.mrb[46].mxu1 %vm1451_vm6, %v3206_v21 }
 0x956   : > { %v4081_v32 = vpop.permute.xlu1 %4080 }
 0x958   : > { %7418 = vmatpush3.bf16.xpose.msk.msra.mxu0 %vm8804_vm4, %v7413_v37 }
 0x95f   : > { %6978 = vmatmul.mubr.msk.f32.vlgmr.msra.gmra.mrb[56].mxu0 %vm1273_vm3, %v4069_v49 }
 0x960   : > { %6980 = vmatprep.mubr.msk.f32.mxu0 %vm1273_vm3, %v4071_v6 }
 0x963   : > { %6981 = vmatmul.mubr.msk.f32.gmra.mrb[58].mxu0 %vm1273_vm3, %v4073_v43 }
 0x964   : > { %6983 = vmatprep.mubr.msk.f32.mxu0 %vm1273_vm3, %v4075_v45 }
 0x967   : > { %6984 = vmatmul.mubr.msk.f32.gmra.mrb[60].mxu0 %vm1273_vm3, %v4077_v26 }
 0x968   : > { %6986 = vmatprep.mubr.msk.f32.mxu0 %vm1273_vm3, %v4079_v23 }
 0x96b   : > { %6987 = vmatmul.mubr.msk.f32.gmra.mrb[62].mxu0 %vm1273_vm3, %v4081_v32 }
 0x97f   : > { %v3687_v54 = vpop.xlane.xlu0 %3686 }
 0x980   : > { %v3709_v59 = vsub.f32 %v9582_v55, %v3687_v54 }
 0x982   : > { %v3717_v12 = vmul.f32 1.442695, %v3709_v59 }
 0x983   : > { %v3693_v5 = vpop.xlane.xlu0 %3692 }
 0x984   : > { %8066 = vpow2.f32 %v3717_v12  ;;  %v3711_v25 = vsub.f32 %v9588_v61, %v3693_v5 }
 0x986   : > { %v3721_v57 = vmul.f32 1.442695, %v3711_v25 }
 0x987   : > { %v3690_v28 = vpop.xlane.xlu1 %3689  ;;  %v3696_v50 = vpop.xlane.xlu0 %3695 }
 0x988   : > { %8068 = vpow2.f32 %v3721_v57  ;;  %v3710_v24 = vsub.f32 %v9594_v52, %v3690_v28  ;;  %v3712_v60 = vsub.f32 %v9598_v39, %v3696_v50 }
 0x98a   : > { %v3719_v18 = vmul.f32 1.442695, %v3710_v24  ;;  %v3723_v22 = vmul.f32 1.442695, %v3712_v60 }
 0x98b   : > { %v3702_v34 = vpop.xlane.xlu1 %3701  ;;  %v3699_v33 = vpop.xlane.xlu0 %3698 }
 0x98c   : > { %8070 = vpow2.f32 %v3719_v18  ;;  %v3714_v55 = vsub.f32 %v9606_v16, %v3702_v34  ;;  %v3713_v4 = vsub.f32 %v9610_v51, %v3699_v33 }
 0x98d   : > { %8072 = vpow2.f32 %v3723_v22 }
 0x98e   : > { %v9681_v15 = vpop.eup %8066  ;;  %v3727_v61 = vmul.f32 1.442695, %v3714_v55  ;;  %v3725_v9 = vmul.f32 1.442695, %v3713_v4 }
 0x98f   : > { %v3708_v30 = vpop.xlane.xlu1 %3707  ;;  %v3705_v62 = vpop.xlane.xlu0 %3704  ;;  %v3733_v52 = vsel %vm1451_vm6, %v9681_v15, 0.0 }
 0x990   : > { %v3716_v39 = vsub.f32 %v9618_v17, %v3708_v30  ;;  %3734 = vadd.xlane.f32.xlu0 %v3733_v52  ;;  %8074 = vpow2.f32 %v3725_v9  ;;  %v3715_v51 = vsub.f32 %v9622_v53, %v3705_v62 }
 0x991   : > { %8076 = vpow2.f32 %v3727_v61 }
 0x992   : > { %v9686_v29 = vpop.eup %8068  ;;  %v3731_v16 = vmul.f32 1.442695, %v3716_v39  ;;  %v3729_v6 = vmul.f32 1.442695, %v3715_v51 }
 0x993   : > { %v7756_v1 = vpop.permute.xlu0 %7755  ;;  %v3739_v20 = vsel %vm1451_vm6, %v9686_v29, 0.0  ;;  %v7761_v57 = vpop.permute.xlu1 %7760 }
 0x994   : > { %v7758_v37 = vunpack.i.h.bf16 %v7756_v1  ;;  %3740 = vadd.xlane.f32.xlu0 %v3739_v20  ;;  %v7757_v21 = vunpack.i.l.bf16 %v7756_v1  ;;  %8078 = vpow2.f32 %v3731_v16  ;;  %v7763_v28 = vunpack.i.h.bf16 %v7761_v57 }
 0x995   : > { %8080 = vpow2.f32 %v3729_v6  ;;  %v7762_v50 = vunpack.i.l.bf16 %v7761_v57 }
 0x996   : > { %v9691_v49 = vpop.eup %8070  ;;  %v7379_v17 = vpack.c.bf16 %v7758_v37, %v7757_v21 }
 0x997   : > { %v3736_v43 = vsel %vm1451_vm6, %v9691_v49, 0.0  ;;  %v9695_v45 = vpop.eup %8072  ;;  %v7383_v18 = vpack.c.bf16 %v7763_v28, %v7762_v50 }
 0x998   : > { %3737 = vadd.xlane.f32.xlu1 %v3736_v43  ;;  %7380 = vmatprep.subr.bf16.mxu1 %v7379_v17  ;;  %v3742_v26 = vsel %vm1451_vm6, %v9695_v45, 0.0 }
 0x99a   : > { %v9697_v53 = vpop.eup %8074 }
 0x99b   : > { %v9701_v23 = vpop.eup %8076  ;;  %v3745_v32 = vsel %vm1451_vm6, %v9697_v53, 0.0 }
 0x99c   : > { %3743 = vadd.xlane.f32.xlu1 %v3742_v26  ;;  %3746 = vadd.xlane.f32.xlu0 %v3745_v32  ;;  %v3748_v54 = vsel %vm1451_vm6, %v9701_v23, 0.0 }
 0x99e   : > { %v9707_v59 = vpop.eup %8078 }
 0x99f   : > { %v3754_v12 = vsel %vm1451_vm6, %v9707_v59, 0.0  ;;  %v9711_v5 = vpop.eup %8080 }
 0x9a0   : > { %3749 = vadd.xlane.f32.xlu1 %v3748_v54  ;;  %v3751_v25 = vsel %vm1451_vm6, %v9711_v5, 0.0 }
 0x9a4   : > { %3755 = vadd.xlane.f32.xlu1 %v3754_v12 }
 0x9a8   : > { %3752 = vadd.xlane.f32.xlu1 %v3751_v25 }
 0x9b2   : > { %7765 = vrot.lane.b32.xlu0 %v8872_v14, %s8213_s17 }
 0x9b6   : > { %7775 = vrot.lane.b32.xlu0 %v8808_v31, %s8215_s21 }
 0x9b9   : > { %7770 = vrot.lane.b32.xlu1 %v8876_v3, %s8213_s17  ;;  %s10223_s17 = scalar_lea.vmem %s10264_s13, %s8295_s27 }
 0x9ba   : > { %7785 = vrot.lane.b32.xlu0 %v8820_v42, %s8215_s21 }
 0x9bd   : > { %7780 = vrot.lane.b32.xlu1 %v8814_v19, %s8215_s21 }
 0x9be   : > { %4632 = vrot.lane.b32.xlu0 %v8827_v40, %s8215_s21 }
 0x9c1   : > { %7790 = vrot.lane.b32.xlu1 %v8829_v13, %s8215_s21 }
 0x9c2   : > { %4636 = vrot.lane.b32.xlu0 %v8844_v46, %s8215_s21 }
 0x9c5   : > { %4634 = vrot.lane.b32.xlu1 %v8842_v11, %s8215_s21 }
 0x9c6   : > { %4640 = vrot.lane.b32.xlu0 %v8850_v8, %s8215_s21 }
 0x9c9   : > { %4638 = vrot.lane.b32.xlu1 %v8848_v7, %s8215_s21 }
 0x9ca   : > { %4644 = vrot.lane.b32.xlu0 %v8860_v58, %s8215_s21 }
 0x9cd   : > { %4642 = vrot.lane.b32.xlu1 %v8858_v35, %s8215_s21 }
 0x9d1   : > { %4646 = vrot.lane.b32.xlu1 %v8868_v47, %s8215_s21 }
 0xa1a   : > { %v6867_v24 = vpop.f32.mrb[40].mxu1 }
 0xa1b   : > { %v3321_v60 = vpop.f32.mrb[41].mxu1 }
 0xa1c   : > { %6879 = vmatprep.mubr.msk.f32.mxu1 %vm1273_vm3, %v3321_v60 }
 0xa1d   : > { %v3735_v22 = vpop.xlane.xlu0 %3734  ;;  %6880 = vmatmul.mubr.msk.f32.vlgmr.msra.gmra.mrb[24].mxu1 %vm1273_vm3, %v6867_v24 }
 0xa1e   : > { %8082 = vrcp.f32 %v3735_v22  ;;  %7382 = vmatpush3.bf16.msra.mxu1 %v7379_v17  ;;  %v6870_v34 = vpop.f32.mrb[42].mxu1 }
 0xa1f   : > { %7384 = vmatprep.subr.bf16.mxu1 %v7383_v18  ;;  %v3331_v33 = vpop.f32.mrb[43].mxu1 }
 0xa20   : > { %6882 = vmatprep.mubr.msk.f32.mxu1 %vm1273_vm3, %v3331_v33 }
 0xa21   : > { %6883 = vmatmul.mubr.msk.f32.gmra.mrb[26].mxu1 %vm1273_vm3, %v6870_v34  ;;  %v3741_v9 = vpop.xlane.xlu0 %3740 }
 0xa22   : > { %7386 = vmatpush3.bf16.msra.mxu1 %v7383_v18  ;;  %v6873_v55 = vpop.f32.mrb[44].mxu1 }
 0xa23   : > { %v3341_v4 = vpop.f32.mrb[45].mxu1 }
 0xa24   : > { %6885 = vmatprep.mubr.msk.f32.mxu1 %vm1273_vm3, %v3341_v4 }
 0xa25   : > { %v3738_v61 = vpop.xlane.xlu1 %3737  ;;  %6886 = vmatmul.mubr.msk.f32.gmra.mrb[28].mxu1 %vm1273_vm3, %v6873_v55 }
 0xa26   : > { %v6876_v30 = vpop.f32.mrb[46].mxu1  ;;  %8084 = vrcp.f32 %v3738_v61 }
 0xa27   : > { %v3351_v62 = vpop.f32.mrb[47].mxu1  ;;  %8086 = vrcp.f32 %v3741_v9 }
 0xa28   : > { %v8083_v52 = vpop.eup %8082  ;;  %6888 = vmatprep.mubr.msk.f32.mxu1 %vm1273_vm3, %v3351_v62 }
 0xa29   : > { %v3744_v39 = vpop.xlane.xlu1 %3743  ;;  %6889 = vmatmul.mubr.msk.f32.gmra.mrb[30].mxu1 %vm1273_vm3, %v6876_v30  ;;  %v3758_v16 = vmul.f32 %v8083_v52, %v9681_v15  ;;  %v3747_v51 = vpop.xlane.xlu0 %3746 }
 0xa2a   : > { %8088 = vrcp.f32 %v3744_v39 }
 0xa2b   : > { %6935 = vmatprep.mubr.msk.f32.mxu1 %vm1451_vm6, %v3758_v16  ;;  %8090 = vrcp.f32 %v3747_v51 }
 0xa2d   : > { %v3750_v1 = vpop.xlane.xlu1 %3749  ;;  %v7766_v20 = vpop.permute.xlu0 %7765 }
 0xa2e   : > { %v7768_v37 = vunpack.i.h.bf16 %v7766_v20  ;;  %v7767_v21 = vunpack.i.l.bf16 %v7766_v20  ;;  %8092 = vrcp.f32 %v3750_v1 }
 0xa30   : > { %v7387_v6 = vpack.c.bf16 %v7768_v37, %v7767_v21 }
 0xa31   : > { %v3756_v17 = vpop.xlane.xlu1 %3755  ;;  %v7776_v43 = vpop.permute.xlu0 %7775 }
 0xa32   : > { %v6979_v26 = vpop.f32.mrb[56].mxu0  ;;  %v7778_v32 = vunpack.i.h.bf16 %v7776_v43  ;;  %v7777_v54 = vunpack.i.l.bf16 %v7776_v43  ;;  %7388 = vmatprep.subr.bf16.mxu1 %v7387_v6 }
 0xa33   : > { %v4236_v12 = vmul.f32 0.5, %v6979_v26  ;;  %v4196_v25 = vpop.f32.mrb[57].mxu0  ;;  %7390 = vmatpush3.bf16.msra.mxu1 %v7387_v6  ;;  %v8085_v6 = vpop.eup %8084 }
 0xa34   : > { %v4235_v57 = vmul.f32 0.5, %v4196_v25  ;;  %v7435_v15 = vpack.c.bf16 %v7778_v32, %v7777_v54 }
 0xa35   : > { %v9755_v28 = vsel %vm1436_vm5, -1e+09, %v4236_v12  ;;  %v3753_v50 = vpop.xlane.xlu1 %3752  ;;  %v7786_v60 = vpop.permute.xlu0 %7785 }
 0xa36   : > { %v9759_v24 = vsel %vm1435_vm7, -1e+09, %v4235_v57  ;;  %v6982_v18 = vpop.f32.mrb[58].mxu0  ;;  %v4254_v22 = vsel %vm1451_vm6, %v9755_v28, -inf  ;;  %7437 = vmatprep.subr.msk.bf16.mxu0 %vm8804_vm4, %v7435_v15  ;;  %8094 = vrcp.f32 %v3753_v50  ;;  %v7788_v43 = vunpack.i.h.bf16 %v7786_v60  ;;  %v8087_v50 = vpop.eup %8086 }
 0xa37   : > { %4255 = vmax.xlane.f32.xlu1 %v4254_v22  ;;  %v4206_v34 = vpop.f32.mrb[59].mxu0  ;;  %v4251_v33 = vsel %vm1451_vm6, %v9759_v24, -inf  ;;  %v4238_v55 = vmul.f32 0.5, %v6982_v18  ;;  %7440 = vmatpush3.bf16.xpose.msk.msra.mxu0 %vm8804_vm4, %v7435_v15  ;;  %v7787_v54 = vunpack.i.l.bf16 %v7786_v60  ;;  %8096 = vrcp.f32 %v3756_v17  ;;  %v8089_v60 = vpop.eup %8088 }
 0xa38   : > { %v4237_v4 = vmul.f32 0.5, %v4206_v34  ;;  %4252 = vmax.xlane.f32.xlu0 %v4251_v33  ;;  %v3760_v33 = vmul.f32 %v8085_v6, %v9691_v49 }
 0xa39   : > { %v7771_v61 = vpop.permute.xlu1 %7770  ;;  %v4633_v52 = vpop.permute.xlu0 %4632  ;;  %v9778_v37 = vsel %vm1438_vm8, -1e+09, %v4238_v55 }
 0xa3a   : > { %v9771_v9 = vsel %vm1437_vm9, -1e+09, %v4237_v4  ;;  %v7773_v30 = vunpack.i.h.bf16 %v7771_v61  ;;  %v7772_v62 = vunpack.i.l.bf16 %v7771_v61  ;;  %v6985_v39 = vpop.f32.mrb[60].mxu0  ;;  %7047 = vmatprep.mubr.msk.f32.mxu0 %vm1273_vm3, %v4633_v52  ;;  %v4260_v34 = vsel %vm1451_vm6, %v9778_v37, -inf }
 0xa3b   : > { %v4240_v16 = vmul.f32 0.5, %v6985_v39  ;;  %v4216_v51 = vpop.f32.mrb[61].mxu0  ;;  %v4257_v20 = vsel %vm1451_vm6, %v9771_v9, -inf  ;;  %v3762_v52 = vmul.f32 %v8087_v50, %v9686_v29 }
 0xa3c   : > { %v7391_v21 = vpack.c.bf16 %v7773_v30, %v7772_v62  ;;  %4258 = vmax.xlane.f32.xlu0 %v4257_v20  ;;  %v4239_v1 = vmul.f32 0.5, %v4216_v51  ;;  %v8091_v30 = vpop.eup %8090  ;;  %v7447_v62 = vpack.c.bf16 %v7788_v43, %v7787_v54  ;;  %v3764_v51 = vmul.f32 %v8089_v60, %v9695_v45 }
 0xa3d   : > { %v9782_v26 = vsel %vm1440_vm10, -1e+09, %v4240_v16  ;;  %v7781_v32 = vpop.permute.xlu1 %7780  ;;  %v8093_v20 = vpop.eup %8092  ;;  %v3766_v29 = vmul.f32 %v8091_v30, %v9697_v53 }
 0xa3e   : > { %v7783_v12 = vunpack.i.h.bf16 %v7781_v32  ;;  %v7782_v25 = vunpack.i.l.bf16 %v7781_v32  ;;  %7392 = vmatprep.subr.bf16.mxu1 %v7391_v21  ;;  %v6988_v57 = vpop.f32.mrb[62].mxu0  ;;  %v4266_v15 = vsel %vm1451_vm6, %v9782_v26, -inf  ;;  %v9791_v4 = vsel %vm1439_vm11, -1e+09, %v4239_v1 }
 0xa3f   : > { %v4242_v18 = vmul.f32 0.5, %v6988_v57  ;;  %4267 = vmax.xlane.f32.xlu1 %v4266_v15  ;;  %7394 = vmatpush3.bf16.msra.mxu1 %v7391_v21  ;;  %v4226_v22 = vpop.f32.mrb[63].mxu0  ;;  %v4263_v16 = vsel %vm1451_vm6, %v9791_v4, -inf  ;;  %v3768_v45 = vmul.f32 %v8093_v20, %v9701_v23 }
 0xa40   : > { %v7441_v55 = vpack.c.bf16 %v7783_v12, %v7782_v25  ;;  %4261 = vmax.xlane.f32.xlu0 %v4260_v34  ;;  %v4241_v17 = vmul.f32 0.5, %v4226_v22  ;;  %v8095_v6 = vpop.eup %8094 }
 0xa41   : > { %v9795_v61 = vsel %vm1442_vm14, -1e+09, %v4242_v18  ;;  %v7791_v39 = vpop.permute.xlu1 %7790  ;;  %v8097_v54 = vpop.eup %8096  ;;  %v3770_v12 = vmul.f32 %v8095_v6, %v9711_v5 }
 0xa42   : > { %6936 = vmatmul.mubr.msk.f32.vlgmr.msra.gmra.mrb[48].mxu1 %vm1451_vm6, %v3760_v33  ;;  %7443 = vmatprep.subr.msk.bf16.mxu0 %vm8804_vm4, %v7441_v55  ;;  %v4272_v49 = vsel %vm1451_vm6, %v9795_v61, -inf  ;;  %v9813_v21 = vsel %vm1441_vm12, -1e+09, %v4241_v17  ;;  %v7793_v43 = vunpack.i.h.bf16 %v7791_v39  ;;  %v7792_v1 = vunpack.i.l.bf16 %v7791_v39  ;;  %v4637_v5 = vpop.permute.xlu0 %4636 }
 0xa43   : > { %7446 = vmatpush3.bf16.xpose.msk.msra.mxu0 %vm8804_vm4, %v7441_v55  ;;  %4273 = vmax.xlane.f32.xlu1 %v4272_v49  ;;  %v4269_v32 = vsel %vm1451_vm6, %v9813_v21, -inf  ;;  %v3772_v53 = vmul.f32 %v8097_v54, %v9707_v59  ;;  %v9839_v59 = vld [vmem:[%s10262_s11 + $0x10] sm:$0xff] }
 0xa44   : > { %6938 = vmatprep.mubr.msk.f32.mxu1 %vm1451_vm6, %v3762_v52  ;;  %7449 = vmatprep.subr.msk.bf16.mxu0 %vm8804_vm4, %v7447_v62  ;;  %v7453_v25 = vpack.c.bf16 %v7793_v43, %v7792_v1 }
 0xa45   : > { %4264 = vmax.xlane.f32.xlu0 %v4263_v16  ;;  %v4635_v23 = vpop.permute.xlu1 %4634  ;;  %6947 = vmatprep.subr.msk.mxu1 %vm2129_vm13, %v9839_v59 }
 0xa46   : > { %6939 = vmatmul.mubr.msk.f32.gmra.mrb[50].mxu1 %vm1451_vm6, %v3764_v51  ;;  %v4641_v15 = vpop.permute.xlu0 %4640 }
 0xa47   : > { %6941 = vmatprep.mubr.msk.f32.mxu1 %vm1451_vm6, %v3766_v29  ;;  %6948 = vmatpush3.msk.msra.mxu1 %vm2129_vm13, %v9839_v59 }
 0xa49   : > { %4270 = vmax.xlane.f32.xlu0 %v4269_v32  ;;  %v4639_v57 = vpop.permute.xlu1 %4638 }
 0xa4a   : > { %6942 = vmatmul.mubr.msk.f32.gmra.mrb[52].mxu1 %vm1451_vm6, %v3768_v45  ;;  %v4645_v18 = vpop.permute.xlu0 %4644 }
 0xa4b   : > { %6944 = vmatprep.mubr.msk.f32.mxu1 %vm1451_vm6, %v3770_v12  ;;  %7452 = vmatpush3.bf16.xpose.msk.msra.mxu0 %vm8804_vm4, %v7447_v62 }
 0xa4c   : > { %7455 = vmatprep.subr.msk.bf16.mxu0 %vm8804_vm4, %v7453_v25 }
 0xa4d   : > { %v4643_v50 = vpop.permute.xlu1 %4642 }
 0xa4e   : > { %6945 = vmatmul.mubr.msk.f32.gmra.mrb[54].mxu1 %vm1451_vm6, %v3772_v53 }
 0xa51   : > { %v4647_v22 = vpop.permute.xlu1 %4646 }
 0xa53   : > { %7458 = vmatpush3.bf16.xpose.msk.msra.mxu0 %vm8804_vm4, %v7453_v25 }
 0xa54   : > { %7800 = vrot.lane.b32.xlu1 %v10281_v0, %s8214_s20 }
 0xa5a   : > { %7048 = vmatmul.mubr.msk.f32.vlgmr.msra.gmra.mrb[64].mxu0 %vm1273_vm3, %v4635_v23 }
 0xa5b   : > { %7050 = vmatprep.mubr.msk.f32.mxu0 %vm1273_vm3, %v4637_v5 }
 0xa5e   : > { %7051 = vmatmul.mubr.msk.f32.gmra.mrb[66].mxu0 %vm1273_vm3, %v4639_v57 }
 0xa5f   : > { %7795 = vrot.lane.b32.xlu0 %v10282_v36, %s8214_s20  ;;  %7053 = vmatprep.mubr.msk.f32.mxu0 %vm1273_vm3, %v4641_v15 }
 0xa62   : > { %7054 = vmatmul.mubr.msk.f32.gmra.mrb[68].mxu0 %vm1273_vm3, %v4643_v50 }
 0xa63   : > { %7056 = vmatprep.mubr.msk.f32.mxu0 %vm1273_vm3, %v4645_v18 }
 0xa66   : > { %7057 = vmatmul.mubr.msk.f32.gmra.mrb[70].mxu0 %vm1273_vm3, %v4647_v22 }
 0xac4   : > { %v4256_v34 = vpop.xlane.xlu1 %4255 }
 0xac5   : > { %v4276_v33 = vsub.f32 %v9755_v28, %v4256_v34  ;;  %v4253_v55 = vpop.xlane.xlu0 %4252 }
 0xac6   : > { %v4275_v60 = vsub.f32 %v9759_v24, %v4253_v55 }
 0xac7   : > { %v4285_v17 = vmul.f32 1.442695, %v4276_v33 }
 0xac8   : > { %v4283_v30 = vmul.f32 1.442695, %v4275_v60 }
 0xac9   : > { %8098 = vpow2.f32 %v4285_v17  ;;  %v4259_v62 = vpop.xlane.xlu0 %4258 }
 0xaca   : > { %8100 = vpow2.f32 %v4283_v30  ;;  %v4277_v49 = vsub.f32 %v9771_v9, %v4259_v62 }
 0xacc   : > { %v4287_v52 = vmul.f32 1.442695, %v4277_v49  ;;  %v4268_v39 = vpop.xlane.xlu1 %4267 }
 0xacd   : > { %v4280_v16 = vsub.f32 %v9782_v26, %v4268_v39  ;;  %v4262_v51 = vpop.xlane.xlu0 %4261 }
 0xace   : > { %8102 = vpow2.f32 %v4287_v52  ;;  %v4278_v20 = vsub.f32 %v9778_v37, %v4262_v51 }
 0xacf   : > { %v4293_v29 = vmul.f32 1.442695, %v4280_v16 }
 0xad0   : > { %v4289_v28 = vmul.f32 1.442695, %v4278_v20  ;;  %v4274_v6 = vpop.xlane.xlu1 %4273 }
 0xad1   : > { %v4282_v24 = vsub.f32 %v9795_v61, %v4274_v6 }
 0xad2   : > { %8104 = vpow2.f32 %v4289_v28  ;;  %v4265_v43 = vpop.xlane.xlu0 %4264 }
 0xad3   : > { %v9858_v1 = vpop.eup %8098  ;;  %v4279_v32 = vsub.f32 %v9791_v4, %v4265_v43  ;;  %8106 = vpow2.f32 %v4293_v29  ;;  %v4297_v45 = vmul.f32 1.442695, %v4282_v24 }
 0xad4   : > { %v9861_v9 = vpop.eup %8100  ;;  %v4302_v26 = vsel %vm1451_vm6, %v9858_v1, 0.0 }
 0xad5   : > { %v4291_v54 = vmul.f32 1.442695, %v4279_v32  ;;  %4303 = vadd.xlane.f32.xlu1 %v4302_v26  ;;  %v4299_v12 = vsel %vm1451_vm6, %v9861_v9, 0.0 }
 0xad6   : > { %v4271_v37 = vpop.xlane.xlu0 %4270  ;;  %4300 = vadd.xlane.f32.xlu0 %v4299_v12 }
 0xad7   : > { %8108 = vpow2.f32 %v4291_v54  ;;  %v4281_v61 = vsub.f32 %v9813_v21, %v4271_v37 }
 0xad8   : > { %v9868_v25 = vpop.eup %8102  ;;  %8110 = vpow2.f32 %v4297_v45 }
 0xad9   : > { %v4295_v4 = vmul.f32 1.442695, %v4281_v61  ;;  %v4305_v53 = vsel %vm1451_vm6, %v9868_v25, 0.0 }
 0xada   : > { %v7796_v23 = vpop.permute.xlu0 %7795  ;;  %4306 = vadd.xlane.f32.xlu0 %v4305_v53 }
 0xadb   : > { %v7798_v5 = vunpack.i.h.bf16 %v7796_v23  ;;  %v7797_v57 = vunpack.i.l.bf16 %v7796_v23  ;;  %8112 = vpow2.f32 %v4295_v4 }
 0xadc   : > { %v9872_v15 = vpop.eup %8104 }
 0xadd   : > { %v7419_v50 = vpack.c.bf16 %v7798_v5, %v7797_v57  ;;  %v4308_v18 = vsel %vm1451_vm6, %v9872_v15, 0.0  ;;  %v9876_v21 = vpop.eup %8106 }
 0xade   : > { %4309 = vadd.xlane.f32.xlu1 %v4308_v18  ;;  %v4314_v34 = vsel %vm1451_vm6, %v9876_v21, 0.0 }
 0xadf   : > { %7420 = vmatprep.subr.bf16.mxu1 %v7419_v50 }
 0xae1   : > { %v9878_v22 = vpop.eup %8108 }
 0xae2   : > { %v9882_v33 = vpop.eup %8110  ;;  %4315 = vadd.xlane.f32.xlu1 %v4314_v34  ;;  %v4311_v55 = vsel %vm1451_vm6, %v9878_v22, 0.0 }
 0xae3   : > { %4312 = vadd.xlane.f32.xlu0 %v4311_v55  ;;  %v4320_v60 = vsel %vm1451_vm6, %v9882_v33, 0.0 }
 0xae5   : > { %v9888_v17 = vpop.eup %8112 }
 0xae6   : > { %4321 = vadd.xlane.f32.xlu1 %v4320_v60  ;;  %v4317_v30 = vsel %vm1451_vm6, %v9888_v17, 0.0 }
 0xaea   : > { %4318 = vadd.xlane.f32.xlu1 %v4317_v30 }
 0xaf9   : > { %7805 = vrot.lane.b32.xlu0 %v8872_v14, %s8214_s20 }
 0xafb   : > { %7810 = vrot.lane.b32.xlu1 %v8876_v3, %s8214_s20 }
 0xafd   : > { %7815 = vrot.lane.b32.xlu0 %v8808_v31, %s8216_s24  ;;  %v7801_v31 = vpop.permute.xlu1 %7800 }
 0xaff   : > { %7820 = vrot.lane.b32.xlu1 %v8814_v19, %s8216_s24  ;;  %v7803_v19 = vunpack.i.h.bf16 %v7801_v31 }
 0xb01   : > { %7825 = vrot.lane.b32.xlu0 %v8820_v42, %s8216_s24  ;;  %v7802_v42 = vunpack.i.l.bf16 %v7801_v31 }
 0xb03   : > { %7830 = vrot.lane.b32.xlu1 %v8829_v13, %s8216_s24 }
 0xb05   : > { %5198 = vrot.lane.b32.xlu0 %v8827_v40, %s8216_s24 }
 0xb07   : > { %5200 = vrot.lane.b32.xlu1 %v8842_v11, %s8216_s24  ;;  %v7423_v11 = vpack.c.bf16 %v7803_v19, %v7802_v42 }
 0xb09   : > { %5202 = vrot.lane.b32.xlu0 %v8844_v46, %s8216_s24 }
 0xb0b   : > { %5204 = vrot.lane.b32.xlu1 %v8848_v7, %s8216_s24 }
 0xb0d   : > { %5206 = vrot.lane.b32.xlu0 %v8850_v8, %s8216_s24 }
 0xb0f   : > { %5208 = vrot.lane.b32.xlu1 %v8858_v35, %s8216_s24 }
 0xb11   : > { %5210 = vrot.lane.b32.xlu0 %v8860_v58, %s8216_s24 }
 0xb13   : > { %5212 = vrot.lane.b32.xlu1 %v8868_v47, %s8216_s24 }
 0xb15   : > { %v6937_v40 = vpop.f32.mrb[48].mxu1 }
 0xb16   : > { %v3887_v13 = vpop.f32.mrb[49].mxu1 }
 0xb17   : > { %6949 = vmatprep.mubr.msk.f32.mxu1 %vm1273_vm3, %v3887_v13 }
 0xb18   : > { %6950 = vmatmul.mubr.msk.f32.vlgmr.msra.gmra.mrb[24].mxu1 %vm1273_vm3, %v6937_v40 }
 0xb19   : > { %7422 = vmatpush3.bf16.msra.mxu1 %v7419_v50  ;;  %v6940_v46 = vpop.f32.mrb[50].mxu1 }
 0xb1a   : > { %7424 = vmatprep.subr.bf16.mxu1 %v7423_v11  ;;  %v3897_v7 = vpop.f32.mrb[51].mxu1 }
 0xb1b   : > { %6952 = vmatprep.mubr.msk.f32.mxu1 %vm1273_vm3, %v3897_v7 }
 0xb1c   : > { %6953 = vmatmul.mubr.msk.f32.gmra.mrb[26].mxu1 %vm1273_vm3, %v6940_v46 }
 0xb1d   : > { %7426 = vmatpush3.bf16.msra.mxu1 %v7423_v11  ;;  %v6943_v8 = vpop.f32.mrb[52].mxu1 }
 0xb1e   : > { %v3907_v35 = vpop.f32.mrb[53].mxu1 }
 0xb1f   : > { %6955 = vmatprep.mubr.msk.f32.mxu1 %vm1273_vm3, %v3907_v35 }
 0xb20   : > { %6956 = vmatmul.mubr.msk.f32.gmra.mrb[28].mxu1 %vm1273_vm3, %v6943_v8 }
 0xb21   : > { %v6946_v58 = vpop.f32.mrb[54].mxu1 }
 0xb22   : > { %v3917_v47 = vpop.f32.mrb[55].mxu1 }
 0xb23   : > { %6958 = vmatprep.mubr.msk.f32.mxu1 %vm1273_vm3, %v3917_v47 }
 0xb24   : > { %6959 = vmatmul.mubr.msk.f32.gmra.mrb[30].mxu1 %vm1273_vm3, %v6946_v58 }
 0xb2d   : > { %v7049_v62 = vpop.f32.mrb[64].mxu0 }
 0xb2e   : > { %v4762_v49 = vpop.f32.mrb[65].mxu0  ;;  %v4802_v52 = vmul.f32 0.5, %v7049_v62 }
 0xb2f   : > { %v4801_v39 = vmul.f32 0.5, %v4762_v49 }
 0xb30   : > { %v9936_v28 = vsel %vm1436_vm5, -1e+09, %v4802_v52 }
 0xb31   : > { %v9930_v16 = vsel %vm1435_vm7, -1e+09, %v4801_v39  ;;  %v7052_v51 = vpop.f32.mrb[66].mxu0  ;;  %v4820_v37 = vsel %vm1451_vm6, %v9936_v28, -inf }
 0xb32   : > { %v4772_v20 = vpop.f32.mrb[67].mxu0  ;;  %v4817_v29 = vsel %vm1451_vm6, %v9930_v16, -inf  ;;  %v4804_v6 = vmul.f32 0.5, %v7052_v51 }
 0xb33   : > { %v4803_v24 = vmul.f32 0.5, %v4772_v20  ;;  %4818 = vmax.xlane.f32.xlu0 %v4817_v29 }
 0xb34   : > { %v9948_v12 = vsel %vm1438_vm8, -1e+09, %v4804_v6 }
 0xb35   : > { %v9940_v43 = vsel %vm1437_vm9, -1e+09, %v4803_v24  ;;  %v7055_v32 = vpop.f32.mrb[68].mxu0  ;;  %v4826_v50 = vsel %vm1451_vm6, %v9948_v12, -inf }
 0xb36   : > { %v4806_v45 = vmul.f32 0.5, %v7055_v32  ;;  %v4782_v26 = vpop.f32.mrb[69].mxu0  ;;  %v4823_v54 = vsel %vm1451_vm6, %v9940_v43, -inf }
 0xb37   : > { %v4805_v61 = vmul.f32 0.5, %v4782_v26  ;;  %4824 = vmax.xlane.f32.xlu0 %v4823_v54  ;;  %4821 = vmax.xlane.f32.xlu1 %v4820_v37  ;;  %v4492_v26 = vrot.slane %v9839_v59, 4 }
 0xb38   : > { %v9952_v4 = vsel %vm1440_vm10, -1e+09, %v4806_v45 }
 0xb39   : > { %v7058_v53 = vpop.f32.mrb[70].mxu0  ;;  %v4832_v23 = vsel %vm1451_vm6, %v9952_v4, -inf  ;;  %v9960_v18 = vsel %vm1439_vm11, -1e+09, %v4805_v61 }
 0xb3a   : > { %v4808_v5 = vmul.f32 0.5, %v7058_v53  ;;  %v4792_v57 = vpop.f32.mrb[71].mxu0  ;;  %v4829_v30 = vsel %vm1451_vm6, %v9960_v18, -inf }
 0xb3b   : > { %v4807_v34 = vmul.f32 0.5, %v4792_v57  ;;  %4827 = vmax.xlane.f32.xlu0 %v4826_v50  ;;  %4833 = vmax.xlane.f32.xlu1 %v4832_v23 }
 0xb3c   : > { %v9964_v55 = vsel %vm1442_vm14, -1e+09, %v4808_v5 }
 0xb3d   : > { %v4838_v60 = vsel %vm1451_vm6, %v9964_v55, -inf  ;;  %v9972_v31 = vsel %vm1441_vm12, -1e+09, %v4807_v34 }
 0xb3e   : > { %v4835_v19 = vsel %vm1451_vm6, %v9972_v31, -inf }
 0xb3f   : > { %4830 = vmax.xlane.f32.xlu0 %v4829_v30  ;;  %4839 = vmax.xlane.f32.xlu1 %v4838_v60 }
 0xb43   : > { %4836 = vmax.xlane.f32.xlu0 %v4835_v19 }
 0xb50   : > { %7840 = vrot.lane.b32.xlu1 %v10281_v0, %s8215_s21 }
 0xb59   : > { %7835 = vrot.lane.b32.xlu0 %v10282_v36, %s8215_s21 }
 0xb62   : > { %v4304_v40 = vpop.xlane.xlu1 %4303 }
 0xb63   : > { %v4301_v42 = vpop.xlane.xlu0 %4300 }
 0xb64   : > { %8114 = vrcp.f32 %v4301_v42 }
 0xb65   : > { %8116 = vrcp.f32 %v4304_v40 }
 0xb67   : > { %v4307_v11 = vpop.xlane.xlu0 %4306 }
 0xb68   : > { %8118 = vrcp.f32 %v4307_v11 }
 0xb6b   : > { %v4310_v13 = vpop.xlane.xlu1 %4309 }
 0xb6c   : > { %8120 = vrcp.f32 %v4310_v13 }
 0xb6e   : > { %v8115_v46 = vpop.eup %8114 }
 0xb6f   : > { %v4316_v7 = vpop.xlane.xlu1 %4315  ;;  %v4324_v35 = vmul.f32 %v8115_v46, %v9861_v9  ;;  %v8117_v37 = vpop.eup %8116 }
 0xb70   : > { %v4313_v8 = vpop.xlane.xlu0 %4312  ;;  %v4326_v59 = vmul.f32 %v8117_v37, %v9858_v1 }
 0xb71   : > { %7005 = vmatprep.mubr.msk.f32.mxu1 %vm1451_vm6, %v4324_v35  ;;  %8122 = vrcp.f32 %v4313_v8 }
 0xb72   : > { %8124 = vrcp.f32 %v4316_v7  ;;  %v8119_v53 = vpop.eup %8118 }
 0xb73   : > { %v4322_v58 = vpop.xlane.xlu1 %4321  ;;  %v4328_v19 = vmul.f32 %v8119_v53, %v9868_v25 }
 0xb74   : > { %v7806_v47 = vpop.permute.xlu0 %7805 }
 0xb75   : > { %v7808_v62 = vunpack.i.h.bf16 %v7806_v47  ;;  %v7807_v49 = vunpack.i.l.bf16 %v7806_v47 }
 0xb76   : > { %v8121_v30 = vpop.eup %8120 }
 0xb77   : > { %v7427_v52 = vpack.c.bf16 %v7808_v62, %v7807_v49  ;;  %v4319_v39 = vpop.xlane.xlu1 %4318  ;;  %v4330_v1 = vmul.f32 %v8121_v30, %v9872_v15 }
 0xb78   : > { %v7816_v51 = vpop.permute.xlu0 %7815  ;;  %8126 = vrcp.f32 %v4319_v39 }
 0xb79   : > { %v7818_v20 = vunpack.i.h.bf16 %v7816_v51  ;;  %v7817_v29 = vunpack.i.l.bf16 %v7816_v51  ;;  %7428 = vmatprep.subr.bf16.mxu1 %v7427_v52  ;;  %8128 = vrcp.f32 %v4322_v58 }
 0xb7a   : > { %7430 = vmatpush3.bf16.msra.mxu1 %v7427_v52 }
 0xb7b   : > { %v7475_v6 = vpack.c.bf16 %v7818_v20, %v7817_v29  ;;  %v7811_v24 = vpop.permute.xlu1 %7810  ;;  %v8123_v42 = vpop.eup %8122 }
 0xb7c   : > { %v7813_v9 = vunpack.i.h.bf16 %v7811_v24  ;;  %v7812_v32 = vunpack.i.l.bf16 %v7811_v24  ;;  %v7826_v45 = vpop.permute.xlu0 %7825  ;;  %v8125_v11 = vpop.eup %8124  ;;  %v4332_v25 = vmul.f32 %v8123_v42, %v9878_v22 }
 0xb7d   : > { %7477 = vmatprep.subr.msk.bf16.mxu0 %vm8804_vm4, %v7475_v6  ;;  %v7828_v50 = vunpack.i.h.bf16 %v7826_v45  ;;  %v7827_v34 = vunpack.i.l.bf16 %v7826_v45  ;;  %v4334_v35 = vmul.f32 %v8125_v11, %v9876_v21 }
 0xb7e   : > { %v7431_v54 = vpack.c.bf16 %v7813_v9, %v7812_v32  ;;  %7480 = vmatpush3.bf16.xpose.msk.msra.mxu0 %vm8804_vm4, %v7475_v6 }
 0xb7f   : > { %v7821_v61 = vpop.permute.xlu1 %7820  ;;  %v7487_v40 = vpack.c.bf16 %v7828_v50, %v7827_v34 }
 0xb80   : > { %v7823_v23 = vunpack.i.h.bf16 %v7821_v61  ;;  %v7822_v5 = vunpack.i.l.bf16 %v7821_v61  ;;  %v5199_v57 = vpop.permute.xlu0 %5198  ;;  %7432 = vmatprep.subr.bf16.mxu1 %v7431_v54 }
 0xb81   : > { %7117 = vmatprep.mubr.msk.f32.mxu0 %vm1273_vm3, %v5199_v57  ;;  %7434 = vmatpush3.bf16.msra.mxu1 %v7431_v54 }
 0xb82   : > { %v7481_v60 = vpack.c.bf16 %v7823_v23, %v7822_v5  ;;  %7017 = vmatprep.subr.msk.mxu1 %vm2129_vm13, %v4492_v26  ;;  %v8127_v46 = vpop.eup %8126 }
 0xb83   : > { %v7831_v13 = vpop.permute.xlu1 %7830  ;;  %v8129_v58 = vpop.eup %8128  ;;  %v4336_v47 = vmul.f32 %v8127_v46, %v9888_v17 }
 0xb84   : > { %7006 = vmatmul.mubr.msk.f32.vlgmr.msra.gmra.mrb[56].mxu1 %vm1451_vm6, %v4326_v59  ;;  %7483 = vmatprep.subr.msk.bf16.mxu0 %vm8804_vm4, %v7481_v60  ;;  %v7833_v7 = vunpack.i.h.bf16 %v7831_v13  ;;  %v7832_v8 = vunpack.i.l.bf16 %v7831_v13  ;;  %v4338_v22 = vmul.f32 %v8129_v58, %v9882_v33  ;;  %v5203_v21 = vpop.permute.xlu0 %5202 }
 0xb85   : > { %7008 = vmatprep.mubr.msk.f32.mxu1 %vm1451_vm6, %v4328_v19  ;;  %7018 = vmatpush3.msk.msra.mxu1 %vm2129_vm13, %v4492_v26 }
 0xb86   : > { %7486 = vmatpush3.bf16.xpose.msk.msra.mxu0 %vm8804_vm4, %v7481_v60  ;;  %v7493_v15 = vpack.c.bf16 %v7833_v7, %v7832_v8 }
 0xb87   : > { %7489 = vmatprep.subr.msk.bf16.mxu0 %vm8804_vm4, %v7487_v40  ;;  %v5201_v62 = vpop.permute.xlu1 %5200 }
 0xb88   : > { %7009 = vmatmul.mubr.msk.f32.gmra.mrb[58].mxu1 %vm1451_vm6, %v4330_v1  ;;  %v5207_v49 = vpop.permute.xlu0 %5206 }
 0xb89   : > { %7011 = vmatprep.mubr.msk.f32.mxu1 %vm1451_vm6, %v4332_v25 }
 0xb8b   : > { %v5205_v17 = vpop.permute.xlu1 %5204 }
 0xb8c   : > { %7012 = vmatmul.mubr.msk.f32.gmra.mrb[60].mxu1 %vm1451_vm6, %v4334_v35  ;;  %v5211_v33 = vpop.permute.xlu0 %5210 }
 0xb8d   : > { %7014 = vmatprep.mubr.msk.f32.mxu1 %vm1451_vm6, %v4336_v47 }
 0xb8e   : > { %7492 = vmatpush3.bf16.xpose.msk.msra.mxu0 %vm8804_vm4, %v7487_v40 }
 0xb8f   : > { %7495 = vmatprep.subr.msk.bf16.mxu0 %vm8804_vm4, %v7493_v15  ;;  %v5209_v52 = vpop.permute.xlu1 %5208 }
 0xb90   : > { %7015 = vmatmul.mubr.msk.f32.gmra.mrb[62].mxu1 %vm1451_vm6, %v4338_v22 }
 0xb93   : > { %v5213_v39 = vpop.permute.xlu1 %5212 }
 0xb96   : > { %7498 = vmatpush3.bf16.xpose.msk.msra.mxu0 %vm8804_vm4, %v7493_v15 }
 0xb9d   : > { %7118 = vmatmul.mubr.msk.f32.vlgmr.msra.gmra.mrb[72].mxu0 %vm1273_vm3, %v5201_v62 }
 0xb9e   : > { %7120 = vmatprep.mubr.msk.f32.mxu0 %vm1273_vm3, %v5203_v21 }
 0xba1   : > { %7121 = vmatmul.mubr.msk.f32.gmra.mrb[74].mxu0 %vm1273_vm3, %v5205_v17 }
 0xba2   : > { %7123 = vmatprep.mubr.msk.f32.mxu0 %vm1273_vm3, %v5207_v49 }
 0xba5   : > { %7124 = vmatmul.mubr.msk.f32.gmra.mrb[76].mxu0 %vm1273_vm3, %v5209_v52 }
 0xba6   : > { %7126 = vmatprep.mubr.msk.f32.mxu0 %vm1273_vm3, %v5211_v33 }
 0xba9   : > { %7127 = vmatmul.mubr.msk.f32.gmra.mrb[78].mxu0 %vm1273_vm3, %v5213_v39 }
 0xbc0   : > { %v4819_v48 = vpop.xlane.xlu0 %4818 }
 0xbc1   : > { %v4841_v51 = vsub.f32 %v9930_v16, %v4819_v48 }
 0xbc3   : > { %v4849_v20 = vmul.f32 1.442695, %v4841_v51 }
 0xbc4   : > { %v4822_v29 = vpop.xlane.xlu1 %4821  ;;  %v4825_v6 = vpop.xlane.xlu0 %4824 }
 0xbc5   : > { %8130 = vpow2.f32 %v4849_v20  ;;  %v4842_v24 = vsub.f32 %v9936_v28, %v4822_v29  ;;  %v4843_v9 = vsub.f32 %v9940_v43, %v4825_v6 }
 0xbc7   : > { %v4851_v32 = vmul.f32 1.442695, %v4842_v24  ;;  %v4853_v45 = vmul.f32 1.442695, %v4843_v9 }
 0xbc8   : > { %v4834_v26 = vpop.xlane.xlu1 %4833  ;;  %v4828_v54 = vpop.xlane.xlu0 %4827 }
 0xbc9   : > { %8132 = vpow2.f32 %v4851_v32  ;;  %v4846_v37 = vsub.f32 %v9952_v4, %v4834_v26  ;;  %v4844_v61 = vsub.f32 %v9948_v12, %v4828_v54 }
 0xbca   : > { %8134 = vpow2.f32 %v4853_v45 }
 0xbcb   : > { %v4855_v53 = vmul.f32 1.442695, %v4844_v61  ;;  %v4859_v16 = vmul.f32 1.442695, %v4846_v37 }
 0xbcc   : > { %v4840_v23 = vpop.xlane.xlu1 %4839  ;;  %v4831_v5 = vpop.xlane.xlu0 %4830 }
 0xbcd   : > { %v4848_v57 = vsub.f32 %v9964_v55, %v4840_v23  ;;  %v4845_v28 = vsub.f32 %v9960_v18, %v4831_v5  ;;  %8136 = vpow2.f32 %v4855_v53 }
 0xbce   : > { %8138 = vpow2.f32 %v4859_v16 }
 0xbcf   : > { %v10030_v43 = vpop.eup %8130  ;;  %v4857_v50 = vmul.f32 1.442695, %v4845_v28  ;;  %v4863_v34 = vmul.f32 1.442695, %v4848_v57 }
 0xbd0   : > { %v4837_v59 = vpop.xlane.xlu0 %4836  ;;  %v4865_v4 = vsel %vm1451_vm6, %v10030_v43, 0.0  ;;  %v7841_v22 = vpop.permute.xlu1 %7840 }
 0xbd1   : > { %v4847_v12 = vsub.f32 %v9972_v31, %v4837_v59  ;;  %4866 = vadd.xlane.f32.xlu0 %v4865_v4  ;;  %8140 = vpow2.f32 %v4857_v50  ;;  %v7843_v62 = vunpack.i.h.bf16 %v7841_v22  ;;  %v7842_v21 = vunpack.i.l.bf16 %v7841_v22 }
 0xbd2   : > { %8142 = vpow2.f32 %v4863_v34 }
 0xbd3   : > { %v10035_v60 = vpop.eup %8132  ;;  %v4861_v18 = vmul.f32 1.442695, %v4847_v12  ;;  %v7463_v52 = vpack.c.bf16 %v7843_v62, %v7842_v21 }
 0xbd4   : > { %v10037_v30 = vpop.eup %8134  ;;  %v7836_v55 = vpop.permute.xlu0 %7835  ;;  %v4868_v19 = vsel %vm1451_vm6, %v10035_v60, 0.0 }
 0xbd5   : > { %v7838_v42 = vunpack.i.h.bf16 %v7836_v55  ;;  %v7837_v40 = vunpack.i.l.bf16 %v7836_v55  ;;  %4869 = vadd.xlane.f32.xlu1 %v4868_v19  ;;  %v4871_v13 = vsel %vm1451_vm6, %v10037_v30, 0.0  ;;  %8144 = vpow2.f32 %v4861_v18 }
 0xbd6   : > { %4872 = vadd.xlane.f32.xlu0 %v4871_v13 }
 0xbd7   : > { %v7459_v31 = vpack.c.bf16 %v7838_v42, %v7837_v40  ;;  %v10043_v1 = vpop.eup %8136 }
 0xbd8   : > { %v4874_v11 = vsel %vm1451_vm6, %v10043_v1, 0.0  ;;  %v10047_v25 = vpop.eup %8138 }
 0xbd9   : > { %7460 = vmatprep.subr.bf16.mxu1 %v7459_v31  ;;  %4875 = vadd.xlane.f32.xlu1 %v4874_v11  ;;  %v4880_v7 = vsel %vm1451_vm6, %v10047_v25, 0.0 }
 0xbdb   : > { %v10049_v46 = vpop.eup %8140 }
 0xbdc   : > { %v4877_v8 = vsel %vm1451_vm6, %v10049_v46, 0.0  ;;  %v10055_v35 = vpop.eup %8142 }
 0xbdd   : > { %4881 = vadd.xlane.f32.xlu1 %v4880_v7  ;;  %4878 = vadd.xlane.f32.xlu0 %v4877_v8  ;;  %v4886_v58 = vsel %vm1451_vm6, %v10055_v35, 0.0 }
 0xbdf   : > { %v10059_v47 = vpop.eup %8144 }
 0xbe0   : > { %v4883_v15 = vsel %vm1451_vm6, %v10059_v47, 0.0 }
 0xbe1   : > { %4887 = vadd.xlane.f32.xlu1 %v4886_v58 }
 0xbe5   : > { %4884 = vadd.xlane.f32.xlu1 %v4883_v15 }
 0xbf3   : > { %7845 = vrot.lane.b32.xlu0 %v8872_v14, %s8215_s21 }
 0xbf6   : > { %7850 = vrot.lane.b32.xlu1 %v8876_v3, %s8215_s21 }
 0xc57   : > { %v7007_v17 = vpop.f32.mrb[56].mxu1 }
 0xc58   : > { %v4453_v49 = vpop.f32.mrb[57].mxu1 }
 0xc59   : > { %7019 = vmatprep.mubr.msk.f32.mxu1 %vm1273_vm3, %v4453_v49 }
 0xc5a   : > { %7020 = vmatmul.mubr.msk.f32.vlgmr.msra.gmra.mrb[24].mxu1 %vm1273_vm3, %v7007_v17 }
 0xc5b   : > { %7462 = vmatpush3.bf16.msra.mxu1 %v7459_v31  ;;  %v7010_v33 = vpop.f32.mrb[58].mxu1 }
 0xc5c   : > { %7464 = vmatprep.subr.bf16.mxu1 %v7463_v52  ;;  %v4463_v39 = vpop.f32.mrb[59].mxu1 }
 0xc5d   : > { %7022 = vmatprep.mubr.msk.f32.mxu1 %vm1273_vm3, %v4463_v39 }
 0xc5e   : > { %v4867_v48 = vpop.xlane.xlu0 %4866  ;;  %7023 = vmatmul.mubr.msk.f32.gmra.mrb[26].mxu1 %vm1273_vm3, %v7010_v33 }
 0xc5f   : > { %8146 = vrcp.f32 %v4867_v48  ;;  %7466 = vmatpush3.bf16.msra.mxu1 %v7463_v52  ;;  %v7013_v51 = vpop.f32.mrb[60].mxu1 }
 0xc60   : > { %v4473_v20 = vpop.f32.mrb[61].mxu1 }
 0xc61   : > { %7025 = vmatprep.mubr.msk.f32.mxu1 %vm1273_vm3, %v4473_v20 }
 0xc62   : > { %v4870_v29 = vpop.xlane.xlu1 %4869  ;;  %7026 = vmatmul.mubr.msk.f32.gmra.mrb[28].mxu1 %vm1273_vm3, %v7013_v51 }
 0xc63   : > { %v7016_v6 = vpop.f32.mrb[62].mxu1  ;;  %v4873_v9 = vpop.xlane.xlu0 %4872  ;;  %8148 = vrcp.f32 %v4870_v29 }
 0xc64   : > { %v4483_v24 = vpop.f32.mrb[63].mxu1  ;;  %8150 = vrcp.f32 %v4873_v9 }
 0xc65   : > { %7028 = vmatprep.mubr.msk.f32.mxu1 %vm1273_vm3, %v4483_v24 }
 0xc66   : > { %7029 = vmatmul.mubr.msk.f32.gmra.mrb[30].mxu1 %vm1273_vm3, %v7016_v6  ;;  %v4876_v32 = vpop.xlane.xlu1 %4875 }
 0xc67   : > { %8152 = vrcp.f32 %v4876_v32 }
 0xc69   : > { %v8147_v45 = vpop.eup %8146 }
 0xc6a   : > { %v4890_v26 = vmul.f32 %v8147_v45, %v10030_v43  ;;  %v4882_v54 = vpop.xlane.xlu1 %4881  ;;  %v4879_v37 = vpop.xlane.xlu0 %4878 }
 0xc6b   : > { %8154 = vrcp.f32 %v4879_v37 }
 0xc6c   : > { %7075 = vmatprep.mubr.msk.f32.mxu1 %vm1451_vm6, %v4890_v26  ;;  %8156 = vrcp.f32 %v4882_v54 }
 0xc6d   : > { %v8149_v56 = vpop.eup %8148 }
 0xc6e   : > { %v4888_v61 = vpop.xlane.xlu1 %4887  ;;  %v7846_v53 = vpop.permute.xlu0 %7845  ;;  %v4892_v48 = vmul.f32 %v8149_v56, %v10035_v60 }
 0xc6f   : > { %v7848_v16 = vunpack.i.h.bf16 %v7846_v53  ;;  %v7847_v23 = vunpack.i.l.bf16 %v7846_v53  ;;  %v8151_v17 = vpop.eup %8150 }
 0xc70   : > { %v7119_v5 = vpop.f32.mrb[72].mxu0  ;;  %v4894_v6 = vmul.f32 %v8151_v17, %v10037_v30 }
 0xc71   : > { %v5368_v57 = vmul.f32 0.5, %v7119_v5  ;;  %v5328_v28 = vpop.f32.mrb[73].mxu0  ;;  %v7467_v50 = vpack.c.bf16 %v7848_v16, %v7847_v23  ;;  %v8153_v20 = vpop.eup %8152 }
 0xc72   : > { %v5367_v34 = vmul.f32 0.5, %v5328_v28  ;;  %v4885_v43 = vpop.xlane.xlu1 %4884  ;;  %v4896_v32 = vmul.f32 %v8153_v20, %v10043_v1 }
 0xc73   : > { %v10079_v59 = vsel %vm1436_vm5, -1e+09, %v5368_v57  ;;  %7468 = vmatprep.subr.bf16.mxu1 %v7467_v50  ;;  %8158 = vrcp.f32 %v4885_v43 }
 0xc74   : > { %v10083_v4 = vsel %vm1435_vm7, -1e+09, %v5367_v34  ;;  %v7122_v12 = vpop.f32.mrb[74].mxu0  ;;  %v5386_v18 = vsel %vm1451_vm6, %v10079_v59, -inf  ;;  %7470 = vmatpush3.bf16.msra.mxu1 %v7467_v50  ;;  %8160 = vrcp.f32 %v4888_v61 }
 0xc75   : > { %5387 = vmax.xlane.f32.xlu1 %v5386_v18  ;;  %v5338_v55 = vpop.f32.mrb[75].mxu0  ;;  %v5383_v19 = vsel %vm1451_vm6, %v10083_v4, -inf  ;;  %v5370_v2 = vmul.f32 0.5, %v7122_v12  ;;  %v8155_v24 = vpop.eup %8154 }
 0xc76   : > { %v5369_v42 = vmul.f32 0.5, %v5338_v55  ;;  %5384 = vmax.xlane.f32.xlu0 %v5383_v19  ;;  %v7851_v40 = vpop.permute.xlu1 %7850  ;;  %v8157_v10 = vpop.eup %8156  ;;  %v4898_v45 = vmul.f32 %v8155_v24, %v10049_v46  ;;  %v10132_v46 = vld [vmem:[%s10262_s11 + $0x18] sm:$0xff] }
 0xc77   : > { %v7853_v13 = vunpack.i.h.bf16 %v7851_v40  ;;  %v7852_v31 = vunpack.i.l.bf16 %v7851_v40  ;;  %v10097_v15 = vsel %vm1438_vm8, -1e+09, %v5370_v2  ;;  %v4900_v54 = vmul.f32 %v8157_v10, %v10047_v25 }
 0xc78   : > { %v10091_v27 = vsel %vm1437_vm9, -1e+09, %v5369_v42  ;;  %v7125_v11 = vpop.f32.mrb[76].mxu0  ;;  %v5392_v44 = vsel %vm1451_vm6, %v10097_v15, -inf }
 0xc79   : > { %v5372_v7 = vmul.f32 0.5, %v7125_v11  ;;  %v5348_v8 = vpop.f32.mrb[77].mxu0  ;;  %v5389_v58 = vsel %vm1451_vm6, %v10091_v27, -inf  ;;  %v7471_v22 = vpack.c.bf16 %v7853_v13, %v7852_v31 }
 0xc7a   : > { %v5371_v62 = vmul.f32 0.5, %v5348_v8  ;;  %5390 = vmax.xlane.f32.xlu0 %v5389_v58 }
 0xc7b   : > { %v5380_v21 = vsel %vm1440_vm10, -1e+09, %v5372_v7  ;;  %7472 = vmatprep.subr.bf16.mxu1 %v7471_v22 }
 0xc7c   : > { %v7128_v49 = vpop.f32.mrb[78].mxu0  ;;  %v5398_v52 = vsel %vm1451_vm6, %v5380_v21, -inf  ;;  %7474 = vmatpush3.bf16.msra.mxu1 %v7471_v22  ;;  %v5379_v51 = vsel %vm1439_vm11, -1e+09, %v5371_v62 }
 0xc7d   : > { %v5374_v33 = vmul.f32 0.5, %v7128_v49  ;;  %5399 = vmax.xlane.f32.xlu1 %v5398_v52  ;;  %v5358_v39 = vpop.f32.mrb[79].mxu0  ;;  %v5395_v60 = vsel %vm1451_vm6, %v5379_v51, -inf  ;;  %v8159_v30 = vpop.eup %8158  ;;  %7087 = vmatprep.subr.msk.mxu1 %vm2129_vm13, %v10132_v46 }
 0xc7e   : > { %v5373_v38 = vmul.f32 0.5, %v5358_v39  ;;  %5393 = vmax.xlane.f32.xlu0 %v5392_v44  ;;  %v8161_v37 = vpop.eup %8160  ;;  %v4902_v41 = vmul.f32 %v8159_v30, %v10059_v47 }
 0xc7f   : > { %v5382_v29 = vsel %vm1442_vm14, -1e+09, %v5374_v33  ;;  %7076 = vmatmul.mubr.msk.f32.vlgmr.msra.gmra.mrb[64].mxu1 %vm1451_vm6, %v4892_v48  ;;  %v4904_v1 = vmul.f32 %v8161_v37, %v10055_v35 }
 0xc80   : > { %v5404_v9 = vsel %vm1451_vm6, %v5382_v29, -inf  ;;  %7078 = vmatprep.mubr.msk.f32.mxu1 %vm1451_vm6, %v4894_v6  ;;  %v5381_v63 = vsel %vm1441_vm12, -1e+09, %v5373_v38  ;;  %7088 = vmatpush3.msk.msra.mxu1 %vm2129_vm13, %v10132_v46 }
 0xc81   : > { %5405 = vmax.xlane.f32.xlu1 %v5404_v9  ;;  %v5401_v26 = vsel %vm1451_vm6, %v5381_v63, -inf }
 0xc82   : > { %5396 = vmax.xlane.f32.xlu0 %v5395_v60 }
 0xc83   : > { %7079 = vmatmul.mubr.msk.f32.gmra.mrb[66].mxu1 %vm1451_vm6, %v4896_v32 }
 0xc84   : > { %7081 = vmatprep.mubr.msk.f32.mxu1 %vm1451_vm6, %v4898_v45 }
 0xc86   : > { %5402 = vmax.xlane.f32.xlu0 %v5401_v26 }
 0xc87   : > { %7082 = vmatmul.mubr.msk.f32.gmra.mrb[68].mxu1 %vm1451_vm6, %v4900_v54 }
 0xc88   : > { %7084 = vmatprep.mubr.msk.f32.mxu1 %vm1451_vm6, %v4902_v41 }
 0xc8b   : > { %7085 = vmatmul.mubr.msk.f32.gmra.mrb[70].mxu1 %vm1451_vm6, %v4904_v1 }
 0xc92   : > { %7860 = vrot.lane.b32.xlu1 %v10281_v0, %s8216_s24 }
 0xc9c   : > { %7855 = vrot.lane.b32.xlu0 %v10282_v36, %s8216_s24 }
 0xd02   : > { %v5388_v25 = vpop.xlane.xlu1 %5387 }
 0xd03   : > { %v5408_v35 = vsub.f32 %v10079_v59, %v5388_v25  ;;  %v5385_v47 = vpop.xlane.xlu0 %5384 }
 0xd04   : > { %v5407_v0 = vsub.f32 %v10083_v4, %v5385_v47 }
 0xd05   : > { %v5417_v61 = vmul.f32 1.442695, %v5408_v35 }
 0xd06   : > { %v5415_v53 = vmul.f32 1.442695, %v5407_v0 }
 0xd07   : > { %8162 = vpow2.f32 %v5417_v61  ;;  %v5391_v16 = vpop.xlane.xlu0 %5390 }
 0xd08   : > { %8164 = vpow2.f32 %v5415_v53  ;;  %v5409_v23 = vsub.f32 %v10091_v27, %v5391_v16 }
 0xd0a   : > { %v5419_v5 = vmul.f32 1.442695, %v5409_v23  ;;  %v5400_v57 = vpop.xlane.xlu1 %5399 }
 0xd0b   : > { %v5412_v28 = vsub.f32 %v5380_v21, %v5400_v57  ;;  %v5394_v36 = vpop.xlane.xlu0 %5393 }
 0xd0c   : > { %8166 = vpow2.f32 %v5419_v5  ;;  %v5410_v50 = vsub.f32 %v10097_v15, %v5394_v36 }
 0xd0d   : > { %v5425_v34 = vmul.f32 1.442695, %v5412_v28 }
 0xd0e   : > { %v5421_v43 = vmul.f32 1.442695, %v5410_v50  ;;  %v5406_v59 = vpop.xlane.xlu1 %5405 }
 0xd0f   : > { %v5414_v12 = vsub.f32 %v5382_v29, %v5406_v59  ;;  %v5397_v18 = vpop.xlane.xlu0 %5396 }
 0xd10   : > { %8168 = vpow2.f32 %v5421_v43  ;;  %v5411_v4 = vsub.f32 %v5379_v51, %v5397_v18 }
 0xd11   : > { %v10144_v55 = vpop.eup %8162  ;;  %8170 = vpow2.f32 %v5425_v34  ;;  %v5429_v2 = vmul.f32 1.442695, %v5414_v12  ;;  %v5624_v34 = vrot.slane %v10132_v46, 4 }
 0xd12   : > { %v10146_v19 = vpop.eup %8164  ;;  %v5423_v42 = vmul.f32 1.442695, %v5411_v4  ;;  %v5434_v40 = vsel %vm1451_vm6, %v10144_v55, 0.0  ;;  %v7861_v11 = vpop.permute.xlu1 %7860 }
 0xd13   : > { %5435 = vadd.xlane.f32.xlu1 %v5434_v40  ;;  %v5403_v27 = vpop.xlane.xlu0 %5402  ;;  %v5431_v13 = vsel %vm1451_vm6, %v10146_v19, 0.0  ;;  %v7863_v22 = vunpack.i.h.bf16 %v7861_v11  ;;  %v7862_v62 = vunpack.i.l.bf16 %v7861_v11 }
 0xd14   : > { %8172 = vpow2.f32 %v5423_v42  ;;  %v5413_v31 = vsub.f32 %v5381_v63, %v5403_v27  ;;  %5432 = vadd.xlane.f32.xlu0 %v5431_v13 }
 0xd15   : > { %8174 = vpow2.f32 %v5429_v2  ;;  %v7503_v39 = vpack.c.bf16 %v7863_v22, %v7862_v62 }
 0xd16   : > { %v10152_v7 = vpop.eup %8166  ;;  %v5427_v8 = vmul.f32 1.442695, %v5413_v31 }
 0xd17   : > { %v7856_v58 = vpop.permute.xlu0 %7855  ;;  %v5437_v15 = vsel %vm1451_vm6, %v10152_v7, 0.0 }
 0xd18   : > { %v7858_v56 = vunpack.i.h.bf16 %v7856_v58  ;;  %v7857_v21 = vunpack.i.l.bf16 %v7856_v58  ;;  %5438 = vadd.xlane.f32.xlu0 %v5437_v15  ;;  %8176 = vpow2.f32 %v5427_v8 }
 0xd1a   : > { %v10156_v17 = vpop.eup %8168  ;;  %v7499_v49 = vpack.c.bf16 %v7858_v56, %v7857_v21  ;;  %v6180_v56 = vld [vmem:[%s10263_s12] ss:$0 sm:$0xff]  ;;  %v8194_v21 = vld [vmem:[%s8315_s16 + $0x8] sm:$0xff] }
 0xd1b   : > { %v5440_v52 = vsel %vm1451_vm6, %v10156_v17, 0.0  ;;  %v10160_v33 = vpop.eup %8170 }
 0xd1c   : > { %5441 = vadd.xlane.f32.xlu1 %v5440_v52  ;;  %7500 = vmatprep.subr.bf16.mxu0 %v7499_v49  ;;  %v5446_v48 = vsel %vm1451_vm6, %v10160_v33, 0.0  ;;  %v8195_v52 = vld [vmem:[%s8315_s16] sm:$0xff] }
 0xd1d   : > { %7515 = vmatprep.subr.bf16.mxu1 %v7499_v49  ;;  %7502 = vmatpush3.bf16.msra.mxu0 %v7499_v49 }
 0xd1e   : > { %v10162_v44 = vpop.eup %8172  ;;  %7504 = vmatprep.subr.bf16.mxu0 %v7503_v39 }
 0xd1f   : > { %v5443_v51 = vsel %vm1451_vm6, %v10162_v44, 0.0  ;;  %v10168_v38 = vpop.eup %8174 }
 0xd20   : > { %5447 = vadd.xlane.f32.xlu1 %v5446_v48  ;;  %5444 = vadd.xlane.f32.xlu0 %v5443_v51  ;;  %v5452_v20 = vsel %vm1451_vm6, %v10168_v38, 0.0  ;;  %v8196_v51 = vld [vmem:[%s8315_s16 + $0x18] sm:$0xff] }
 0xd21   : > { %7506 = vmatpush3.bf16.msra.mxu0 %v7503_v39 }
 0xd22   : > { %v10172_v29 = vpop.eup %8176 }
 0xd23   : > { %v5449_v6 = vsel %vm1451_vm6, %v10172_v29, 0.0 }
 0xd24   : > { %5453 = vadd.xlane.f32.xlu1 %v5452_v20 }
 0xd28   : > { %5450 = vadd.xlane.f32.xlu1 %v5449_v6 }
 0xd36   : > { %7865 = vrot.lane.b32.xlu0 %v8872_v14, %s8216_s24 }
 0xd39   : > { %7870 = vrot.lane.b32.xlu1 %v8876_v3, %s8216_s24 }
 0xd52   : > { %v7077_v24 = vpop.f32.mrb[64].mxu1 }
 0xd53   : > { %v5019_v9 = vpop.f32.mrb[65].mxu1 }
 0xd54   : > { %7089 = vmatprep.mubr.msk.f32.mxu1 %vm1273_vm3, %v5019_v9 }
 0xd55   : > { %7090 = vmatmul.mubr.msk.f32.vlgmr.msra.gmra.mrb[24].mxu1 %vm1273_vm3, %v7077_v24 }
 0xd56   : > { %7519 = vmatpush3.bf16.msra.mxu1 %v7499_v49  ;;  %v7080_v60 = vpop.f32.mrb[66].mxu1 }
 0xd57   : > { %7516 = vmatprep.subr.bf16.mxu1 %v7503_v39  ;;  %v5029_v63 = vpop.f32.mrb[67].mxu1 }
 0xd58   : > { %7092 = vmatprep.mubr.msk.f32.mxu1 %vm1273_vm3, %v5029_v63  ;;  %v8198_v63 = vld [vmem:[%s8315_s16 + $0x28] sm:$0xff] }
 0xd59   : > { %7093 = vmatmul.mubr.msk.f32.gmra.mrb[26].mxu1 %vm1273_vm3, %v7080_v60 }
 0xd5a   : > { %7520 = vmatpush3.bf16.msra.mxu1 %v7503_v39  ;;  %v7083_v32 = vpop.f32.mrb[68].mxu1 }
 0xd5b   : > { %v5039_v14 = vpop.f32.mrb[69].mxu1 }
 0xd5c   : > { %7095 = vmatprep.mubr.msk.f32.mxu1 %vm1273_vm3, %v5039_v14 }
 0xd5d   : > { %7096 = vmatmul.mubr.msk.f32.gmra.mrb[28].mxu1 %vm1273_vm3, %v7083_v32 }
 0xd5e   : > { %v7086_v3 = vpop.f32.mrb[70].mxu1 }
 0xd5f   : > { %v5049_v10 = vpop.f32.mrb[71].mxu1 }
 0xd60   : > { %7098 = vmatprep.mubr.msk.f32.mxu1 %vm1273_vm3, %v5049_v10 }
 0xd61   : > { %7099 = vmatmul.mubr.msk.f32.gmra.mrb[30].mxu1 %vm1273_vm3, %v7086_v3  ;;  %v8199_v3 = vld [vmem:[%s8315_s16 + $0x20] sm:$0xff] }
 0xda0   : > { %v5436_v30 = vpop.xlane.xlu1 %5435 }
 0xda1   : > { %v5433_v45 = vpop.xlane.xlu0 %5432 }
 0xda2   : > { %8178 = vrcp.f32 %v5433_v45 }
 0xda5   : > { %v5439_v26 = vpop.xlane.xlu0 %5438 }
 0xda9   : > { %v5442_v54 = vpop.xlane.xlu1 %5441 }
 0xdac   : > { %v8179_v37 = vpop.eup %8178 }
 0xdad   : > { %v5448_v41 = vpop.xlane.xlu1 %5447  ;;  %v5445_v1 = vpop.xlane.xlu0 %5444  ;;  %v5456_v25 = vmul.f32 %v8179_v37, %v10146_v19 }
 0xdae   : > { %8180 = vrcp.f32 %v5445_v1  ;;  %v8201_v1 = vld [vmem:[%s8315_s16 + $0x30] sm:$0xff] }
 0xdaf   : > { %7145 = vmatprep.mubr.msk.f32.mxu0 %vm1451_vm6, %v5456_v25  ;;  %8182 = vrcp.f32 %v5436_v30 }
 0xdb0   : > { %8184 = vrcp.f32 %v5448_v41 }
 0xdb1   : > { %v5454_v35 = vpop.xlane.xlu1 %5453  ;;  %v7866_v47 = vpop.permute.xlu0 %7865  ;;  %8186 = vrcp.f32 %v5439_v26 }
 0xdb2   : > { %v7868_v0 = vunpack.i.h.bf16 %v7866_v47  ;;  %v7867_v61 = vunpack.i.l.bf16 %v7866_v47  ;;  %8188 = vrcp.f32 %v5442_v54  ;;  %v8200_v54 = vld [vmem:[%s8315_s16 + $0x38] sm:$0xff] }
 0xdb4   : > { %v7507_v53 = vpack.c.bf16 %v7868_v0, %v7867_v61 }
 0xdb5   : > { %v5451_v16 = vpop.xlane.xlu1 %5450 }
 0xdb6   : > { %8190 = vrcp.f32 %v5451_v16  ;;  %7508 = vmatprep.subr.bf16.mxu0 %v7507_v53  ;;  %7517 = vmatprep.subr.bf16.mxu1 %v7507_v53 }
 0xdb7   : > { %8192 = vrcp.f32 %v5454_v35  ;;  %7510 = vmatpush3.bf16.msra.mxu0 %v7507_v53  ;;  %7521 = vmatpush3.bf16.msra.mxu1 %v7507_v53 }
 0xdb8   : > { %v8181_v23 = vpop.eup %8180 }
 0xdb9   : > { %v7871_v5 = vpop.permute.xlu1 %7870  ;;  %v5464_v36 = vmul.f32 %v8181_v23, %v10162_v44  ;;  %v8183_v50 = vpop.eup %8182 }
 0xdba   : > { %v7873_v57 = vunpack.i.h.bf16 %v7871_v5  ;;  %v7872_v28 = vunpack.i.l.bf16 %v7871_v5  ;;  %v8185_v59 = vpop.eup %8184  ;;  %v5458_v19 = vmul.f32 %v8183_v50, %v10144_v55 }
 0xdbb   : > { %7151 = vmatprep.mubr.msk.f32.mxu1 %vm1451_vm6, %v5464_v36  ;;  %v8187_v12 = vpop.eup %8186  ;;  %v5466_v2 = vmul.f32 %v8185_v59, %v10160_v33 }
 0xdbc   : > { %v7511_v43 = vpack.c.bf16 %v7873_v57, %v7872_v28  ;;  %v8189_v18 = vpop.eup %8188  ;;  %v5460_v46 = vmul.f32 %v8187_v12, %v10152_v7 }
 0xdbd   : > { %v5462_v27 = vmul.f32 %v8189_v18, %v10156_v17 }
 0xdbe   : > { %7512 = vmatprep.subr.bf16.mxu0 %v7511_v43  ;;  %7518 = vmatprep.subr.bf16.mxu1 %v7511_v43 }
 0xdbf   : > { %7514 = vmatpush3.bf16.msra.mxu0 %v7511_v43  ;;  %7522 = vmatpush3.bf16.msra.mxu1 %v7511_v43 }
 0xdc0   : > { %v8191_v4 = vpop.eup %8190  ;;  %7157 = vmatprep.subr.msk.mxu1 %vm2129_vm13, %v5624_v34 }
 0xdc1   : > { %v8193_v42 = vpop.eup %8192  ;;  %v5468_v40 = vmul.f32 %v8191_v4, %v10172_v29  ;;  %v8197_v29 = vld [vmem:[%s8315_s16 + $0x10] sm:$0xff] }
 0xdc2   : > { %7146 = vmatmul.mubr.msk.f32.vlgmr.msra.gmra.mrb[80].mxu0 %vm1451_vm6, %v5458_v19  ;;  %7152 = vmatmul.mubr.msk.f32.vlgmr.msra.gmra.mrb[72].mxu1 %vm1451_vm6, %v5466_v2  ;;  %v5470_v55 = vmul.f32 %v8193_v42, %v10168_v38 }
 0xdc3   : > { %7148 = vmatprep.mubr.msk.f32.mxu0 %vm1451_vm6, %v5460_v46  ;;  %7154 = vmatprep.mubr.msk.f32.mxu1 %vm1451_vm6, %v5468_v40 }
 0xdc4   : > { %7158 = vmatpush3.msk.msra.mxu1 %vm2129_vm13, %v5624_v34 }
 0xdc6   : > { %7149 = vmatmul.mubr.msk.f32.gmra.mrb[82].mxu0 %vm1451_vm6, %v5462_v27  ;;  %7155 = vmatmul.mubr.msk.f32.gmra.mrb[74].mxu1 %vm1451_vm6, %v5470_v55 }
 0xe95   : > { %v7147_v13 = vpop.f32.mrb[80].mxu0  ;;  %v7153_v31 = vpop.f32.mrb[72].mxu1 }
 0xe96   : > { %v5585_v11 = vpop.f32.mrb[81].mxu0  ;;  %v5605_v7 = vpop.f32.mrb[73].mxu1 }
 0xe97   : > { %7159 = vmatprep.mubr.msk.f32.mxu1 %vm1273_vm3, %v5585_v11 }
 0xe98   : > { %7160 = vmatmul.mubr.msk.f32.vlgmr.msra.gmra.mrb[24].mxu1 %vm1273_vm3, %v7147_v13 }
 0xe99   : > { %v7150_v8 = vpop.f32.mrb[82].mxu0  ;;  %v7156_v58 = vpop.f32.mrb[74].mxu1 }
 0xe9a   : > { %v5595_v15 = vpop.f32.mrb[83].mxu0  ;;  %v5615_v22 = vpop.f32.mrb[75].mxu1 }
 0xe9b   : > { %7162 = vmatprep.mubr.msk.f32.mxu1 %vm1273_vm3, %v5595_v15 }
 0xe9c   : > { %7163 = vmatmul.mubr.msk.f32.gmra.mrb[26].mxu1 %vm1273_vm3, %v7150_v8 }
 0xe9d   : > { %7165 = vmatprep.mubr.msk.f32.mxu1 %vm1273_vm3, %v5605_v7 }
 0xea0   : > { %7166 = vmatmul.mubr.msk.f32.gmra.mrb[28].mxu1 %vm1273_vm3, %v7153_v31 }
 0xea1   : > { %7168 = vmatprep.mubr.msk.f32.mxu1 %vm1273_vm3, %v5615_v22 }
 0xea4   : > { %7169 = vmatmul.mubr.msk.f32.gmra.mrb[30].mxu1 %vm1273_vm3, %v7156_v58 }
 0xf6b   : > { %v7161_v62 = vpop.f32.mrb[24].mxu1 }
 0xf6c   : > { %v5765_v17 = vadd.f32 %v8194_v21, %v7161_v62  ;;  %v5717_v49 = vpop.f32.mrb[25].mxu1 }
 0xf6d   : > { %v5764_v33 = vadd.f32 %v8195_v52, %v5717_v49 }
 0xf6e   : > { %v5780_v39 = vadd.f32 %v6180_v56, %v5765_v17 }
 0xf6f   : > { %v5779_v44 = vadd.f32 %v6180_v56, %v5764_v33  ;;  %v7164_v48 = vpop.f32.mrb[26].mxu1 }
 0xf70   : > { %5788 = vst.msk [vmem:[%s10223_s17 + $0x8] sm:$0xff] %vm507_vm0, %v5780_v39  ;;  %v5767_v38 = vadd.f32 %v8196_v51, %v7164_v48  ;;  %v5727_v20 = vpop.f32.mrb[27].mxu1 }
 0xf71   : > { %5787 = vst.msk [vmem:[%s10223_s17] sm:$0xff] %vm507_vm0, %v5779_v44  ;;  %v5766_v6 = vadd.f32 %v8197_v29, %v5727_v20 }
 0xf72   : > { %v5782_v24 = vadd.f32 %v6180_v56, %v5767_v38 }
 0xf73   : > { %v5781_v9 = vadd.f32 %v6180_v56, %v5766_v6  ;;  %v7167_v60 = vpop.f32.mrb[28].mxu1 }
 0xf74   : > { %5790 = vst.msk [vmem:[%s10223_s17 + $0x18] sm:$0xff] %vm507_vm0, %v5782_v24  ;;  %v5769_v32 = vadd.f32 %v8198_v63, %v7167_v60  ;;  %v5737_v14 = vpop.f32.mrb[29].mxu1 }
 0xf75   : > { %5789 = vst.msk [vmem:[%s10223_s17 + $0x10] sm:$0xff] %vm507_vm0, %v5781_v9  ;;  %v5768_v10 = vadd.f32 %v8199_v3, %v5737_v14 }
 0xf76   : > { %v5784_v45 = vadd.f32 %v6180_v56, %v5769_v32 }
 0xf77   : > { %v5783_v30 = vadd.f32 %v6180_v56, %v5768_v10  ;;  %v7170_v26 = vpop.f32.mrb[30].mxu1 }
 0xf78   : > { %5792 = vst.msk [vmem:[%s10223_s17 + $0x28] sm:$0xff] %vm507_vm0, %v5784_v45  ;;  %v5771_v37 = vadd.f32 %v8200_v54, %v7170_v26  ;;  %v5747_v41 = vpop.f32.mrb[31].mxu1 }
 0xf79   : > { %5791 = vst.msk [vmem:[%s10223_s17 + $0x20] sm:$0xff] %vm507_vm0, %v5783_v30  ;;  %v5770_v25 = vadd.f32 %v8201_v1, %v5747_v41 }
 0xf7a   : > { %v5786_v35 = vadd.f32 %v6180_v56, %v5771_v37 }
 0xf7b   : > { %v5785_v47 = vadd.f32 %v6180_v56, %v5770_v25 }
 0xf7c   : > { %5794 = vst.msk [vmem:[%s10223_s17 + $0x38] sm:$0xff] %vm507_vm0, %v5786_v35 }
 0xf7d   : > { %5793 = vst.msk [vmem:[%s10223_s17 + $0x30] sm:$0xff] %vm507_vm0, %v5785_v47 }
 0xf7e PF: > { %s23_s25 = sadd.s32 1, %s8208_s25  }
 0xf7f   : > { %p20_p4 = scmp.ge.s32.totalorder %s23_s25, 4  }
 0xf81   :  { %22 = sbr.rel (!%p20_p4) target bundleno = 1 (0x1), region = 108 }

// kernel: transformer_forward.34
= control target key start
LH: loop header
LB: loop body
LE: loop exit
PB: predicated region body
PF: predicated region fallthrough
CT: control target
= control target key end

     0   :  { %s3263_s25 = smov 0   ;;  %s3584_s0 = inlined_call_operand.vmem [shape: f32[2,8,32], index: 0, kind: input, shape index: {}, may-alias: {0,1}]   ;;  %s3585_s1 = inlined_call_operand.vmem [shape: f32[2,8,32], index: 1, kind: input, shape index: {}, may-alias: {0,1}]   ;;  %s3586_s2 = inlined_call_operand.vmem [shape: f32[2,8,8], index: 2, kind: input, shape index: {}]   ;;  %s3587_s3 = inlined_call_operand.vmem [shape: f32[1,32], index: 3, kind: input, shape index: {}]   ;;  %s3588_s4 = inlined_call_operand.vmem [shape: f32[1,32], index: 4, kind: input, shape index: {}]   ;;  %s3589_s5 = inlined_call_operand.vmem [shape: f32[32,32], index: 5, kind: input, shape index: {}]   ;;  %s3590_s6 = inlined_call_operand.vmem [shape: f32[1,32], index: 6, kind: input, shape index: {}]   ;;  %s3591_s7 = inlined_call_operand.vmem [shape: f32[32,32], index: 7, kind: input, shape index: {}]   ;;  %s3592_s8 = inlined_call_operand.vmem [shape: f32[1,32], index: 8, kind: input, shape index: {}]   ;;  %s3593_s9 = inlined_call_operand.vmem [shape: f32[32,32], index: 9, kind: input, shape index: {}]   ;;  %s3594_s10 = inlined_call_operand.vmem [shape: f32[1,32], index: 10, kind: input, shape index: {}]   ;;  %s3595_s11 = inlined_call_operand.vmem [shape: f32[32,32], index: 11, kind: input, shape index: {}]   ;;  %s3596_s12 = inlined_call_operand.vmem [shape: f32[1,32], index: 12, kind: input, shape index: {}]   ;;  %s3597_s13 = inlined_call_operand.vmem [shape: f32[2,8,32], index: 13, kind: output, shape index: {}]  }
   0x1 LB: > { %s2823_s26 = sadd.s32 4294967295, %s3181_s25   ;;  %p2827_p0 = scmp.ge.s32.totalorder %s3181_s25, 1  ;;  %s3181_s25 = sphi %s3263_s25, %s23_s25  }
   0x2   : > { %p404_p1 = scmp.lt.s32.totalorder %s3181_s25, 3 }
   0x4   : > { %p405_p2 = pnand %p2827_p0, %p404_p1 }
   0x5   : > { %p454_p3 = scmp.lt.s32.totalorder (!%p405_p2), %s2823_s26, 1  ;;  %vm475_vm0 = vcmask (!%p405_p2), 261120   ;;  %v617_v14 = vld [vmem:[%s3591_s7] sm:$0xff] (!%p405_p2)  ;;  %v618_v15 = vld [vmem:[%s3591_s7 + $0x8] sm:$0xff] (!%p405_p2)  ;;  %v3183_v17 = vmov (!%p405_p2), 0.0|0.0   ;;  %v619_v20 = vld [vmem:[%s3591_s7 + $0x10] sm:$0xff] (!%p405_p2) }
   0x6   : > { %408 = sbr.rel (%p405_p2) target bundleno = 5046 (0x13b6), region = 72  ;;  %v533_v16 = vld [vmem:[%s3589_s5] sm:$0xff] (!%p405_p2)  ;;  %3105 = vmatprep.subr.bf16.mxu1 (!%p405_p2), %v3183_v17  ;;  %v3106_v18 = vpack.c.bf16 (!%p405_p2), %v618_v15, %v617_v14  ;;  %3099 = vmatprep.subr.bf16.mxu0 (!%p405_p2), %v3183_v17  ;;  %v534_v19 = vld [vmem:[%s3589_s5 + $0x8] sm:$0xff] (!%p405_p2)  ;;  %v620_v21 = vld [vmem:[%s3591_s7 + $0x18] sm:$0xff] (!%p405_p2)  ;;  %vm3184_vm1 = vmmov (!%p405_p2), 0   ;;  %v3185_v23 = vmov (!%p405_p2), 0.0  }
   0x7   : > { %v3100_v22 = vpack.c.bf16 (!%p405_p2), %v534_v19, %v533_v16  ;;  %2965 = vmatprep.mubr.msk.f32.mxu1 (!%p405_p2), %vm3184_vm1, %v3185_v23  ;;  %v535_v24 = vld [vmem:[%s3589_s5 + $0x10] sm:$0xff] (!%p405_p2)  ;;  %v536_v25 = vld [vmem:[%s3589_s5 + $0x18] sm:$0xff] (!%p405_p2)  ;;  %2954 = vmatprep.mubr.msk.f32.mxu0 (!%p405_p2), %vm3184_vm1, %v3185_v23  ;;  %v3109_v26 = vpack.c.bf16 (!%p405_p2), %v620_v21, %v619_v20  ;;  %v2832_v44 = vld [vmem:[%s3587_s3] ss:$0 sm:$0xff] (!%p405_p2)  ;;  %vm786_vm6 = vcmask (!%p405_p2), 31744   ;;  %s3186_s19 = smov (!%p405_p2), 124  }
   0x8   : > { %3107 = vmatpush3.bf16.msra.mxu1 (!%p405_p2), %v3106_v18  ;;  %v3103_v27 = vpack.c.bf16 (!%p405_p2), %v536_v25, %v535_v24  ;;  %v2833_v47 = vld [vmem:[%s3588_s4] ss:$0 sm:$0xff] (!%p405_p2)  ;;  %v702_v52 = vld [vmem:[%s3593_s9 + $0x8] sm:$0xff] (!%p405_p2)  ;;  %v703_v57 = vld [vmem:[%s3593_s9 + $0x10] sm:$0xff] (!%p405_p2)  ;;  %vm866_vm8 = vcmask (!%p405_p2), 64512   ;;  %vm1124_vm9 = vcmask (!%p405_p2), 1043456  }
   0x9   : > { %3101 = vmatpush3.bf16.msra.mxu0 (!%p405_p2), %v3100_v22  ;;  %3108 = vmatprep.subr.bf16.mxu1 (!%p405_p2), %v3183_v17  ;;  %v701_v51 = vld [vmem:[%s3593_s9] sm:$0xff] (!%p405_p2)  ;;  %v704_v58 = vld [vmem:[%s3593_s9 + $0x18] sm:$0xff] (!%p405_p2)  ;;  %s3190_s17 = smov (!%p405_p2), 108   ;;  %s3191_s20 = smov (!%p405_p2), 104  }
   0xa   : > { %3102 = vmatprep.subr.bf16.mxu0 (!%p405_p2), %v3183_v17  ;;  %v3112_v55 = vpack.c.bf16 (!%p405_p2), %v702_v52, %v701_v51  ;;  %v3115_v59 = vpack.c.bf16 (!%p405_p2), %v704_v58, %v703_v57  ;;  %v2836_v60 = vld [vmem:[%s3592_s8] ss:$0 sm:$0xff] (!%p405_p2)  ;;  %s3192_s21 = smov (!%p405_p2), 100  }
   0xc   : > { %3110 = vmatpush3.bf16.msra.mxu1 (!%p405_p2), %v3109_v26 }
   0xd   : > { %s3599_s26 = smov (!%p454_p3, %s2823_s26), 1  ;;  %3104 = vmatpush3.bf16.msra.mxu0 %v3103_v27  ;;  %2979 = vmatprep.subr.mxu1 %v3185_v23 }
   0xe   : > { %s3271_s27 = sshll.u32 %s3599_s26, 3  ;;  %3111 = vmatprep.subr.bf16.mxu0 %v3183_v17  ;;  %s3187_s26 = smov 120  }
   0xf   : > { %s461_s30 = scalar_lea.vmem %s3585_s1, %s3271_s27  ;;  %s457_s16 = scalar_lea.vmem %s3584_s0, %s3271_s27 }
  0x10   : > { %v471_v0 = vld [vmem:[%s461_s30] sm:$0xff]  ;;  %s465_s24 = scalar_lea.vmem %s3586_s2, %s3271_s27  ;;  %s3188_s30 = smov 116  }
  0x11   : > { %v511_v1 = vsel %vm475_vm0, %v471_v0, 0.0  ;;  %v3282_v2 = vld [vmem:[%s457_s16] sm:$0xff]  ;;  %s3189_s16 = smov 112  }
  0x12   : > { %512 = vadd.xlane.f32.xlu0 %v511_v1  ;;  %v476_v3 = vsel %vm475_vm0, %v3282_v2, 0.0 }
  0x16   : > { %477 = vadd.xlane.f32.xlu0 %v476_v3 }
  0x9f   : > { %v513_v4 = vpop.xlane.xlu0 %512 }
  0xa0   : > { %v514_v5 = vmul.f32 0.03125, %v513_v4 }
  0xa2   : > { %v515_v6 = vsub.f32 %v471_v0, %v514_v5  ;;  %v2834_v0 = vld [vmem:[%s3590_s6] ss:$0 sm:$0xff] }
  0xa3   : > { %v478_v7 = vpop.xlane.xlu0 %477  ;;  %v2838_v5 = vld [vmem:[%s3594_s10] ss:$0 sm:$0xff] }
  0xa4   : > { %v480_v8 = vmul.f32 0.03125, %v478_v7  ;;  %v516_v9 = vmul.f32 %v515_v6, %v515_v6  ;;  %v521_v45 = vmul.f32 %v2832_v44, %v515_v6 }
  0xa6   : > { %v481_v10 = vsub.f32 %v3282_v2, %v480_v8  ;;  %v517_v11 = vsel %vm475_vm0, %v516_v9, 0.0 }
  0xa7   : > { %518 = vadd.xlane.f32.xlu1 %v517_v11  ;;  %v3389_v11 = vld [vmem:[%s465_s24] sm:$0xff] }
  0xa8   : > { %v482_v12 = vmul.f32 %v481_v10, %v481_v10  ;;  %v493_v49 = vmul.f32 %v2832_v44, %v481_v10  ;;  %vm864_vm7 = vcmp.eq.f32.partialorder %v3389_v11, 0.0 }
  0xaa   : > { %v483_v13 = vsel %vm475_vm0, %v482_v12, 0.0 }
  0xab   : > { %484 = vadd.xlane.f32.xlu1 %v483_v13 }
 0x134   : > { %v519_v28 = vpop.xlane.xlu1 %518 }
 0x135   : > { %v520_v29 = vmul.f32 0.032258064, %v519_v28 }
 0x137   : > { %3135 = vrsqrt.f32 %v520_v29  ;;  %vm524_vm2 = vcmp.eq.f32.partialorder %v520_v29, inf  ;;  %v527_v34 = vand.u32 2147483648, %v520_v29  ;;  %vm526_vm3 = vcmp.eq.f32.partialorder %v520_v29, 0.0 }
 0x138   : > { %v485_v30 = vpop.xlane.xlu1 %484 }
 0x139   : > { %v486_v31 = vmul.f32 0.032258064, %v485_v30 }
 0x13b   : > { %3137 = vrsqrt.f32 %v486_v31  ;;  %vm496_vm4 = vcmp.eq.f32.partialorder %v486_v31, inf  ;;  %v499_v40 = vand.u32 2147483648, %v486_v31  ;;  %vm498_vm5 = vcmp.eq.f32.partialorder %v486_v31, 0.0 }
 0x141   : > { %v3136_v32 = vpop.eup %3135 }
 0x142   : > { %v523_v33 = vmul.f32 %v3136_v32, %v520_v29 }
 0x144   : > { %v525_v35 = vsel %vm524_vm2, %v520_v29, %v523_v33 }
 0x145   : > { %v3138_v36 = vpop.eup %3137  ;;  %v528_v37 = vsel %vm526_vm3, %v527_v34, %v525_v35 }
 0x146   : > { %v495_v38 = vmul.f32 %v3138_v36, %v486_v31  ;;  %v529_v39 = vadd.f32 1e-06, %v528_v37  ;;  %v782_v37 = vld [vmem:[%s3595_s11] sm:$0xff] }
 0x148   : > { %v497_v41 = vsel %vm496_vm4, %v486_v31, %v495_v38  ;;  %3139 = vrcp.f32 %v529_v39  ;;  %v1120_v38 = vrot.slane %v782_v37, 4 }
 0x149   : > { %v500_v42 = vsel %vm498_vm5, %v499_v40, %v497_v41 }
 0x14a   : > { %v501_v43 = vadd.f32 1e-06, %v500_v42 }
 0x14c   : > { %3141 = vrcp.f32 %v501_v43 }
 0x152   : > { %v3140_v46 = vpop.eup %3139 }
 0x153   : > { %v531_v48 = vmul.f32 %v3140_v46, %v521_v45 }
 0x155   : > { %v532_v50 = vadd.f32 %v2833_v47, %v531_v48 }
 0x156   : > { %v3142_v53 = vpop.eup %3141 }
 0x157   : > { %2966 = vmatmul.mubr.msk.f32.vlgmr.msra.gmra.mrb[0].mxu1 %vm475_vm0, %v532_v50  ;;  %v503_v54 = vmul.f32 %v3142_v53, %v493_v49 }
 0x158   : > { %2981 = vmatprep.mubr.msk.f32.mxu1 %vm3184_vm1, %v3185_v23 }
 0x159   : > { %v510_v56 = vadd.f32 %v2833_v47, %v503_v54 }
 0x15b   : > { %2955 = vmatmul.mubr.msk.f32.vlgmr.msra.gmra.mrb[0].mxu0 %vm475_vm0, %v510_v56 }
 0x15c   : > { %3113 = vmatpush3.bf16.msra.mxu0 %v3112_v55  ;;  %2976 = vmatprep.mubr.msk.f32.mxu0 %vm3184_vm1, %v3185_v23 }
 0x15d   : > { %3114 = vmatprep.subr.bf16.mxu0 %v3183_v17 }
 0x160   : > { %3116 = vmatpush3.bf16.msra.mxu0 %v3115_v59 }
 0x161   : > { %2989 = vmatprep.subr.mxu0 %v3185_v23 }
 0x163   : > { %2977 = vmatmul.mubr.msk.f32.vlgmr.msra.gmra.mrb[2].mxu0 %vm475_vm0, %v532_v50 }
 0x164   : > { %2991 = vmatprep.mubr.msk.f32.mxu0 %vm3184_vm1, %v3185_v23 }
 0x22a   : > { %v697_v61 = vpop.f32.mrb[0].mxu1 }
 0x22b   : > { %v3355_v62 = vadd.f32 %v2836_v60, %v697_v61  ;;  %v2967_v63 = vpop.f32.mrb[1].mxu1 }
 0x22d   : > { %2980 = vmatpush3.xpose.msk.msra.mxu1 %vm786_vm6, %v3355_v62  ;;  %953 = vrot.lane.b32.xlu0 %v3355_v62, %s3186_s19 }
 0x22e   : > { %v613_v1 = vpop.f32.mrb[0].mxu0  ;;  %2984 = vmatprep.subr.mxu1 %v3185_v23 }
 0x22f   : > { %v3365_v3 = vadd.f32 %v2834_v0, %v613_v1  ;;  %v2956_v4 = vpop.f32.mrb[1].mxu0 }
 0x231   : > { %951 = vrot.lane.b32.xlu1 %v3365_v3, %s3186_s19  ;;  %2982 = vmatmul.mubr.msk.f32.vlgmr.msra.gmra.mrb[2].mxu1 %vm786_vm6, %v3365_v3 }
 0x232   : > { %2986 = vmatprep.mubr.msk.f32.mxu1 %vm3184_vm1, %v3185_v23 }
 0x236   : > { %v778_v6 = vpop.f32.mrb[2].mxu0 }
 0x237   : > { %v3376_v7 = vadd.f32 %v2838_v5, %v778_v6  ;;  %v2978_v8 = vpop.f32.mrb[3].mxu0 }
 0x239   : > { %2985 = vmatpush3.msra.mxu1 %v3376_v7 }
 0x23a   : > { %2994 = vmatprep.subr.mxu1 %v3185_v23 }
 0x29f   : > { %v954_v9 = vpop.permute.xlu0 %953 }
 0x2a0   : > { %2990 = vmatpush3.xpose.msk.msra.mxu0 %vm786_vm6, %v954_v9  ;;  %v783_v9 = vld [vmem:[%s3595_s11 + $0x8] sm:$0xff] }
 0x2a1   : > { %2999 = vmatprep.subr.mxu0 %v3185_v23 }
 0x2a3   : > { %v952_v10 = vpop.permute.xlu1 %951 }
 0x2a4   : > { %2992 = vmatmul.mubr.msk.f32.vlgmr.msra.gmra.mrb[4].mxu0 %vm786_vm6, %v952_v10  ;;  %v1683_v10 = vrot.slane %v783_v9, 4 }
 0x2a5   : > { %3001 = vmatprep.mubr.msk.f32.mxu0 %vm3184_vm1, %v3185_v23  ;;  %3000 = vmatpush3.msk.msra.mxu0 %vm1124_vm9, %v1120_v38 }
 0x2a6   : > { %3009 = vmatprep.subr.mxu0 %v3185_v23 }
 0x304   : > { %v859_v12 = vpop.f32.mrb[2].mxu1 }
 0x305   : > { %v863_v13 = vmul.f32 0.5, %v859_v12  ;;  %v2983_v14 = vpop.f32.mrb[3].mxu1 }
 0x307   : > { %v865_v15 = vsel %vm864_vm7, -1e+09, %v863_v13 }
 0x308   : > { %v867_v16 = vsel %vm866_vm8, %v865_v15, -inf }
 0x309   : > { %868 = vmax.xlane.f32.xlu1 %v867_v16 }
 0x377   : > { %v1025_v17 = vpop.f32.mrb[4].mxu0 }
 0x378   : > { %v1029_v18 = vmul.f32 0.5, %v1025_v17  ;;  %v2993_v19 = vpop.f32.mrb[5].mxu0 }
 0x37a   : > { %v1030_v20 = vsel %vm864_vm7, -1e+09, %v1029_v18 }
 0x37b   : > { %v1031_v21 = vsel %vm866_vm8, %v1030_v20, -inf }
 0x37c   : > { %1032 = vmax.xlane.f32.xlu0 %v1031_v21 }
 0x396   : > { %v869_v22 = vpop.xlane.xlu1 %868 }
 0x397   : > { %v870_v24 = vsub.f32 %v865_v15, %v869_v22 }
 0x399   : > { %v871_v25 = vmul.f32 1.442695, %v870_v24 }
 0x39b   : > { %3143 = vpow2.f32 %v871_v25 }
 0x3a5   : > { %v3144_v26 = vpop.eup %3143 }
 0x3a6   : > { %v873_v27 = vsel %vm866_vm8, %v3144_v26, 0.0 }
 0x3a7   : > { %874 = vadd.xlane.f32.xlu0 %v873_v27 }
 0x3bd   : > { %1043 = vrot.lane.b32.xlu0 %v3376_v7, %s3186_s19 }
 0x409   : > { %v1033_v28 = vpop.xlane.xlu0 %1032 }
 0x40a   : > { %v1034_v29 = vsub.f32 %v1030_v20, %v1033_v28 }
 0x40c   : > { %v1035_v30 = vmul.f32 1.442695, %v1034_v29 }
 0x40e   : > { %3145 = vpow2.f32 %v1035_v30 }
 0x418   : > { %v3146_v31 = vpop.eup %3145 }
 0x419   : > { %v1037_v32 = vsel %vm866_vm8, %v3146_v31, 0.0 }
 0x41a   : > { %1038 = vadd.xlane.f32.xlu1 %v1037_v32 }
 0x42b   : > { %1274 = vrot.lane.b32.xlu1 %v3355_v62, %s3187_s26 }
 0x42f   : > { %1272 = vrot.lane.b32.xlu1 %v3365_v3, %s3187_s26 }
 0x434   : > { %v875_v33 = vpop.xlane.xlu0 %874 }
 0x435   : > { %3147 = vrcp.f32 %v875_v33 }
 0x438   : > { %v1044_v36 = vpop.permute.xlu0 %1043 }
 0x43f   : > { %v3148_v34 = vpop.eup %3147 }
 0x440   : > { %v877_v35 = vmul.f32 %v3148_v34, %v3144_v26 }
 0x442   : > { %2987 = vmatmul.mubr.msk.f32.vlgmr.msra.gmra.mrb[4].mxu1 %vm866_vm8, %v877_v35 }
 0x443   : > { %2995 = vmatpush3.msra.mxu1 %v1044_v36  ;;  %2996 = vmatprep.mubr.msk.f32.mxu1 %vm3184_vm1, %v3185_v23 }
 0x444   : > { %3004 = vmatprep.subr.mxu1 %v3185_v23 }
 0x4a7   : > { %v1039_v39 = vpop.xlane.xlu1 %1038 }
 0x4a8   : > { %3149 = vrcp.f32 %v1039_v39 }
 0x4ab   : > { %v1275_v44 = vpop.permute.xlu1 %1274 }
 0x4af   : > { %v1273_v47 = vpop.permute.xlu1 %1272 }
 0x4b2   : > { %v3150_v40 = vpop.eup %3149 }
 0x4b3   : > { %v1041_v41 = vmul.f32 %v3150_v40, %v3146_v31 }
 0x4b5   : > { %2997 = vmatmul.mubr.msk.f32.vlgmr.msra.gmra.mrb[6].mxu1 %vm866_vm8, %v1041_v41 }
 0x4b6   : > { %3005 = vmatpush3.msk.msra.mxu1 %vm1124_vm9, %v782_v37  ;;  %3006 = vmatprep.mubr.msk.f32.mxu1 %vm3184_vm1, %v3185_v23 }
 0x4b7   : > { %3014 = vmatprep.subr.mxu1 %v3185_v23 }
 0x515   : > { %v947_v42 = vpop.f32.mrb[4].mxu1 }
 0x516   : > { %v2988_v43 = vpop.f32.mrb[5].mxu1  ;;  %3007 = vmatmul.mubr.msk.f32.vlgmr.msra.gmra.mrb[8].mxu1 %vm786_vm6, %v947_v42 }
 0x517   : > { %3016 = vmatprep.mubr.msk.f32.mxu1 %vm3184_vm1, %v3185_v23 }
 0x588   : > { %v1115_v45 = vpop.f32.mrb[6].mxu1 }
 0x589   : > { %v2998_v46 = vpop.f32.mrb[7].mxu1  ;;  %3002 = vmatmul.mubr.msk.f32.vlgmr.msra.gmra.mrb[6].mxu0 %vm786_vm6, %v1115_v45 }
 0x58a   : > { %3010 = vmatpush3.xpose.msk.msra.mxu0 %vm786_vm6, %v1275_v44  ;;  %3011 = vmatprep.mubr.msk.f32.mxu0 %vm3184_vm1, %v3185_v23 }
 0x58b   : > { %3019 = vmatprep.subr.mxu0 %v3185_v23 }
 0x58d   : > { %3012 = vmatmul.mubr.msk.f32.vlgmr.msra.gmra.mrb[8].mxu0 %vm786_vm6, %v1273_v47 }
 0x58e   : > { %3021 = vmatprep.mubr.msk.f32.mxu0 %vm3184_vm1, %v3185_v23  ;;  %3020 = vmatpush3.msk.msra.mxu0 %vm1124_vm9, %v783_v9 }
 0x58f   : > { %3029 = vmatprep.subr.mxu0 %v3185_v23 }
 0x5e9   : > { %v1268_v48 = vpop.f32.mrb[8].mxu1 }
 0x5ea   : > { %v3008_v49 = vpop.f32.mrb[9].mxu1 }
 0x65c   : > { %v1193_v50 = vpop.f32.mrb[6].mxu0 }
 0x65d   : > { %v3431_v51 = vadd.f32 %v1268_v48, %v1193_v50  ;;  %v3003_v52 = vpop.f32.mrb[7].mxu0 }
 0x660   : > { %v1346_v53 = vpop.f32.mrb[8].mxu0 }
 0x661   : > { %v1350_v54 = vmul.f32 0.5, %v1346_v53  ;;  %v3013_v55 = vpop.f32.mrb[9].mxu0 }
 0x662   : > { %v784_v55 = vld [vmem:[%s3595_s11 + $0x10] sm:$0xff] }
 0x663   : > { %v1351_v56 = vsel %vm864_vm7, -1e+09, %v1350_v54 }
 0x664   : > { %v1352_v57 = vsel %vm866_vm8, %v1351_v56, -inf }
 0x665   : > { %1353 = vmax.xlane.f32.xlu1 %v1352_v57 }
 0x676   : > { %1518 = vrot.lane.b32.xlu1 %v3355_v62, %s3188_s30 }
 0x67a   : > { %1516 = vrot.lane.b32.xlu1 %v3365_v3, %s3188_s30 }
 0x6f2   : > { %v1354_v58 = vpop.xlane.xlu1 %1353 }
 0x6f3   : > { %v1355_v59 = vsub.f32 %v1351_v56, %v1354_v58  ;;  %v2171_v56 = vrot.slane %v784_v55, 4 }
 0x6f5   : > { %v1356_v60 = vmul.f32 1.442695, %v1355_v59 }
 0x6f6   : > { %v1519_v5 = vpop.permute.xlu1 %1518 }
 0x6f7   : > { %3151 = vpow2.f32 %v1356_v60 }
 0x6fa   : > { %v1517_v8 = vpop.permute.xlu1 %1516 }
 0x701   : > { %v3152_v61 = vpop.eup %3151 }
 0x702   : > { %v1358_v63 = vsel %vm866_vm8, %v3152_v61, 0.0 }
 0x703   : > { %1359 = vadd.xlane.f32.xlu0 %v1358_v63 }
 0x719   : > { %1363 = vrot.lane.b32.xlu0 %v3376_v7, %s3187_s26 }
 0x790   : > { %v1360_v0 = vpop.xlane.xlu0 %1359 }
 0x791   : > { %3153 = vrcp.f32 %v1360_v0 }
 0x794   : > { %v1364_v1 = vpop.permute.xlu0 %1363 }
 0x795   : > { %3015 = vmatpush3.msra.mxu1 %v1364_v1 }
 0x796   : > { %3024 = vmatprep.subr.mxu1 %v3185_v23 }
 0x79b   : > { %v3154_v4 = vpop.eup %3153 }
 0x79c   : > { %v1362_v6 = vmul.f32 %v3154_v4, %v3152_v61 }
 0x79e   : > { %3017 = vmatmul.mubr.msk.f32.vlgmr.msra.gmra.mrb[10].mxu1 %vm866_vm8, %v1362_v6 }
 0x79f   : > { %3025 = vmatpush3.xpose.msk.msra.mxu1 %vm786_vm6, %v1519_v5  ;;  %3026 = vmatprep.mubr.msk.f32.mxu1 %vm3184_vm1, %v3185_v23 }
 0x7a0   : > { %3034 = vmatprep.subr.mxu1 %v3185_v23 }
 0x7a2   : > { %3027 = vmatmul.mubr.msk.f32.vlgmr.msra.gmra.mrb[12].mxu1 %vm786_vm6, %v1517_v8 }
 0x7a3   : > { %3036 = vmatprep.mubr.msk.f32.mxu1 %vm3184_vm1, %v3185_v23  ;;  %3035 = vmatpush3.msk.msra.mxu1 %vm1124_vm9, %v1683_v10 }
 0x7a4   : > { %3044 = vmatprep.subr.mxu1 %v3185_v23 }
 0x871   : > { %v1435_v12 = vpop.f32.mrb[10].mxu1 }
 0x872   : > { %v3018_v13 = vpop.f32.mrb[11].mxu1  ;;  %3022 = vmatmul.mubr.msk.f32.vlgmr.msra.gmra.mrb[10].mxu0 %vm786_vm6, %v1435_v12 }
 0x873   : > { %3031 = vmatprep.mubr.msk.f32.mxu0 %vm3184_vm1, %v3185_v23 }
 0x875   : > { %v1590_v14 = vpop.f32.mrb[12].mxu1 }
 0x876   : > { %v1594_v15 = vmul.f32 0.5, %v1590_v14  ;;  %v3028_v16 = vpop.f32.mrb[13].mxu1 }
 0x878   : > { %v1595_v17 = vsel %vm864_vm7, -1e+09, %v1594_v15 }
 0x879   : > { %v1596_v18 = vsel %vm866_vm8, %v1595_v17, -inf }
 0x87a   : > { %1597 = vmax.xlane.f32.xlu0 %v1596_v18 }
 0x890   : > { %1607 = vrot.lane.b32.xlu0 %v3376_v7, %s3188_s30  ;;  %s469_s30 = scalar_lea.vmem %s3597_s13, %s3271_s27 }
 0x894   : > { %1760 = vrot.lane.b32.xlu0 %v3365_v3, %s3189_s16 }
 0x907   : > { %v1598_v19 = vpop.xlane.xlu0 %1597 }
 0x908   : > { %v1599_v20 = vsub.f32 %v1595_v17, %v1598_v19 }
 0x90a   : > { %v1600_v21 = vmul.f32 1.442695, %v1599_v20 }
 0x90b   : > { %v1608_v22 = vpop.permute.xlu0 %1607 }
 0x90c   : > { %3155 = vpow2.f32 %v1600_v21  ;;  %3030 = vmatpush3.msra.mxu0 %v1608_v22 }
 0x90d   : > { %3039 = vmatprep.subr.mxu0 %v3185_v23 }
 0x90f   : > { %v1761_v33 = vpop.permute.xlu0 %1760 }
 0x916   : > { %v3156_v24 = vpop.eup %3155 }
 0x917   : > { %v1602_v25 = vsel %vm866_vm8, %v3156_v24, 0.0 }
 0x918   : > { %1603 = vadd.xlane.f32.xlu1 %v1602_v25 }
 0x929   : > { %1762 = vrot.lane.b32.xlu1 %v3355_v62, %s3189_s16 }
 0x945   : > { %v1511_v26 = vpop.f32.mrb[10].mxu0 }
 0x946   : > { %v1515_v27 = vadd.f32 %v1511_v26, %v3431_v51  ;;  %v3023_v28 = vpop.f32.mrb[11].mxu0 }
 0x9a5   : > { %v1604_v29 = vpop.xlane.xlu1 %1603 }
 0x9a6   : > { %3157 = vrcp.f32 %v1604_v29 }
 0x9a9   : > { %v1763_v32 = vpop.permute.xlu1 %1762 }
 0x9b0   : > { %v3158_v30 = vpop.eup %3157 }
 0x9b1   : > { %v1606_v31 = vmul.f32 %v3158_v30, %v3156_v24 }
 0x9b3   : > { %3032 = vmatmul.mubr.msk.f32.vlgmr.msra.gmra.mrb[12].mxu0 %vm866_vm8, %v1606_v31 }
 0x9b4   : > { %3040 = vmatpush3.xpose.msk.msra.mxu0 %vm786_vm6, %v1763_v32  ;;  %3041 = vmatprep.mubr.msk.f32.mxu0 %vm3184_vm1, %v3185_v23 }
 0x9b5   : > { %3049 = vmatprep.subr.mxu0 %v3185_v23 }
 0x9b7   : > { %3042 = vmatmul.mubr.msk.f32.vlgmr.msra.gmra.mrb[14].mxu0 %vm786_vm6, %v1761_v33 }
 0x9b8   : > { %3051 = vmatprep.mubr.msk.f32.mxu0 %vm3184_vm1, %v3185_v23  ;;  %3050 = vmatpush3.msk.msra.mxu0 %vm1124_vm9, %v784_v55 }
 0x9b9   : > { %3059 = vmatprep.subr.mxu0 %v3185_v23 }
 0xa86   : > { %v1679_v34 = vpop.f32.mrb[12].mxu0 }
 0xa87   : > { %v3033_v35 = vpop.f32.mrb[13].mxu0  ;;  %3037 = vmatmul.mubr.msk.f32.vlgmr.msra.gmra.mrb[14].mxu1 %vm786_vm6, %v1679_v34 }
 0xa88   : > { %3046 = vmatprep.mubr.msk.f32.mxu1 %vm3184_vm1, %v3185_v23 }
 0xa8a   : > { %v1834_v36 = vpop.f32.mrb[14].mxu0 }
 0xa8b   : > { %v1838_v37 = vmul.f32 0.5, %v1834_v36  ;;  %v3043_v38 = vpop.f32.mrb[15].mxu0 }
 0xa8d   : > { %v1839_v39 = vsel %vm864_vm7, -1e+09, %v1838_v37 }
 0xa8e   : > { %v1840_v40 = vsel %vm866_vm8, %v1839_v39, -inf }
 0xa8f   : > { %1841 = vmax.xlane.f32.xlu1 %v1840_v40 }
 0xaa0   : > { %2006 = vrot.lane.b32.xlu1 %v3355_v62, %s3190_s17 }
 0xaa4   : > { %2004 = vrot.lane.b32.xlu1 %v3365_v3, %s3190_s17 }
 0xb1c   : > { %v1842_v41 = vpop.xlane.xlu1 %1841 }
 0xb1d   : > { %v1843_v42 = vsub.f32 %v1839_v39, %v1842_v41  ;;  %v785_v39 = vld [vmem:[%s3595_s11 + $0x18] sm:$0xff] }
 0xb1e   : > { %v2659_v40 = vrot.slane %v785_v39, 4 }
 0xb1f   : > { %v1844_v43 = vmul.f32 1.442695, %v1843_v42 }
 0xb20   : > { %v2007_v52 = vpop.permute.xlu1 %2006 }
 0xb21   : > { %3159 = vpow2.f32 %v1844_v43 }
 0xb24   : > { %v2005_v54 = vpop.permute.xlu1 %2004 }
 0xb2b   : > { %v3160_v44 = vpop.eup %3159 }
 0xb2c   : > { %v1846_v45 = vsel %vm866_vm8, %v3160_v44, 0.0 }
 0xb2d   : > { %1847 = vadd.xlane.f32.xlu0 %v1846_v45 }
 0xb43   : > { %1851 = vrot.lane.b32.xlu0 %v3376_v7, %s3189_s16 }
 0xb5a   : > { %v1755_v46 = vpop.f32.mrb[14].mxu1 }
 0xb5b   : > { %v1759_v47 = vadd.f32 %v1755_v46, %v1515_v27  ;;  %v3038_v48 = vpop.f32.mrb[15].mxu1 }
 0xbba   : > { %v1848_v49 = vpop.xlane.xlu0 %1847 }
 0xbbb   : > { %3161 = vrcp.f32 %v1848_v49 }
 0xbbe   : > { %v1852_v50 = vpop.permute.xlu0 %1851 }
 0xbbf   : > { %3045 = vmatpush3.msra.mxu1 %v1852_v50 }
 0xbc0   : > { %3054 = vmatprep.subr.mxu1 %v3185_v23 }
 0xbc5   : > { %v3162_v51 = vpop.eup %3161 }
 0xbc6   : > { %v1850_v53 = vmul.f32 %v3162_v51, %v3160_v44 }
 0xbc8   : > { %3047 = vmatmul.mubr.msk.f32.vlgmr.msra.gmra.mrb[16].mxu1 %vm866_vm8, %v1850_v53 }
 0xbc9   : > { %3055 = vmatpush3.xpose.msk.msra.mxu1 %vm786_vm6, %v2007_v52  ;;  %3056 = vmatprep.mubr.msk.f32.mxu1 %vm3184_vm1, %v3185_v23 }
 0xbca   : > { %3064 = vmatprep.subr.mxu1 %v3185_v23 }
 0xbcc   : > { %3057 = vmatmul.mubr.msk.f32.vlgmr.msra.gmra.mrb[18].mxu1 %vm786_vm6, %v2005_v54 }
 0xbcd   : > { %3066 = vmatprep.mubr.msk.f32.mxu1 %vm3184_vm1, %v3185_v23  ;;  %3065 = vmatpush3.msk.msra.mxu1 %vm1124_vm9, %v2171_v56 }
 0xbce   : > { %3074 = vmatprep.subr.mxu1 %v3185_v23 }
 0xc9b   : > { %v1923_v57 = vpop.f32.mrb[16].mxu1 }
 0xc9c   : > { %v3048_v58 = vpop.f32.mrb[17].mxu1  ;;  %3052 = vmatmul.mubr.msk.f32.vlgmr.msra.gmra.mrb[16].mxu0 %vm786_vm6, %v1923_v57 }
 0xc9d   : > { %3061 = vmatprep.mubr.msk.f32.mxu0 %vm3184_vm1, %v3185_v23 }
 0xc9f   : > { %v2078_v59 = vpop.f32.mrb[18].mxu1 }
 0xca0   : > { %v2082_v60 = vmul.f32 0.5, %v2078_v59  ;;  %v3058_v61 = vpop.f32.mrb[19].mxu1 }
 0xca2   : > { %v2083_v63 = vsel %vm864_vm7, -1e+09, %v2082_v60 }
 0xca3   : > { %v2084_v0 = vsel %vm866_vm8, %v2083_v63, -inf }
 0xca4   : > { %2085 = vmax.xlane.f32.xlu0 %v2084_v0 }
 0xcba   : > { %2095 = vrot.lane.b32.xlu0 %v3376_v7, %s3190_s17 }
 0xcbe   : > { %2248 = vrot.lane.b32.xlu0 %v3365_v3, %s3191_s20 }
 0xd31   : > { %v2086_v1 = vpop.xlane.xlu0 %2085 }
 0xd32   : > { %v2087_v4 = vsub.f32 %v2083_v63, %v2086_v1  ;;  %v2880_v63 = vld [vmem:[%s3596_s12] ss:$0 sm:$0xff] }
 0xd34   : > { %v2088_v5 = vmul.f32 1.442695, %v2087_v4 }
 0xd35   : > { %v2096_v6 = vpop.permute.xlu0 %2095 }
 0xd36   : > { %3163 = vpow2.f32 %v2088_v5  ;;  %3060 = vmatpush3.msra.mxu0 %v2096_v6 }
 0xd37   : > { %3069 = vmatprep.subr.mxu0 %v3185_v23 }
 0xd39   : > { %v2249_v18 = vpop.permute.xlu0 %2248 }
 0xd40   : > { %v3164_v8 = vpop.eup %3163 }
 0xd41   : > { %v2090_v9 = vsel %vm866_vm8, %v3164_v8, 0.0 }
 0xd42   : > { %2091 = vadd.xlane.f32.xlu1 %v2090_v9 }
 0xd53   : > { %2250 = vrot.lane.b32.xlu1 %v3355_v62, %s3191_s20 }
 0xd6f   : > { %v1999_v10 = vpop.f32.mrb[16].mxu0 }
 0xd70   : > { %v2003_v12 = vadd.f32 %v1999_v10, %v1759_v47  ;;  %v3053_v13 = vpop.f32.mrb[17].mxu0 }
 0xdcf   : > { %v2092_v14 = vpop.xlane.xlu1 %2091 }
 0xdd0   : > { %3165 = vrcp.f32 %v2092_v14 }
 0xdd3   : > { %v2251_v17 = vpop.permute.xlu1 %2250 }
 0xdda   : > { %v3166_v15 = vpop.eup %3165 }
 0xddb   : > { %v2094_v16 = vmul.f32 %v3166_v15, %v3164_v8 }
 0xddd   : > { %3062 = vmatmul.mubr.msk.f32.vlgmr.msra.gmra.mrb[18].mxu0 %vm866_vm8, %v2094_v16 }
 0xdde   : > { %3070 = vmatpush3.xpose.msk.msra.mxu0 %vm786_vm6, %v2251_v17  ;;  %3071 = vmatprep.mubr.msk.f32.mxu0 %vm3184_vm1, %v3185_v23 }
 0xddf   : > { %3079 = vmatprep.subr.mxu0 %v3185_v23 }
 0xde1   : > { %3072 = vmatmul.mubr.msk.f32.vlgmr.msra.gmra.mrb[20].mxu0 %vm786_vm6, %v2249_v18 }
 0xde2   : > { %3081 = vmatprep.mubr.msk.f32.mxu0 %vm3184_vm1, %v3185_v23  ;;  %3080 = vmatpush3.msk.msra.mxu0 %vm1124_vm9, %v785_v39 }
 0xde3   : > { %3089 = vmatprep.subr.mxu0 %v3185_v23 }
 0xeb0   : > { %v2167_v19 = vpop.f32.mrb[18].mxu0 }
 0xeb1   : > { %v3063_v20 = vpop.f32.mrb[19].mxu0  ;;  %3067 = vmatmul.mubr.msk.f32.vlgmr.msra.gmra.mrb[20].mxu1 %vm786_vm6, %v2167_v19 }
 0xeb2   : > { %3076 = vmatprep.mubr.msk.f32.mxu1 %vm3184_vm1, %v3185_v23 }
 0xeb4   : > { %v2322_v21 = vpop.f32.mrb[20].mxu0 }
 0xeb5   : > { %v2326_v22 = vmul.f32 0.5, %v2322_v21  ;;  %v3073_v24 = vpop.f32.mrb[21].mxu0 }
 0xeb7   : > { %v2327_v25 = vsel %vm864_vm7, -1e+09, %v2326_v22 }
 0xeb8   : > { %v2328_v26 = vsel %vm866_vm8, %v2327_v25, -inf }
 0xeb9   : > { %2329 = vmax.xlane.f32.xlu1 %v2328_v26 }
 0xeca   : > { %2494 = vrot.lane.b32.xlu1 %v3355_v62, %s3192_s21 }
 0xece   : > { %2492 = vrot.lane.b32.xlu1 %v3365_v3, %s3192_s21 }
 0xf46   : > { %v2330_v27 = vpop.xlane.xlu1 %2329 }
 0xf47   : > { %v2331_v28 = vsub.f32 %v2327_v25, %v2330_v27 }
 0xf49   : > { %v2332_v29 = vmul.f32 1.442695, %v2331_v28 }
 0xf4a   : > { %v2495_v36 = vpop.permute.xlu1 %2494 }
 0xf4b   : > { %3167 = vpow2.f32 %v2332_v29 }
 0xf4e   : > { %v2493_v38 = vpop.permute.xlu1 %2492 }
 0xf55   : > { %v3168_v30 = vpop.eup %3167 }
 0xf56   : > { %v2334_v31 = vsel %vm866_vm8, %v3168_v30, 0.0 }
 0xf57   : > { %2335 = vadd.xlane.f32.xlu0 %v2334_v31 }
 0xf6d   : > { %2339 = vrot.lane.b32.xlu0 %v3376_v7, %s3191_s20 }
 0xf84   : > { %v2243_v32 = vpop.f32.mrb[20].mxu1 }
 0xf85   : > { %v2247_v33 = vadd.f32 %v2243_v32, %v2003_v12  ;;  %v3068_v34 = vpop.f32.mrb[21].mxu1 }
 0xfe4   : > { %v2336_v35 = vpop.xlane.xlu0 %2335 }
 0xfe5   : > { %3169 = vrcp.f32 %v2336_v35 }
 0xfe8   : > { %v2340_v62 = vpop.permute.xlu0 %2339 }
 0xfe9   : > { %3075 = vmatpush3.msra.mxu1 %v2340_v62 }
 0xfea   : > { %3084 = vmatprep.subr.mxu1 %v3185_v23 }
 0xfef   : > { %v3170_v3 = vpop.eup %3169 }
 0xff0   : > { %v2338_v37 = vmul.f32 %v3170_v3, %v3168_v30 }
 0xff2   : > { %3077 = vmatmul.mubr.msk.f32.vlgmr.msra.gmra.mrb[22].mxu1 %vm866_vm8, %v2338_v37 }
 0xff3   : > { %3085 = vmatpush3.xpose.msk.msra.mxu1 %vm786_vm6, %v2495_v36  ;;  %3086 = vmatprep.mubr.msk.f32.mxu1 %vm3184_vm1, %v3185_v23 }
 0xff4   : > { %3094 = vmatprep.subr.mxu1 %v3185_v23 }
 0xff6   : > { %3087 = vmatmul.mubr.msk.f32.vlgmr.msra.gmra.mrb[24].mxu1 %vm786_vm6, %v2493_v38 }
 0xff7   : > { %3096 = vmatprep.mubr.msk.f32.mxu1 %vm3184_vm1, %v3185_v23  ;;  %3095 = vmatpush3.msk.msra.mxu1 %vm1124_vm9, %v2659_v40 }
0x10c5   : > { %v2411_v41 = vpop.f32.mrb[22].mxu1 }
0x10c6   : > { %v3078_v42 = vpop.f32.mrb[23].mxu1  ;;  %3082 = vmatmul.mubr.msk.f32.vlgmr.msra.gmra.mrb[22].mxu0 %vm786_vm6, %v2411_v41 }
0x10c7   : > { %3091 = vmatprep.mubr.msk.f32.mxu0 %vm3184_vm1, %v3185_v23 }
0x10c9   : > { %v2566_v43 = vpop.f32.mrb[24].mxu1 }
0x10ca   : > { %v2570_v44 = vmul.f32 0.5, %v2566_v43  ;;  %v3088_v45 = vpop.f32.mrb[25].mxu1 }
0x10cc   : > { %v2571_v46 = vsel %vm864_vm7, -1e+09, %v2570_v44 }
0x10cd   : > { %v2572_v47 = vsel %vm866_vm8, %v2571_v46, -inf }
0x10ce   : > { %2573 = vmax.xlane.f32.xlu0 %v2572_v47 }
0x10e4   : > { %2583 = vrot.lane.b32.xlu0 %v3376_v7, %s3192_s21 }
0x115b   : > { %v2574_v48 = vpop.xlane.xlu0 %2573 }
0x115c   : > { %v2575_v49 = vsub.f32 %v2571_v46, %v2574_v48 }
0x115e   : > { %v2576_v50 = vmul.f32 1.442695, %v2575_v49 }
0x115f   : > { %v2584_v51 = vpop.permute.xlu0 %2583 }
0x1160   : > { %3171 = vpow2.f32 %v2576_v50  ;;  %3090 = vmatpush3.msra.mxu0 %v2584_v51 }
0x116a   : > { %v3172_v52 = vpop.eup %3171 }
0x116b   : > { %v2578_v23 = vsel %vm866_vm8, %v3172_v52, 0.0 }
0x116c   : > { %2579 = vadd.xlane.f32.xlu1 %v2578_v23 }
0x1199   : > { %v2487_v53 = vpop.f32.mrb[22].mxu0 }
0x119a   : > { %v2491_v11 = vadd.f32 %v2487_v53, %v2247_v33  ;;  %v3083_v54 = vpop.f32.mrb[23].mxu0 }
0x11f9   : > { %v2580_v55 = vpop.xlane.xlu1 %2579 }
0x11fa   : > { %3173 = vrcp.f32 %v2580_v55 }
0x1204   : > { %v3174_v56 = vpop.eup %3173 }
0x1205   : > { %v2582_v57 = vmul.f32 %v3174_v56, %v3172_v52 }
0x1207   : > { %3092 = vmatmul.mubr.msk.f32.vlgmr.msra.gmra.mrb[24].mxu0 %vm866_vm8, %v2582_v57 }
0x12da   : > { %v2655_v7 = vpop.f32.mrb[24].mxu0 }
0x12db   : > { %v3093_v58 = vpop.f32.mrb[25].mxu0  ;;  %3097 = vmatmul.mubr.msk.f32.vlgmr.msra.gmra.mrb[26].mxu1 %vm786_vm6, %v2655_v7 }
0x13ae   : > { %v2731_v59 = vpop.f32.mrb[26].mxu1 }
0x13af   : > { %v2735_v60 = vadd.f32 %v2731_v59, %v2491_v11  ;;  %v3098_v61 = vpop.f32.mrb[27].mxu1 }
0x13b1   : > { %v2736_v0 = vadd.f32 %v2735_v60, %v3282_v2 }
0x13b3   : > { %v2744_v1 = vadd.f32 %v2880_v63, %v2736_v0 }
0x13b5   : > { %2745 = vst.msk [vmem:[%s469_s30] sm:$0xff] %vm475_vm0, %v2744_v1 }
0x13b6 PF: > { %s23_s25 = sadd.s32 1, %s3181_s25  }
0x13b7   : > { %p20_p4 = scmp.ge.s32.totalorder %s23_s25, 4  }
0x13b9   :  { %22 = sbr.rel (!%p20_p4) target bundleno = 1 (0x1), region = 108 }

// kernel: transformer_forward.35
= control target key start
LH: loop header
LB: loop body
LE: loop exit
PB: predicated region body
PF: predicated region fallthrough
CT: control target
= control target key end

     0   :  { %s4658_s25 = smov 0   ;;  %s5264_s0 = inlined_call_operand.vmem [shape: f32[2,8,32], index: 0, kind: input, shape index: {}]   ;;  %s5265_s1 = inlined_call_operand.vmem [shape: f32[2,64,32], index: 1, kind: input, shape index: {}]   ;;  %s5266_s2 = inlined_call_operand.vmem [shape: f32[2,8,64], index: 2, kind: input, shape index: {}]   ;;  %s5267_s3 = inlined_call_operand.vmem [shape: f32[1,32], index: 3, kind: input, shape index: {}]   ;;  %s5268_s4 = inlined_call_operand.vmem [shape: f32[1,32], index: 4, kind: input, shape index: {}]   ;;  %s5269_s5 = inlined_call_operand.vmem [shape: f32[32,32], index: 5, kind: input, shape index: {}]   ;;  %s5270_s6 = inlined_call_operand.vmem [shape: f32[1,32], index: 6, kind: input, shape index: {}]   ;;  %s5271_s7 = inlined_call_operand.vmem [shape: f32[32,32], index: 7, kind: input, shape index: {}]   ;;  %s5272_s8 = inlined_call_operand.vmem [shape: f32[1,32], index: 8, kind: input, shape index: {}]   ;;  %s5273_s9 = inlined_call_operand.vmem [shape: f32[32,32], index: 9, kind: input, shape index: {}]   ;;  %s5274_s10 = inlined_call_operand.vmem [shape: f32[1,32], index: 10, kind: input, shape index: {}]   ;;  %s5275_s11 = inlined_call_operand.vmem [shape: f32[32,32], index: 11, kind: input, shape index: {}]   ;;  %s5276_s12 = inlined_call_operand.vmem [shape: f32[1,32], index: 12, kind: input, shape index: {}]   ;;  %s5277_s13 = inlined_call_operand.vmem [shape: f32[2,8,32], index: 13, kind: output, shape index: {}]  }
   0x1 LB: > { %s3273_s26 = sadd.s32 4294967295, %s4576_s25   ;;  %p3277_p0 = scmp.ge.s32.totalorder %s4576_s25, 1  ;;  %s4576_s25 = sphi %s4658_s25, %s23_s25  }
   0x2   : > { %p405_p1 = scmp.lt.s32.totalorder %s4576_s25, 3 }
   0x4   : > { %p406_p2 = pnand %p3277_p0, %p405_p1 }
   0x5   : > { %p456_p3 = scmp.lt.s32.totalorder (!%p406_p2), %s3273_s26, 1  ;;  %vm485_vm0 = vcmask (!%p406_p2), 261120   ;;  %v605_v2 = vld [vmem:[%s5271_s7] sm:$0xff] (!%p406_p2)  ;;  %v606_v3 = vld [vmem:[%s5271_s7 + $0x8] sm:$0xff] (!%p406_p2)  ;;  %v607_v4 = vld [vmem:[%s5271_s7 + $0x10] sm:$0xff] (!%p406_p2)  ;;  %v4578_v22 = vmov (!%p406_p2), 0.0|0.0  }
   0x6   : > { %409 = sbr.rel (%p406_p2) target bundleno = 6175 (0x181f), region = 72  ;;  %v3995_v5 = vpack.c.bf16 (!%p406_p2), %v606_v3, %v605_v2  ;;  %v608_v6 = vld [vmem:[%s5271_s7 + $0x18] sm:$0xff] (!%p406_p2)  ;;  %v521_v21 = vld [vmem:[%s5269_s5] sm:$0xff] (!%p406_p2)  ;;  %3989 = vmatprep.subr.bf16.mxu0 (!%p406_p2), %v4578_v22  ;;  %v522_v23 = vld [vmem:[%s5269_s5 + $0x8] sm:$0xff] (!%p406_p2)  ;;  %vm4579_vm1 = vmmov (!%p406_p2), 0   ;;  %v4580_v27 = vmov (!%p406_p2), 0.0  }
   0x7   : > { %v3999_v8 = vpack.c.bf16 (!%p406_p2), %v608_v6, %v607_v4  ;;  %v523_v24 = vld [vmem:[%s5269_s5 + $0x10] sm:$0xff] (!%p406_p2)  ;;  %v524_v25 = vld [vmem:[%s5269_s5 + $0x18] sm:$0xff] (!%p406_p2)  ;;  %v3990_v26 = vpack.c.bf16 (!%p406_p2), %v522_v23, %v521_v21  ;;  %3602 = vmatprep.mubr.msk.f32.mxu0 (!%p406_p2), %vm4579_vm1, %v4580_v27  ;;  %v3287_v29 = vld [vmem:[%s5272_s8] ss:$0 sm:$0xff] (!%p406_p2)  ;;  %vm865_vm2 = vcmask (!%p406_p2), 31744   ;;  %s4581_s22 = smov (!%p406_p2), 124  }
   0x8   : > { %3996 = vmatprep.subr.bf16.mxu1 (!%p406_p2), %v3995_v5  ;;  %v3993_v28 = vpack.c.bf16 (!%p406_p2), %v524_v25, %v523_v24  ;;  %vm4748_vm3 = vmpackc.low (!%p406_p2), %vm865_vm2, %vm865_vm2  ;;  %v3283_v45 = vld [vmem:[%s5267_s3] ss:$0 sm:$0xff] (!%p406_p2)  ;;  %s4582_s15 = smov (!%p406_p2), 120   ;;  %vm966_vm7 = vcmask (!%p406_p2), 523264   ;;  %s4583_s18 = smov (!%p406_p2), 116   ;;  %vm1280_vm8 = vcmask (!%p406_p2), 1043456  }
   0x9   : > { %3998 = vmatpush3.bf16.msra.mxu1 (!%p406_p2), %v3995_v5  ;;  %3991 = vmatpush3.bf16.msra.mxu0 (!%p406_p2), %v3990_v26  ;;  %v3284_v48 = vld [vmem:[%s5268_s4] ss:$0 sm:$0xff] (!%p406_p2)  ;;  %s4584_s20 = smov (!%p406_p2), 112   ;;  %s4585_s21 = smov (!%p406_p2), 108  }
   0xa   : > { %4000 = vmatprep.subr.bf16.mxu1 (!%p406_p2), %v3999_v8  ;;  %3992 = vmatprep.subr.bf16.mxu0 (!%p406_p2), %v4578_v22  ;;  %v3285_v5 = vld [vmem:[%s5270_s6] ss:$0 sm:$0xff] (!%p406_p2)  ;;  %s4586_s28 = smov (!%p406_p2), 104  }
   0xd   : > { %s5281_s26 = smov (!%p456_p3, %s3273_s26), 1  ;;  %4002 = vmatpush3.bf16.msra.mxu1 %v3999_v8  ;;  %3994 = vmatpush3.bf16.msra.mxu0 %v3993_v28 }
   0xe   : > { %s4666_s27 = sshll.u32 %s5281_s26, 3  ;;  %s3404_s14 = sshll.u32 %s5281_s26, 6  ;;  %4011 = vmatprep.subr.bf16.mxu1 %v4578_v22 }
   0xf   : > { %s4672_s30 = scalar_lea.vmem %s5264_s0, %s4666_s27  ;;  %s464_s17 = scalar_lea.vmem %s5265_s1, %s3404_s14 }
  0x10   : > { %v473_v0 = vld [vmem:[%s4672_s30] sm:$0xff]  ;;  %v4695_v9 = vld [vmem:[%s464_s17 + $0x8] sm:$0xff]  ;;  %v4700_v15 = vld [vmem:[%s464_s17 + $0x10] sm:$0xff]  ;;  %s468_s29 = scalar_lea.vmem %s5266_s2, %s4666_s27  ;;  %s4587_s26 = smov 100  }
  0x11   : > { %v486_v1 = vsel %vm485_vm0, %v473_v0, 0.0  ;;  %v4691_v7 = vld [vmem:[%s464_s17] sm:$0xff]  ;;  %v4704_v16 = vld [vmem:[%s464_s17 + $0x18] sm:$0xff]  ;;  %v4712_v18 = vld [vmem:[%s464_s17 + $0x28] sm:$0xff] }
  0x12   : > { %487 = vadd.xlane.f32.xlu0 %v486_v1  ;;  %3613 = vmatprep.mubr.msk.f32.mxu1 %vm485_vm0, %v4691_v7  ;;  %v4708_v17 = vld [vmem:[%s464_s17 + $0x20] sm:$0xff]  ;;  %v4716_v19 = vld [vmem:[%s464_s17 + $0x30] sm:$0xff]  ;;  %v4718_v20 = vld [vmem:[%s464_s17 + $0x38] sm:$0xff] }
  0x13   : > { %3614 = vmatmul.mubr.msk.f32.vlgmr.msra.gmra.mrb[0].mxu1 %vm485_vm0, %v4695_v9 }
  0x14   : > { %3616 = vmatprep.mubr.msk.f32.mxu1 %vm485_vm0, %v4700_v15 }
  0x17   : > { %3617 = vmatmul.mubr.msk.f32.gmra.mrb[2].mxu1 %vm485_vm0, %v4704_v16 }
  0x18   : > { %3619 = vmatprep.mubr.msk.f32.mxu1 %vm485_vm0, %v4708_v17 }
  0x1b   : > { %3620 = vmatmul.mubr.msk.f32.gmra.mrb[4].mxu1 %vm485_vm0, %v4712_v18 }
  0x1c   : > { %3622 = vmatprep.mubr.msk.f32.mxu1 %vm485_vm0, %v4716_v19 }
  0x1f   : > { %3623 = vmatmul.mubr.msk.f32.gmra.mrb[6].mxu1 %vm485_vm0, %v4718_v20 }
  0x20   : > { %3661 = vmatprep.mubr.msk.f32.mxu1 %vm4579_vm1, %v4580_v27 }
  0x9f   : > { %v488_v10 = vpop.xlane.xlu0 %487 }
  0xa0   : > { %v490_v11 = vmul.f32 0.03125, %v488_v10  ;;  %v745_v10 = vld [vmem:[%s5273_s9] sm:$0xff] }
  0xa2   : > { %v491_v12 = vsub.f32 %v473_v0, %v490_v11  ;;  %v746_v11 = vld [vmem:[%s5273_s9 + $0x8] sm:$0xff] }
  0xa4   : > { %v492_v13 = vmul.f32 %v491_v12, %v491_v12  ;;  %v503_v46 = vmul.f32 %v3283_v45, %v491_v12  ;;  %v747_v12 = vld [vmem:[%s5273_s9 + $0x10] sm:$0xff] }
  0xa6   : > { %v493_v14 = vsel %vm485_vm0, %v492_v13, 0.0  ;;  %v4003_v13 = vpack.c.bf16 %v746_v11, %v745_v10 }
  0xa7   : > { %494 = vadd.xlane.f32.xlu0 %v493_v14  ;;  %v748_v14 = vld [vmem:[%s5273_s9 + $0x18] sm:$0xff] }
  0xa8   : > { %v4007_v21 = vpack.c.bf16 %v748_v14, %v747_v12  ;;  %4004 = vmatprep.subr.bf16.mxu0 %v4003_v13 }
  0xe6   : > { %v3615_v30 = vpop.f32.mrb[0].mxu1 }
  0xe7   : > { %v712_v31 = vadd.f32 %v3615_v30, %v3287_v29  ;;  %v706_v32 = vpop.f32.mrb[1].mxu1 }
  0xe8   : > { %v707_v33 = vadd.f32 %v3287_v29, %v706_v32 }
  0xea   : > { %v4012_v35 = vpack.c.bf16 %v712_v31, %v707_v33  ;;  %v4752_v36 = vpack.i.bf16 %v712_v31, %v707_v33  ;;  %v3618_v51 = vpop.f32.mrb[2].mxu1 }
  0xeb   : > { %v722_v52 = vadd.f32 %v3618_v51, %v3287_v29  ;;  %v716_v53 = vpop.f32.mrb[3].mxu1 }
  0xec   : > { %4014 = vmatpush3.bf16.xpose.msk.msra.mxu1 %vm4748_vm3, %v4012_v35  ;;  %4254 = vrot.lane.b32.xlu0 %v4752_v36, %s4581_s22  ;;  %v717_v54 = vadd.f32 %v3287_v29, %v716_v53 }
  0xed   : > { %4015 = vmatprep.subr.bf16.mxu1 %v4578_v22 }
  0xee   : > { %v4016_v55 = vpack.c.bf16 %v722_v52, %v717_v54  ;;  %v4768_v56 = vpack.i.bf16 %v722_v52, %v717_v54  ;;  %v3621_v57 = vpop.f32.mrb[4].mxu1 }
  0xef   : > { %v732_v58 = vadd.f32 %v3621_v57, %v3287_v29  ;;  %v726_v59 = vpop.f32.mrb[5].mxu1 }
  0xf0   : > { %v727_v60 = vadd.f32 %v3287_v29, %v726_v59 }
  0xf2   : > { %v4020_v61 = vpack.c.bf16 %v732_v58, %v727_v60  ;;  %v3624_v62 = vpop.f32.mrb[6].mxu1  ;;  %v4773_v63 = vpack.i.bf16 %v732_v58, %v727_v60 }
  0xf3   : > { %v742_v0 = vadd.f32 %v3624_v62, %v3287_v29  ;;  %v736_v1 = vpop.f32.mrb[7].mxu1 }
  0xf4   : > { %4018 = vmatpush3.bf16.xpose.msk.msra.mxu1 %vm4748_vm3, %v4016_v55  ;;  %v737_v2 = vadd.f32 %v3287_v29, %v736_v1 }
  0xf5   : > { %4019 = vmatprep.subr.bf16.mxu1 %v4578_v22 }
  0xf6   : > { %v4024_v3 = vpack.c.bf16 %v742_v0, %v737_v2  ;;  %v4778_v4 = vpack.i.bf16 %v742_v0, %v737_v2 }
  0xfc   : > { %4022 = vmatpush3.bf16.xpose.msk.msra.mxu1 %vm4748_vm3, %v4020_v61 }
  0xfd   : > { %4023 = vmatprep.subr.bf16.mxu1 %v4578_v22 }
 0x104   : > { %4026 = vmatpush3.bf16.xpose.msk.msra.mxu1 %vm4748_vm3, %v4024_v3 }
 0x105   : > { %4055 = vmatprep.subr.bf16.mxu1 %v4578_v22 }
 0x134   : > { %v495_v37 = vpop.xlane.xlu0 %494 }
 0x135   : > { %v496_v38 = vmul.f32 0.032258064, %v495_v37 }
 0x137   : > { %4533 = vrsqrt.f32 %v496_v38  ;;  %vm506_vm4 = vcmp.eq.f32.partialorder %v496_v38, inf  ;;  %v509_v41 = vand.u32 2147483648, %v496_v38  ;;  %vm508_vm5 = vcmp.eq.f32.partialorder %v496_v38, 0.0 }
 0x141   : > { %v4534_v39 = vpop.eup %4533 }
 0x142   : > { %v505_v40 = vmul.f32 %v4534_v39, %v496_v38 }
 0x144   : > { %v507_v42 = vsel %vm506_vm4, %v496_v38, %v505_v40 }
 0x145   : > { %v510_v43 = vsel %vm508_vm5, %v509_v41, %v507_v42 }
 0x146   : > { %v511_v44 = vadd.f32 1e-06, %v510_v43 }
 0x148   : > { %4535 = vrcp.f32 %v511_v44 }
 0x152   : > { %v4536_v47 = vpop.eup %4535 }
 0x153   : > { %v513_v49 = vmul.f32 %v4536_v47, %v503_v46 }
 0x155   : > { %v520_v50 = vadd.f32 %v3284_v48, %v513_v49 }
 0x157   : > { %3603 = vmatmul.mubr.msk.f32.vlgmr.msra.gmra.mrb[0].mxu0 %vm485_vm0, %v520_v50 }
 0x158   : > { %3633 = vmatprep.mubr.msk.f32.mxu0 %vm485_vm0, %v4691_v7  ;;  %4006 = vmatpush3.bf16.msra.mxu0 %v4003_v13 }
 0x159   : > { %4008 = vmatprep.subr.bf16.mxu0 %v4007_v21 }
 0x15c   : > { %4010 = vmatpush3.bf16.msra.mxu0 %v4007_v21 }
 0x15d   : > { %4027 = vmatprep.subr.bf16.mxu0 %v4578_v22 }
 0x15e   : > { %v4255_v55 = vpop.permute.xlu0 %4254 }
 0x15f   : > { %3634 = vmatmul.mubr.msk.f32.vlgmr.msra.gmra.mrb[2].mxu0 %vm485_vm0, %v4695_v9  ;;  %v4831_v9 = vld [vmem:[%s468_s29] sm:$0xff]  ;;  %v4257_v57 = vunpack.i.h.bf16 %v4255_v55  ;;  %v4256_v58 = vunpack.i.l.bf16 %v4255_v55 }
 0x160   : > { %3636 = vmatprep.mubr.msk.f32.mxu0 %vm485_vm0, %v4700_v15  ;;  %vm964_vm6 = vcmp.eq.f32.partialorder %v4831_v9, 0.0 }
 0x161   : > { %v4040_v61 = vpack.c.bf16 %v4257_v57, %v4256_v58 }
 0x163   : > { %3637 = vmatmul.mubr.msk.f32.gmra.mrb[4].mxu0 %vm485_vm0, %v4704_v16 }
 0x164   : > { %3639 = vmatprep.mubr.msk.f32.mxu0 %vm485_vm0, %v4708_v17 }
 0x167   : > { %3640 = vmatmul.mubr.msk.f32.gmra.mrb[6].mxu0 %vm485_vm0, %v4712_v18 }
 0x168   : > { %3642 = vmatprep.mubr.msk.f32.mxu0 %vm485_vm0, %v4716_v19 }
 0x16b   : > { %3643 = vmatmul.mubr.msk.f32.gmra.mrb[8].mxu0 %vm485_vm0, %v4718_v20  ;;  %v3296_v20 = vld [vmem:[%s5274_s10] ss:$0 sm:$0xff] }
 0x16c   : > { %3680 = vmatprep.mubr.msk.f32.mxu0 %vm4579_vm1, %v4580_v27 }
 0x22a   : > { %v601_v6 = vpop.f32.mrb[0].mxu0 }
 0x22b   : > { %v4786_v7 = vadd.f32 %v3285_v5, %v601_v6  ;;  %v3604_v8 = vpop.f32.mrb[1].mxu0 }
 0x22d   : > { %1051 = vrot.lane.b32.xlu0 %v4786_v7, %s4581_s22  ;;  %3662 = vmatmul.mubr.msk.f32.vlgmr.msra.gmra.mrb[8].mxu1 %vm865_vm2, %v4786_v7 }
 0x22e   : > { %3718 = vmatprep.mubr.msk.f32.mxu1 %vm4579_vm1, %v4580_v27 }
 0x231   : > { %4279 = vrot.lane.b32.xlu0 %v4768_v56, %s4582_s15 }
 0x232   : > { %v3635_v23 = vpop.f32.mrb[2].mxu0 }
 0x233   : > { %v4840_v24 = vadd.f32 %v3635_v23, %v3296_v20  ;;  %v822_v25 = vpop.f32.mrb[3].mxu0 }
 0x234   : > { %v4842_v26 = vadd.f32 %v3296_v20, %v822_v25 }
 0x235   : > { %4289 = vrot.lane.b32.xlu0 %v4778_v4, %s4582_s15 }
 0x236   : > { %v3638_v28 = vpop.f32.mrb[4].mxu0  ;;  %v4028_v29 = vpack.c.bf16 %v4840_v24, %v4842_v26 }
 0x237   : > { %v838_v30 = vadd.f32 %v3638_v28, %v3296_v20  ;;  %v832_v31 = vpop.f32.mrb[5].mxu0 }
 0x238   : > { %v833_v32 = vadd.f32 %v3296_v20, %v832_v31  ;;  %4029 = vmatpush3.bf16.msra.mxu0 %v4028_v29 }
 0x239   : > { %4030 = vmatprep.subr.bf16.mxu0 %v4578_v22 }
 0x23a   : > { %v3641_v33 = vpop.f32.mrb[6].mxu0  ;;  %v4031_v35 = vpack.c.bf16 %v838_v30, %v833_v32  ;;  %v4867_v53 = vpack.i.bf16 %v838_v30, %v833_v32 }
 0x23b   : > { %v848_v37 = vadd.f32 %v3641_v33, %v3296_v20  ;;  %v842_v38 = vpop.f32.mrb[7].mxu0 }
 0x23c   : > { %v843_v39 = vadd.f32 %v3296_v20, %v842_v38  ;;  %4032 = vmatpush3.bf16.msra.mxu0 %v4031_v35 }
 0x23d   : > { %4033 = vmatprep.subr.bf16.mxu0 %v4578_v22 }
 0x23e   : > { %v3644_v40 = vpop.f32.mrb[8].mxu0  ;;  %v4034_v49 = vpack.c.bf16 %v848_v37, %v843_v39  ;;  %v4849_v50 = vpack.i.bf16 %v848_v37, %v843_v39 }
 0x23f   : > { %v858_v41 = vadd.f32 %v3644_v40, %v3296_v20  ;;  %v852_v42 = vpop.f32.mrb[9].mxu0 }
 0x240   : > { %v853_v43 = vadd.f32 %v3296_v20, %v852_v42  ;;  %4035 = vmatpush3.bf16.msra.mxu0 %v4034_v49 }
 0x241   : > { %4036 = vmatprep.subr.bf16.mxu0 %v4578_v22 }
 0x242   : > { %v4037_v51 = vpack.c.bf16 %v858_v41, %v853_v43  ;;  %v4852_v52 = vpack.i.bf16 %v858_v41, %v853_v43 }
 0x244   : > { %4038 = vmatpush3.bf16.msra.mxu0 %v4037_v51 }
 0x245   : > { %4039 = vmatprep.subr.bf16.mxu0 %v4578_v22 }
 0x29f   : > { %v1052_v21 = vpop.permute.xlu0 %1051 }
 0x300   : > { %v959_v15 = vpop.f32.mrb[8].mxu1 }
 0x301   : > { %v963_v16 = vmul.f32 0.5, %v959_v15  ;;  %v3663_v17 = vpop.f32.mrb[9].mxu1 }
 0x303   : > { %v965_v18 = vsel %vm964_vm6, -1e+09, %v963_v16 }
 0x304   : > { %v967_v19 = vsel %vm966_vm7, %v965_v18, -inf }
 0x305   : > { %968 = vmax.xlane.f32.xlu1 %v967_v19 }
 0x392   : > { %v969_v44 = vpop.xlane.xlu1 %968 }
 0x393   : > { %v970_v45 = vsub.f32 %v965_v18, %v969_v44  ;;  %v4280_v18 = vpop.permute.xlu0 %4279 }
 0x394   : > { %v4282_v19 = vunpack.i.h.bf16 %v4280_v18  ;;  %v4281_v20 = vunpack.i.l.bf16 %v4280_v18 }
 0x395   : > { %v971_v46 = vmul.f32 1.442695, %v970_v45  ;;  %v4911_v45 = vpack.i.bf16 %v4840_v24, %v4842_v26 }
 0x396   : > { %v4072_v23 = vpack.c.bf16 %v4282_v19, %v4281_v20 }
 0x397   : > { %4537 = vpow2.f32 %v971_v46  ;;  %v4290_v31 = vpop.permute.xlu0 %4289 }
 0x398   : > { %v4292_v32 = vunpack.i.h.bf16 %v4290_v31  ;;  %v4291_v33 = vunpack.i.l.bf16 %v4290_v31 }
 0x39a   : > { %v4080_v35 = vpack.c.bf16 %v4292_v32, %v4291_v33  ;;  %v861_v33 = vld [vmem:[%s5275_s11] sm:$0xff] }
 0x3a1   : > { %v4538_v47 = vpop.eup %4537 }
 0x3a2   : > { %v973_v48 = vsel %vm966_vm7, %v4538_v47, 0.0 }
 0x3a3   : > { %974 = vadd.xlane.f32.xlu1 %v973_v48 }
 0x3b4   : > { %4259 = vrot.lane.b32.xlu1 %v4768_v56, %s4581_s22 }
 0x3b8   : > { %4264 = vrot.lane.b32.xlu1 %v4773_v63, %s4581_s22 }
 0x3bc   : > { %4269 = vrot.lane.b32.xlu1 %v4778_v4, %s4581_s22 }
 0x3c0   : > { %4274 = vrot.lane.b32.xlu1 %v4752_v36, %s4582_s15 }
 0x3c4   : > { %4284 = vrot.lane.b32.xlu1 %v4773_v63, %s4582_s15 }
 0x3c8   : > { %1428 = vrot.lane.b32.xlu1 %v4786_v7, %s4582_s15 }
 0x3cc   : > { %4299 = vrot.lane.b32.xlu1 %v4867_v53, %s4581_s22 }
 0x430   : > { %v975_v54 = vpop.xlane.xlu1 %974 }
 0x431   : > { %4539 = vrcp.f32 %v975_v54 }
 0x434   : > { %v4260_v62 = vpop.permute.xlu1 %4259 }
 0x435   : > { %v4262_v0 = vunpack.i.h.bf16 %v4260_v62  ;;  %v4261_v1 = vunpack.i.l.bf16 %v4260_v62 }
 0x437   : > { %v4044_v2 = vpack.c.bf16 %v4262_v0, %v4261_v1 }
 0x438   : > { %v4265_v3 = vpop.permute.xlu1 %4264 }
 0x439   : > { %v4267_v5 = vunpack.i.h.bf16 %v4265_v3  ;;  %v4266_v6 = vunpack.i.l.bf16 %v4265_v3 }
 0x43b   : > { %v4540_v59 = vpop.eup %4539  ;;  %v4048_v8 = vpack.c.bf16 %v4267_v5, %v4266_v6 }
 0x43c   : > { %v977_v60 = vmul.f32 %v4540_v59, %v4538_v47  ;;  %v4270_v10 = vpop.permute.xlu1 %4269 }
 0x43d   : > { %v4272_v11 = vunpack.i.h.bf16 %v4270_v10  ;;  %v4271_v12 = vunpack.i.l.bf16 %v4270_v10 }
 0x43e   : > { %3681 = vmatmul.mubr.msk.f32.vlgmr.msra.gmra.mrb[10].mxu0 %vm966_vm7, %v977_v60 }
 0x43f   : > { %4042 = vmatpush3.bf16.xpose.msk.msra.mxu0 %vm4748_vm3, %v4040_v61  ;;  %3699 = vmatprep.mubr.msk.f32.mxu0 %vm4579_vm1, %v4580_v27  ;;  %v4052_v13 = vpack.c.bf16 %v4272_v11, %v4271_v12 }
 0x440   : > { %4043 = vmatprep.subr.bf16.mxu0 %v4578_v22  ;;  %v4275_v14 = vpop.permute.xlu1 %4274 }
 0x441   : > { %v4277_v15 = vunpack.i.h.bf16 %v4275_v14  ;;  %v4276_v16 = vunpack.i.l.bf16 %v4275_v14 }
 0x443   : > { %v4068_v17 = vpack.c.bf16 %v4277_v15, %v4276_v16 }
 0x444   : > { %v4285_v25 = vpop.permute.xlu1 %4284 }
 0x445   : > { %v4287_v28 = vunpack.i.h.bf16 %v4285_v25  ;;  %v4286_v29 = vunpack.i.l.bf16 %v4285_v25 }
 0x447   : > { %4046 = vmatpush3.bf16.xpose.msk.msra.mxu0 %vm4748_vm3, %v4044_v2  ;;  %v4076_v30 = vpack.c.bf16 %v4287_v28, %v4286_v29 }
 0x448   : > { %4047 = vmatprep.subr.bf16.mxu0 %v4578_v22  ;;  %v1429_v37 = vpop.permute.xlu1 %1428 }
 0x44c   : > { %v4300_v55 = vpop.permute.xlu1 %4299 }
 0x44d   : > { %v4302_v60 = vunpack.i.h.bf16 %v4300_v55  ;;  %v4301_v61 = vunpack.i.l.bf16 %v4300_v55 }
 0x44f   : > { %4050 = vmatpush3.bf16.xpose.msk.msra.mxu0 %vm4748_vm3, %v4048_v8  ;;  %v4059_v1 = vpack.c.bf16 %v4302_v60, %v4301_v61  ;;  %v4986_v61 = vld [vmem:[%s5275_s11 + $0x8] sm:$0xff] }
 0x450   : > { %4051 = vmatprep.subr.bf16.mxu0 %v4578_v22 }
 0x457   : > { %4054 = vmatpush3.bf16.xpose.msk.msra.mxu0 %vm4748_vm3, %v4052_v13 }
 0x458   : > { %4067 = vmatprep.subr.bf16.mxu0 %v4578_v22 }
 0x45e   : > { %3700 = vmatmul.mubr.msk.f32.vlgmr.msra.gmra.mrb[12].mxu0 %vm865_vm2, %v1052_v21 }
 0x45f   : > { %4070 = vmatpush3.bf16.xpose.msk.msra.mxu0 %vm4748_vm3, %v4068_v17  ;;  %3747 = vmatprep.mubr.msk.f32.mxu0 %vm4579_vm1, %v4580_v27 }
 0x460   : > { %4071 = vmatprep.subr.bf16.mxu0 %v4578_v22 }
 0x467   : > { %4074 = vmatpush3.bf16.xpose.msk.msra.mxu0 %vm4748_vm3, %v4072_v23 }
 0x468   : > { %4075 = vmatprep.subr.bf16.mxu0 %v4578_v22 }
 0x46f   : > { %4078 = vmatpush3.bf16.xpose.msk.msra.mxu0 %vm4748_vm3, %v4076_v30 }
 0x470   : > { %4079 = vmatprep.subr.bf16.mxu0 %v4578_v22 }
 0x477   : > { %4082 = vmatpush3.bf16.xpose.msk.msra.mxu0 %vm4748_vm3, %v4080_v35 }
 0x478   : > { %4111 = vmatprep.subr.bf16.mxu0 %v4578_v22 }
 0x47e   : > { %3748 = vmatmul.mubr.msk.f32.vlgmr.msra.gmra.mrb[14].mxu0 %vm865_vm2, %v1429_v37  ;;  %v1276_v37 = vrot.slane %v861_v33, 4 }
 0x47f   : > { %3809 = vmatprep.mubr.msk.f32.mxu0 %vm4579_vm1, %v4580_v27 }
 0x511   : > { %v4904_v38 = vpop.f32.mrb[10].mxu0 }
 0x512   : > { %v3682_v39 = vpop.f32.mrb[11].mxu0 }
 0x531   : > { %v1153_v40 = vpop.f32.mrb[12].mxu0 }
 0x532   : > { %v1157_v41 = vmul.f32 0.5, %v1153_v40  ;;  %v3701_v42 = vpop.f32.mrb[13].mxu0 }
 0x534   : > { %v1158_v43 = vsel %vm964_vm6, -1e+09, %v1157_v41 }
 0x535   : > { %v1159_v44 = vsel %vm966_vm7, %v1158_v43, -inf }
 0x536   : > { %1160 = vmax.xlane.f32.xlu0 %v1159_v44 }
 0x54c   : > { %4294 = vrot.lane.b32.xlu0 %v4911_v45, %s4581_s22 }
 0x550   : > { %4304 = vrot.lane.b32.xlu0 %v4849_v50, %s4581_s22 }
 0x551   : > { %v1530_v46 = vpop.f32.mrb[14].mxu0 }
 0x552   : > { %v3749_v47 = vpop.f32.mrb[15].mxu0  ;;  %v1534_v48 = vmul.f32 0.5, %v1530_v46 }
 0x554   : > { %v1535_v49 = vsel %vm964_vm6, -1e+09, %v1534_v48 }
 0x555   : > { %v1536_v51 = vsel %vm966_vm7, %v1535_v49, -inf }
 0x56f   : > { %1537 = vmax.xlane.f32.xlu0 %v1536_v51 }
 0x585   : > { %4314 = vrot.lane.b32.xlu0 %v4911_v45, %s4582_s15 }
 0x589   : > { %4324 = vrot.lane.b32.xlu0 %v4849_v50, %s4582_s15 }
 0x58d   : > { %4334 = vrot.lane.b32.xlu0 %v4752_v36, %s4583_s18 }
 0x591   : > { %4344 = vrot.lane.b32.xlu0 %v4773_v63, %s4583_s18 }
 0x595   : > { %1721 = vrot.lane.b32.xlu0 %v4786_v7, %s4583_s18 }
 0x599   : > { %4354 = vrot.lane.b32.xlu0 %v4911_v45, %s4583_s18 }
 0x5c3   : > { %v1161_v24 = vpop.xlane.xlu0 %1160 }
 0x5c4   : > { %v1162_v26 = vsub.f32 %v1158_v43, %v1161_v24 }
 0x5c6   : > { %v1163_v54 = vmul.f32 1.442695, %v1162_v26 }
 0x5c7   : > { %v4295_v57 = vpop.permute.xlu0 %4294 }
 0x5c8   : > { %4541 = vpow2.f32 %v1163_v54  ;;  %v4297_v58 = vunpack.i.h.bf16 %v4295_v57  ;;  %v4296_v59 = vunpack.i.l.bf16 %v4295_v57 }
 0x5ca   : > { %v4056_v62 = vpack.c.bf16 %v4297_v58, %v4296_v59 }
 0x5cb   : > { %v4305_v0 = vpop.permute.xlu0 %4304 }
 0x5cc   : > { %4057 = vmatpush3.bf16.msra.mxu1 %v4056_v62  ;;  %v4307_v2 = vunpack.i.h.bf16 %v4305_v0  ;;  %v4306_v3 = vunpack.i.l.bf16 %v4305_v0 }
 0x5cd   : > { %4058 = vmatprep.subr.bf16.mxu1 %v4578_v22 }
 0x5ce   : > { %v4062_v6 = vpack.c.bf16 %v4307_v2, %v4306_v3 }
 0x5d0   : > { %4060 = vmatpush3.bf16.msra.mxu1 %v4059_v1 }
 0x5d1   : > { %4061 = vmatprep.subr.bf16.mxu1 %v4578_v22 }
 0x5d2   : > { %v4542_v5 = vpop.eup %4541 }
 0x5d3   : > { %v1165_v8 = vsel %vm966_vm7, %v4542_v5, 0.0 }
 0x5d4   : > { %1166 = vadd.xlane.f32.xlu1 %v1165_v8  ;;  %4063 = vmatpush3.bf16.msra.mxu1 %v4062_v6 }
 0x5d5   : > { %4064 = vmatprep.subr.bf16.mxu1 %v4578_v22 }
 0x5e5   : > { %4309 = vrot.lane.b32.xlu1 %v4852_v52, %s4581_s22 }
 0x5e9   : > { %4319 = vrot.lane.b32.xlu1 %v4867_v53, %s4582_s15 }
 0x5fc   : > { %v1538_v10 = vpop.xlane.xlu0 %1537 }
 0x5fd   : > { %v1539_v11 = vsub.f32 %v1535_v49, %v1538_v10 }
 0x5ff   : > { %v1540_v12 = vmul.f32 1.442695, %v1539_v11 }
 0x600   : > { %v4315_v13 = vpop.permute.xlu0 %4314 }
 0x601   : > { %4543 = vpow2.f32 %v1540_v12  ;;  %v4317_v41 = vunpack.i.h.bf16 %v4315_v13  ;;  %v4316_v42 = vunpack.i.l.bf16 %v4315_v13 }
 0x603   : > { %v4084_v47 = vpack.c.bf16 %v4317_v41, %v4316_v42 }
 0x604   : > { %v4325_v14 = vpop.permute.xlu0 %4324 }
 0x605   : > { %v4327_v51 = vunpack.i.h.bf16 %v4325_v14  ;;  %v4326_v24 = vunpack.i.l.bf16 %v4325_v14 }
 0x607   : > { %v4090_v55 = vpack.c.bf16 %v4327_v51, %v4326_v24 }
 0x608   : > { %v4940_v21 = vpop.permute.xlu0 %4334 }
 0x609   : > { %v4336_v6 = vunpack.i.l.bf16 %v4940_v21 }
 0x60b   : > { %v4942_v15 = vpop.eup %4543 }
 0x60c   : > { %v4944_v16 = vpop.permute.xlu0 %4344  ;;  %v1542_v17 = vsel %vm966_vm7, %v4942_v15, 0.0 }
 0x60d   : > { %1543 = vadd.xlane.f32.xlu1 %v1542_v17  ;;  %v4346_v17 = vunpack.i.l.bf16 %v4944_v16 }
 0x610   : > { %v4948_v18 = vpop.permute.xlu0 %1721 }
 0x614   : > { %v4355_v19 = vpop.permute.xlu0 %4354 }
 0x615   : > { %v4357_v20 = vunpack.i.h.bf16 %v4355_v19  ;;  %v4356_v23 = vunpack.i.l.bf16 %v4355_v19 }
 0x617   : > { %v4112_v25 = vpack.c.bf16 %v4357_v20, %v4356_v23 }
 0x619   : > { %4113 = vmatpush3.bf16.msra.mxu0 %v4112_v25 }
 0x61a   : > { %4114 = vmatprep.subr.bf16.mxu0 %v4578_v22 }
 0x61e   : > { %4329 = vrot.lane.b32.xlu1 %v4852_v52, %s4582_s15  ;;  %s472_s15 = scalar_lea.vmem %s5277_s13, %s4666_s27 }
 0x622   : > { %4339 = vrot.lane.b32.xlu1 %v4768_v56, %s4583_s18 }
 0x626   : > { %4349 = vrot.lane.b32.xlu1 %v4778_v4, %s4583_s18 }
 0x661   : > { %v1167_v28 = vpop.xlane.xlu1 %1166 }
 0x662   : > { %4545 = vrcp.f32 %v1167_v28 }
 0x665   : > { %v4310_v29 = vpop.permute.xlu1 %4309 }
 0x666   : > { %v4312_v30 = vunpack.i.h.bf16 %v4310_v29  ;;  %v4311_v31 = vunpack.i.l.bf16 %v4310_v29 }
 0x668   : > { %v4065_v32 = vpack.c.bf16 %v4312_v30, %v4311_v31 }
 0x669   : > { %v4320_v40 = vpop.permute.xlu1 %4319 }
 0x66a   : > { %4066 = vmatpush3.bf16.msra.mxu1 %v4065_v32  ;;  %v4322_v48 = vunpack.i.h.bf16 %v4320_v40  ;;  %v4321_v49 = vunpack.i.l.bf16 %v4320_v40 }
 0x66b   : > { %3721 = vmatprep.subr.mxu1 %v4580_v27 }
 0x66c   : > { %v4546_v35 = vpop.eup %4545  ;;  %v4087_v26 = vpack.c.bf16 %v4322_v48, %v4321_v49 }
 0x66d   : > { %v1169_v39 = vmul.f32 %v4546_v35, %v4542_v5  ;;  %v4337_v5 = vunpack.i.h.bf16 %v4940_v21  ;;  %v4347_v21 = vunpack.i.h.bf16 %v4944_v16 }
 0x66f   : > { %3719 = vmatmul.mubr.msk.f32.vlgmr.msra.gmra.mrb[10].mxu1 %vm966_vm7, %v1169_v39  ;;  %v4096_v8 = vpack.c.bf16 %v4337_v5, %v4336_v6  ;;  %v4104_v19 = vpack.c.bf16 %v4347_v21, %v4346_v17 }
 0x670   : > { %3722 = vmatpush3.msk.msra.mxu1 %vm1280_vm8, %v1276_v37  ;;  %3723 = vmatprep.mubr.msk.f32.mxu1 %vm4579_vm1, %v4580_v27 }
 0x671   : > { %3726 = vmatprep.subr.mxu1 %v4580_v27 }
 0x69a   : > { %v1544_v46 = vpop.xlane.xlu1 %1543 }
 0x69b   : > { %4547 = vrcp.f32 %v1544_v46 }
 0x69e   : > { %v4330_v54 = vpop.permute.xlu1 %4329 }
 0x69f   : > { %v4332_v57 = vunpack.i.h.bf16 %v4330_v54  ;;  %v4331_v58 = vunpack.i.l.bf16 %v4330_v54 }
 0x6a1   : > { %v4093_v59 = vpack.c.bf16 %v4332_v57, %v4331_v58 }
 0x6a2   : > { %v4340_v11 = vpop.permute.xlu1 %4339 }
 0x6a3   : > { %v4342_v13 = vunpack.i.h.bf16 %v4340_v11  ;;  %v4341_v14 = vunpack.i.l.bf16 %v4340_v11 }
 0x6a6   : > { %v4350_v20 = vpop.permute.xlu1 %4349 }
 0x6a7   : > { %v4352_v23 = vunpack.i.h.bf16 %v4350_v20  ;;  %v4351_v25 = vunpack.i.l.bf16 %v4350_v20 }
 0x6a9   : > { %v4108_v28 = vpack.c.bf16 %v4352_v23, %v4351_v25 }
 0x742   : > { %v1271_v43 = vpop.f32.mrb[10].mxu1 }
 0x743   : > { %v3720_v44 = vpop.f32.mrb[11].mxu1  ;;  %3724 = vmatmul.mubr.msk.f32.vlgmr.msra.gmra.mrb[12].mxu1 %vm865_vm2, %v1271_v43 }
 0x744   : > { %3727 = vmatpush3.msk.msra.mxu1 %vm1280_vm8, %v861_v33  ;;  %3728 = vmatprep.mubr.msk.f32.mxu1 %vm4579_vm1, %v4580_v27 }
 0x745   : > { %4083 = vmatprep.subr.bf16.mxu1 %v4578_v22 }
 0x747   : > { %3729 = vmatmul.mubr.msk.f32.vlgmr.msra.gmra.mrb[14].mxu1 %vm865_vm2, %v4904_v38  ;;  %v4548_v38 = vpop.eup %4547 }
 0x748   : > { %4085 = vmatpush3.bf16.msra.mxu1 %v4084_v47  ;;  %3766 = vmatprep.mubr.msk.f32.mxu1 %vm4579_vm1, %v4580_v27  ;;  %v1546_v60 = vmul.f32 %v4548_v38, %v4942_v15  ;;  %v4100_v15 = vpack.c.bf16 %v4342_v13, %v4341_v14 }
 0x749   : > { %4086 = vmatprep.subr.bf16.mxu1 %v4578_v22 }
 0x74c   : > { %4088 = vmatpush3.bf16.msra.mxu1 %v4087_v26 }
 0x74d   : > { %4089 = vmatprep.subr.bf16.mxu1 %v4578_v22 }
 0x750   : > { %4091 = vmatpush3.bf16.msra.mxu1 %v4090_v55 }
 0x751   : > { %4092 = vmatprep.subr.bf16.mxu1 %v4578_v22 }
 0x754   : > { %4094 = vmatpush3.bf16.msra.mxu1 %v4093_v59  ;;  %v1937_v59 = vrot.slane %v4986_v61, 4 }
 0x755   : > { %3769 = vmatprep.subr.mxu1 %v4580_v27 }
 0x757   : > { %3767 = vmatmul.mubr.msk.f32.vlgmr.msra.gmra.mrb[16].mxu1 %vm966_vm7, %v1546_v60 }
 0x758   : > { %3771 = vmatprep.mubr.msk.f32.mxu1 %vm4579_vm1, %v4580_v27  ;;  %3770 = vmatpush3.msk.msra.mxu1 %vm1280_vm8, %v4986_v61 }
 0x759   : > { %4095 = vmatprep.subr.bf16.mxu1 %v4578_v22 }
 0x816   : > { %v1349_v62 = vpop.f32.mrb[12].mxu1 }
 0x817   : > { %v3725_v0 = vpop.f32.mrb[13].mxu1 }
 0x81a   : > { %v1424_v1 = vpop.f32.mrb[14].mxu1 }
 0x81b   : > { %v1425_v2 = vadd.f32 %v1424_v1, %v1349_v62  ;;  %v3730_v3 = vpop.f32.mrb[15].mxu1 }
 0x82a   : > { %v1640_v10 = vpop.f32.mrb[16].mxu1 }
 0x82b   : > { %v3768_v12 = vpop.f32.mrb[17].mxu1  ;;  %3772 = vmatmul.mubr.msk.f32.vlgmr.msra.gmra.mrb[18].mxu1 %vm865_vm2, %v1640_v10 }
 0x82c   : > { %4098 = vmatpush3.bf16.xpose.msk.msra.mxu1 %vm4748_vm3, %v4096_v8  ;;  %3790 = vmatprep.mubr.msk.f32.mxu1 %vm4579_vm1, %v4580_v27 }
 0x82d   : > { %4099 = vmatprep.subr.bf16.mxu1 %v4578_v22 }
 0x834   : > { %4102 = vmatpush3.bf16.xpose.msk.msra.mxu1 %vm4748_vm3, %v4100_v15 }
 0x835   : > { %4103 = vmatprep.subr.bf16.mxu1 %v4578_v22 }
 0x83c   : > { %4106 = vmatpush3.bf16.xpose.msk.msra.mxu1 %vm4748_vm3, %v4104_v19 }
 0x83d   : > { %4107 = vmatprep.subr.bf16.mxu1 %v4578_v22 }
 0x844   : > { %4110 = vmatpush3.bf16.xpose.msk.msra.mxu1 %vm4748_vm3, %v4108_v28 }
 0x845   : > { %4139 = vmatprep.subr.bf16.mxu1 %v4578_v22 }
 0x84b   : > { %3791 = vmatmul.mubr.msk.f32.vlgmr.msra.gmra.mrb[20].mxu1 %vm865_vm2, %v4948_v18 }
 0x84c   : > { %3852 = vmatprep.mubr.msk.f32.mxu1 %vm4579_vm1, %v4580_v27 }
 0x8fe   : > { %v1716_v16 = vpop.f32.mrb[18].mxu1 }
 0x8ff   : > { %v5014_v29 = vadd.f32 %v1716_v16, %v1425_v2  ;;  %v3773_v30 = vpop.f32.mrb[19].mxu1 }
 0x91e   : > { %v1823_v31 = vpop.f32.mrb[20].mxu1 }
 0x91f   : > { %v1827_v32 = vmul.f32 0.5, %v1823_v31  ;;  %v3792_v33 = vpop.f32.mrb[21].mxu1 }
 0x921   : > { %v1828_v35 = vsel %vm964_vm6, -1e+09, %v1827_v32 }
 0x922   : > { %v1829_v37 = vsel %vm966_vm7, %v1828_v35, -inf }
 0x923   : > { %1830 = vmax.xlane.f32.xlu1 %v1829_v37 }
 0x934   : > { %4359 = vrot.lane.b32.xlu1 %v4867_v53, %s4583_s18 }
 0x938   : > { %4364 = vrot.lane.b32.xlu1 %v4849_v50, %s4583_s18 }
 0x93c   : > { %4374 = vrot.lane.b32.xlu1 %v4752_v36, %s4584_s20 }
 0x940   : > { %4384 = vrot.lane.b32.xlu1 %v4773_v63, %s4584_s20 }
 0x944   : > { %2014 = vrot.lane.b32.xlu1 %v4786_v7, %s4584_s20 }
 0x948   : > { %4399 = vrot.lane.b32.xlu1 %v4867_v53, %s4584_s20 }
 0x9b0   : > { %v1831_v18 = vpop.xlane.xlu1 %1830 }
 0x9b1   : > { %v1832_v39 = vsub.f32 %v1828_v35, %v1831_v18 }
 0x9b3   : > { %v1833_v40 = vmul.f32 1.442695, %v1832_v39 }
 0x9b4   : > { %v4360_v41 = vpop.permute.xlu1 %4359 }
 0x9b5   : > { %4549 = vpow2.f32 %v1833_v40  ;;  %v4362_v42 = vunpack.i.h.bf16 %v4360_v41  ;;  %v4361_v43 = vunpack.i.l.bf16 %v4360_v41 }
 0x9b7   : > { %v4115_v44 = vpack.c.bf16 %v4362_v42, %v4361_v43 }
 0x9b8   : > { %v4365_v46 = vpop.permute.xlu1 %4364 }
 0x9b9   : > { %v4367_v47 = vunpack.i.h.bf16 %v4365_v46  ;;  %v4366_v48 = vunpack.i.l.bf16 %v4365_v46  ;;  %4116 = vmatpush3.bf16.msra.mxu0 %v4115_v44 }
 0x9ba   : > { %4117 = vmatprep.subr.bf16.mxu0 %v4578_v22 }
 0x9bb   : > { %v4118_v49 = vpack.c.bf16 %v4367_v47, %v4366_v48 }
 0x9bc   : > { %v4375_v62 = vpop.permute.xlu1 %4374 }
 0x9bd   : > { %4119 = vmatpush3.bf16.msra.mxu0 %v4118_v49  ;;  %v4377_v0 = vunpack.i.h.bf16 %v4375_v62  ;;  %v4376_v1 = vunpack.i.l.bf16 %v4375_v62 }
 0x9be   : > { %4120 = vmatprep.subr.bf16.mxu0 %v4578_v22 }
 0x9bf   : > { %v4550_v51 = vpop.eup %4549  ;;  %v4124_v2 = vpack.c.bf16 %v4377_v0, %v4376_v1 }
 0x9c0   : > { %v1835_v24 = vsel %vm966_vm7, %v4550_v51, 0.0  ;;  %v4385_v11 = vpop.permute.xlu1 %4384 }
 0x9c1   : > { %1836 = vadd.xlane.f32.xlu0 %v1835_v24  ;;  %v4387_v12 = vunpack.i.h.bf16 %v4385_v11  ;;  %v4386_v13 = vunpack.i.l.bf16 %v4385_v11 }
 0x9c3   : > { %v4132_v14 = vpack.c.bf16 %v4387_v12, %v4386_v13 }
 0x9c4   : > { %v2015_v20 = vpop.permute.xlu1 %2014 }
 0x9c8   : > { %v4400_v18 = vpop.permute.xlu1 %4399 }
 0x9c9   : > { %v4402_v42 = vunpack.i.h.bf16 %v4400_v18  ;;  %v4401_v43 = vunpack.i.l.bf16 %v4400_v18 }
 0x9cb   : > { %v4143_v47 = vpack.c.bf16 %v4402_v42, %v4401_v43 }
 0x9d7   : > { %4369 = vrot.lane.b32.xlu0 %v4852_v52, %s4583_s18 }
 0x9db   : > { %4379 = vrot.lane.b32.xlu0 %v4768_v56, %s4584_s20 }
 0x9df   : > { %4389 = vrot.lane.b32.xlu0 %v4778_v4, %s4584_s20 }
 0xa4e   : > { %v1837_v26 = vpop.xlane.xlu0 %1836 }
 0xa4f   : > { %4551 = vrcp.f32 %v1837_v26 }
 0xa52   : > { %v4370_v54 = vpop.permute.xlu0 %4369 }
 0xa53   : > { %v4372_v55 = vunpack.i.h.bf16 %v4370_v54  ;;  %v4371_v57 = vunpack.i.l.bf16 %v4370_v54 }
 0xa55   : > { %v4121_v58 = vpack.c.bf16 %v4372_v55, %v4371_v57 }
 0xa56   : > { %v4380_v5 = vpop.permute.xlu0 %4379 }
 0xa57   : > { %4122 = vmatpush3.bf16.msra.mxu0 %v4121_v58  ;;  %v4382_v61 = vunpack.i.h.bf16 %v4380_v5  ;;  %v4381_v8 = vunpack.i.l.bf16 %v4380_v5 }
 0xa58   : > { %3812 = vmatprep.subr.mxu0 %v4580_v27 }
 0xa59   : > { %v4552_v38 = vpop.eup %4551  ;;  %v4128_v10 = vpack.c.bf16 %v4382_v61, %v4381_v8  ;;  %v5098_v61 = vld [vmem:[%s5275_s11 + $0x10] sm:$0xff] }
 0xa5a   : > { %v1839_v60 = vmul.f32 %v4552_v38, %v4550_v51  ;;  %v4390_v15 = vpop.permute.xlu0 %4389 }
 0xa5b   : > { %v4392_v21 = vunpack.i.h.bf16 %v4390_v15  ;;  %v4391_v17 = vunpack.i.l.bf16 %v4390_v15 }
 0xa5c   : > { %3810 = vmatmul.mubr.msk.f32.vlgmr.msra.gmra.mrb[16].mxu0 %vm966_vm7, %v1839_v60 }
 0xa5d   : > { %3813 = vmatpush3.msk.msra.mxu0 %vm1280_vm8, %v1937_v59  ;;  %3814 = vmatprep.mubr.msk.f32.mxu0 %vm4579_vm1, %v4580_v27  ;;  %v4136_v19 = vpack.c.bf16 %v4392_v21, %v4391_v17 }
 0xa5e   : > { %4123 = vmatprep.subr.bf16.mxu0 %v4578_v22 }
 0xb2f   : > { %v1933_v3 = vpop.f32.mrb[16].mxu0 }
 0xb30   : > { %v3811_v6 = vpop.f32.mrb[17].mxu0  ;;  %3815 = vmatmul.mubr.msk.f32.vlgmr.msra.gmra.mrb[18].mxu0 %vm865_vm2, %v1933_v3 }
 0xb31   : > { %4126 = vmatpush3.bf16.xpose.msk.msra.mxu0 %vm4748_vm3, %v4124_v2  ;;  %3833 = vmatprep.mubr.msk.f32.mxu0 %vm4579_vm1, %v4580_v27 }
 0xb32   : > { %4127 = vmatprep.subr.bf16.mxu0 %v4578_v22 }
 0xb39   : > { %4130 = vmatpush3.bf16.xpose.msk.msra.mxu0 %vm4748_vm3, %v4128_v10 }
 0xb3a   : > { %4131 = vmatprep.subr.bf16.mxu0 %v4578_v22 }
 0xb41   : > { %4134 = vmatpush3.bf16.xpose.msk.msra.mxu0 %vm4748_vm3, %v4132_v14 }
 0xb42   : > { %4135 = vmatprep.subr.bf16.mxu0 %v4578_v22 }
 0xb49   : > { %4138 = vmatpush3.bf16.xpose.msk.msra.mxu0 %vm4748_vm3, %v4136_v19 }
 0xb4a   : > { %4167 = vmatprep.subr.bf16.mxu0 %v4578_v22 }
 0xb50   : > { %3834 = vmatmul.mubr.msk.f32.vlgmr.msra.gmra.mrb[20].mxu0 %vm865_vm2, %v2015_v20 }
 0xb51   : > { %3895 = vmatprep.mubr.msk.f32.mxu0 %vm4579_vm1, %v4580_v27 }
 0xc03   : > { %v2009_v23 = vpop.f32.mrb[18].mxu0 }
 0xc04   : > { %v5066_v25 = vadd.f32 %v2009_v23, %v5014_v29  ;;  %v3816_v28 = vpop.f32.mrb[19].mxu0 }
 0xc23   : > { %v2116_v16 = vpop.f32.mrb[20].mxu0 }
 0xc24   : > { %v2120_v30 = vmul.f32 0.5, %v2116_v16  ;;  %v3835_v31 = vpop.f32.mrb[21].mxu0 }
 0xc26   : > { %v2121_v32 = vsel %vm964_vm6, -1e+09, %v2120_v30 }
 0xc27   : > { %v2122_v33 = vsel %vm966_vm7, %v2121_v32, -inf }
 0xc28   : > { %2123 = vmax.xlane.f32.xlu0 %v2122_v33 }
 0xc3e   : > { %4394 = vrot.lane.b32.xlu0 %v4911_v45, %s4584_s20 }
 0xc42   : > { %4404 = vrot.lane.b32.xlu0 %v4849_v50, %s4584_s20 }
 0xc46   : > { %4414 = vrot.lane.b32.xlu0 %v4752_v36, %s4585_s21 }
 0xc4a   : > { %4424 = vrot.lane.b32.xlu0 %v4773_v63, %s4585_s21 }
 0xc4e   : > { %2307 = vrot.lane.b32.xlu0 %v4786_v7, %s4585_s21 }
 0xc52   : > { %4434 = vrot.lane.b32.xlu0 %v4911_v45, %s4585_s21 }
 0xcb5   : > { %v2124_v29 = vpop.xlane.xlu0 %2123 }
 0xcb6   : > { %v2125_v35 = vsub.f32 %v2121_v32, %v2124_v29 }
 0xcb8   : > { %v2126_v37 = vmul.f32 1.442695, %v2125_v35 }
 0xcb9   : > { %v4395_v39 = vpop.permute.xlu0 %4394 }
 0xcba   : > { %4553 = vpow2.f32 %v2126_v37  ;;  %v4397_v40 = vunpack.i.h.bf16 %v4395_v39  ;;  %v4396_v41 = vunpack.i.l.bf16 %v4395_v39 }
 0xcbc   : > { %v4140_v44 = vpack.c.bf16 %v4397_v40, %v4396_v41 }
 0xcbd   : > { %v4405_v46 = vpop.permute.xlu0 %4404 }
 0xcbe   : > { %4141 = vmatpush3.bf16.msra.mxu1 %v4140_v44  ;;  %v4407_v48 = vunpack.i.h.bf16 %v4405_v46  ;;  %v4406_v49 = vunpack.i.l.bf16 %v4405_v46 }
 0xcbf   : > { %4142 = vmatprep.subr.bf16.mxu1 %v4578_v22 }
 0xcc0   : > { %v4146_v26 = vpack.c.bf16 %v4407_v48, %v4406_v49 }
 0xcc1   : > { %v4415_v51 = vpop.permute.xlu0 %4414 }
 0xcc2   : > { %4144 = vmatpush3.bf16.msra.mxu1 %v4143_v47  ;;  %v4417_v8 = vunpack.i.h.bf16 %v4415_v51  ;;  %v4416_v10 = vunpack.i.l.bf16 %v4415_v51 }
 0xcc3   : > { %4145 = vmatprep.subr.bf16.mxu1 %v4578_v22 }
 0xcc4   : > { %v4554_v24 = vpop.eup %4553  ;;  %v4152_v11 = vpack.c.bf16 %v4417_v8, %v4416_v10 }
 0xcc5   : > { %v4425_v54 = vpop.permute.xlu0 %4424  ;;  %v2128_v55 = vsel %vm966_vm7, %v4554_v24, 0.0 }
 0xcc6   : > { %2129 = vadd.xlane.f32.xlu1 %v2128_v55  ;;  %4147 = vmatpush3.bf16.msra.mxu1 %v4146_v26  ;;  %v4427_v19 = vunpack.i.h.bf16 %v4425_v54  ;;  %v4426_v20 = vunpack.i.l.bf16 %v4425_v54 }
 0xcc7   : > { %4148 = vmatprep.subr.bf16.mxu1 %v4578_v22 }
 0xcc8   : > { %v4160_v23 = vpack.c.bf16 %v4427_v19, %v4426_v20 }
 0xcc9   : > { %v2308_v57 = vpop.permute.xlu0 %2307 }
 0xccd   : > { %v4435_v58 = vpop.permute.xlu0 %4434 }
 0xcce   : > { %v4437_v38 = vunpack.i.h.bf16 %v4435_v58  ;;  %v4436_v59 = vunpack.i.l.bf16 %v4435_v58 }
 0xcd0   : > { %v4168_v60 = vpack.c.bf16 %v4437_v38, %v4436_v59 }
 0xcd2   : > { %4169 = vmatpush3.bf16.msra.mxu0 %v4168_v60 }
 0xcd3   : > { %4170 = vmatprep.subr.bf16.mxu0 %v4578_v22 }
 0xcd7   : > { %4409 = vrot.lane.b32.xlu1 %v4852_v52, %s4584_s20 }
 0xcdb   : > { %4419 = vrot.lane.b32.xlu1 %v4768_v56, %s4585_s21 }
 0xcdf   : > { %4429 = vrot.lane.b32.xlu1 %v4778_v4, %s4585_s21 }
 0xd53   : > { %v2130_v62 = vpop.xlane.xlu1 %2129 }
 0xd54   : > { %4555 = vrcp.f32 %v2130_v62  ;;  %v2523_v62 = vrot.slane %v5098_v61, 4 }
 0xd57   : > { %v4410_v0 = vpop.permute.xlu1 %4409 }
 0xd58   : > { %v4412_v1 = vunpack.i.h.bf16 %v4410_v0  ;;  %v4411_v2 = vunpack.i.l.bf16 %v4410_v0 }
 0xd5a   : > { %v4149_v3 = vpack.c.bf16 %v4412_v1, %v4411_v2 }
 0xd5b   : > { %v4420_v13 = vpop.permute.xlu1 %4419 }
 0xd5c   : > { %4150 = vmatpush3.bf16.msra.mxu1 %v4149_v3  ;;  %v4422_v15 = vunpack.i.h.bf16 %v4420_v13  ;;  %v4421_v21 = vunpack.i.l.bf16 %v4420_v13 }
 0xd5d   : > { %3855 = vmatprep.subr.mxu1 %v4580_v27 }
 0xd5e   : > { %v4556_v5 = vpop.eup %4555  ;;  %v4156_v17 = vpack.c.bf16 %v4422_v15, %v4421_v21 }
 0xd5f   : > { %v2132_v6 = vmul.f32 %v4556_v5, %v4554_v24  ;;  %v4430_v28 = vpop.permute.xlu1 %4429 }
 0xd60   : > { %v4432_v16 = vunpack.i.h.bf16 %v4430_v28  ;;  %v4431_v30 = vunpack.i.l.bf16 %v4430_v28 }
 0xd61   : > { %3853 = vmatmul.mubr.msk.f32.vlgmr.msra.gmra.mrb[22].mxu1 %vm966_vm7, %v2132_v6 }
 0xd62   : > { %3856 = vmatpush3.msk.msra.mxu1 %vm1280_vm8, %v5098_v61  ;;  %3857 = vmatprep.mubr.msk.f32.mxu1 %vm4579_vm1, %v4580_v27  ;;  %v4164_v31 = vpack.c.bf16 %v4432_v16, %v4431_v30 }
 0xd63   : > { %4151 = vmatprep.subr.bf16.mxu1 %v4578_v22 }
 0xe34   : > { %v2226_v12 = vpop.f32.mrb[22].mxu1 }
 0xe35   : > { %v3854_v14 = vpop.f32.mrb[23].mxu1  ;;  %3858 = vmatmul.mubr.msk.f32.vlgmr.msra.gmra.mrb[24].mxu1 %vm865_vm2, %v2226_v12 }
 0xe36   : > { %4154 = vmatpush3.bf16.xpose.msk.msra.mxu1 %vm4748_vm3, %v4152_v11  ;;  %3876 = vmatprep.mubr.msk.f32.mxu1 %vm4579_vm1, %v4580_v27 }
 0xe37   : > { %4155 = vmatprep.subr.bf16.mxu1 %v4578_v22 }
 0xe3e   : > { %4158 = vmatpush3.bf16.xpose.msk.msra.mxu1 %vm4748_vm3, %v4156_v17 }
 0xe3f   : > { %4159 = vmatprep.subr.bf16.mxu1 %v4578_v22 }
 0xe46   : > { %4162 = vmatpush3.bf16.xpose.msk.msra.mxu1 %vm4748_vm3, %v4160_v23 }
 0xe47   : > { %4163 = vmatprep.subr.bf16.mxu1 %v4578_v22 }
 0xe4e   : > { %4166 = vmatpush3.bf16.xpose.msk.msra.mxu1 %vm4748_vm3, %v4164_v31 }
 0xe4f   : > { %4195 = vmatprep.subr.bf16.mxu1 %v4578_v22 }
 0xe55   : > { %3877 = vmatmul.mubr.msk.f32.vlgmr.msra.gmra.mrb[26].mxu1 %vm865_vm2, %v2308_v57 }
 0xe56   : > { %3938 = vmatprep.mubr.msk.f32.mxu1 %vm4579_vm1, %v4580_v27 }
 0xf08   : > { %v2302_v32 = vpop.f32.mrb[24].mxu1 }
 0xf09   : > { %v5125_v33 = vadd.f32 %v2302_v32, %v5066_v25  ;;  %v3859_v29 = vpop.f32.mrb[25].mxu1 }
 0xf28   : > { %v2409_v35 = vpop.f32.mrb[26].mxu1 }
 0xf29   : > { %v2413_v37 = vmul.f32 0.5, %v2409_v35  ;;  %v3878_v18 = vpop.f32.mrb[27].mxu1 }
 0xf2b   : > { %v2414_v39 = vsel %vm964_vm6, -1e+09, %v2413_v37 }
 0xf2c   : > { %v2415_v40 = vsel %vm966_vm7, %v2414_v39, -inf }
 0xf2d   : > { %2416 = vmax.xlane.f32.xlu1 %v2415_v40 }
 0xf3e   : > { %4439 = vrot.lane.b32.xlu1 %v4867_v53, %s4585_s21 }
 0xf42   : > { %4444 = vrot.lane.b32.xlu1 %v4849_v50, %s4585_s21 }
 0xf46   : > { %4454 = vrot.lane.b32.xlu1 %v4752_v36, %s4586_s28 }
 0xf4a   : > { %4464 = vrot.lane.b32.xlu1 %v4773_v63, %s4586_s28 }
 0xf4e   : > { %2600 = vrot.lane.b32.xlu1 %v4786_v7, %s4586_s28 }
 0xf52   : > { %4479 = vrot.lane.b32.xlu1 %v4867_v53, %s4586_s28 }
 0xfba   : > { %v2417_v25 = vpop.xlane.xlu1 %2416 }
 0xfbb   : > { %v2418_v41 = vsub.f32 %v2414_v39, %v2417_v25 }
 0xfbd   : > { %v2419_v42 = vmul.f32 1.442695, %v2418_v41 }
 0xfbe   : > { %v4440_v43 = vpop.permute.xlu1 %4439 }
 0xfbf   : > { %4557 = vpow2.f32 %v2419_v42  ;;  %v4442_v44 = vunpack.i.h.bf16 %v4440_v43  ;;  %v4441_v46 = vunpack.i.l.bf16 %v4440_v43 }
 0xfc1   : > { %v4171_v47 = vpack.c.bf16 %v4442_v44, %v4441_v46 }
 0xfc2   : > { %v4445_v48 = vpop.permute.xlu1 %4444 }
 0xfc3   : > { %v4447_v49 = vunpack.i.h.bf16 %v4445_v48  ;;  %v4446_v51 = vunpack.i.l.bf16 %v4445_v48  ;;  %4172 = vmatpush3.bf16.msra.mxu0 %v4171_v47 }
 0xfc4   : > { %4173 = vmatprep.subr.bf16.mxu0 %v4578_v22 }
 0xfc5   : > { %v4174_v24 = vpack.c.bf16 %v4447_v49, %v4446_v51 }
 0xfc6   : > { %v4455_v1 = vpop.permute.xlu1 %4454 }
 0xfc7   : > { %4175 = vmatpush3.bf16.msra.mxu0 %v4174_v24  ;;  %v4457_v2 = vunpack.i.h.bf16 %v4455_v1  ;;  %v4456_v3 = vunpack.i.l.bf16 %v4455_v1 }
 0xfc8   : > { %4176 = vmatprep.subr.bf16.mxu0 %v4578_v22 }
 0xfc9   : > { %v4558_v26 = vpop.eup %4557  ;;  %v4180_v5 = vpack.c.bf16 %v4457_v2, %v4456_v3 }
 0xfca   : > { %v2421_v54 = vsel %vm966_vm7, %v4558_v26, 0.0  ;;  %v4465_v13 = vpop.permute.xlu1 %4464 }
 0xfcb   : > { %2422 = vadd.xlane.f32.xlu0 %v2421_v54  ;;  %v4467_v14 = vunpack.i.h.bf16 %v4465_v13  ;;  %v4466_v15 = vunpack.i.l.bf16 %v4465_v13 }
 0xfcd   : > { %v4188_v21 = vpack.c.bf16 %v4467_v14, %v4466_v15 }
 0xfce   : > { %v2601_v28 = vpop.permute.xlu1 %2600 }
 0xfd2   : > { %v4480_v25 = vpop.permute.xlu1 %4479 }
 0xfd3   : > { %v4482_v44 = vunpack.i.h.bf16 %v4480_v25  ;;  %v4481_v46 = vunpack.i.l.bf16 %v4480_v25 }
 0xfe1   : > { %4449 = vrot.lane.b32.xlu0 %v4852_v52, %s4585_s21 }
 0xfe5   : > { %4459 = vrot.lane.b32.xlu0 %v4768_v56, %s4586_s28 }
 0xfe9   : > { %4469 = vrot.lane.b32.xlu0 %v4778_v4, %s4586_s28 }
0x1058   : > { %v2423_v55 = vpop.xlane.xlu0 %2422 }
0x1059   : > { %4559 = vrcp.f32 %v2423_v55 }
0x105c   : > { %v4450_v57 = vpop.permute.xlu0 %4449 }
0x105d   : > { %v4452_v58 = vunpack.i.h.bf16 %v4450_v57  ;;  %v4451_v38 = vunpack.i.l.bf16 %v4450_v57 }
0x105f   : > { %v4177_v59 = vpack.c.bf16 %v4452_v58, %v4451_v38 }
0x1060   : > { %v4460_v8 = vpop.permute.xlu0 %4459 }
0x1061   : > { %4178 = vmatpush3.bf16.msra.mxu0 %v4177_v59  ;;  %v4462_v61 = vunpack.i.h.bf16 %v4460_v8  ;;  %v4461_v11 = vunpack.i.l.bf16 %v4460_v8 }
0x1062   : > { %3898 = vmatprep.subr.mxu0 %v4580_v27 }
0x1063   : > { %v4560_v60 = vpop.eup %4559  ;;  %v4184_v12 = vpack.c.bf16 %v4462_v61, %v4461_v11 }
0x1064   : > { %v2425_v0 = vmul.f32 %v4560_v60, %v4558_v26  ;;  %v4470_v17 = vpop.permute.xlu0 %4469 }
0x1065   : > { %v4472_v19 = vunpack.i.h.bf16 %v4470_v17  ;;  %v4471_v20 = vunpack.i.l.bf16 %v4470_v17 }
0x1066   : > { %3896 = vmatmul.mubr.msk.f32.vlgmr.msra.gmra.mrb[22].mxu0 %vm966_vm7, %v2425_v0 }
0x1067   : > { %3899 = vmatpush3.msk.msra.mxu0 %vm1280_vm8, %v2523_v62  ;;  %3900 = vmatprep.mubr.msk.f32.mxu0 %vm4579_vm1, %v4580_v27  ;;  %v4192_v23 = vpack.c.bf16 %v4472_v19, %v4471_v20 }
0x1068   : > { %4179 = vmatprep.subr.bf16.mxu0 %v4578_v22 }
0x1139   : > { %v2519_v6 = vpop.f32.mrb[22].mxu0 }
0x113a   : > { %v3897_v10 = vpop.f32.mrb[23].mxu0  ;;  %3901 = vmatmul.mubr.msk.f32.vlgmr.msra.gmra.mrb[24].mxu0 %vm865_vm2, %v2519_v6 }
0x113b   : > { %4182 = vmatpush3.bf16.xpose.msk.msra.mxu0 %vm4748_vm3, %v4180_v5  ;;  %3919 = vmatprep.mubr.msk.f32.mxu0 %vm4579_vm1, %v4580_v27  ;;  %v5209_v5 = vld [vmem:[%s5275_s11 + $0x18] sm:$0xff] }
0x113c   : > { %4183 = vmatprep.subr.bf16.mxu0 %v4578_v22 }
0x1143   : > { %4186 = vmatpush3.bf16.xpose.msk.msra.mxu0 %vm4748_vm3, %v4184_v12 }
0x1144   : > { %4187 = vmatprep.subr.bf16.mxu0 %v4578_v22 }
0x114b   : > { %4190 = vmatpush3.bf16.xpose.msk.msra.mxu0 %vm4748_vm3, %v4188_v21 }
0x114c   : > { %4191 = vmatprep.subr.bf16.mxu0 %v4578_v22 }
0x1153   : > { %4194 = vmatpush3.bf16.xpose.msk.msra.mxu0 %vm4748_vm3, %v4192_v23 }
0x1154   : > { %4223 = vmatprep.subr.bf16.mxu0 %v4578_v22 }
0x115a   : > { %3920 = vmatmul.mubr.msk.f32.vlgmr.msra.gmra.mrb[26].mxu0 %vm865_vm2, %v2601_v28 }
0x115b   : > { %3981 = vmatprep.mubr.msk.f32.mxu0 %vm4579_vm1, %v4580_v27 }
0x120d   : > { %v2595_v16 = vpop.f32.mrb[24].mxu0 }
0x120e   : > { %v5177_v30 = vadd.f32 %v2595_v16, %v5125_v33  ;;  %v3902_v31 = vpop.f32.mrb[25].mxu0 }
0x122d   : > { %v2702_v32 = vpop.f32.mrb[26].mxu0 }
0x122e   : > { %v2706_v29 = vmul.f32 0.5, %v2702_v32  ;;  %v3921_v35 = vpop.f32.mrb[27].mxu0 }
0x1230   : > { %v2707_v37 = vsel %vm964_vm6, -1e+09, %v2706_v29 }
0x1231   : > { %v2708_v18 = vsel %vm966_vm7, %v2707_v37, -inf }
0x1232   : > { %2709 = vmax.xlane.f32.xlu0 %v2708_v18 }
0x1248   : > { %4474 = vrot.lane.b32.xlu0 %v4911_v45, %s4586_s28 }
0x124c   : > { %4484 = vrot.lane.b32.xlu0 %v4849_v50, %s4586_s28 }
0x1250   : > { %4494 = vrot.lane.b32.xlu0 %v4752_v36, %s4587_s26 }
0x1254   : > { %4504 = vrot.lane.b32.xlu0 %v4773_v63, %s4587_s26  ;;  %v4199_v63 = vpack.c.bf16 %v4482_v44, %v4481_v46 }
0x1258   : > { %2893 = vrot.lane.b32.xlu0 %v4786_v7, %s4587_s26 }
0x125c   : > { %4514 = vrot.lane.b32.xlu0 %v4911_v45, %s4587_s26 }
0x12bf   : > { %v2710_v33 = vpop.xlane.xlu0 %2709 }
0x12c0   : > { %v2711_v39 = vsub.f32 %v2707_v37, %v2710_v33 }
0x12c2   : > { %v2712_v40 = vmul.f32 1.442695, %v2711_v39 }
0x12c3   : > { %v4475_v41 = vpop.permute.xlu0 %4474 }
0x12c4   : > { %4561 = vpow2.f32 %v2712_v40  ;;  %v4477_v42 = vunpack.i.h.bf16 %v4475_v41  ;;  %v4476_v43 = vunpack.i.l.bf16 %v4475_v41 }
0x12c6   : > { %v4196_v36 = vpack.c.bf16 %v4477_v42, %v4476_v43 }
0x12c7   : > { %v4485_v47 = vpop.permute.xlu0 %4484 }
0x12c8   : > { %4197 = vmatpush3.bf16.msra.mxu1 %v4196_v36  ;;  %v4487_v7 = vunpack.i.h.bf16 %v4485_v47  ;;  %v4486_v48 = vunpack.i.l.bf16 %v4485_v47 }
0x12c9   : > { %4198 = vmatprep.subr.bf16.mxu1 %v4578_v22 }
0x12ca   : > { %v4202_v51 = vpack.c.bf16 %v4487_v7, %v4486_v48 }
0x12cb   : > { %v4495_v49 = vpop.permute.xlu0 %4494 }
0x12cc   : > { %4200 = vmatpush3.bf16.msra.mxu1 %v4199_v63 }
0x12cd   : > { %4201 = vmatprep.subr.bf16.mxu1 %v4578_v22 }
0x12ce   : > { %v4562_v45 = vpop.eup %4561 }
0x12cf   : > { %v4505_v24 = vpop.permute.xlu0 %4504  ;;  %v2714_v26 = vsel %vm966_vm7, %v4562_v45, 0.0 }
0x12d0   : > { %2715 = vadd.xlane.f32.xlu1 %v2714_v26  ;;  %4203 = vmatpush3.bf16.msra.mxu1 %v4202_v51  ;;  %v4507_v14 = vunpack.i.h.bf16 %v4505_v24  ;;  %v4506_v15 = vunpack.i.l.bf16 %v4505_v24 }
0x12d1   : > { %4204 = vmatprep.subr.bf16.mxu1 %v4578_v22 }
0x12d2   : > { %v4216_v21 = vpack.c.bf16 %v4507_v14, %v4506_v15 }
0x12d3   : > { %v2894_v54 = vpop.permute.xlu0 %2893 }
0x12d7   : > { %v4515_v55 = vpop.permute.xlu0 %4514 }
0x12d8   : > { %v4517_v57 = vunpack.i.h.bf16 %v4515_v55  ;;  %v4516_v58 = vunpack.i.l.bf16 %v4515_v55  ;;  %v4569_v55 = vld [vmem:[%s4672_s30] sm:$0xff] }
0x12da   : > { %v4224_v38 = vpack.c.bf16 %v4517_v57, %v4516_v58 }
0x12dc   : > { %4225 = vmatpush3.bf16.msra.mxu0 %v4224_v38 }
0x12dd   : > { %4226 = vmatprep.subr.bf16.mxu0 %v4578_v22 }
0x12e1   : > { %4489 = vrot.lane.b32.xlu1 %v4852_v52, %s4586_s28 }
0x12e5   : > { %4499 = vrot.lane.b32.xlu1 %v4768_v56, %s4587_s26  ;;  %v4497_v56 = vunpack.i.h.bf16 %v4495_v49 }
0x12e9   : > { %4509 = vrot.lane.b32.xlu1 %v4778_v4, %s4587_s26  ;;  %v4496_v4 = vunpack.i.l.bf16 %v4495_v49 }
0x12eb   : > { %v4208_v6 = vpack.c.bf16 %v4497_v56, %v4496_v4 }
0x135d   : > { %v2716_v59 = vpop.xlane.xlu1 %2715 }
0x135e   : > { %4563 = vrcp.f32 %v2716_v59 }
0x1361   : > { %v4490_v60 = vpop.permute.xlu1 %4489 }
0x1362   : > { %v4492_v62 = vunpack.i.h.bf16 %v4490_v60  ;;  %v4491_v0 = vunpack.i.l.bf16 %v4490_v60 }
0x1364   : > { %v4205_v1 = vpack.c.bf16 %v4492_v62, %v4491_v0 }
0x1365   : > { %v4500_v10 = vpop.permute.xlu1 %4499 }
0x1366   : > { %4206 = vmatpush3.bf16.msra.mxu1 %v4205_v1  ;;  %v4502_v11 = vunpack.i.h.bf16 %v4500_v10  ;;  %v4501_v12 = vunpack.i.l.bf16 %v4500_v10 }
0x1367   : > { %3941 = vmatprep.subr.mxu1 %v4580_v27 }
0x1368   : > { %v4564_v2 = vpop.eup %4563  ;;  %v4212_v13 = vpack.c.bf16 %v4502_v11, %v4501_v12 }
0x1369   : > { %v2718_v3 = vmul.f32 %v4564_v2, %v4562_v45  ;;  %v4510_v17 = vpop.permute.xlu1 %4509 }
0x136a   : > { %v4512_v19 = vunpack.i.h.bf16 %v4510_v17  ;;  %v4511_v20 = vunpack.i.l.bf16 %v4510_v17 }
0x136b   : > { %3939 = vmatmul.mubr.msk.f32.vlgmr.msra.gmra.mrb[28].mxu1 %vm966_vm7, %v2718_v3 }
0x136c   : > { %3942 = vmatpush3.msk.msra.mxu1 %vm1280_vm8, %v5209_v5  ;;  %3943 = vmatprep.mubr.msk.f32.mxu1 %vm4579_vm1, %v4580_v27  ;;  %v4220_v23 = vpack.c.bf16 %v4512_v19, %v4511_v20 }
0x136d   : > { %4207 = vmatprep.subr.bf16.mxu1 %v4578_v22 }
0x143e   : > { %v2812_v8 = vpop.f32.mrb[28].mxu1 }
0x143f   : > { %v3940_v61 = vpop.f32.mrb[29].mxu1  ;;  %3944 = vmatmul.mubr.msk.f32.vlgmr.msra.gmra.mrb[30].mxu1 %vm865_vm2, %v2812_v8 }
0x1440   : > { %4210 = vmatpush3.bf16.xpose.msk.msra.mxu1 %vm4748_vm3, %v4208_v6  ;;  %3962 = vmatprep.mubr.msk.f32.mxu1 %vm4579_vm1, %v4580_v27 }
0x1441   : > { %4211 = vmatprep.subr.bf16.mxu1 %v4578_v22 }
0x1448   : > { %4214 = vmatpush3.bf16.xpose.msk.msra.mxu1 %vm4748_vm3, %v4212_v13 }
0x1449   : > { %4215 = vmatprep.subr.bf16.mxu1 %v4578_v22 }
0x1450   : > { %4218 = vmatpush3.bf16.xpose.msk.msra.mxu1 %vm4748_vm3, %v4216_v21 }
0x1451   : > { %4219 = vmatprep.subr.bf16.mxu1 %v4578_v22 }
0x1458   : > { %4222 = vmatpush3.bf16.xpose.msk.msra.mxu1 %vm4748_vm3, %v4220_v23 }
0x145f   : > { %3963 = vmatmul.mubr.msk.f32.vlgmr.msra.gmra.mrb[32].mxu1 %vm865_vm2, %v2894_v54  ;;  %v3401_v54 = vld [vmem:[%s5276_s12] ss:$0 sm:$0xff] }
0x1512   : > { %v2888_v28 = vpop.f32.mrb[30].mxu1 }
0x1513   : > { %v2892_v16 = vadd.f32 %v2888_v28, %v5177_v30  ;;  %v3945_v31 = vpop.f32.mrb[31].mxu1 }
0x1532   : > { %v2995_v32 = vpop.f32.mrb[32].mxu1 }
0x1533   : > { %v2999_v29 = vmul.f32 0.5, %v2995_v32  ;;  %v3964_v35 = vpop.f32.mrb[33].mxu1 }
0x1535   : > { %v3000_v37 = vsel %vm964_vm6, -1e+09, %v2999_v29 }
0x1536   : > { %v3001_v18 = vsel %vm966_vm7, %v3000_v37, -inf }
0x1537   : > { %3002 = vmax.xlane.f32.xlu1 %v3001_v18 }
0x1548   : > { %4519 = vrot.lane.b32.xlu1 %v4867_v53, %s4587_s26 }
0x154c   : > { %4524 = vrot.lane.b32.xlu1 %v4849_v50, %s4587_s26 }
0x15c4   : > { %v3003_v34 = vpop.xlane.xlu1 %3002 }
0x15c5   : > { %v3004_v33 = vsub.f32 %v3000_v37, %v3003_v34 }
0x15c7   : > { %v3005_v39 = vmul.f32 1.442695, %v3004_v33 }
0x15c8   : > { %v4520_v30 = vpop.permute.xlu1 %4519 }
0x15c9   : > { %4565 = vpow2.f32 %v3005_v39  ;;  %v4522_v40 = vunpack.i.h.bf16 %v4520_v30  ;;  %v4521_v25 = vunpack.i.l.bf16 %v4520_v30 }
0x15cb   : > { %v4227_v41 = vpack.c.bf16 %v4522_v40, %v4521_v25 }
0x15cc   : > { %v4525_v42 = vpop.permute.xlu1 %4524 }
0x15cd   : > { %v4527_v9 = vunpack.i.h.bf16 %v4525_v42  ;;  %v4526_v43 = vunpack.i.l.bf16 %v4525_v42  ;;  %4228 = vmatpush3.bf16.msra.mxu0 %v4227_v41 }
0x15ce   : > { %4229 = vmatprep.subr.bf16.mxu0 %v4578_v22 }
0x15cf   : > { %v4230_v44 = vpack.c.bf16 %v4527_v9, %v4526_v43 }
0x15d1   : > { %4231 = vmatpush3.bf16.msra.mxu0 %v4230_v44 }
0x15d2   : > { %4232 = vmatprep.subr.bf16.mxu0 %v4578_v22  ;;  %v3109_v22 = vrot.slane %v5209_v5, 4 }
0x15d3   : > { %v4566_v53 = vpop.eup %4565 }
0x15d4   : > { %v3007_v50 = vsel %vm966_vm7, %v4566_v53, 0.0 }
0x15d5   : > { %3008 = vadd.xlane.f32.xlu0 %v3007_v50 }
0x15eb   : > { %4529 = vrot.lane.b32.xlu0 %v4852_v52, %s4587_s26 }
0x1662   : > { %v3009_v46 = vpop.xlane.xlu0 %3008 }
0x1663   : > { %4567 = vrcp.f32 %v3009_v46 }
0x1666   : > { %v4530_v36 = vpop.permute.xlu0 %4529 }
0x1667   : > { %v4532_v47 = vunpack.i.h.bf16 %v4530_v36  ;;  %v4531_v63 = vunpack.i.l.bf16 %v4530_v36 }
0x1669   : > { %v4233_v7 = vpack.c.bf16 %v4532_v47, %v4531_v63 }
0x166b   : > { %4234 = vmatpush3.bf16.msra.mxu0 %v4233_v7 }
0x166c   : > { %3984 = vmatprep.subr.mxu0 %v4580_v27 }
0x166d   : > { %v4568_v48 = vpop.eup %4567 }
0x166e   : > { %v3011_v49 = vmul.f32 %v4568_v48, %v4566_v53 }
0x1670   : > { %3982 = vmatmul.mubr.msk.f32.vlgmr.msra.gmra.mrb[28].mxu0 %vm966_vm7, %v3011_v49 }
0x1671   : > { %3985 = vmatpush3.msk.msra.mxu0 %vm1280_vm8, %v3109_v22  ;;  %3986 = vmatprep.mubr.msk.f32.mxu0 %vm4579_vm1, %v4580_v27 }
0x1743   : > { %v3105_v52 = vpop.f32.mrb[28].mxu0 }
0x1744   : > { %v3983_v45 = vpop.f32.mrb[29].mxu0  ;;  %3987 = vmatmul.mubr.msk.f32.vlgmr.msra.gmra.mrb[30].mxu0 %vm865_vm2, %v3105_v52 }
0x1817   : > { %v3181_v51 = vpop.f32.mrb[30].mxu0 }
0x1818   : > { %v3185_v24 = vadd.f32 %v3181_v51, %v2892_v16  ;;  %v3988_v26 = vpop.f32.mrb[31].mxu0 }
0x181a   : > { %v3186_v57 = vadd.f32 %v4569_v55, %v3185_v24 }
0x181c   : > { %v3194_v58 = vadd.f32 %v3401_v54, %v3186_v57 }
0x181e   : > { %3195 = vst.msk [vmem:[%s472_s15] sm:$0xff] %vm485_vm0, %v3194_v58 }
0x181f PF: > { %s23_s25 = sadd.s32 1, %s4576_s25  }
0x1820   : > { %p20_p4 = scmp.ge.s32.totalorder %s23_s25, 4  }
0x1822   :  { %22 = sbr.rel (!%p20_p4) target bundleno = 1 (0x1), region = 108 }

// kernel: transformer_forward.36
= control target key start
LH: loop header
LB: loop body
LE: loop exit
PB: predicated region body
PF: predicated region fallthrough
CT: control target
= control target key end

     0   :  { %vm30_vm0 = vcmask 261120   ;;  %vm190_vm5 = vcmask 523264   ;;  %s503_s0 = inlined_call_operand.vmem [shape: f32[16,32], index: 0, kind: input, shape index: {}]   ;;  %s504_s3 = inlined_call_operand.vmem [shape: f32[32,64], index: 3, kind: input, shape index: {}]   ;;  %s505_s5 = inlined_call_operand.vmem [shape: f32[64,32], index: 5, kind: input, shape index: {}]   ;;  %s506_s1 = inlined_call_operand.vmem [shape: f32[1,32], index: 1, kind: input, shape index: {}]   ;;  %s507_s2 = inlined_call_operand.vmem [shape: f32[1,32], index: 2, kind: input, shape index: {}]   ;;  %s508_s4 = inlined_call_operand.vmem [shape: f32[1,64], index: 4, kind: input, shape index: {}]   ;;  %s509_s6 = inlined_call_operand.vmem [shape: f32[1,32], index: 6, kind: input, shape index: {}]   ;;  %s510_s7 = inlined_call_operand.vmem [shape: f32[16,32], index: 7, kind: output, shape index: {}]  }
   0x1   :  { %v418_v0 = vld [vmem:[%s503_s0] sm:$0xff]  ;;  %v423_v1 = vld [vmem:[%s503_s0 + $0x8] sm:$0xff]  ;;  %v90_v16 = vld [vmem:[%s504_s3 + $0x10] sm:$0xff] }
   0x2   :  { %v31_v2 = vsel %vm30_vm0, %v418_v0, 0.0  ;;  %v34_v3 = vsel %vm30_vm0, %v423_v1, 0.0  ;;  %v88_v14 = vld [vmem:[%s504_s3] sm:$0xff]  ;;  %v89_v15 = vld [vmem:[%s504_s3 + $0x8] sm:$0xff]  ;;  %v91_v18 = vld [vmem:[%s504_s3 + $0x18] sm:$0xff] }
   0x3   :  { %32 = vadd.xlane.f32.xlu0 %v31_v2  ;;  %v343_v17 = vpack.c.bf16 %v89_v15, %v88_v14  ;;  %v347_v19 = vpack.c.bf16 %v91_v18, %v90_v16  ;;  %v182_v20 = vld [vmem:[%s505_s5] sm:$0xff]  ;;  %v183_v21 = vld [vmem:[%s505_s5 + $0x8] sm:$0xff]  ;;  %v184_v22 = vld [vmem:[%s505_s5 + $0x10] sm:$0xff] }
   0x4   :  { %v351_v23 = vpack.c.bf16 %v183_v21, %v182_v20  ;;  %v185_v24 = vld [vmem:[%s505_s5 + $0x18] sm:$0xff]  ;;  %v186_v26 = vld [vmem:[%s505_s5 + $0x20] sm:$0xff]  ;;  %v187_v27 = vld [vmem:[%s505_s5 + $0x28] sm:$0xff] }
   0x5   :  { %344 = vmatprep.subr.bf16.mxu0 %v343_v17  ;;  %v355_v25 = vpack.c.bf16 %v185_v24, %v184_v22  ;;  %v359_v28 = vpack.c.bf16 %v187_v27, %v186_v26  ;;  %v289_v45 = vld [vmem:[%s506_s1] ss:$0 sm:$0xff]  ;;  %v188_v55 = vld [vmem:[%s505_s5 + $0x30] sm:$0xff]  ;;  %v189_v56 = vld [vmem:[%s505_s5 + $0x38] sm:$0xff] }
   0x6   :  { %346 = vmatpush3.bf16.msra.mxu0 %v343_v17  ;;  %352 = vmatprep.subr.bf16.mxu1 %v351_v23  ;;  %v290_v48 = vld [vmem:[%s507_s2] ss:$0 sm:$0xff]  ;;  %v363_v57 = vpack.c.bf16 %v189_v56, %v188_v55 }
   0x7   :  { %35 = vadd.xlane.f32.xlu0 %v34_v3  ;;  %348 = vmatprep.subr.bf16.mxu0 %v347_v19  ;;  %v291_v58 = vld [vmem:[%s508_s4] ss:$0 sm:$0xff] }
   0x8   :  { %354 = vmatpush3.bf16.msra.mxu1 %v351_v23 }
   0x9   :  { %356 = vmatprep.subr.bf16.mxu1 %v355_v25 }
   0xa   :  { %350 = vmatpush3.bf16.msra.mxu0 %v347_v19 }
   0xc   :  { %358 = vmatpush3.bf16.msra.mxu1 %v355_v25 }
   0xd   :  { %360 = vmatprep.subr.bf16.mxu1 %v359_v28 }
  0x10   :  { %362 = vmatpush3.bf16.msra.mxu1 %v359_v28 }
  0x11   :  { %364 = vmatprep.subr.bf16.mxu1 %v363_v57 }
  0x14   :  { %366 = vmatpush3.bf16.msra.mxu1 %v363_v57 }
  0x90   :  { %v33_v4 = vpop.xlane.xlu0 %32 }
  0x91   :  { %v38_v5 = vmul.f32 0.03125, %v33_v4  ;;  %v296_v4 = vld [vmem:[%s509_s6] ss:$0 sm:$0xff] }
  0x93   :  { %v430_v6 = vsub.f32 %v418_v0, %v38_v5 }
  0x94   :  { %v36_v7 = vpop.xlane.xlu0 %35 }
  0x95   :  { %v39_v8 = vmul.f32 0.03125, %v36_v7  ;;  %v42_v9 = vmul.f32 %v430_v6, %v430_v6  ;;  %v58_v46 = vmul.f32 %v289_v45, %v430_v6 }
  0x97   :  { %v435_v10 = vsub.f32 %v423_v1, %v39_v8  ;;  %v44_v11 = vsel %vm30_vm0, %v42_v9, 0.0 }
  0x98   :  { %45 = vadd.xlane.f32.xlu1 %v44_v11 }
  0x99   :  { %v43_v12 = vmul.f32 %v435_v10, %v435_v10  ;;  %v59_v50 = vmul.f32 %v289_v45, %v435_v10 }
  0x9b   :  { %v47_v13 = vsel %vm30_vm0, %v43_v12, 0.0 }
  0x9c   :  { %48 = vadd.xlane.f32.xlu1 %v47_v13 }
 0x125   :  { %v46_v29 = vpop.xlane.xlu1 %45 }
 0x126   :  { %v50_v30 = vmul.f32 0.032258064, %v46_v29 }
 0x128   :  { %367 = vrsqrt.f32 %v50_v30  ;;  %vm62_vm1 = vcmp.eq.f32.partialorder %v50_v30, inf  ;;  %v65_v35 = vand.u32 2147483648, %v50_v30  ;;  %vm64_vm2 = vcmp.eq.f32.partialorder %v50_v30, 0.0 }
 0x129   :  { %v49_v31 = vpop.xlane.xlu1 %48 }
 0x12a   :  { %v51_v32 = vmul.f32 0.032258064, %v49_v31 }
 0x12c   :  { %369 = vrsqrt.f32 %v51_v32  ;;  %vm69_vm3 = vcmp.eq.f32.partialorder %v51_v32, inf  ;;  %v72_v41 = vand.u32 2147483648, %v51_v32  ;;  %vm71_vm4 = vcmp.eq.f32.partialorder %v51_v32, 0.0 }
 0x132   :  { %v368_v33 = vpop.eup %367 }
 0x133   :  { %v61_v34 = vmul.f32 %v368_v33, %v50_v30 }
 0x135   :  { %v63_v36 = vsel %vm62_vm1, %v50_v30, %v61_v34 }
 0x136   :  { %v370_v37 = vpop.eup %369  ;;  %v66_v38 = vsel %vm64_vm2, %v65_v35, %v63_v36 }
 0x137   :  { %v68_v39 = vmul.f32 %v370_v37, %v51_v32  ;;  %v74_v40 = vadd.f32 1e-06, %v66_v38 }
 0x139   :  { %v70_v42 = vsel %vm69_vm3, %v51_v32, %v68_v39  ;;  %371 = vrcp.f32 %v74_v40 }
 0x13a   :  { %v73_v43 = vsel %vm71_vm4, %v72_v41, %v70_v42 }
 0x13b   :  { %v75_v44 = vadd.f32 1e-06, %v73_v43 }
 0x13d   :  { %373 = vrcp.f32 %v75_v44 }
 0x143   :  { %v372_v47 = vpop.eup %371 }
 0x144   :  { %v77_v49 = vmul.f32 %v372_v47, %v58_v46 }
 0x146   :  { %v86_v51 = vadd.f32 %v290_v48, %v77_v49 }
 0x147   :  { %v374_v52 = vpop.eup %373 }
 0x148   :  { %v79_v53 = vmul.f32 %v374_v52, %v59_v50  ;;  %321 = vmatprep.mubr.msk.f32.mxu0 %vm30_vm0, %v86_v51 }
 0x14a   :  { %v87_v54 = vadd.f32 %v290_v48, %v79_v53 }
 0x14c   :  { %322 = vmatmul.mubr.msk.f32.vlgmr.msra.gmra.mrb[0].mxu0 %vm30_vm0, %v87_v54 }
 0x21f   :  { %v323_v59 = vpop.f32.mrb[0].mxu0 }
 0x220   :  { %v177_v60 = vadd.f32 %v323_v59, %v291_v58  ;;  %v171_v61 = vpop.f32.mrb[1].mxu0 }
 0x221   :  { %v172_v62 = vadd.f32 %v291_v58, %v171_v61 }
 0x222   :  { %v181_v2 = vmax.f32 %v177_v60, 0.0 }
 0x223   :  { %v180_v63 = vmax.f32 %v172_v62, 0.0 }
 0x225   :  { %340 = vmatprep.mubr.msk.f32.mxu1 %vm190_vm5, %v180_v63 }
 0x226   :  { %341 = vmatmul.mubr.msk.f32.vlgmr.msra.gmra.mrb[0].mxu1 %vm190_vm5, %v181_v2 }
 0x2f9   :  { %v342_v3 = vpop.f32.mrb[0].mxu1 }
 0x2fa   :  { %v273_v5 = vadd.f32 %v342_v3, %v423_v1  ;;  %v263_v6 = vpop.f32.mrb[1].mxu1 }
 0x2fb   :  { %v272_v7 = vadd.f32 %v263_v6, %v418_v0 }
 0x2fc   :  { %v282_v8 = vadd.f32 %v296_v4, %v273_v5 }
 0x2fd   :  { %v281_v9 = vadd.f32 %v296_v4, %v272_v7 }
 0x2fe   :  { %284 = vst.msk [vmem:[%s510_s7 + $0x8] sm:$0xff] %vm30_vm0, %v282_v8 }
 0x2ff   :  { %283 = vst.msk [vmem:[%s510_s7] sm:$0xff] %vm30_vm0, %v281_v9 }

// kernel: transformer_forward.46
= control target key start
LH: loop header
LB: loop body
LE: loop exit
PB: predicated region body
PF: predicated region fallthrough
CT: control target
= control target key end

     0   :  { %vm18_vm0 = vcmask 261120   ;;  %s136_s0 = inlined_call_operand.vmem [shape: f32[16,32], index: 0, kind: input, shape index: {}]   ;;  %s137_s1 = inlined_call_operand.vmem [shape: f32[1,32], index: 1, kind: input, shape index: {}]   ;;  %s138_s2 = inlined_call_operand.vmem [shape: f32[1,32], index: 2, kind: input, shape index: {}]   ;;  %s139_s3 = inlined_call_operand.vmem [shape: f32[16,32], index: 3, kind: output, shape index: {}]  }
   0x1   :  { %v14_v0 = vld [vmem:[%s136_s0] sm:$0xff]  ;;  %v15_v1 = vld [vmem:[%s136_s0 + $0x8] sm:$0xff] }
   0x2   :  { %v19_v2 = vsel %vm18_vm0, %v14_v0, 0.0  ;;  %v22_v3 = vsel %vm18_vm0, %v15_v1, 0.0  ;;  %v82_v30 = vld [vmem:[%s137_s1] ss:$0 sm:$0xff] }
   0x3   :  { %20 = vadd.xlane.f32.xlu0 %v19_v2  ;;  %v83_v33 = vld [vmem:[%s138_s2] ss:$0 sm:$0xff] }
   0x7   :  { %23 = vadd.xlane.f32.xlu0 %v22_v3 }
  0x90   :  { %v21_v4 = vpop.xlane.xlu0 %20 }
  0x91   :  { %v26_v5 = vmul.f32 0.03125, %v21_v4 }
  0x93   :  { %v28_v6 = vsub.f32 %v14_v0, %v26_v5 }
  0x94   :  { %v24_v7 = vpop.xlane.xlu0 %23 }
  0x95   :  { %v27_v8 = vmul.f32 0.03125, %v24_v7  ;;  %v30_v9 = vmul.f32 %v28_v6, %v28_v6  ;;  %v46_v31 = vmul.f32 %v82_v30, %v28_v6 }
  0x97   :  { %v29_v10 = vsub.f32 %v15_v1, %v27_v8  ;;  %v32_v11 = vsel %vm18_vm0, %v30_v9, 0.0 }
  0x98   :  { %33 = vadd.xlane.f32.xlu1 %v32_v11 }
  0x99   :  { %v31_v12 = vmul.f32 %v29_v10, %v29_v10  ;;  %v47_v35 = vmul.f32 %v82_v30, %v29_v10 }
  0x9b   :  { %v35_v13 = vsel %vm18_vm0, %v31_v12, 0.0 }
  0x9c   :  { %36 = vadd.xlane.f32.xlu1 %v35_v13 }
 0x125   :  { %v34_v14 = vpop.xlane.xlu1 %33 }
 0x126   :  { %v38_v15 = vmul.f32 0.032258064, %v34_v14 }
 0x128   :  { %84 = vrsqrt.f32 %v38_v15  ;;  %vm50_vm1 = vcmp.eq.f32.partialorder %v38_v15, inf  ;;  %v53_v20 = vand.u32 2147483648, %v38_v15  ;;  %vm52_vm2 = vcmp.eq.f32.partialorder %v38_v15, 0.0 }
 0x129   :  { %v37_v16 = vpop.xlane.xlu1 %36 }
 0x12a   :  { %v39_v17 = vmul.f32 0.032258064, %v37_v16 }
 0x12c   :  { %86 = vrsqrt.f32 %v39_v17  ;;  %vm57_vm3 = vcmp.eq.f32.partialorder %v39_v17, inf  ;;  %v60_v26 = vand.u32 2147483648, %v39_v17  ;;  %vm59_vm4 = vcmp.eq.f32.partialorder %v39_v17, 0.0 }
 0x132   :  { %v85_v18 = vpop.eup %84 }
 0x133   :  { %v49_v19 = vmul.f32 %v85_v18, %v38_v15 }
 0x135   :  { %v51_v21 = vsel %vm50_vm1, %v38_v15, %v49_v19 }
 0x136   :  { %v87_v22 = vpop.eup %86  ;;  %v54_v23 = vsel %vm52_vm2, %v53_v20, %v51_v21 }
 0x137   :  { %v62_v24 = vadd.f32 1e-06, %v54_v23  ;;  %v56_v25 = vmul.f32 %v87_v22, %v39_v17 }
 0x139   :  { %88 = vrcp.f32 %v62_v24  ;;  %v58_v27 = vsel %vm57_vm3, %v39_v17, %v56_v25 }
 0x13a   :  { %v61_v28 = vsel %vm59_vm4, %v60_v26, %v58_v27 }
 0x13b   :  { %v63_v29 = vadd.f32 1e-06, %v61_v28 }
 0x13d   :  { %90 = vrcp.f32 %v63_v29 }
 0x143   :  { %v89_v32 = vpop.eup %88 }
 0x144   :  { %v65_v34 = vmul.f32 %v89_v32, %v46_v31 }
 0x146   :  { %v74_v36 = vadd.f32 %v83_v33, %v65_v34 }
 0x147   :  { %v91_v37 = vpop.eup %90 }
 0x148   :  { %76 = vst.msk [vmem:[%s139_s3] sm:$0xff] %vm18_vm0, %v74_v36  ;;  %v67_v38 = vmul.f32 %v91_v37, %v47_v35 }
 0x14a   :  { %v75_v39 = vadd.f32 %v83_v33, %v67_v38 }
 0x14c   :  { %77 = vst.msk [vmem:[%s139_s3 + $0x8] sm:$0xff] %vm18_vm0, %v75_v39 }

// kernel: transformer_forward.47
= control target key start
LH: loop header
LB: loop body
LE: loop exit
PB: predicated region body
PF: predicated region fallthrough
CT: control target
= control target key end

     0   :  { %vm28_vm0 = vcmask 261120   ;;  %s278_s0 = inlined_call_operand.vmem [shape: f32[16,32], index: 0, kind: input, shape index: {}]   ;;  %s279_s1 = inlined_call_operand.vmem [shape: f32[32,16], index: 1, kind: input, shape index: {}]   ;;  %s280_s2 = inlined_call_operand.vmem [shape: f32[1,16], index: 2, kind: input, shape index: {}]   ;;  %s281_s3 = inlined_call_operand.hbm [shape: f32[16,16], index: 3, kind: output, shape index: {}]  }
   0x1   :  { %v17_v0 = vld [vmem:[%s279_s1] sm:$0xff]  ;;  %v18_v1 = vld [vmem:[%s279_s1 + $0x8] sm:$0xff]  ;;  %v19_v2 = vld [vmem:[%s279_s1 + $0x10] sm:$0xff] }
   0x2   :  { %v173_v3 = vpack.c.bf16 %v18_v1, %v17_v0  ;;  %v20_v4 = vld [vmem:[%s279_s1 + $0x18] sm:$0xff]  ;;  %v15_v5 = vld [vmem:[%s278_s0] sm:$0xff] }
   0x3   :  { %v177_v6 = vpack.c.bf16 %v20_v4, %v19_v2  ;;  %170 = vmatprep.mubr.msk.f32.mxu0 %vm28_vm0, %v15_v5 }
   0x4   :  { %8 = vsyncpa [#allocation3], 0  ;;  %174 = vmatprep.subr.bf16.mxu0 %v173_v3  ;;  %v16_v7 = vld [vmem:[%s278_s0 + $0x8] sm:$0xff]  ;;  %v153_v8 = vld [vmem:[%s280_s2] ss:$0 sm:$0xff]  ;;  %vm110_vm1 = vcmask 130048  }
   0x5   :  { %176 = vmatpush3.bf16.msra.mxu0 %v173_v3  ;;  %s216_s0 = smov [#allocation2]  }
   0x6   :  { %178 = vmatprep.subr.bf16.mxu0 %v177_v6  ;;  %s142_s1 = sshll.u32 %s216_s0, 4  ;;  %s143_s1 = int_to_ptr.vmem [resolvable:$true] %s142_s1 }
   0x7   :  { %s192_s2 = scalar_lea.vmem %s143_s1, 256  ;;  %p197_p1 = scmp.lt.s32.totalorder %s143_s1, %s143_s1 }
   0x8   :  { %p193_p0 = scmp.ne.s32.totalorder %s143_s1, %s192_s2  ;;  %p198_p2 = scmp.lt.s32.totalorder %s192_s2, %s192_s2 }
   0x9   :  { %180 = vmatpush3.bf16.msra.mxu0 %v177_v6 }
   0xa   :  { %p199_p3 = por %p198_p2, %p197_p1 }
   0xc   :  { %171 = vmatmul.mubr.msk.f32.vlgmr.msra.gmra.mrb[0].mxu0 %vm28_vm0, %v16_v7  ;;  %p200_p4 = pnand %p199_p3, %p193_p0 }
  0xdf   :  { %v172_v9 = vpop.f32.mrb[0].mxu0 }
  0xe0   :  { %v101_v10 = vpop.f32.mrb[1].mxu0  ;;  %v107_v12 = vadd.f32 %v172_v9, %v153_v8 }
  0xe1   :  { %v102_v11 = vadd.f32 %v153_v8, %v101_v10 }
  0xe2   :  { %v114_v14 = vsel %vm110_vm1, %v107_v12, -inf }
  0xe3   :  { %v111_v13 = vsel %vm110_vm1, %v102_v11, -inf }
  0xe4   :  { %112 = vmax.xlane.f32.xlu0 %v111_v13 }
  0xe8   :  { %115 = vmax.xlane.f32.xlu0 %v114_v14 }
 0x171   :  { %v113_v15 = vpop.xlane.xlu0 %112 }
 0x172   :  { %v117_v16 = vsub.f32 %v102_v11, %v113_v15 }
 0x174   :  { %v119_v17 = vmul.f32 1.442695, %v117_v16 }
 0x175   :  { %v116_v18 = vpop.xlane.xlu0 %115 }
 0x176   :  { %184 = vpow2.f32 %v119_v17  ;;  %v118_v19 = vsub.f32 %v107_v12, %v116_v18 }
 0x178   :  { %v121_v20 = vmul.f32 1.442695, %v118_v19 }
 0x17a   :  { %186 = vpow2.f32 %v121_v20 }
 0x180   :  { %v185_v21 = vpop.eup %184 }
 0x181   :  { %v123_v22 = vsel %vm110_vm1, %v185_v21, 0.0 }
 0x182   :  { %124 = vadd.xlane.f32.xlu1 %v123_v22 }
 0x184   :  { %v187_v23 = vpop.eup %186 }
 0x185   :  { %v126_v24 = vsel %vm110_vm1, %v187_v23, 0.0 }
 0x186   :  { %127 = vadd.xlane.f32.xlu1 %v126_v24 }
 0x20f   :  { %v125_v25 = vpop.xlane.xlu1 %124 }
 0x210   :  { %188 = vlog2.f32 %v125_v25 }
 0x213   :  { %v128_v26 = vpop.xlane.xlu1 %127 }
 0x214   :  { %190 = vlog2.f32 %v128_v26 }
 0x21a   :  { %v189_v27 = vpop.eup %188 }
 0x21b   :  { %v130_v28 = vmul.f32 0.6931472, %v189_v27 }
 0x21d   :  { %v133_v29 = vsub.f32 %v117_v16, %v130_v28 }
 0x21e   :  { %v191_v30 = vpop.eup %190 }
 0x21f   :  { %135 = vst.msk [vmem:[#allocation2] sm:$0xff] %vm110_vm1, %v133_v29  ;;  %v132_v31 = vmul.f32 0.6931472, %v191_v30 }
 0x221   :  { %v134_v32 = vsub.f32 %v118_v19, %v132_v31 }
 0x223   :  { %136 = vst.msk [vmem:[#allocation2 + $0x8] sm:$0xff] %vm110_vm1, %v134_v32 }
 0x224   :  { %203 = shalt.err (!%p200_p4)
}
 0x225   :  { %s204_s28 = scalar_lea.hbm %s281_s3, 256 }
 0x226   :  { %p205_p5 = scmp.ne.s32.totalorder %s281_s3, %s204_s28  ;;  %p208_p6 = scmp.lt.u32.totalorder %s204_s28, %s281_s3 }
 0x228   :  { %p210_p7 = pnand %p208_p6, %p205_p5 }
 0x22a   :  { %213 = shalt.err (!%p210_p7)
}
 0x22b   :  { %s217_s6 = smov 128   ;;  %s218_s7 = smov 8  }
 0x22c   :  { %148 = dma.vmem_to_hbm [thread:$0]  %s143_s1, 256, %s281_s3, [#allocation3], %s217_s6, %s217_s6, %s218_s7  }
 0x22d   :  { %214 = dma.done.wait [#allocation3], 256  }
 0x22e   :  { %215 = vsyncadd [#allocation3], 4294967040 }
 0x22f   :  { %152 = vsyncpa [#allocation3], 1 }

</bundles_post_ra>
